<compile_context>
chip_gen: v7x
topology: tpu7x:2x2x1
jax: 0.10.0
libtpu: 0.0.40
codegen_flags: <defaults>
</compile_context>

<pallas_src>
import functools

import jax
import jax.numpy as jnp
from jax import lax
from jax.experimental import pallas as pl
from jax.experimental.pallas import tpu as pltpu


# ----------------------------------------------------------------------------
# Helpers shared by the fused and tiled kernels
# ----------------------------------------------------------------------------
def _fc_sigmoid(pooled, wfc, bfc, use_mxu):
    """sigmoid(W @ pooled + b) for the 1x1 ChannelAttention fc.

    pooled: (1, C_in) f32, wfc: (C_out, C_in) f32, bfc: (C_out, 1) f32.
    Returns (C_out, 1) f32.
    """
    if use_mxu:
        # MXU path for large C: contract wfc dim 1 with pooled dim 1 -> (C, 1).
        logits = lax.dot_general(wfc, pooled, (((1,), (1,)), ((), ())),
                                 preferred_element_type=jnp.float32)
    else:
        # Small C: broadcast multiply + lane reduce is cheaper than MXU padding.
        logits = jnp.sum(wfc * pooled, axis=-1, keepdims=True)
    return jax.nn.sigmoid(logits + bfc)


def _shift_flat(x, off, s_total):
    """Cyclic lane shift of a (1, S) array: out[s] = x[(s + off) mod S]."""
    off = off % s_total
    if off == 0:
        return x
    return jnp.concatenate([x[:, off:], x[:, :off]], axis=-1)


def _spatial_conv_sigmoid_flat(mean_c, max_c, w_ref, col, row, *, H, W, K, pad):
    """KxK (2->1 channel, no bias) conv + sigmoid in the flattened (1, S) layout.

    Tap (c, kh, kw) reads pixel (h+kh-pad, w+kw-pad); in flat coordinates that
    is a constant offset (kh-pad)*W + (kw-pad), so each tap is one cyclic lane
    shift plus a border-validity mask (zero-padding semantics).  Border masks
    are hoisted per row / per column offset (2*K of them, not 2*K*K).
    """
    s_total = mean_c.shape[-1]
    stats = (mean_c, max_c)
    colm = [(col + (kw - pad) >= 0) & (col + (kw - pad) < W) for kw in range(K)]
    rowm = [(row + (kh - pad) >= 0) & (row + (kh - pad) < H) for kh in range(K)]
    acc = jnp.zeros((1, s_total), jnp.float32)
    for c in range(2):
        for kh in range(K):
            off_h = (kh - pad) * W
            for kw in range(K):
                wv = w_ref[c * K * K + kh * K + kw]          # scalar from SMEM
                shifted = _shift_flat(stats[c], off_h + (kw - pad), s_total)
                valid = rowm[kh] & colm[kw]
                acc = acc + wv * jnp.where(valid, shifted, 0.0)
    return jax.nn.sigmoid(acc)                               # (1, S)


# ----------------------------------------------------------------------------
# Fully-fused per-image kernel (grid=(N,)): one read of x, one write of out.
#   col,row : (1, S) i32  flat -> 2D index helpers (resident)
#   x       : (N, C, S)   blocks (1, C, S)
#   wfc     : (C, C) f32, bfc : (C, 1) f32, wsp : (2*K*K,) f32 in SMEM
# ----------------------------------------------------------------------------
def _cbam_fused_kernel(col_ref, row_ref, x_ref, wfc_ref, bfc_ref, wsp_ref, o_ref,
                       *, H, W, K, pad, use_mxu):
    s_total = H * W
    xb = x_ref[...].astype(jnp.float32)                       # (1, C, S)
    pooled = jnp.sum(xb, axis=-1) * (1.0 / float(s_total))    # (1, C)
    ca = _fc_sigmoid(pooled, wfc_ref[...], bfc_ref[...], use_mxu)[None]  # (1,C,1)
    xc = xb * ca                                              # (1, C, S)
    mean_c = jnp.mean(xc, axis=1)                             # (1, S)
    max_c = jnp.max(xc, axis=1)                               # (1, S)
    sa = _spatial_conv_sigmoid_flat(mean_c, max_c, wsp_ref,
                                    col_ref[...], row_ref[...],
                                    H=H, W=W, K=K, pad=pad)   # (1, S)
    o_ref[...] = (xc * sa[:, None, :]).astype(o_ref.dtype)


# ----------------------------------------------------------------------------
# Tiled streaming path (used when an image does not fit the VMEM budget)
# ----------------------------------------------------------------------------
# Kernel 1: global average pool (accumulated over spatial tiles) + fc + sigmoid.
# NOTE: the spatial axis must stay the innermost "arbitrary" grid axis — the
# VMEM accumulator relies on it.
def _pool_fc_sigmoid_kernel(x_ref, wfc_ref, bfc_ref, ca_ref, acc_ref,
                            *, inv_hw, use_mxu):
    s = pl.program_id(1)

    @pl.when(s == 0)
    def _():
        acc_ref[...] = jnp.zeros_like(acc_ref)

    acc_ref[...] += jnp.sum(x_ref[...].astype(jnp.float32), axis=-1)   # (1, C)

    @pl.when(s == pl.num_programs(1) - 1)
    def _():
        pooled = acc_ref[...] * inv_hw                                  # (1, C)
        ca_ref[0] = _fc_sigmoid(pooled, wfc_ref[...], bfc_ref[...],
                                use_mxu).astype(ca_ref.dtype)


# Kernel 2: per-pixel channel mean/max of x*ca.  `y` itself is never written.
def _ca_stats_kernel(x_ref, ca_ref, st_ref):
    xc = x_ref[...].astype(jnp.float32) * ca_ref[...]        # (1, C, TS)
    st_ref[:, 0:1, :] = jnp.mean(xc, axis=1, keepdims=True).astype(st_ref.dtype)
    st_ref[:, 1:2, :] = jnp.max(xc, axis=1, keepdims=True).astype(st_ref.dtype)


# Kernel 3: spatial attention map, fully lane-dense in and out (no jnp.pad pass).
def _spatial_conv_kernel(col_ref, row_ref, wsp_ref, st_ref, sa_ref,
                         *, H, W, K, pad):
    st = st_ref[...].astype(jnp.float32)                     # (1, 2, S)
    sa = _spatial_conv_sigmoid_flat(st[:, 0, :], st[:, 1, :], wsp_ref,
                                    col_ref[...], row_ref[...],
                                    H=H, W=W, K=K, pad=pad)  # (1, S)
    sa_ref[...] = sa[:, None, :].astype(sa_ref.dtype)


# Kernel 4: out = x * ca * sa  (single read of x, single write of out).
def _apply_attn_kernel(x_ref, ca_ref, sa_ref, o_ref):
    o_ref[...] = (x_ref[...].astype(jnp.float32) * ca_ref[...] * sa_ref[...]
                  ).astype(o_ref.dtype)


# ----------------------------------------------------------------------------
# Tile / path selection
# ----------------------------------------------------------------------------
def _pick_spatial_tile(S, C, itemsize, budget_bytes):
    """Largest lane-aligned (multiple-of-128) divisor of S whose x block
    C*TS*itemsize stays within budget; full S if no aligned divisor exists."""
    aligned = [t for t in range(128, S + 1, 128) if S % t == 0]
    if not aligned:
        # TODO(synk): ragged S (not a multiple of 128) combined with a huge C*S
        # would need a masked cdiv grid; such shapes do not occur for CBAM
        # feature maps in practice (and small ones fit the fused path anyway).
        return S
    fitting = [t for t in aligned if C * t * itemsize <= budget_bytes]
    return max(fitting) if fitting else min(aligned)


# ----------------------------------------------------------------------------
# CBAM forward (wrapper is layout plumbing only; all heavy passes are Pallas)
# ----------------------------------------------------------------------------
def cbam_forward(x_nchw, fc_w, fc_b, sp_w, *, kernel_size=7,
                 force_path=None, tile_budget_bytes=2 * 1024 * 1024):
    """CBAM: spatial_attention(channel_attention(x)).

    x_nchw : (N, C, H, W)
    fc_w   : (C, C, 1, 1)  ChannelAttention 1x1 conv weight (bias fc_b (C,))
    sp_w   : (1, 2, K, K)  SpatialAttention conv weight (no bias), K in {3, 7}
    force_path : None | "fused" | "tiled"  (testing hook)
    """
    assert kernel_size in (3, 7)
    pad = 3 if kernel_size == 7 else 1
    K = kernel_size
    N, C, H, W = x_nchw.shape
    S = H * W
    dtype = x_nchw.dtype
    itemsize = jnp.dtype(dtype).itemsize

    x3 = x_nchw.reshape(N, C, S)                   # free reshape, no transpose
    wfc = fc_w.reshape(C, C).astype(jnp.float32)   # (out, in)
    bfc = fc_b.reshape(C, 1).astype(jnp.float32)
    wsp = sp_w.reshape(-1).astype(jnp.float32)     # (2*K*K,), (c, kh, kw) order
    use_mxu = C >= 256

    # flat -> (row, col) index helpers for the lane-dense spatial conv (tiny).
    flat = jnp.arange(S, dtype=jnp.int32)[None, :]
    col_idx = flat % jnp.int32(W)
    row_idx = flat // jnp.int32(W)

    # --- path selection: fuse per image when it fits VMEM comfortably --------
    # footprint ~ double-buffered x+out blocks + f32 in-kernel temporaries.
    fused_bytes = 4 * C * S * itemsize + 3 * C * S * 4 + 24 * S + C * C * 4
    use_fused = fused_bytes <= 24 * 1024 * 1024     # conservative for v7x 64 MiB
    if force_path == "fused":
        use_fused = True
    elif force_path == "tiled":
        use_fused = False

    if use_fused:
        out3 = pl.pallas_call(
            functools.partial(_cbam_fused_kernel, H=H, W=W, K=K, pad=pad,
                              use_mxu=use_mxu),
            out_shape=jax.ShapeDtypeStruct((N, C, S), dtype),
            grid_spec=pltpu.PrefetchScalarGridSpec(
                num_scalar_prefetch=0,
                grid=(N,),
                in_specs=[
                    pl.BlockSpec((1, S), lambda n: (0, 0)),           # col
                    pl.BlockSpec((1, S), lambda n: (0, 0)),           # row
                    pl.BlockSpec((1, C, S), lambda n: (n, 0, 0)),     # x
                    pl.BlockSpec((C, C), lambda n: (0, 0)),           # wfc
                    pl.BlockSpec((C, 1), lambda n: (0, 0)),           # bfc
                    pl.BlockSpec(memory_space=pltpu.MemorySpace.SMEM),  # wsp
                ],
                out_specs=pl.BlockSpec((1, C, S), lambda n: (n, 0, 0)),
            ),
            compiler_params=pltpu.CompilerParams(
                dimension_semantics=("parallel",),
                vmem_limit_bytes=48 * 1024 * 1024),
        )(col_idx, row_idx, x3, wfc, bfc, wsp)
        return out3.reshape(N, C, H, W)

    # --- tiled streaming path -------------------------------------------------
    TS = _pick_spatial_tile(S, C, itemsize, tile_budget_bytes)
    n_s = S // TS
    reduce_params = pltpu.CompilerParams(
        dimension_semantics=("parallel", "arbitrary"),
        vmem_limit_bytes=32 * 1024 * 1024)
    par_params = pltpu.CompilerParams(
        dimension_semantics=("parallel", "parallel"),
        vmem_limit_bytes=32 * 1024 * 1024)

    # 1) channel attention weights: sigmoid(fc(avgpool(x)))
    ca = pl.pallas_call(
        functools.partial(_pool_fc_sigmoid_kernel, inv_hw=1.0 / float(S),
                          use_mxu=use_mxu),
        out_shape=jax.ShapeDtypeStruct((N, C, 1), jnp.float32),
        grid_spec=pltpu.PrefetchScalarGridSpec(
            num_scalar_prefetch=0,
            grid=(N, n_s),
            in_specs=[
                pl.BlockSpec((1, C, TS), lambda n, s: (n, 0, s)),
                pl.BlockSpec((C, C), lambda n, s: (0, 0)),
                pl.BlockSpec((C, 1), lambda n, s: (0, 0)),
            ],
            out_specs=pl.BlockSpec((1, C, 1), lambda n, s: (n, 0, 0)),
            scratch_shapes=[pltpu.VMEM((1, C), jnp.float32)],
        ),
        compiler_params=reduce_params,
    )(x3, wfc, bfc)

    # 2) per-pixel channel mean/max of x*ca (the attended tensor is NOT stored)
    stats = pl.pallas_call(
        _ca_stats_kernel,
        out_shape=jax.ShapeDtypeStruct((N, 2, S), jnp.float32),
        grid_spec=pltpu.PrefetchScalarGridSpec(
            num_scalar_prefetch=0,
            grid=(N, n_s),
            in_specs=[
                pl.BlockSpec((1, C, TS), lambda n, s: (n, 0, s)),
                pl.BlockSpec((1, C, 1), lambda n, s: (n, 0, 0)),
            ],
            out_specs=pl.BlockSpec((1, 2, TS), lambda n, s: (n, 0, s)),
        ),
        compiler_params=par_params,
    )(x3, ca)

    # 3) spatial attention map, lane-dense (N, 1, S): sigmoid(conv_KxK([mean,max]))
    sa = pl.pallas_call(
        functools.partial(_spatial_conv_kernel, H=H, W=W, K=K, pad=pad),
        out_shape=jax.ShapeDtypeStruct((N, 1, S), jnp.float32),
        grid_spec=pltpu.PrefetchScalarGridSpec(
            num_scalar_prefetch=0,
            grid=(N,),
            in_specs=[
                pl.BlockSpec((1, S), lambda n: (0, 0)),               # col
                pl.BlockSpec((1, S), lambda n: (0, 0)),               # row
                pl.BlockSpec(memory_space=pltpu.MemorySpace.SMEM),    # wsp
                pl.BlockSpec((1, 2, S), lambda n: (n, 0, 0)),         # stats
            ],
            out_specs=pl.BlockSpec((1, 1, S), lambda n: (n, 0, 0)),
        ),
        compiler_params=pltpu.CompilerParams(
            dimension_semantics=("parallel",),
            vmem_limit_bytes=32 * 1024 * 1024),
    )(col_idx, row_idx, wsp, stats)
    # TODO(synk): on v7x, row-tile this per-image conv (halo of K-1) so both
    # TensorCores stay busy when N < 2 and the stats block stays bounded.

    # 4) out = x * ca * sa  (channel-attention multiply folded in here)
    out3 = pl.pallas_call(
        _apply_attn_kernel,
        out_shape=jax.ShapeDtypeStruct((N, C, S), dtype),
        grid_spec=pltpu.PrefetchScalarGridSpec(
            num_scalar_prefetch=0,
            grid=(N, n_s),
            in_specs=[
                pl.BlockSpec((1, C, TS), lambda n, s: (n, 0, s)),
                pl.BlockSpec((1, C, 1), lambda n, s: (n, 0, 0)),
                pl.BlockSpec((1, 1, TS), lambda n, s: (n, 0, s)),
            ],
            out_specs=pl.BlockSpec((1, C, TS), lambda n, s: (n, 0, s)),
        ),
        compiler_params=par_params,
    )(x3, ca, sa)

    return out3.reshape(N, C, H, W)


# ----------------------------------------------------------------------------
# Pure-JAX reference for correctness check
# ----------------------------------------------------------------------------
def cbam_ref(x, fc_w, fc_b, sp_w, *, kernel_size=7):
    pad = 3 if kernel_size == 7 else 1
    C = x.shape[1]
    pooled = jnp.mean(x, axis=(2, 3), keepdims=True)
    ca_logits = lax.conv_general_dilated(
        pooled, fc_w, (1, 1), "VALID",
        dimension_numbers=("NCHW", "OIHW", "NCHW")) + fc_b.reshape(1, C, 1, 1)
    y = x * jax.nn.sigmoid(ca_logits)
    stats = jnp.concatenate(
        [jnp.mean(y, axis=1, keepdims=True), jnp.max(y, axis=1, keepdims=True)],
        axis=1)
    sa_logits = lax.conv_general_dilated(
        stats, sp_w, (1, 1), ((pad, pad), (pad, pad)),
        dimension_numbers=("NCHW", "OIHW", "NCHW"))
    return y * jax.nn.sigmoid(sa_logits)


if __name__ == "__main__":
    key = jax.random.PRNGKey(0)
    k_x, k_w1, k_b1, k_w2 = jax.random.split(key, 4)

    N, C, H, W = 2, 8, 32, 32
    K = 7

    x = jax.random.normal(k_x, (N, C, H, W), dtype=jnp.float32)
    fc_w = jax.random.normal(k_w1, (C, C, 1, 1), dtype=jnp.float32) * 0.2
    fc_b = jax.random.normal(k_b1, (C,), dtype=jnp.float32) * 0.1
    sp_w = jax.random.normal(k_w2, (1, 2, K, K), dtype=jnp.float32) * 0.2

    ref = jax.block_until_ready(cbam_ref(x, fc_w, fc_b, sp_w, kernel_size=K))

    # 1) fused per-image path (default dispatch for shapes this small)
    fwd_fused = jax.jit(functools.partial(cbam_forward, kernel_size=K))
    out_fused = jax.block_until_ready(fwd_fused(x, fc_w, fc_b, sp_w))
    assert out_fused.shape == (N, C, H, W), out_fused.shape
    err_f = float(jnp.max(jnp.abs(out_fused - ref)))
    assert jnp.allclose(out_fused, ref, atol=1e-4, rtol=1e-4), err_f

    # 2) tiled streaming path, forced small tiles to exercise the spatial
    #    accumulation across multiple grid steps (TS=256 -> 4 tiles).
    fwd_tiled = jax.jit(functools.partial(
        cbam_forward, kernel_size=K, force_path="tiled",
        tile_budget_bytes=8 * 1024))
    out_tiled = jax.block_until_ready(fwd_tiled(x, fc_w, fc_b, sp_w))
    err_t = float(jnp.max(jnp.abs(out_tiled - ref)))
    assert jnp.allclose(out_tiled, ref, atol=1e-4, rtol=1e-4), err_t

    # 3) kernel_size=3 (pad=1) variant
    sp_w3 = jax.random.normal(k_w2, (1, 2, 3, 3), dtype=jnp.float32) * 0.2
    ref3 = jax.block_until_ready(cbam_ref(x, fc_w, fc_b, sp_w3, kernel_size=3))
    out_k3 = jax.block_until_ready(
        jax.jit(functools.partial(cbam_forward, kernel_size=3))(
            x, fc_w, fc_b, sp_w3))
    err_3 = float(jnp.max(jnp.abs(out_k3 - ref3)))
    assert jnp.allclose(out_k3, ref3, atol=1e-4, rtol=1e-4), err_3

    print("KERNEL_OK")
</pallas_src>

<mosaic_0001>
module attributes {stable_mosaic.version = 11 : i64} {
  func.func @_cbam_fused_kernel(%arg0: i32, %arg1: memref<1x1024xi32, #tpu.memory_space<vmem>>, %arg2: memref<1x1024xi32, #tpu.memory_space<vmem>>, %arg3: memref<1x8x1024xf32, #tpu.memory_space<vmem>>, %arg4: memref<8x8xf32, #tpu.memory_space<vmem>>, %arg5: memref<8x1xf32, #tpu.memory_space<vmem>>, %arg6: memref<98xf32, #tpu.memory_space<smem>>, %arg7: memref<1x8x1024xf32, #tpu.memory_space<vmem>>) attributes {dimension_semantics = [#tpu.dimension_semantics<parallel>], iteration_bounds = array<i64: 2>, scalar_prefetch = 0 : i64, scratch_operands = 0 : i64, tpu.core_type = #tpu.core_type<tc>, window_params = [{pipeline_mode = #tpu.pipeline_mode<synchronous>, transform_indices = @transform_0, window_bounds = array<i64: 1, 1024>}, {pipeline_mode = #tpu.pipeline_mode<synchronous>, transform_indices = @transform_1, window_bounds = array<i64: 1, 1024>}, {transform_indices = @transform_2, window_bounds = array<i64: 1, 8, 1024>}, {pipeline_mode = #tpu.pipeline_mode<synchronous>, transform_indices = @transform_3, window_bounds = array<i64: 8, 8>}, {pipeline_mode = #tpu.pipeline_mode<synchronous>, transform_indices = @transform_4, window_bounds = array<i64: 8, 1>}, {transform_indices = @transform_5, window_bounds = array<i64: 98>}, {transform_indices = @transform_6, window_bounds = array<i64: 1, 8, 1024>}]} {
    %c0 = arith.constant 0 : index
    %c0_0 = arith.constant 0 : index
    %c0_1 = arith.constant 0 : index
    %0 = vector.load %arg3[%c0, %c0_0, %c0_1] : memref<1x8x1024xf32, #tpu.memory_space<vmem>>, vector<1x8x1024xf32>
    %cst = arith.constant dense<0.000000e+00> : vector<1x8xf32>
    %1 = vector.multi_reduction <add>, %0, %cst [2] : vector<1x8x1024xf32> to vector<1x8xf32>
    %cst_2 = arith.constant 9.765625E-4 : f32
    %2 = vector.broadcast %cst_2 : f32 to vector<1x8xf32>
    %3 = arith.mulf %1, %2 : vector<1x8xf32>
    %c0_3 = arith.constant 0 : index
    %c0_4 = arith.constant 0 : index
    %4 = vector.load %arg4[%c0_3, %c0_4] : memref<8x8xf32, #tpu.memory_space<vmem>>, vector<8x8xf32>
    %c0_5 = arith.constant 0 : index
    %c0_6 = arith.constant 0 : index
    %5 = vector.load %arg5[%c0_5, %c0_6] : memref<8x1xf32, #tpu.memory_space<vmem>>, vector<8x1xf32>
    %6 = vector.broadcast %3 : vector<1x8xf32> to vector<8x8xf32>
    %7 = arith.mulf %4, %6 : vector<8x8xf32>
    %cst_7 = arith.constant dense<0.000000e+00> : vector<8xf32>
    %8 = vector.multi_reduction <add>, %7, %cst_7 [1] : vector<8x8xf32> to vector<8xf32>
    %9 = vector.shape_cast %8 : vector<8xf32> to vector<8x1xf32>
    %10 = arith.addf %9, %5 : vector<8x1xf32>
    %11 = arith.negf %10 : vector<8x1xf32>
    %12 = math.exp %11 : vector<8x1xf32>
    %cst_8 = arith.constant 1.000000e+00 : f32
    %13 = vector.broadcast %cst_8 : f32 to vector<8x1xf32>
    %14 = arith.addf %13, %12 : vector<8x1xf32>
    %15 = arith.divf %13, %14 : vector<8x1xf32>
    %16 = vector.shape_cast %15 : vector<8x1xf32> to vector<1x8x1xf32>
    %17 = vector.broadcast %16 : vector<1x8x1xf32> to vector<1x8x1024xf32>
    %18 = arith.mulf %0, %17 : vector<1x8x1024xf32>
    %cst_9 = arith.constant dense<0.000000e+00> : vector<1x1024xf32>
    %19 = vector.multi_reduction <add>, %18, %cst_9 [1] : vector<1x8x1024xf32> to vector<1x1024xf32>
    %cst_10 = arith.constant 8.000000e+00 : f32
    %20 = vector.broadcast %cst_10 : f32 to vector<1x1024xf32>
    %21 = arith.divf %19, %20 : vector<1x1024xf32>
    %cst_11 = arith.constant dense<0xFF800000> : vector<1x1024xf32>
    %22 = vector.multi_reduction <maximumf>, %18, %cst_11 [1] : vector<1x8x1024xf32> to vector<1x1024xf32>
    %c0_12 = arith.constant 0 : index
    %c0_13 = arith.constant 0 : index
    %23 = vector.load %arg1[%c0_12, %c0_13] : memref<1x1024xi32, #tpu.memory_space<vmem>>, vector<1x1024xi32>
    %c0_14 = arith.constant 0 : index
    %c0_15 = arith.constant 0 : index
    %24 = vector.load %arg2[%c0_14, %c0_15] : memref<1x1024xi32, #tpu.memory_space<vmem>>, vector<1x1024xi32>
    %c-3_i32 = arith.constant -3 : i32
    %25 = vector.broadcast %c-3_i32 : i32 to vector<1x1024xi32>
    %26 = arith.addi %23, %25 : vector<1x1024xi32>
    %c0_i32 = arith.constant 0 : i32
    %27 = vector.broadcast %c0_i32 : i32 to vector<1x1024xi32>
    %28 = arith.cmpi sge, %26, %27 : vector<1x1024xi32>
    %c-3_i32_16 = arith.constant -3 : i32
    %29 = vector.broadcast %c-3_i32_16 : i32 to vector<1x1024xi32>
    %30 = arith.addi %23, %29 : vector<1x1024xi32>
    %c32_i32 = arith.constant 32 : i32
    %31 = vector.broadcast %c32_i32 : i32 to vector<1x1024xi32>
    %32 = arith.cmpi slt, %30, %31 : vector<1x1024xi32>
    %33 = arith.andi %28, %32 : vector<1x1024xi1>
    %c-2_i32 = arith.constant -2 : i32
    %34 = vector.broadcast %c-2_i32 : i32 to vector<1x1024xi32>
    %35 = arith.addi %23, %34 : vector<1x1024xi32>
    %c0_i32_17 = arith.constant 0 : i32
    %36 = vector.broadcast %c0_i32_17 : i32 to vector<1x1024xi32>
    %37 = arith.cmpi sge, %35, %36 : vector<1x1024xi32>
    %c-2_i32_18 = arith.constant -2 : i32
    %38 = vector.broadcast %c-2_i32_18 : i32 to vector<1x1024xi32>
    %39 = arith.addi %23, %38 : vector<1x1024xi32>
    %c32_i32_19 = arith.constant 32 : i32
    %40 = vector.broadcast %c32_i32_19 : i32 to vector<1x1024xi32>
    %41 = arith.cmpi slt, %39, %40 : vector<1x1024xi32>
    %42 = arith.andi %37, %41 : vector<1x1024xi1>
    %c-1_i32 = arith.constant -1 : i32
    %43 = vector.broadcast %c-1_i32 : i32 to vector<1x1024xi32>
    %44 = arith.addi %23, %43 : vector<1x1024xi32>
    %c0_i32_20 = arith.constant 0 : i32
    %45 = vector.broadcast %c0_i32_20 : i32 to vector<1x1024xi32>
    %46 = arith.cmpi sge, %44, %45 : vector<1x1024xi32>
    %c-1_i32_21 = arith.constant -1 : i32
    %47 = vector.broadcast %c-1_i32_21 : i32 to vector<1x1024xi32>
    %48 = arith.addi %23, %47 : vector<1x1024xi32>
    %c32_i32_22 = arith.constant 32 : i32
    %49 = vector.broadcast %c32_i32_22 : i32 to vector<1x1024xi32>
    %50 = arith.cmpi slt, %48, %49 : vector<1x1024xi32>
    %51 = arith.andi %46, %50 : vector<1x1024xi1>
    %c0_i32_23 = arith.constant 0 : i32
    %52 = vector.broadcast %c0_i32_23 : i32 to vector<1x1024xi32>
    %53 = arith.addi %23, %52 : vector<1x1024xi32>
    %c0_i32_24 = arith.constant 0 : i32
    %54 = vector.broadcast %c0_i32_24 : i32 to vector<1x1024xi32>
    %55 = arith.cmpi sge, %53, %54 : vector<1x1024xi32>
    %c0_i32_25 = arith.constant 0 : i32
    %56 = vector.broadcast %c0_i32_25 : i32 to vector<1x1024xi32>
    %57 = arith.addi %23, %56 : vector<1x1024xi32>
    %c32_i32_26 = arith.constant 32 : i32
    %58 = vector.broadcast %c32_i32_26 : i32 to vector<1x1024xi32>
    %59 = arith.cmpi slt, %57, %58 : vector<1x1024xi32>
    %60 = arith.andi %55, %59 : vector<1x1024xi1>
    %c1_i32 = arith.constant 1 : i32
    %61 = vector.broadcast %c1_i32 : i32 to vector<1x1024xi32>
    %62 = arith.addi %23, %61 : vector<1x1024xi32>
    %c0_i32_27 = arith.constant 0 : i32
    %63 = vector.broadcast %c0_i32_27 : i32 to vector<1x1024xi32>
    %64 = arith.cmpi sge, %62, %63 : vector<1x1024xi32>
    %c1_i32_28 = arith.constant 1 : i32
    %65 = vector.broadcast %c1_i32_28 : i32 to vector<1x1024xi32>
    %66 = arith.addi %23, %65 : vector<1x1024xi32>
    %c32_i32_29 = arith.constant 32 : i32
    %67 = vector.broadcast %c32_i32_29 : i32 to vector<1x1024xi32>
    %68 = arith.cmpi slt, %66, %67 : vector<1x1024xi32>
    %69 = arith.andi %64, %68 : vector<1x1024xi1>
    %c2_i32 = arith.constant 2 : i32
    %70 = vector.broadcast %c2_i32 : i32 to vector<1x1024xi32>
    %71 = arith.addi %23, %70 : vector<1x1024xi32>
    %c0_i32_30 = arith.constant 0 : i32
    %72 = vector.broadcast %c0_i32_30 : i32 to vector<1x1024xi32>
    %73 = arith.cmpi sge, %71, %72 : vector<1x1024xi32>
    %c2_i32_31 = arith.constant 2 : i32
    %74 = vector.broadcast %c2_i32_31 : i32 to vector<1x1024xi32>
    %75 = arith.addi %23, %74 : vector<1x1024xi32>
    %c32_i32_32 = arith.constant 32 : i32
    %76 = vector.broadcast %c32_i32_32 : i32 to vector<1x1024xi32>
    %77 = arith.cmpi slt, %75, %76 : vector<1x1024xi32>
    %78 = arith.andi %73, %77 : vector<1x1024xi1>
    %c3_i32 = arith.constant 3 : i32
    %79 = vector.broadcast %c3_i32 : i32 to vector<1x1024xi32>
    %80 = arith.addi %23, %79 : vector<1x1024xi32>
    %c0_i32_33 = arith.constant 0 : i32
    %81 = vector.broadcast %c0_i32_33 : i32 to vector<1x1024xi32>
    %82 = arith.cmpi sge, %80, %81 : vector<1x1024xi32>
    %c3_i32_34 = arith.constant 3 : i32
    %83 = vector.broadcast %c3_i32_34 : i32 to vector<1x1024xi32>
    %84 = arith.addi %23, %83 : vector<1x1024xi32>
    %c32_i32_35 = arith.constant 32 : i32
    %85 = vector.broadcast %c32_i32_35 : i32 to vector<1x1024xi32>
    %86 = arith.cmpi slt, %84, %85 : vector<1x1024xi32>
    %87 = arith.andi %82, %86 : vector<1x1024xi1>
    %c-3_i32_36 = arith.constant -3 : i32
    %88 = vector.broadcast %c-3_i32_36 : i32 to vector<1x1024xi32>
    %89 = arith.addi %24, %88 : vector<1x1024xi32>
    %c0_i32_37 = arith.constant 0 : i32
    %90 = vector.broadcast %c0_i32_37 : i32 to vector<1x1024xi32>
    %91 = arith.cmpi sge, %89, %90 : vector<1x1024xi32>
    %c-3_i32_38 = arith.constant -3 : i32
    %92 = vector.broadcast %c-3_i32_38 : i32 to vector<1x1024xi32>
    %93 = arith.addi %24, %92 : vector<1x1024xi32>
    %c32_i32_39 = arith.constant 32 : i32
    %94 = vector.broadcast %c32_i32_39 : i32 to vector<1x1024xi32>
    %95 = arith.cmpi slt, %93, %94 : vector<1x1024xi32>
    %96 = arith.andi %91, %95 : vector<1x1024xi1>
    %c-2_i32_40 = arith.constant -2 : i32
    %97 = vector.broadcast %c-2_i32_40 : i32 to vector<1x1024xi32>
    %98 = arith.addi %24, %97 : vector<1x1024xi32>
    %c0_i32_41 = arith.constant 0 : i32
    %99 = vector.broadcast %c0_i32_41 : i32 to vector<1x1024xi32>
    %100 = arith.cmpi sge, %98, %99 : vector<1x1024xi32>
    %c-2_i32_42 = arith.constant -2 : i32
    %101 = vector.broadcast %c-2_i32_42 : i32 to vector<1x1024xi32>
    %102 = arith.addi %24, %101 : vector<1x1024xi32>
    %c32_i32_43 = arith.constant 32 : i32
    %103 = vector.broadcast %c32_i32_43 : i32 to vector<1x1024xi32>
    %104 = arith.cmpi slt, %102, %103 : vector<1x1024xi32>
    %105 = arith.andi %100, %104 : vector<1x1024xi1>
    %c-1_i32_44 = arith.constant -1 : i32
    %106 = vector.broadcast %c-1_i32_44 : i32 to vector<1x1024xi32>
    %107 = arith.addi %24, %106 : vector<1x1024xi32>
    %c0_i32_45 = arith.constant 0 : i32
    %108 = vector.broadcast %c0_i32_45 : i32 to vector<1x1024xi32>
    %109 = arith.cmpi sge, %107, %108 : vector<1x1024xi32>
    %c-1_i32_46 = arith.constant -1 : i32
    %110 = vector.broadcast %c-1_i32_46 : i32 to vector<1x1024xi32>
    %111 = arith.addi %24, %110 : vector<1x1024xi32>
    %c32_i32_47 = arith.constant 32 : i32
    %112 = vector.broadcast %c32_i32_47 : i32 to vector<1x1024xi32>
    %113 = arith.cmpi slt, %111, %112 : vector<1x1024xi32>
    %114 = arith.andi %109, %113 : vector<1x1024xi1>
    %c0_i32_48 = arith.constant 0 : i32
    %115 = vector.broadcast %c0_i32_48 : i32 to vector<1x1024xi32>
    %116 = arith.addi %24, %115 : vector<1x1024xi32>
    %c0_i32_49 = arith.constant 0 : i32
    %117 = vector.broadcast %c0_i32_49 : i32 to vector<1x1024xi32>
    %118 = arith.cmpi sge, %116, %117 : vector<1x1024xi32>
    %c0_i32_50 = arith.constant 0 : i32
    %119 = vector.broadcast %c0_i32_50 : i32 to vector<1x1024xi32>
    %120 = arith.addi %24, %119 : vector<1x1024xi32>
    %c32_i32_51 = arith.constant 32 : i32
    %121 = vector.broadcast %c32_i32_51 : i32 to vector<1x1024xi32>
    %122 = arith.cmpi slt, %120, %121 : vector<1x1024xi32>
    %123 = arith.andi %118, %122 : vector<1x1024xi1>
    %c1_i32_52 = arith.constant 1 : i32
    %124 = vector.broadcast %c1_i32_52 : i32 to vector<1x1024xi32>
    %125 = arith.addi %24, %124 : vector<1x1024xi32>
    %c0_i32_53 = arith.constant 0 : i32
    %126 = vector.broadcast %c0_i32_53 : i32 to vector<1x1024xi32>
    %127 = arith.cmpi sge, %125, %126 : vector<1x1024xi32>
    %c1_i32_54 = arith.constant 1 : i32
    %128 = vector.broadcast %c1_i32_54 : i32 to vector<1x1024xi32>
    %129 = arith.addi %24, %128 : vector<1x1024xi32>
    %c32_i32_55 = arith.constant 32 : i32
    %130 = vector.broadcast %c32_i32_55 : i32 to vector<1x1024xi32>
    %131 = arith.cmpi slt, %129, %130 : vector<1x1024xi32>
    %132 = arith.andi %127, %131 : vector<1x1024xi1>
    %c2_i32_56 = arith.constant 2 : i32
    %133 = vector.broadcast %c2_i32_56 : i32 to vector<1x1024xi32>
    %134 = arith.addi %24, %133 : vector<1x1024xi32>
    %c0_i32_57 = arith.constant 0 : i32
    %135 = vector.broadcast %c0_i32_57 : i32 to vector<1x1024xi32>
    %136 = arith.cmpi sge, %134, %135 : vector<1x1024xi32>
    %c2_i32_58 = arith.constant 2 : i32
    %137 = vector.broadcast %c2_i32_58 : i32 to vector<1x1024xi32>
    %138 = arith.addi %24, %137 : vector<1x1024xi32>
    %c32_i32_59 = arith.constant 32 : i32
    %139 = vector.broadcast %c32_i32_59 : i32 to vector<1x1024xi32>
    %140 = arith.cmpi slt, %138, %139 : vector<1x1024xi32>
    %141 = arith.andi %136, %140 : vector<1x1024xi1>
    %c3_i32_60 = arith.constant 3 : i32
    %142 = vector.broadcast %c3_i32_60 : i32 to vector<1x1024xi32>
    %143 = arith.addi %24, %142 : vector<1x1024xi32>
    %c0_i32_61 = arith.constant 0 : i32
    %144 = vector.broadcast %c0_i32_61 : i32 to vector<1x1024xi32>
    %145 = arith.cmpi sge, %143, %144 : vector<1x1024xi32>
    %c3_i32_62 = arith.constant 3 : i32
    %146 = vector.broadcast %c3_i32_62 : i32 to vector<1x1024xi32>
    %147 = arith.addi %24, %146 : vector<1x1024xi32>
    %c32_i32_63 = arith.constant 32 : i32
    %148 = vector.broadcast %c32_i32_63 : i32 to vector<1x1024xi32>
    %149 = arith.cmpi slt, %147, %148 : vector<1x1024xi32>
    %150 = arith.andi %145, %149 : vector<1x1024xi1>
    %cst_64 = arith.constant 0.000000e+00 : f32
    %151 = vector.broadcast %cst_64 : f32 to vector<1x1024xf32>
    %c0_65 = arith.constant 0 : index
    %152 = memref.load %arg6[%c0_65] : memref<98xf32, #tpu.memory_space<smem>>
    %153 = vector.extract_strided_slice %21 {offsets = [0, 925], sizes = [1, 99], strides = [1, 1]} : vector<1x1024xf32> to vector<1x99xf32>
    %154 = vector.extract_strided_slice %21 {offsets = [0, 0], sizes = [1, 925], strides = [1, 1]} : vector<1x1024xf32> to vector<1x925xf32>
    %155 = tpu.concatenate %153, %154 in 1 : vector<1x99xf32>, vector<1x925xf32> -> vector<1x1024xf32>
    %156 = arith.andi %96, %33 : vector<1x1024xi1>
    %cst_66 = arith.constant 0.000000e+00 : f32
    %157 = vector.broadcast %cst_66 : f32 to vector<1x1024xf32>
    %158 = arith.select %156, %155, %157 : vector<1x1024xi1>, vector<1x1024xf32>
    %159 = vector.broadcast %152 : f32 to vector<1x1024xf32>
    %160 = arith.mulf %159, %158 : vector<1x1024xf32>
    %161 = arith.addf %151, %160 : vector<1x1024xf32>
    %c1 = arith.constant 1 : index
    %162 = memref.load %arg6[%c1] : memref<98xf32, #tpu.memory_space<smem>>
    %163 = vector.extract_strided_slice %21 {offsets = [0, 926], sizes = [1, 98], strides = [1, 1]} : vector<1x1024xf32> to vector<1x98xf32>
    %164 = vector.extract_strided_slice %21 {offsets = [0, 0], sizes = [1, 926], strides = [1, 1]} : vector<1x1024xf32> to vector<1x926xf32>
    %165 = tpu.concatenate %163, %164 in 1 : vector<1x98xf32>, vector<1x926xf32> -> vector<1x1024xf32>
    %166 = arith.andi %96, %42 : vector<1x1024xi1>
    %cst_67 = arith.constant 0.000000e+00 : f32
    %167 = vector.broadcast %cst_67 : f32 to vector<1x1024xf32>
    %168 = arith.select %166, %165, %167 : vector<1x1024xi1>, vector<1x1024xf32>
    %169 = vector.broadcast %162 : f32 to vector<1x1024xf32>
    %170 = arith.mulf %169, %168 : vector<1x1024xf32>
    %171 = arith.addf %161, %170 : vector<1x1024xf32>
    %c2 = arith.constant 2 : index
    %172 = memref.load %arg6[%c2] : memref<98xf32, #tpu.memory_space<smem>>
    %173 = vector.extract_strided_slice %21 {offsets = [0, 927], sizes = [1, 97], strides = [1, 1]} : vector<1x1024xf32> to vector<1x97xf32>
    %174 = vector.extract_strided_slice %21 {offsets = [0, 0], sizes = [1, 927], strides = [1, 1]} : vector<1x1024xf32> to vector<1x927xf32>
    %175 = tpu.concatenate %173, %174 in 1 : vector<1x97xf32>, vector<1x927xf32> -> vector<1x1024xf32>
    %176 = arith.andi %96, %51 : vector<1x1024xi1>
    %cst_68 = arith.constant 0.000000e+00 : f32
    %177 = vector.broadcast %cst_68 : f32 to vector<1x1024xf32>
    %178 = arith.select %176, %175, %177 : vector<1x1024xi1>, vector<1x1024xf32>
    %179 = vector.broadcast %172 : f32 to vector<1x1024xf32>
    %180 = arith.mulf %179, %178 : vector<1x1024xf32>
    %181 = arith.addf %171, %180 : vector<1x1024xf32>
    %c3 = arith.constant 3 : index
    %182 = memref.load %arg6[%c3] : memref<98xf32, #tpu.memory_space<smem>>
    %183 = vector.extract_strided_slice %21 {offsets = [0, 928], sizes = [1, 96], strides = [1, 1]} : vector<1x1024xf32> to vector<1x96xf32>
    %184 = vector.extract_strided_slice %21 {offsets = [0, 0], sizes = [1, 928], strides = [1, 1]} : vector<1x1024xf32> to vector<1x928xf32>
    %185 = tpu.concatenate %183, %184 in 1 : vector<1x96xf32>, vector<1x928xf32> -> vector<1x1024xf32>
    %186 = arith.andi %96, %60 : vector<1x1024xi1>
    %cst_69 = arith.constant 0.000000e+00 : f32
    %187 = vector.broadcast %cst_69 : f32 to vector<1x1024xf32>
    %188 = arith.select %186, %185, %187 : vector<1x1024xi1>, vector<1x1024xf32>
    %189 = vector.broadcast %182 : f32 to vector<1x1024xf32>
    %190 = arith.mulf %189, %188 : vector<1x1024xf32>
    %191 = arith.addf %181, %190 : vector<1x1024xf32>
    %c4 = arith.constant 4 : index
    %192 = memref.load %arg6[%c4] : memref<98xf32, #tpu.memory_space<smem>>
    %193 = vector.extract_strided_slice %21 {offsets = [0, 929], sizes = [1, 95], strides = [1, 1]} : vector<1x1024xf32> to vector<1x95xf32>
    %194 = vector.extract_strided_slice %21 {offsets = [0, 0], sizes = [1, 929], strides = [1, 1]} : vector<1x1024xf32> to vector<1x929xf32>
    %195 = tpu.concatenate %193, %194 in 1 : vector<1x95xf32>, vector<1x929xf32> -> vector<1x1024xf32>
    %196 = arith.andi %96, %69 : vector<1x1024xi1>
    %cst_70 = arith.constant 0.000000e+00 : f32
    %197 = vector.broadcast %cst_70 : f32 to vector<1x1024xf32>
    %198 = arith.select %196, %195, %197 : vector<1x1024xi1>, vector<1x1024xf32>
    %199 = vector.broadcast %192 : f32 to vector<1x1024xf32>
    %200 = arith.mulf %199, %198 : vector<1x1024xf32>
    %201 = arith.addf %191, %200 : vector<1x1024xf32>
    %c5 = arith.constant 5 : index
    %202 = memref.load %arg6[%c5] : memref<98xf32, #tpu.memory_space<smem>>
    %203 = vector.extract_strided_slice %21 {offsets = [0, 930], sizes = [1, 94], strides = [1, 1]} : vector<1x1024xf32> to vector<1x94xf32>
    %204 = vector.extract_strided_slice %21 {offsets = [0, 0], sizes = [1, 930], strides = [1, 1]} : vector<1x1024xf32> to vector<1x930xf32>
    %205 = tpu.concatenate %203, %204 in 1 : vector<1x94xf32>, vector<1x930xf32> -> vector<1x1024xf32>
    %206 = arith.andi %96, %78 : vector<1x1024xi1>
    %cst_71 = arith.constant 0.000000e+00 : f32
    %207 = vector.broadcast %cst_71 : f32 to vector<1x1024xf32>
    %208 = arith.select %206, %205, %207 : vector<1x1024xi1>, vector<1x1024xf32>
    %209 = vector.broadcast %202 : f32 to vector<1x1024xf32>
    %210 = arith.mulf %209, %208 : vector<1x1024xf32>
    %211 = arith.addf %201, %210 : vector<1x1024xf32>
    %c6 = arith.constant 6 : index
    %212 = memref.load %arg6[%c6] : memref<98xf32, #tpu.memory_space<smem>>
    %213 = vector.extract_strided_slice %21 {offsets = [0, 931], sizes = [1, 93], strides = [1, 1]} : vector<1x1024xf32> to vector<1x93xf32>
    %214 = vector.extract_strided_slice %21 {offsets = [0, 0], sizes = [1, 931], strides = [1, 1]} : vector<1x1024xf32> to vector<1x931xf32>
    %215 = tpu.concatenate %213, %214 in 1 : vector<1x93xf32>, vector<1x931xf32> -> vector<1x1024xf32>
    %216 = arith.andi %96, %87 : vector<1x1024xi1>
    %cst_72 = arith.constant 0.000000e+00 : f32
    %217 = vector.broadcast %cst_72 : f32 to vector<1x1024xf32>
    %218 = arith.select %216, %215, %217 : vector<1x1024xi1>, vector<1x1024xf32>
    %219 = vector.broadcast %212 : f32 to vector<1x1024xf32>
    %220 = arith.mulf %219, %218 : vector<1x1024xf32>
    %221 = arith.addf %211, %220 : vector<1x1024xf32>
    %c7 = arith.constant 7 : index
    %222 = memref.load %arg6[%c7] : memref<98xf32, #tpu.memory_space<smem>>
    %223 = vector.extract_strided_slice %21 {offsets = [0, 957], sizes = [1, 67], strides = [1, 1]} : vector<1x1024xf32> to vector<1x67xf32>
    %224 = vector.extract_strided_slice %21 {offsets = [0, 0], sizes = [1, 957], strides = [1, 1]} : vector<1x1024xf32> to vector<1x957xf32>
    %225 = tpu.concatenate %223, %224 in 1 : vector<1x67xf32>, vector<1x957xf32> -> vector<1x1024xf32>
    %226 = arith.andi %105, %33 : vector<1x1024xi1>
    %cst_73 = arith.constant 0.000000e+00 : f32
    %227 = vector.broadcast %cst_73 : f32 to vector<1x1024xf32>
    %228 = arith.select %226, %225, %227 : vector<1x1024xi1>, vector<1x1024xf32>
    %229 = vector.broadcast %222 : f32 to vector<1x1024xf32>
    %230 = arith.mulf %229, %228 : vector<1x1024xf32>
    %231 = arith.addf %221, %230 : vector<1x1024xf32>
    %c8 = arith.constant 8 : index
    %232 = memref.load %arg6[%c8] : memref<98xf32, #tpu.memory_space<smem>>
    %233 = vector.extract_strided_slice %21 {offsets = [0, 958], sizes = [1, 66], strides = [1, 1]} : vector<1x1024xf32> to vector<1x66xf32>
    %234 = vector.extract_strided_slice %21 {offsets = [0, 0], sizes = [1, 958], strides = [1, 1]} : vector<1x1024xf32> to vector<1x958xf32>
    %235 = tpu.concatenate %233, %234 in 1 : vector<1x66xf32>, vector<1x958xf32> -> vector<1x1024xf32>
    %236 = arith.andi %105, %42 : vector<1x1024xi1>
    %cst_74 = arith.constant 0.000000e+00 : f32
    %237 = vector.broadcast %cst_74 : f32 to vector<1x1024xf32>
    %238 = arith.select %236, %235, %237 : vector<1x1024xi1>, vector<1x1024xf32>
    %239 = vector.broadcast %232 : f32 to vector<1x1024xf32>
    %240 = arith.mulf %239, %238 : vector<1x1024xf32>
    %241 = arith.addf %231, %240 : vector<1x1024xf32>
    %c9 = arith.constant 9 : index
    %242 = memref.load %arg6[%c9] : memref<98xf32, #tpu.memory_space<smem>>
    %243 = vector.extract_strided_slice %21 {offsets = [0, 959], sizes = [1, 65], strides = [1, 1]} : vector<1x1024xf32> to vector<1x65xf32>
    %244 = vector.extract_strided_slice %21 {offsets = [0, 0], sizes = [1, 959], strides = [1, 1]} : vector<1x1024xf32> to vector<1x959xf32>
    %245 = tpu.concatenate %243, %244 in 1 : vector<1x65xf32>, vector<1x959xf32> -> vector<1x1024xf32>
    %246 = arith.andi %105, %51 : vector<1x1024xi1>
    %cst_75 = arith.constant 0.000000e+00 : f32
    %247 = vector.broadcast %cst_75 : f32 to vector<1x1024xf32>
    %248 = arith.select %246, %245, %247 : vector<1x1024xi1>, vector<1x1024xf32>
    %249 = vector.broadcast %242 : f32 to vector<1x1024xf32>
    %250 = arith.mulf %249, %248 : vector<1x1024xf32>
    %251 = arith.addf %241, %250 : vector<1x1024xf32>
    %c10 = arith.constant 10 : index
    %252 = memref.load %arg6[%c10] : memref<98xf32, #tpu.memory_space<smem>>
    %253 = vector.extract_strided_slice %21 {offsets = [0, 960], sizes = [1, 64], strides = [1, 1]} : vector<1x1024xf32> to vector<1x64xf32>
    %254 = vector.extract_strided_slice %21 {offsets = [0, 0], sizes = [1, 960], strides = [1, 1]} : vector<1x1024xf32> to vector<1x960xf32>
    %255 = tpu.concatenate %253, %254 in 1 : vector<1x64xf32>, vector<1x960xf32> -> vector<1x1024xf32>
    %256 = arith.andi %105, %60 : vector<1x1024xi1>
    %cst_76 = arith.constant 0.000000e+00 : f32
    %257 = vector.broadcast %cst_76 : f32 to vector<1x1024xf32>
    %258 = arith.select %256, %255, %257 : vector<1x1024xi1>, vector<1x1024xf32>
    %259 = vector.broadcast %252 : f32 to vector<1x1024xf32>
    %260 = arith.mulf %259, %258 : vector<1x1024xf32>
    %261 = arith.addf %251, %260 : vector<1x1024xf32>
    %c11 = arith.constant 11 : index
    %262 = memref.load %arg6[%c11] : memref<98xf32, #tpu.memory_space<smem>>
    %263 = vector.extract_strided_slice %21 {offsets = [0, 961], sizes = [1, 63], strides = [1, 1]} : vector<1x1024xf32> to vector<1x63xf32>
    %264 = vector.extract_strided_slice %21 {offsets = [0, 0], sizes = [1, 961], strides = [1, 1]} : vector<1x1024xf32> to vector<1x961xf32>
    %265 = tpu.concatenate %263, %264 in 1 : vector<1x63xf32>, vector<1x961xf32> -> vector<1x1024xf32>
    %266 = arith.andi %105, %69 : vector<1x1024xi1>
    %cst_77 = arith.constant 0.000000e+00 : f32
    %267 = vector.broadcast %cst_77 : f32 to vector<1x1024xf32>
    %268 = arith.select %266, %265, %267 : vector<1x1024xi1>, vector<1x1024xf32>
    %269 = vector.broadcast %262 : f32 to vector<1x1024xf32>
    %270 = arith.mulf %269, %268 : vector<1x1024xf32>
    %271 = arith.addf %261, %270 : vector<1x1024xf32>
    %c12 = arith.constant 12 : index
    %272 = memref.load %arg6[%c12] : memref<98xf32, #tpu.memory_space<smem>>
    %273 = vector.extract_strided_slice %21 {offsets = [0, 962], sizes = [1, 62], strides = [1, 1]} : vector<1x1024xf32> to vector<1x62xf32>
    %274 = vector.extract_strided_slice %21 {offsets = [0, 0], sizes = [1, 962], strides = [1, 1]} : vector<1x1024xf32> to vector<1x962xf32>
    %275 = tpu.concatenate %273, %274 in 1 : vector<1x62xf32>, vector<1x962xf32> -> vector<1x1024xf32>
    %276 = arith.andi %105, %78 : vector<1x1024xi1>
    %cst_78 = arith.constant 0.000000e+00 : f32
    %277 = vector.broadcast %cst_78 : f32 to vector<1x1024xf32>
    %278 = arith.select %276, %275, %277 : vector<1x1024xi1>, vector<1x1024xf32>
    %279 = vector.broadcast %272 : f32 to vector<1x1024xf32>
    %280 = arith.mulf %279, %278 : vector<1x1024xf32>
    %281 = arith.addf %271, %280 : vector<1x1024xf32>
    %c13 = arith.constant 13 : index
    %282 = memref.load %arg6[%c13] : memref<98xf32, #tpu.memory_space<smem>>
    %283 = vector.extract_strided_slice %21 {offsets = [0, 963], sizes = [1, 61], strides = [1, 1]} : vector<1x1024xf32> to vector<1x61xf32>
    %284 = vector.extract_strided_slice %21 {offsets = [0, 0], sizes = [1, 963], strides = [1, 1]} : vector<1x1024xf32> to vector<1x963xf32>
    %285 = tpu.concatenate %283, %284 in 1 : vector<1x61xf32>, vector<1x963xf32> -> vector<1x1024xf32>
    %286 = arith.andi %105, %87 : vector<1x1024xi1>
    %cst_79 = arith.constant 0.000000e+00 : f32
    %287 = vector.broadcast %cst_79 : f32 to vector<1x1024xf32>
    %288 = arith.select %286, %285, %287 : vector<1x1024xi1>, vector<1x1024xf32>
    %289 = vector.broadcast %282 : f32 to vector<1x1024xf32>
    %290 = arith.mulf %289, %288 : vector<1x1024xf32>
    %291 = arith.addf %281, %290 : vector<1x1024xf32>
    %c14 = arith.constant 14 : index
    %292 = memref.load %arg6[%c14] : memref<98xf32, #tpu.memory_space<smem>>
    %293 = vector.extract_strided_slice %21 {offsets = [0, 989], sizes = [1, 35], strides = [1, 1]} : vector<1x1024xf32> to vector<1x35xf32>
    %294 = vector.extract_strided_slice %21 {offsets = [0, 0], sizes = [1, 989], strides = [1, 1]} : vector<1x1024xf32> to vector<1x989xf32>
    %295 = tpu.concatenate %293, %294 in 1 : vector<1x35xf32>, vector<1x989xf32> -> vector<1x1024xf32>
    %296 = arith.andi %114, %33 : vector<1x1024xi1>
    %cst_80 = arith.constant 0.000000e+00 : f32
    %297 = vector.broadcast %cst_80 : f32 to vector<1x1024xf32>
    %298 = arith.select %296, %295, %297 : vector<1x1024xi1>, vector<1x1024xf32>
    %299 = vector.broadcast %292 : f32 to vector<1x1024xf32>
    %300 = arith.mulf %299, %298 : vector<1x1024xf32>
    %301 = arith.addf %291, %300 : vector<1x1024xf32>
    %c15 = arith.constant 15 : index
    %302 = memref.load %arg6[%c15] : memref<98xf32, #tpu.memory_space<smem>>
    %303 = vector.extract_strided_slice %21 {offsets = [0, 990], sizes = [1, 34], strides = [1, 1]} : vector<1x1024xf32> to vector<1x34xf32>
    %304 = vector.extract_strided_slice %21 {offsets = [0, 0], sizes = [1, 990], strides = [1, 1]} : vector<1x1024xf32> to vector<1x990xf32>
    %305 = tpu.concatenate %303, %304 in 1 : vector<1x34xf32>, vector<1x990xf32> -> vector<1x1024xf32>
    %306 = arith.andi %114, %42 : vector<1x1024xi1>
    %cst_81 = arith.constant 0.000000e+00 : f32
    %307 = vector.broadcast %cst_81 : f32 to vector<1x1024xf32>
    %308 = arith.select %306, %305, %307 : vector<1x1024xi1>, vector<1x1024xf32>
    %309 = vector.broadcast %302 : f32 to vector<1x1024xf32>
    %310 = arith.mulf %309, %308 : vector<1x1024xf32>
    %311 = arith.addf %301, %310 : vector<1x1024xf32>
    %c16 = arith.constant 16 : index
    %312 = memref.load %arg6[%c16] : memref<98xf32, #tpu.memory_space<smem>>
    %313 = vector.extract_strided_slice %21 {offsets = [0, 991], sizes = [1, 33], strides = [1, 1]} : vector<1x1024xf32> to vector<1x33xf32>
    %314 = vector.extract_strided_slice %21 {offsets = [0, 0], sizes = [1, 991], strides = [1, 1]} : vector<1x1024xf32> to vector<1x991xf32>
    %315 = tpu.concatenate %313, %314 in 1 : vector<1x33xf32>, vector<1x991xf32> -> vector<1x1024xf32>
    %316 = arith.andi %114, %51 : vector<1x1024xi1>
    %cst_82 = arith.constant 0.000000e+00 : f32
    %317 = vector.broadcast %cst_82 : f32 to vector<1x1024xf32>
    %318 = arith.select %316, %315, %317 : vector<1x1024xi1>, vector<1x1024xf32>
    %319 = vector.broadcast %312 : f32 to vector<1x1024xf32>
    %320 = arith.mulf %319, %318 : vector<1x1024xf32>
    %321 = arith.addf %311, %320 : vector<1x1024xf32>
    %c17 = arith.constant 17 : index
    %322 = memref.load %arg6[%c17] : memref<98xf32, #tpu.memory_space<smem>>
    %323 = vector.extract_strided_slice %21 {offsets = [0, 992], sizes = [1, 32], strides = [1, 1]} : vector<1x1024xf32> to vector<1x32xf32>
    %324 = vector.extract_strided_slice %21 {offsets = [0, 0], sizes = [1, 992], strides = [1, 1]} : vector<1x1024xf32> to vector<1x992xf32>
    %325 = tpu.concatenate %323, %324 in 1 : vector<1x32xf32>, vector<1x992xf32> -> vector<1x1024xf32>
    %326 = arith.andi %114, %60 : vector<1x1024xi1>
    %cst_83 = arith.constant 0.000000e+00 : f32
    %327 = vector.broadcast %cst_83 : f32 to vector<1x1024xf32>
    %328 = arith.select %326, %325, %327 : vector<1x1024xi1>, vector<1x1024xf32>
    %329 = vector.broadcast %322 : f32 to vector<1x1024xf32>
    %330 = arith.mulf %329, %328 : vector<1x1024xf32>
    %331 = arith.addf %321, %330 : vector<1x1024xf32>
    %c18 = arith.constant 18 : index
    %332 = memref.load %arg6[%c18] : memref<98xf32, #tpu.memory_space<smem>>
    %333 = vector.extract_strided_slice %21 {offsets = [0, 993], sizes = [1, 31], strides = [1, 1]} : vector<1x1024xf32> to vector<1x31xf32>
    %334 = vector.extract_strided_slice %21 {offsets = [0, 0], sizes = [1, 993], strides = [1, 1]} : vector<1x1024xf32> to vector<1x993xf32>
    %335 = tpu.concatenate %333, %334 in 1 : vector<1x31xf32>, vector<1x993xf32> -> vector<1x1024xf32>
    %336 = arith.andi %114, %69 : vector<1x1024xi1>
    %cst_84 = arith.constant 0.000000e+00 : f32
    %337 = vector.broadcast %cst_84 : f32 to vector<1x1024xf32>
    %338 = arith.select %336, %335, %337 : vector<1x1024xi1>, vector<1x1024xf32>
    %339 = vector.broadcast %332 : f32 to vector<1x1024xf32>
    %340 = arith.mulf %339, %338 : vector<1x1024xf32>
    %341 = arith.addf %331, %340 : vector<1x1024xf32>
    %c19 = arith.constant 19 : index
    %342 = memref.load %arg6[%c19] : memref<98xf32, #tpu.memory_space<smem>>
    %343 = vector.extract_strided_slice %21 {offsets = [0, 994], sizes = [1, 30], strides = [1, 1]} : vector<1x1024xf32> to vector<1x30xf32>
    %344 = vector.extract_strided_slice %21 {offsets = [0, 0], sizes = [1, 994], strides = [1, 1]} : vector<1x1024xf32> to vector<1x994xf32>
    %345 = tpu.concatenate %343, %344 in 1 : vector<1x30xf32>, vector<1x994xf32> -> vector<1x1024xf32>
    %346 = arith.andi %114, %78 : vector<1x1024xi1>
    %cst_85 = arith.constant 0.000000e+00 : f32
    %347 = vector.broadcast %cst_85 : f32 to vector<1x1024xf32>
    %348 = arith.select %346, %345, %347 : vector<1x1024xi1>, vector<1x1024xf32>
    %349 = vector.broadcast %342 : f32 to vector<1x1024xf32>
    %350 = arith.mulf %349, %348 : vector<1x1024xf32>
    %351 = arith.addf %341, %350 : vector<1x1024xf32>
    %c20 = arith.constant 20 : index
    %352 = memref.load %arg6[%c20] : memref<98xf32, #tpu.memory_space<smem>>
    %353 = vector.extract_strided_slice %21 {offsets = [0, 995], sizes = [1, 29], strides = [1, 1]} : vector<1x1024xf32> to vector<1x29xf32>
    %354 = vector.extract_strided_slice %21 {offsets = [0, 0], sizes = [1, 995], strides = [1, 1]} : vector<1x1024xf32> to vector<1x995xf32>
    %355 = tpu.concatenate %353, %354 in 1 : vector<1x29xf32>, vector<1x995xf32> -> vector<1x1024xf32>
    %356 = arith.andi %114, %87 : vector<1x1024xi1>
    %cst_86 = arith.constant 0.000000e+00 : f32
    %357 = vector.broadcast %cst_86 : f32 to vector<1x1024xf32>
    %358 = arith.select %356, %355, %357 : vector<1x1024xi1>, vector<1x1024xf32>
    %359 = vector.broadcast %352 : f32 to vector<1x1024xf32>
    %360 = arith.mulf %359, %358 : vector<1x1024xf32>
    %361 = arith.addf %351, %360 : vector<1x1024xf32>
    %c21 = arith.constant 21 : index
    %362 = memref.load %arg6[%c21] : memref<98xf32, #tpu.memory_space<smem>>
    %363 = vector.extract_strided_slice %21 {offsets = [0, 1021], sizes = [1, 3], strides = [1, 1]} : vector<1x1024xf32> to vector<1x3xf32>
    %364 = vector.extract_strided_slice %21 {offsets = [0, 0], sizes = [1, 1021], strides = [1, 1]} : vector<1x1024xf32> to vector<1x1021xf32>
    %365 = tpu.concatenate %363, %364 in 1 : vector<1x3xf32>, vector<1x1021xf32> -> vector<1x1024xf32>
    %366 = arith.andi %123, %33 : vector<1x1024xi1>
    %cst_87 = arith.constant 0.000000e+00 : f32
    %367 = vector.broadcast %cst_87 : f32 to vector<1x1024xf32>
    %368 = arith.select %366, %365, %367 : vector<1x1024xi1>, vector<1x1024xf32>
    %369 = vector.broadcast %362 : f32 to vector<1x1024xf32>
    %370 = arith.mulf %369, %368 : vector<1x1024xf32>
    %371 = arith.addf %361, %370 : vector<1x1024xf32>
    %c22 = arith.constant 22 : index
    %372 = memref.load %arg6[%c22] : memref<98xf32, #tpu.memory_space<smem>>
    %373 = vector.extract_strided_slice %21 {offsets = [0, 1022], sizes = [1, 2], strides = [1, 1]} : vector<1x1024xf32> to vector<1x2xf32>
    %374 = vector.extract_strided_slice %21 {offsets = [0, 0], sizes = [1, 1022], strides = [1, 1]} : vector<1x1024xf32> to vector<1x1022xf32>
    %375 = tpu.concatenate %373, %374 in 1 : vector<1x2xf32>, vector<1x1022xf32> -> vector<1x1024xf32>
    %376 = arith.andi %123, %42 : vector<1x1024xi1>
    %cst_88 = arith.constant 0.000000e+00 : f32
    %377 = vector.broadcast %cst_88 : f32 to vector<1x1024xf32>
    %378 = arith.select %376, %375, %377 : vector<1x1024xi1>, vector<1x1024xf32>
    %379 = vector.broadcast %372 : f32 to vector<1x1024xf32>
    %380 = arith.mulf %379, %378 : vector<1x1024xf32>
    %381 = arith.addf %371, %380 : vector<1x1024xf32>
    %c23 = arith.constant 23 : index
    %382 = memref.load %arg6[%c23] : memref<98xf32, #tpu.memory_space<smem>>
    %383 = vector.extract_strided_slice %21 {offsets = [0, 1023], sizes = [1, 1], strides = [1, 1]} : vector<1x1024xf32> to vector<1x1xf32>
    %384 = vector.extract_strided_slice %21 {offsets = [0, 0], sizes = [1, 1023], strides = [1, 1]} : vector<1x1024xf32> to vector<1x1023xf32>
    %385 = tpu.concatenate %383, %384 in 1 : vector<1x1xf32>, vector<1x1023xf32> -> vector<1x1024xf32>
    %386 = arith.andi %123, %51 : vector<1x1024xi1>
    %cst_89 = arith.constant 0.000000e+00 : f32
    %387 = vector.broadcast %cst_89 : f32 to vector<1x1024xf32>
    %388 = arith.select %386, %385, %387 : vector<1x1024xi1>, vector<1x1024xf32>
    %389 = vector.broadcast %382 : f32 to vector<1x1024xf32>
    %390 = arith.mulf %389, %388 : vector<1x1024xf32>
    %391 = arith.addf %381, %390 : vector<1x1024xf32>
    %c24 = arith.constant 24 : index
    %392 = memref.load %arg6[%c24] : memref<98xf32, #tpu.memory_space<smem>>
    %393 = arith.andi %123, %60 : vector<1x1024xi1>
    %cst_90 = arith.constant 0.000000e+00 : f32
    %394 = vector.broadcast %cst_90 : f32 to vector<1x1024xf32>
    %395 = arith.select %393, %21, %394 : vector<1x1024xi1>, vector<1x1024xf32>
    %396 = vector.broadcast %392 : f32 to vector<1x1024xf32>
    %397 = arith.mulf %396, %395 : vector<1x1024xf32>
    %398 = arith.addf %391, %397 : vector<1x1024xf32>
    %c25 = arith.constant 25 : index
    %399 = memref.load %arg6[%c25] : memref<98xf32, #tpu.memory_space<smem>>
    %400 = vector.extract_strided_slice %21 {offsets = [0, 1], sizes = [1, 1023], strides = [1, 1]} : vector<1x1024xf32> to vector<1x1023xf32>
    %401 = vector.extract_strided_slice %21 {offsets = [0, 0], sizes = [1, 1], strides = [1, 1]} : vector<1x1024xf32> to vector<1x1xf32>
    %402 = tpu.concatenate %400, %401 in 1 : vector<1x1023xf32>, vector<1x1xf32> -> vector<1x1024xf32>
    %403 = arith.andi %123, %69 : vector<1x1024xi1>
    %cst_91 = arith.constant 0.000000e+00 : f32
    %404 = vector.broadcast %cst_91 : f32 to vector<1x1024xf32>
    %405 = arith.select %403, %402, %404 : vector<1x1024xi1>, vector<1x1024xf32>
    %406 = vector.broadcast %399 : f32 to vector<1x1024xf32>
    %407 = arith.mulf %406, %405 : vector<1x1024xf32>
    %408 = arith.addf %398, %407 : vector<1x1024xf32>
    %c26 = arith.constant 26 : index
    %409 = memref.load %arg6[%c26] : memref<98xf32, #tpu.memory_space<smem>>
    %410 = vector.extract_strided_slice %21 {offsets = [0, 2], sizes = [1, 1022], strides = [1, 1]} : vector<1x1024xf32> to vector<1x1022xf32>
    %411 = vector.extract_strided_slice %21 {offsets = [0, 0], sizes = [1, 2], strides = [1, 1]} : vector<1x1024xf32> to vector<1x2xf32>
    %412 = tpu.concatenate %410, %411 in 1 : vector<1x1022xf32>, vector<1x2xf32> -> vector<1x1024xf32>
    %413 = arith.andi %123, %78 : vector<1x1024xi1>
    %cst_92 = arith.constant 0.000000e+00 : f32
    %414 = vector.broadcast %cst_92 : f32 to vector<1x1024xf32>
    %415 = arith.select %413, %412, %414 : vector<1x1024xi1>, vector<1x1024xf32>
    %416 = vector.broadcast %409 : f32 to vector<1x1024xf32>
    %417 = arith.mulf %416, %415 : vector<1x1024xf32>
    %418 = arith.addf %408, %417 : vector<1x1024xf32>
    %c27 = arith.constant 27 : index
    %419 = memref.load %arg6[%c27] : memref<98xf32, #tpu.memory_space<smem>>
    %420 = vector.extract_strided_slice %21 {offsets = [0, 3], sizes = [1, 1021], strides = [1, 1]} : vector<1x1024xf32> to vector<1x1021xf32>
    %421 = vector.extract_strided_slice %21 {offsets = [0, 0], sizes = [1, 3], strides = [1, 1]} : vector<1x1024xf32> to vector<1x3xf32>
    %422 = tpu.concatenate %420, %421 in 1 : vector<1x1021xf32>, vector<1x3xf32> -> vector<1x1024xf32>
    %423 = arith.andi %123, %87 : vector<1x1024xi1>
    %cst_93 = arith.constant 0.000000e+00 : f32
    %424 = vector.broadcast %cst_93 : f32 to vector<1x1024xf32>
    %425 = arith.select %423, %422, %424 : vector<1x1024xi1>, vector<1x1024xf32>
    %426 = vector.broadcast %419 : f32 to vector<1x1024xf32>
    %427 = arith.mulf %426, %425 : vector<1x1024xf32>
    %428 = arith.addf %418, %427 : vector<1x1024xf32>
    %c28 = arith.constant 28 : index
    %429 = memref.load %arg6[%c28] : memref<98xf32, #tpu.memory_space<smem>>
    %430 = vector.extract_strided_slice %21 {offsets = [0, 29], sizes = [1, 995], strides = [1, 1]} : vector<1x1024xf32> to vector<1x995xf32>
    %431 = vector.extract_strided_slice %21 {offsets = [0, 0], sizes = [1, 29], strides = [1, 1]} : vector<1x1024xf32> to vector<1x29xf32>
    %432 = tpu.concatenate %430, %431 in 1 : vector<1x995xf32>, vector<1x29xf32> -> vector<1x1024xf32>
    %433 = arith.andi %132, %33 : vector<1x1024xi1>
    %cst_94 = arith.constant 0.000000e+00 : f32
    %434 = vector.broadcast %cst_94 : f32 to vector<1x1024xf32>
    %435 = arith.select %433, %432, %434 : vector<1x1024xi1>, vector<1x1024xf32>
    %436 = vector.broadcast %429 : f32 to vector<1x1024xf32>
    %437 = arith.mulf %436, %435 : vector<1x1024xf32>
    %438 = arith.addf %428, %437 : vector<1x1024xf32>
    %c29 = arith.constant 29 : index
    %439 = memref.load %arg6[%c29] : memref<98xf32, #tpu.memory_space<smem>>
    %440 = vector.extract_strided_slice %21 {offsets = [0, 30], sizes = [1, 994], strides = [1, 1]} : vector<1x1024xf32> to vector<1x994xf32>
    %441 = vector.extract_strided_slice %21 {offsets = [0, 0], sizes = [1, 30], strides = [1, 1]} : vector<1x1024xf32> to vector<1x30xf32>
    %442 = tpu.concatenate %440, %441 in 1 : vector<1x994xf32>, vector<1x30xf32> -> vector<1x1024xf32>
    %443 = arith.andi %132, %42 : vector<1x1024xi1>
    %cst_95 = arith.constant 0.000000e+00 : f32
    %444 = vector.broadcast %cst_95 : f32 to vector<1x1024xf32>
    %445 = arith.select %443, %442, %444 : vector<1x1024xi1>, vector<1x1024xf32>
    %446 = vector.broadcast %439 : f32 to vector<1x1024xf32>
    %447 = arith.mulf %446, %445 : vector<1x1024xf32>
    %448 = arith.addf %438, %447 : vector<1x1024xf32>
    %c30 = arith.constant 30 : index
    %449 = memref.load %arg6[%c30] : memref<98xf32, #tpu.memory_space<smem>>
    %450 = vector.extract_strided_slice %21 {offsets = [0, 31], sizes = [1, 993], strides = [1, 1]} : vector<1x1024xf32> to vector<1x993xf32>
    %451 = vector.extract_strided_slice %21 {offsets = [0, 0], sizes = [1, 31], strides = [1, 1]} : vector<1x1024xf32> to vector<1x31xf32>
    %452 = tpu.concatenate %450, %451 in 1 : vector<1x993xf32>, vector<1x31xf32> -> vector<1x1024xf32>
    %453 = arith.andi %132, %51 : vector<1x1024xi1>
    %cst_96 = arith.constant 0.000000e+00 : f32
    %454 = vector.broadcast %cst_96 : f32 to vector<1x1024xf32>
    %455 = arith.select %453, %452, %454 : vector<1x1024xi1>, vector<1x1024xf32>
    %456 = vector.broadcast %449 : f32 to vector<1x1024xf32>
    %457 = arith.mulf %456, %455 : vector<1x1024xf32>
    %458 = arith.addf %448, %457 : vector<1x1024xf32>
    %c31 = arith.constant 31 : index
    %459 = memref.load %arg6[%c31] : memref<98xf32, #tpu.memory_space<smem>>
    %460 = vector.extract_strided_slice %21 {offsets = [0, 32], sizes = [1, 992], strides = [1, 1]} : vector<1x1024xf32> to vector<1x992xf32>
    %461 = vector.extract_strided_slice %21 {offsets = [0, 0], sizes = [1, 32], strides = [1, 1]} : vector<1x1024xf32> to vector<1x32xf32>
    %462 = tpu.concatenate %460, %461 in 1 : vector<1x992xf32>, vector<1x32xf32> -> vector<1x1024xf32>
    %463 = arith.andi %132, %60 : vector<1x1024xi1>
    %cst_97 = arith.constant 0.000000e+00 : f32
    %464 = vector.broadcast %cst_97 : f32 to vector<1x1024xf32>
    %465 = arith.select %463, %462, %464 : vector<1x1024xi1>, vector<1x1024xf32>
    %466 = vector.broadcast %459 : f32 to vector<1x1024xf32>
    %467 = arith.mulf %466, %465 : vector<1x1024xf32>
    %468 = arith.addf %458, %467 : vector<1x1024xf32>
    %c32 = arith.constant 32 : index
    %469 = memref.load %arg6[%c32] : memref<98xf32, #tpu.memory_space<smem>>
    %470 = vector.extract_strided_slice %21 {offsets = [0, 33], sizes = [1, 991], strides = [1, 1]} : vector<1x1024xf32> to vector<1x991xf32>
    %471 = vector.extract_strided_slice %21 {offsets = [0, 0], sizes = [1, 33], strides = [1, 1]} : vector<1x1024xf32> to vector<1x33xf32>
    %472 = tpu.concatenate %470, %471 in 1 : vector<1x991xf32>, vector<1x33xf32> -> vector<1x1024xf32>
    %473 = arith.andi %132, %69 : vector<1x1024xi1>
    %cst_98 = arith.constant 0.000000e+00 : f32
    %474 = vector.broadcast %cst_98 : f32 to vector<1x1024xf32>
    %475 = arith.select %473, %472, %474 : vector<1x1024xi1>, vector<1x1024xf32>
    %476 = vector.broadcast %469 : f32 to vector<1x1024xf32>
    %477 = arith.mulf %476, %475 : vector<1x1024xf32>
    %478 = arith.addf %468, %477 : vector<1x1024xf32>
    %c33 = arith.constant 33 : index
    %479 = memref.load %arg6[%c33] : memref<98xf32, #tpu.memory_space<smem>>
    %480 = vector.extract_strided_slice %21 {offsets = [0, 34], sizes = [1, 990], strides = [1, 1]} : vector<1x1024xf32> to vector<1x990xf32>
    %481 = vector.extract_strided_slice %21 {offsets = [0, 0], sizes = [1, 34], strides = [1, 1]} : vector<1x1024xf32> to vector<1x34xf32>
    %482 = tpu.concatenate %480, %481 in 1 : vector<1x990xf32>, vector<1x34xf32> -> vector<1x1024xf32>
    %483 = arith.andi %132, %78 : vector<1x1024xi1>
    %cst_99 = arith.constant 0.000000e+00 : f32
    %484 = vector.broadcast %cst_99 : f32 to vector<1x1024xf32>
    %485 = arith.select %483, %482, %484 : vector<1x1024xi1>, vector<1x1024xf32>
    %486 = vector.broadcast %479 : f32 to vector<1x1024xf32>
    %487 = arith.mulf %486, %485 : vector<1x1024xf32>
    %488 = arith.addf %478, %487 : vector<1x1024xf32>
    %c34 = arith.constant 34 : index
    %489 = memref.load %arg6[%c34] : memref<98xf32, #tpu.memory_space<smem>>
    %490 = vector.extract_strided_slice %21 {offsets = [0, 35], sizes = [1, 989], strides = [1, 1]} : vector<1x1024xf32> to vector<1x989xf32>
    %491 = vector.extract_strided_slice %21 {offsets = [0, 0], sizes = [1, 35], strides = [1, 1]} : vector<1x1024xf32> to vector<1x35xf32>
    %492 = tpu.concatenate %490, %491 in 1 : vector<1x989xf32>, vector<1x35xf32> -> vector<1x1024xf32>
    %493 = arith.andi %132, %87 : vector<1x1024xi1>
    %cst_100 = arith.constant 0.000000e+00 : f32
    %494 = vector.broadcast %cst_100 : f32 to vector<1x1024xf32>
    %495 = arith.select %493, %492, %494 : vector<1x1024xi1>, vector<1x1024xf32>
    %496 = vector.broadcast %489 : f32 to vector<1x1024xf32>
    %497 = arith.mulf %496, %495 : vector<1x1024xf32>
    %498 = arith.addf %488, %497 : vector<1x1024xf32>
    %c35 = arith.constant 35 : index
    %499 = memref.load %arg6[%c35] : memref<98xf32, #tpu.memory_space<smem>>
    %500 = vector.extract_strided_slice %21 {offsets = [0, 61], sizes = [1, 963], strides = [1, 1]} : vector<1x1024xf32> to vector<1x963xf32>
    %501 = vector.extract_strided_slice %21 {offsets = [0, 0], sizes = [1, 61], strides = [1, 1]} : vector<1x1024xf32> to vector<1x61xf32>
    %502 = tpu.concatenate %500, %501 in 1 : vector<1x963xf32>, vector<1x61xf32> -> vector<1x1024xf32>
    %503 = arith.andi %141, %33 : vector<1x1024xi1>
    %cst_101 = arith.constant 0.000000e+00 : f32
    %504 = vector.broadcast %cst_101 : f32 to vector<1x1024xf32>
    %505 = arith.select %503, %502, %504 : vector<1x1024xi1>, vector<1x1024xf32>
    %506 = vector.broadcast %499 : f32 to vector<1x1024xf32>
    %507 = arith.mulf %506, %505 : vector<1x1024xf32>
    %508 = arith.addf %498, %507 : vector<1x1024xf32>
    %c36 = arith.constant 36 : index
    %509 = memref.load %arg6[%c36] : memref<98xf32, #tpu.memory_space<smem>>
    %510 = vector.extract_strided_slice %21 {offsets = [0, 62], sizes = [1, 962], strides = [1, 1]} : vector<1x1024xf32> to vector<1x962xf32>
    %511 = vector.extract_strided_slice %21 {offsets = [0, 0], sizes = [1, 62], strides = [1, 1]} : vector<1x1024xf32> to vector<1x62xf32>
    %512 = tpu.concatenate %510, %511 in 1 : vector<1x962xf32>, vector<1x62xf32> -> vector<1x1024xf32>
    %513 = arith.andi %141, %42 : vector<1x1024xi1>
    %cst_102 = arith.constant 0.000000e+00 : f32
    %514 = vector.broadcast %cst_102 : f32 to vector<1x1024xf32>
    %515 = arith.select %513, %512, %514 : vector<1x1024xi1>, vector<1x1024xf32>
    %516 = vector.broadcast %509 : f32 to vector<1x1024xf32>
    %517 = arith.mulf %516, %515 : vector<1x1024xf32>
    %518 = arith.addf %508, %517 : vector<1x1024xf32>
    %c37 = arith.constant 37 : index
    %519 = memref.load %arg6[%c37] : memref<98xf32, #tpu.memory_space<smem>>
    %520 = vector.extract_strided_slice %21 {offsets = [0, 63], sizes = [1, 961], strides = [1, 1]} : vector<1x1024xf32> to vector<1x961xf32>
    %521 = vector.extract_strided_slice %21 {offsets = [0, 0], sizes = [1, 63], strides = [1, 1]} : vector<1x1024xf32> to vector<1x63xf32>
    %522 = tpu.concatenate %520, %521 in 1 : vector<1x961xf32>, vector<1x63xf32> -> vector<1x1024xf32>
    %523 = arith.andi %141, %51 : vector<1x1024xi1>
    %cst_103 = arith.constant 0.000000e+00 : f32
    %524 = vector.broadcast %cst_103 : f32 to vector<1x1024xf32>
    %525 = arith.select %523, %522, %524 : vector<1x1024xi1>, vector<1x1024xf32>
    %526 = vector.broadcast %519 : f32 to vector<1x1024xf32>
    %527 = arith.mulf %526, %525 : vector<1x1024xf32>
    %528 = arith.addf %518, %527 : vector<1x1024xf32>
    %c38 = arith.constant 38 : index
    %529 = memref.load %arg6[%c38] : memref<98xf32, #tpu.memory_space<smem>>
    %530 = vector.extract_strided_slice %21 {offsets = [0, 64], sizes = [1, 960], strides = [1, 1]} : vector<1x1024xf32> to vector<1x960xf32>
    %531 = vector.extract_strided_slice %21 {offsets = [0, 0], sizes = [1, 64], strides = [1, 1]} : vector<1x1024xf32> to vector<1x64xf32>
    %532 = tpu.concatenate %530, %531 in 1 : vector<1x960xf32>, vector<1x64xf32> -> vector<1x1024xf32>
    %533 = arith.andi %141, %60 : vector<1x1024xi1>
    %cst_104 = arith.constant 0.000000e+00 : f32
    %534 = vector.broadcast %cst_104 : f32 to vector<1x1024xf32>
    %535 = arith.select %533, %532, %534 : vector<1x1024xi1>, vector<1x1024xf32>
    %536 = vector.broadcast %529 : f32 to vector<1x1024xf32>
    %537 = arith.mulf %536, %535 : vector<1x1024xf32>
    %538 = arith.addf %528, %537 : vector<1x1024xf32>
    %c39 = arith.constant 39 : index
    %539 = memref.load %arg6[%c39] : memref<98xf32, #tpu.memory_space<smem>>
    %540 = vector.extract_strided_slice %21 {offsets = [0, 65], sizes = [1, 959], strides = [1, 1]} : vector<1x1024xf32> to vector<1x959xf32>
    %541 = vector.extract_strided_slice %21 {offsets = [0, 0], sizes = [1, 65], strides = [1, 1]} : vector<1x1024xf32> to vector<1x65xf32>
    %542 = tpu.concatenate %540, %541 in 1 : vector<1x959xf32>, vector<1x65xf32> -> vector<1x1024xf32>
    %543 = arith.andi %141, %69 : vector<1x1024xi1>
    %cst_105 = arith.constant 0.000000e+00 : f32
    %544 = vector.broadcast %cst_105 : f32 to vector<1x1024xf32>
    %545 = arith.select %543, %542, %544 : vector<1x1024xi1>, vector<1x1024xf32>
    %546 = vector.broadcast %539 : f32 to vector<1x1024xf32>
    %547 = arith.mulf %546, %545 : vector<1x1024xf32>
    %548 = arith.addf %538, %547 : vector<1x1024xf32>
    %c40 = arith.constant 40 : index
    %549 = memref.load %arg6[%c40] : memref<98xf32, #tpu.memory_space<smem>>
    %550 = vector.extract_strided_slice %21 {offsets = [0, 66], sizes = [1, 958], strides = [1, 1]} : vector<1x1024xf32> to vector<1x958xf32>
    %551 = vector.extract_strided_slice %21 {offsets = [0, 0], sizes = [1, 66], strides = [1, 1]} : vector<1x1024xf32> to vector<1x66xf32>
    %552 = tpu.concatenate %550, %551 in 1 : vector<1x958xf32>, vector<1x66xf32> -> vector<1x1024xf32>
    %553 = arith.andi %141, %78 : vector<1x1024xi1>
    %cst_106 = arith.constant 0.000000e+00 : f32
    %554 = vector.broadcast %cst_106 : f32 to vector<1x1024xf32>
    %555 = arith.select %553, %552, %554 : vector<1x1024xi1>, vector<1x1024xf32>
    %556 = vector.broadcast %549 : f32 to vector<1x1024xf32>
    %557 = arith.mulf %556, %555 : vector<1x1024xf32>
    %558 = arith.addf %548, %557 : vector<1x1024xf32>
    %c41 = arith.constant 41 : index
    %559 = memref.load %arg6[%c41] : memref<98xf32, #tpu.memory_space<smem>>
    %560 = vector.extract_strided_slice %21 {offsets = [0, 67], sizes = [1, 957], strides = [1, 1]} : vector<1x1024xf32> to vector<1x957xf32>
    %561 = vector.extract_strided_slice %21 {offsets = [0, 0], sizes = [1, 67], strides = [1, 1]} : vector<1x1024xf32> to vector<1x67xf32>
    %562 = tpu.concatenate %560, %561 in 1 : vector<1x957xf32>, vector<1x67xf32> -> vector<1x1024xf32>
    %563 = arith.andi %141, %87 : vector<1x1024xi1>
    %cst_107 = arith.constant 0.000000e+00 : f32
    %564 = vector.broadcast %cst_107 : f32 to vector<1x1024xf32>
    %565 = arith.select %563, %562, %564 : vector<1x1024xi1>, vector<1x1024xf32>
    %566 = vector.broadcast %559 : f32 to vector<1x1024xf32>
    %567 = arith.mulf %566, %565 : vector<1x1024xf32>
    %568 = arith.addf %558, %567 : vector<1x1024xf32>
    %c42 = arith.constant 42 : index
    %569 = memref.load %arg6[%c42] : memref<98xf32, #tpu.memory_space<smem>>
    %570 = vector.extract_strided_slice %21 {offsets = [0, 93], sizes = [1, 931], strides = [1, 1]} : vector<1x1024xf32> to vector<1x931xf32>
    %571 = vector.extract_strided_slice %21 {offsets = [0, 0], sizes = [1, 93], strides = [1, 1]} : vector<1x1024xf32> to vector<1x93xf32>
    %572 = tpu.concatenate %570, %571 in 1 : vector<1x931xf32>, vector<1x93xf32> -> vector<1x1024xf32>
    %573 = arith.andi %150, %33 : vector<1x1024xi1>
    %cst_108 = arith.constant 0.000000e+00 : f32
    %574 = vector.broadcast %cst_108 : f32 to vector<1x1024xf32>
    %575 = arith.select %573, %572, %574 : vector<1x1024xi1>, vector<1x1024xf32>
    %576 = vector.broadcast %569 : f32 to vector<1x1024xf32>
    %577 = arith.mulf %576, %575 : vector<1x1024xf32>
    %578 = arith.addf %568, %577 : vector<1x1024xf32>
    %c43 = arith.constant 43 : index
    %579 = memref.load %arg6[%c43] : memref<98xf32, #tpu.memory_space<smem>>
    %580 = vector.extract_strided_slice %21 {offsets = [0, 94], sizes = [1, 930], strides = [1, 1]} : vector<1x1024xf32> to vector<1x930xf32>
    %581 = vector.extract_strided_slice %21 {offsets = [0, 0], sizes = [1, 94], strides = [1, 1]} : vector<1x1024xf32> to vector<1x94xf32>
    %582 = tpu.concatenate %580, %581 in 1 : vector<1x930xf32>, vector<1x94xf32> -> vector<1x1024xf32>
    %583 = arith.andi %150, %42 : vector<1x1024xi1>
    %cst_109 = arith.constant 0.000000e+00 : f32
    %584 = vector.broadcast %cst_109 : f32 to vector<1x1024xf32>
    %585 = arith.select %583, %582, %584 : vector<1x1024xi1>, vector<1x1024xf32>
    %586 = vector.broadcast %579 : f32 to vector<1x1024xf32>
    %587 = arith.mulf %586, %585 : vector<1x1024xf32>
    %588 = arith.addf %578, %587 : vector<1x1024xf32>
    %c44 = arith.constant 44 : index
    %589 = memref.load %arg6[%c44] : memref<98xf32, #tpu.memory_space<smem>>
    %590 = vector.extract_strided_slice %21 {offsets = [0, 95], sizes = [1, 929], strides = [1, 1]} : vector<1x1024xf32> to vector<1x929xf32>
    %591 = vector.extract_strided_slice %21 {offsets = [0, 0], sizes = [1, 95], strides = [1, 1]} : vector<1x1024xf32> to vector<1x95xf32>
    %592 = tpu.concatenate %590, %591 in 1 : vector<1x929xf32>, vector<1x95xf32> -> vector<1x1024xf32>
    %593 = arith.andi %150, %51 : vector<1x1024xi1>
    %cst_110 = arith.constant 0.000000e+00 : f32
    %594 = vector.broadcast %cst_110 : f32 to vector<1x1024xf32>
    %595 = arith.select %593, %592, %594 : vector<1x1024xi1>, vector<1x1024xf32>
    %596 = vector.broadcast %589 : f32 to vector<1x1024xf32>
    %597 = arith.mulf %596, %595 : vector<1x1024xf32>
    %598 = arith.addf %588, %597 : vector<1x1024xf32>
    %c45 = arith.constant 45 : index
    %599 = memref.load %arg6[%c45] : memref<98xf32, #tpu.memory_space<smem>>
    %600 = vector.extract_strided_slice %21 {offsets = [0, 96], sizes = [1, 928], strides = [1, 1]} : vector<1x1024xf32> to vector<1x928xf32>
    %601 = vector.extract_strided_slice %21 {offsets = [0, 0], sizes = [1, 96], strides = [1, 1]} : vector<1x1024xf32> to vector<1x96xf32>
    %602 = tpu.concatenate %600, %601 in 1 : vector<1x928xf32>, vector<1x96xf32> -> vector<1x1024xf32>
    %603 = arith.andi %150, %60 : vector<1x1024xi1>
    %cst_111 = arith.constant 0.000000e+00 : f32
    %604 = vector.broadcast %cst_111 : f32 to vector<1x1024xf32>
    %605 = arith.select %603, %602, %604 : vector<1x1024xi1>, vector<1x1024xf32>
    %606 = vector.broadcast %599 : f32 to vector<1x1024xf32>
    %607 = arith.mulf %606, %605 : vector<1x1024xf32>
    %608 = arith.addf %598, %607 : vector<1x1024xf32>
    %c46 = arith.constant 46 : index
    %609 = memref.load %arg6[%c46] : memref<98xf32, #tpu.memory_space<smem>>
    %610 = vector.extract_strided_slice %21 {offsets = [0, 97], sizes = [1, 927], strides = [1, 1]} : vector<1x1024xf32> to vector<1x927xf32>
    %611 = vector.extract_strided_slice %21 {offsets = [0, 0], sizes = [1, 97], strides = [1, 1]} : vector<1x1024xf32> to vector<1x97xf32>
    %612 = tpu.concatenate %610, %611 in 1 : vector<1x927xf32>, vector<1x97xf32> -> vector<1x1024xf32>
    %613 = arith.andi %150, %69 : vector<1x1024xi1>
    %cst_112 = arith.constant 0.000000e+00 : f32
    %614 = vector.broadcast %cst_112 : f32 to vector<1x1024xf32>
    %615 = arith.select %613, %612, %614 : vector<1x1024xi1>, vector<1x1024xf32>
    %616 = vector.broadcast %609 : f32 to vector<1x1024xf32>
    %617 = arith.mulf %616, %615 : vector<1x1024xf32>
    %618 = arith.addf %608, %617 : vector<1x1024xf32>
    %c47 = arith.constant 47 : index
    %619 = memref.load %arg6[%c47] : memref<98xf32, #tpu.memory_space<smem>>
    %620 = vector.extract_strided_slice %21 {offsets = [0, 98], sizes = [1, 926], strides = [1, 1]} : vector<1x1024xf32> to vector<1x926xf32>
    %621 = vector.extract_strided_slice %21 {offsets = [0, 0], sizes = [1, 98], strides = [1, 1]} : vector<1x1024xf32> to vector<1x98xf32>
    %622 = tpu.concatenate %620, %621 in 1 : vector<1x926xf32>, vector<1x98xf32> -> vector<1x1024xf32>
    %623 = arith.andi %150, %78 : vector<1x1024xi1>
    %cst_113 = arith.constant 0.000000e+00 : f32
    %624 = vector.broadcast %cst_113 : f32 to vector<1x1024xf32>
    %625 = arith.select %623, %622, %624 : vector<1x1024xi1>, vector<1x1024xf32>
    %626 = vector.broadcast %619 : f32 to vector<1x1024xf32>
    %627 = arith.mulf %626, %625 : vector<1x1024xf32>
    %628 = arith.addf %618, %627 : vector<1x1024xf32>
    %c48 = arith.constant 48 : index
    %629 = memref.load %arg6[%c48] : memref<98xf32, #tpu.memory_space<smem>>
    %630 = vector.extract_strided_slice %21 {offsets = [0, 99], sizes = [1, 925], strides = [1, 1]} : vector<1x1024xf32> to vector<1x925xf32>
    %631 = vector.extract_strided_slice %21 {offsets = [0, 0], sizes = [1, 99], strides = [1, 1]} : vector<1x1024xf32> to vector<1x99xf32>
    %632 = tpu.concatenate %630, %631 in 1 : vector<1x925xf32>, vector<1x99xf32> -> vector<1x1024xf32>
    %633 = arith.andi %150, %87 : vector<1x1024xi1>
    %cst_114 = arith.constant 0.000000e+00 : f32
    %634 = vector.broadcast %cst_114 : f32 to vector<1x1024xf32>
    %635 = arith.select %633, %632, %634 : vector<1x1024xi1>, vector<1x1024xf32>
    %636 = vector.broadcast %629 : f32 to vector<1x1024xf32>
    %637 = arith.mulf %636, %635 : vector<1x1024xf32>
    %638 = arith.addf %628, %637 : vector<1x1024xf32>
    %c49 = arith.constant 49 : index
    %639 = memref.load %arg6[%c49] : memref<98xf32, #tpu.memory_space<smem>>
    %640 = vector.extract_strided_slice %22 {offsets = [0, 925], sizes = [1, 99], strides = [1, 1]} : vector<1x1024xf32> to vector<1x99xf32>
    %641 = vector.extract_strided_slice %22 {offsets = [0, 0], sizes = [1, 925], strides = [1, 1]} : vector<1x1024xf32> to vector<1x925xf32>
    %642 = tpu.concatenate %640, %641 in 1 : vector<1x99xf32>, vector<1x925xf32> -> vector<1x1024xf32>
    %643 = arith.andi %96, %33 : vector<1x1024xi1>
    %cst_115 = arith.constant 0.000000e+00 : f32
    %644 = vector.broadcast %cst_115 : f32 to vector<1x1024xf32>
    %645 = arith.select %643, %642, %644 : vector<1x1024xi1>, vector<1x1024xf32>
    %646 = vector.broadcast %639 : f32 to vector<1x1024xf32>
    %647 = arith.mulf %646, %645 : vector<1x1024xf32>
    %648 = arith.addf %638, %647 : vector<1x1024xf32>
    %c50 = arith.constant 50 : index
    %649 = memref.load %arg6[%c50] : memref<98xf32, #tpu.memory_space<smem>>
    %650 = vector.extract_strided_slice %22 {offsets = [0, 926], sizes = [1, 98], strides = [1, 1]} : vector<1x1024xf32> to vector<1x98xf32>
    %651 = vector.extract_strided_slice %22 {offsets = [0, 0], sizes = [1, 926], strides = [1, 1]} : vector<1x1024xf32> to vector<1x926xf32>
    %652 = tpu.concatenate %650, %651 in 1 : vector<1x98xf32>, vector<1x926xf32> -> vector<1x1024xf32>
    %653 = arith.andi %96, %42 : vector<1x1024xi1>
    %cst_116 = arith.constant 0.000000e+00 : f32
    %654 = vector.broadcast %cst_116 : f32 to vector<1x1024xf32>
    %655 = arith.select %653, %652, %654 : vector<1x1024xi1>, vector<1x1024xf32>
    %656 = vector.broadcast %649 : f32 to vector<1x1024xf32>
    %657 = arith.mulf %656, %655 : vector<1x1024xf32>
    %658 = arith.addf %648, %657 : vector<1x1024xf32>
    %c51 = arith.constant 51 : index
    %659 = memref.load %arg6[%c51] : memref<98xf32, #tpu.memory_space<smem>>
    %660 = vector.extract_strided_slice %22 {offsets = [0, 927], sizes = [1, 97], strides = [1, 1]} : vector<1x1024xf32> to vector<1x97xf32>
    %661 = vector.extract_strided_slice %22 {offsets = [0, 0], sizes = [1, 927], strides = [1, 1]} : vector<1x1024xf32> to vector<1x927xf32>
    %662 = tpu.concatenate %660, %661 in 1 : vector<1x97xf32>, vector<1x927xf32> -> vector<1x1024xf32>
    %663 = arith.andi %96, %51 : vector<1x1024xi1>
    %cst_117 = arith.constant 0.000000e+00 : f32
    %664 = vector.broadcast %cst_117 : f32 to vector<1x1024xf32>
    %665 = arith.select %663, %662, %664 : vector<1x1024xi1>, vector<1x1024xf32>
    %666 = vector.broadcast %659 : f32 to vector<1x1024xf32>
    %667 = arith.mulf %666, %665 : vector<1x1024xf32>
    %668 = arith.addf %658, %667 : vector<1x1024xf32>
    %c52 = arith.constant 52 : index
    %669 = memref.load %arg6[%c52] : memref<98xf32, #tpu.memory_space<smem>>
    %670 = vector.extract_strided_slice %22 {offsets = [0, 928], sizes = [1, 96], strides = [1, 1]} : vector<1x1024xf32> to vector<1x96xf32>
    %671 = vector.extract_strided_slice %22 {offsets = [0, 0], sizes = [1, 928], strides = [1, 1]} : vector<1x1024xf32> to vector<1x928xf32>
    %672 = tpu.concatenate %670, %671 in 1 : vector<1x96xf32>, vector<1x928xf32> -> vector<1x1024xf32>
    %673 = arith.andi %96, %60 : vector<1x1024xi1>
    %cst_118 = arith.constant 0.000000e+00 : f32
    %674 = vector.broadcast %cst_118 : f32 to vector<1x1024xf32>
    %675 = arith.select %673, %672, %674 : vector<1x1024xi1>, vector<1x1024xf32>
    %676 = vector.broadcast %669 : f32 to vector<1x1024xf32>
    %677 = arith.mulf %676, %675 : vector<1x1024xf32>
    %678 = arith.addf %668, %677 : vector<1x1024xf32>
    %c53 = arith.constant 53 : index
    %679 = memref.load %arg6[%c53] : memref<98xf32, #tpu.memory_space<smem>>
    %680 = vector.extract_strided_slice %22 {offsets = [0, 929], sizes = [1, 95], strides = [1, 1]} : vector<1x1024xf32> to vector<1x95xf32>
    %681 = vector.extract_strided_slice %22 {offsets = [0, 0], sizes = [1, 929], strides = [1, 1]} : vector<1x1024xf32> to vector<1x929xf32>
    %682 = tpu.concatenate %680, %681 in 1 : vector<1x95xf32>, vector<1x929xf32> -> vector<1x1024xf32>
    %683 = arith.andi %96, %69 : vector<1x1024xi1>
    %cst_119 = arith.constant 0.000000e+00 : f32
    %684 = vector.broadcast %cst_119 : f32 to vector<1x1024xf32>
    %685 = arith.select %683, %682, %684 : vector<1x1024xi1>, vector<1x1024xf32>
    %686 = vector.broadcast %679 : f32 to vector<1x1024xf32>
    %687 = arith.mulf %686, %685 : vector<1x1024xf32>
    %688 = arith.addf %678, %687 : vector<1x1024xf32>
    %c54 = arith.constant 54 : index
    %689 = memref.load %arg6[%c54] : memref<98xf32, #tpu.memory_space<smem>>
    %690 = vector.extract_strided_slice %22 {offsets = [0, 930], sizes = [1, 94], strides = [1, 1]} : vector<1x1024xf32> to vector<1x94xf32>
    %691 = vector.extract_strided_slice %22 {offsets = [0, 0], sizes = [1, 930], strides = [1, 1]} : vector<1x1024xf32> to vector<1x930xf32>
    %692 = tpu.concatenate %690, %691 in 1 : vector<1x94xf32>, vector<1x930xf32> -> vector<1x1024xf32>
    %693 = arith.andi %96, %78 : vector<1x1024xi1>
    %cst_120 = arith.constant 0.000000e+00 : f32
    %694 = vector.broadcast %cst_120 : f32 to vector<1x1024xf32>
    %695 = arith.select %693, %692, %694 : vector<1x1024xi1>, vector<1x1024xf32>
    %696 = vector.broadcast %689 : f32 to vector<1x1024xf32>
    %697 = arith.mulf %696, %695 : vector<1x1024xf32>
    %698 = arith.addf %688, %697 : vector<1x1024xf32>
    %c55 = arith.constant 55 : index
    %699 = memref.load %arg6[%c55] : memref<98xf32, #tpu.memory_space<smem>>
    %700 = vector.extract_strided_slice %22 {offsets = [0, 931], sizes = [1, 93], strides = [1, 1]} : vector<1x1024xf32> to vector<1x93xf32>
    %701 = vector.extract_strided_slice %22 {offsets = [0, 0], sizes = [1, 931], strides = [1, 1]} : vector<1x1024xf32> to vector<1x931xf32>
    %702 = tpu.concatenate %700, %701 in 1 : vector<1x93xf32>, vector<1x931xf32> -> vector<1x1024xf32>
    %703 = arith.andi %96, %87 : vector<1x1024xi1>
    %cst_121 = arith.constant 0.000000e+00 : f32
    %704 = vector.broadcast %cst_121 : f32 to vector<1x1024xf32>
    %705 = arith.select %703, %702, %704 : vector<1x1024xi1>, vector<1x1024xf32>
    %706 = vector.broadcast %699 : f32 to vector<1x1024xf32>
    %707 = arith.mulf %706, %705 : vector<1x1024xf32>
    %708 = arith.addf %698, %707 : vector<1x1024xf32>
    %c56 = arith.constant 56 : index
    %709 = memref.load %arg6[%c56] : memref<98xf32, #tpu.memory_space<smem>>
    %710 = vector.extract_strided_slice %22 {offsets = [0, 957], sizes = [1, 67], strides = [1, 1]} : vector<1x1024xf32> to vector<1x67xf32>
    %711 = vector.extract_strided_slice %22 {offsets = [0, 0], sizes = [1, 957], strides = [1, 1]} : vector<1x1024xf32> to vector<1x957xf32>
    %712 = tpu.concatenate %710, %711 in 1 : vector<1x67xf32>, vector<1x957xf32> -> vector<1x1024xf32>
    %713 = arith.andi %105, %33 : vector<1x1024xi1>
    %cst_122 = arith.constant 0.000000e+00 : f32
    %714 = vector.broadcast %cst_122 : f32 to vector<1x1024xf32>
    %715 = arith.select %713, %712, %714 : vector<1x1024xi1>, vector<1x1024xf32>
    %716 = vector.broadcast %709 : f32 to vector<1x1024xf32>
    %717 = arith.mulf %716, %715 : vector<1x1024xf32>
    %718 = arith.addf %708, %717 : vector<1x1024xf32>
    %c57 = arith.constant 57 : index
    %719 = memref.load %arg6[%c57] : memref<98xf32, #tpu.memory_space<smem>>
    %720 = vector.extract_strided_slice %22 {offsets = [0, 958], sizes = [1, 66], strides = [1, 1]} : vector<1x1024xf32> to vector<1x66xf32>
    %721 = vector.extract_strided_slice %22 {offsets = [0, 0], sizes = [1, 958], strides = [1, 1]} : vector<1x1024xf32> to vector<1x958xf32>
    %722 = tpu.concatenate %720, %721 in 1 : vector<1x66xf32>, vector<1x958xf32> -> vector<1x1024xf32>
    %723 = arith.andi %105, %42 : vector<1x1024xi1>
    %cst_123 = arith.constant 0.000000e+00 : f32
    %724 = vector.broadcast %cst_123 : f32 to vector<1x1024xf32>
    %725 = arith.select %723, %722, %724 : vector<1x1024xi1>, vector<1x1024xf32>
    %726 = vector.broadcast %719 : f32 to vector<1x1024xf32>
    %727 = arith.mulf %726, %725 : vector<1x1024xf32>
    %728 = arith.addf %718, %727 : vector<1x1024xf32>
    %c58 = arith.constant 58 : index
    %729 = memref.load %arg6[%c58] : memref<98xf32, #tpu.memory_space<smem>>
    %730 = vector.extract_strided_slice %22 {offsets = [0, 959], sizes = [1, 65], strides = [1, 1]} : vector<1x1024xf32> to vector<1x65xf32>
    %731 = vector.extract_strided_slice %22 {offsets = [0, 0], sizes = [1, 959], strides = [1, 1]} : vector<1x1024xf32> to vector<1x959xf32>
    %732 = tpu.concatenate %730, %731 in 1 : vector<1x65xf32>, vector<1x959xf32> -> vector<1x1024xf32>
    %733 = arith.andi %105, %51 : vector<1x1024xi1>
    %cst_124 = arith.constant 0.000000e+00 : f32
    %734 = vector.broadcast %cst_124 : f32 to vector<1x1024xf32>
    %735 = arith.select %733, %732, %734 : vector<1x1024xi1>, vector<1x1024xf32>
    %736 = vector.broadcast %729 : f32 to vector<1x1024xf32>
    %737 = arith.mulf %736, %735 : vector<1x1024xf32>
    %738 = arith.addf %728, %737 : vector<1x1024xf32>
    %c59 = arith.constant 59 : index
    %739 = memref.load %arg6[%c59] : memref<98xf32, #tpu.memory_space<smem>>
    %740 = vector.extract_strided_slice %22 {offsets = [0, 960], sizes = [1, 64], strides = [1, 1]} : vector<1x1024xf32> to vector<1x64xf32>
    %741 = vector.extract_strided_slice %22 {offsets = [0, 0], sizes = [1, 960], strides = [1, 1]} : vector<1x1024xf32> to vector<1x960xf32>
    %742 = tpu.concatenate %740, %741 in 1 : vector<1x64xf32>, vector<1x960xf32> -> vector<1x1024xf32>
    %743 = arith.andi %105, %60 : vector<1x1024xi1>
    %cst_125 = arith.constant 0.000000e+00 : f32
    %744 = vector.broadcast %cst_125 : f32 to vector<1x1024xf32>
    %745 = arith.select %743, %742, %744 : vector<1x1024xi1>, vector<1x1024xf32>
    %746 = vector.broadcast %739 : f32 to vector<1x1024xf32>
    %747 = arith.mulf %746, %745 : vector<1x1024xf32>
    %748 = arith.addf %738, %747 : vector<1x1024xf32>
    %c60 = arith.constant 60 : index
    %749 = memref.load %arg6[%c60] : memref<98xf32, #tpu.memory_space<smem>>
    %750 = vector.extract_strided_slice %22 {offsets = [0, 961], sizes = [1, 63], strides = [1, 1]} : vector<1x1024xf32> to vector<1x63xf32>
    %751 = vector.extract_strided_slice %22 {offsets = [0, 0], sizes = [1, 961], strides = [1, 1]} : vector<1x1024xf32> to vector<1x961xf32>
    %752 = tpu.concatenate %750, %751 in 1 : vector<1x63xf32>, vector<1x961xf32> -> vector<1x1024xf32>
    %753 = arith.andi %105, %69 : vector<1x1024xi1>
    %cst_126 = arith.constant 0.000000e+00 : f32
    %754 = vector.broadcast %cst_126 : f32 to vector<1x1024xf32>
    %755 = arith.select %753, %752, %754 : vector<1x1024xi1>, vector<1x1024xf32>
    %756 = vector.broadcast %749 : f32 to vector<1x1024xf32>
    %757 = arith.mulf %756, %755 : vector<1x1024xf32>
    %758 = arith.addf %748, %757 : vector<1x1024xf32>
    %c61 = arith.constant 61 : index
    %759 = memref.load %arg6[%c61] : memref<98xf32, #tpu.memory_space<smem>>
    %760 = vector.extract_strided_slice %22 {offsets = [0, 962], sizes = [1, 62], strides = [1, 1]} : vector<1x1024xf32> to vector<1x62xf32>
    %761 = vector.extract_strided_slice %22 {offsets = [0, 0], sizes = [1, 962], strides = [1, 1]} : vector<1x1024xf32> to vector<1x962xf32>
    %762 = tpu.concatenate %760, %761 in 1 : vector<1x62xf32>, vector<1x962xf32> -> vector<1x1024xf32>
    %763 = arith.andi %105, %78 : vector<1x1024xi1>
    %cst_127 = arith.constant 0.000000e+00 : f32
    %764 = vector.broadcast %cst_127 : f32 to vector<1x1024xf32>
    %765 = arith.select %763, %762, %764 : vector<1x1024xi1>, vector<1x1024xf32>
    %766 = vector.broadcast %759 : f32 to vector<1x1024xf32>
    %767 = arith.mulf %766, %765 : vector<1x1024xf32>
    %768 = arith.addf %758, %767 : vector<1x1024xf32>
    %c62 = arith.constant 62 : index
    %769 = memref.load %arg6[%c62] : memref<98xf32, #tpu.memory_space<smem>>
    %770 = vector.extract_strided_slice %22 {offsets = [0, 963], sizes = [1, 61], strides = [1, 1]} : vector<1x1024xf32> to vector<1x61xf32>
    %771 = vector.extract_strided_slice %22 {offsets = [0, 0], sizes = [1, 963], strides = [1, 1]} : vector<1x1024xf32> to vector<1x963xf32>
    %772 = tpu.concatenate %770, %771 in 1 : vector<1x61xf32>, vector<1x963xf32> -> vector<1x1024xf32>
    %773 = arith.andi %105, %87 : vector<1x1024xi1>
    %cst_128 = arith.constant 0.000000e+00 : f32
    %774 = vector.broadcast %cst_128 : f32 to vector<1x1024xf32>
    %775 = arith.select %773, %772, %774 : vector<1x1024xi1>, vector<1x1024xf32>
    %776 = vector.broadcast %769 : f32 to vector<1x1024xf32>
    %777 = arith.mulf %776, %775 : vector<1x1024xf32>
    %778 = arith.addf %768, %777 : vector<1x1024xf32>
    %c63 = arith.constant 63 : index
    %779 = memref.load %arg6[%c63] : memref<98xf32, #tpu.memory_space<smem>>
    %780 = vector.extract_strided_slice %22 {offsets = [0, 989], sizes = [1, 35], strides = [1, 1]} : vector<1x1024xf32> to vector<1x35xf32>
    %781 = vector.extract_strided_slice %22 {offsets = [0, 0], sizes = [1, 989], strides = [1, 1]} : vector<1x1024xf32> to vector<1x989xf32>
    %782 = tpu.concatenate %780, %781 in 1 : vector<1x35xf32>, vector<1x989xf32> -> vector<1x1024xf32>
    %783 = arith.andi %114, %33 : vector<1x1024xi1>
    %cst_129 = arith.constant 0.000000e+00 : f32
    %784 = vector.broadcast %cst_129 : f32 to vector<1x1024xf32>
    %785 = arith.select %783, %782, %784 : vector<1x1024xi1>, vector<1x1024xf32>
    %786 = vector.broadcast %779 : f32 to vector<1x1024xf32>
    %787 = arith.mulf %786, %785 : vector<1x1024xf32>
    %788 = arith.addf %778, %787 : vector<1x1024xf32>
    %c64 = arith.constant 64 : index
    %789 = memref.load %arg6[%c64] : memref<98xf32, #tpu.memory_space<smem>>
    %790 = vector.extract_strided_slice %22 {offsets = [0, 990], sizes = [1, 34], strides = [1, 1]} : vector<1x1024xf32> to vector<1x34xf32>
    %791 = vector.extract_strided_slice %22 {offsets = [0, 0], sizes = [1, 990], strides = [1, 1]} : vector<1x1024xf32> to vector<1x990xf32>
    %792 = tpu.concatenate %790, %791 in 1 : vector<1x34xf32>, vector<1x990xf32> -> vector<1x1024xf32>
    %793 = arith.andi %114, %42 : vector<1x1024xi1>
    %cst_130 = arith.constant 0.000000e+00 : f32
    %794 = vector.broadcast %cst_130 : f32 to vector<1x1024xf32>
    %795 = arith.select %793, %792, %794 : vector<1x1024xi1>, vector<1x1024xf32>
    %796 = vector.broadcast %789 : f32 to vector<1x1024xf32>
    %797 = arith.mulf %796, %795 : vector<1x1024xf32>
    %798 = arith.addf %788, %797 : vector<1x1024xf32>
    %c65 = arith.constant 65 : index
    %799 = memref.load %arg6[%c65] : memref<98xf32, #tpu.memory_space<smem>>
    %800 = vector.extract_strided_slice %22 {offsets = [0, 991], sizes = [1, 33], strides = [1, 1]} : vector<1x1024xf32> to vector<1x33xf32>
    %801 = vector.extract_strided_slice %22 {offsets = [0, 0], sizes = [1, 991], strides = [1, 1]} : vector<1x1024xf32> to vector<1x991xf32>
    %802 = tpu.concatenate %800, %801 in 1 : vector<1x33xf32>, vector<1x991xf32> -> vector<1x1024xf32>
    %803 = arith.andi %114, %51 : vector<1x1024xi1>
    %cst_131 = arith.constant 0.000000e+00 : f32
    %804 = vector.broadcast %cst_131 : f32 to vector<1x1024xf32>
    %805 = arith.select %803, %802, %804 : vector<1x1024xi1>, vector<1x1024xf32>
    %806 = vector.broadcast %799 : f32 to vector<1x1024xf32>
    %807 = arith.mulf %806, %805 : vector<1x1024xf32>
    %808 = arith.addf %798, %807 : vector<1x1024xf32>
    %c66 = arith.constant 66 : index
    %809 = memref.load %arg6[%c66] : memref<98xf32, #tpu.memory_space<smem>>
    %810 = vector.extract_strided_slice %22 {offsets = [0, 992], sizes = [1, 32], strides = [1, 1]} : vector<1x1024xf32> to vector<1x32xf32>
    %811 = vector.extract_strided_slice %22 {offsets = [0, 0], sizes = [1, 992], strides = [1, 1]} : vector<1x1024xf32> to vector<1x992xf32>
    %812 = tpu.concatenate %810, %811 in 1 : vector<1x32xf32>, vector<1x992xf32> -> vector<1x1024xf32>
    %813 = arith.andi %114, %60 : vector<1x1024xi1>
    %cst_132 = arith.constant 0.000000e+00 : f32
    %814 = vector.broadcast %cst_132 : f32 to vector<1x1024xf32>
    %815 = arith.select %813, %812, %814 : vector<1x1024xi1>, vector<1x1024xf32>
    %816 = vector.broadcast %809 : f32 to vector<1x1024xf32>
    %817 = arith.mulf %816, %815 : vector<1x1024xf32>
    %818 = arith.addf %808, %817 : vector<1x1024xf32>
    %c67 = arith.constant 67 : index
    %819 = memref.load %arg6[%c67] : memref<98xf32, #tpu.memory_space<smem>>
    %820 = vector.extract_strided_slice %22 {offsets = [0, 993], sizes = [1, 31], strides = [1, 1]} : vector<1x1024xf32> to vector<1x31xf32>
    %821 = vector.extract_strided_slice %22 {offsets = [0, 0], sizes = [1, 993], strides = [1, 1]} : vector<1x1024xf32> to vector<1x993xf32>
    %822 = tpu.concatenate %820, %821 in 1 : vector<1x31xf32>, vector<1x993xf32> -> vector<1x1024xf32>
    %823 = arith.andi %114, %69 : vector<1x1024xi1>
    %cst_133 = arith.constant 0.000000e+00 : f32
    %824 = vector.broadcast %cst_133 : f32 to vector<1x1024xf32>
    %825 = arith.select %823, %822, %824 : vector<1x1024xi1>, vector<1x1024xf32>
    %826 = vector.broadcast %819 : f32 to vector<1x1024xf32>
    %827 = arith.mulf %826, %825 : vector<1x1024xf32>
    %828 = arith.addf %818, %827 : vector<1x1024xf32>
    %c68 = arith.constant 68 : index
    %829 = memref.load %arg6[%c68] : memref<98xf32, #tpu.memory_space<smem>>
    %830 = vector.extract_strided_slice %22 {offsets = [0, 994], sizes = [1, 30], strides = [1, 1]} : vector<1x1024xf32> to vector<1x30xf32>
    %831 = vector.extract_strided_slice %22 {offsets = [0, 0], sizes = [1, 994], strides = [1, 1]} : vector<1x1024xf32> to vector<1x994xf32>
    %832 = tpu.concatenate %830, %831 in 1 : vector<1x30xf32>, vector<1x994xf32> -> vector<1x1024xf32>
    %833 = arith.andi %114, %78 : vector<1x1024xi1>
    %cst_134 = arith.constant 0.000000e+00 : f32
    %834 = vector.broadcast %cst_134 : f32 to vector<1x1024xf32>
    %835 = arith.select %833, %832, %834 : vector<1x1024xi1>, vector<1x1024xf32>
    %836 = vector.broadcast %829 : f32 to vector<1x1024xf32>
    %837 = arith.mulf %836, %835 : vector<1x1024xf32>
    %838 = arith.addf %828, %837 : vector<1x1024xf32>
    %c69 = arith.constant 69 : index
    %839 = memref.load %arg6[%c69] : memref<98xf32, #tpu.memory_space<smem>>
    %840 = vector.extract_strided_slice %22 {offsets = [0, 995], sizes = [1, 29], strides = [1, 1]} : vector<1x1024xf32> to vector<1x29xf32>
    %841 = vector.extract_strided_slice %22 {offsets = [0, 0], sizes = [1, 995], strides = [1, 1]} : vector<1x1024xf32> to vector<1x995xf32>
    %842 = tpu.concatenate %840, %841 in 1 : vector<1x29xf32>, vector<1x995xf32> -> vector<1x1024xf32>
    %843 = arith.andi %114, %87 : vector<1x1024xi1>
    %cst_135 = arith.constant 0.000000e+00 : f32
    %844 = vector.broadcast %cst_135 : f32 to vector<1x1024xf32>
    %845 = arith.select %843, %842, %844 : vector<1x1024xi1>, vector<1x1024xf32>
    %846 = vector.broadcast %839 : f32 to vector<1x1024xf32>
    %847 = arith.mulf %846, %845 : vector<1x1024xf32>
    %848 = arith.addf %838, %847 : vector<1x1024xf32>
    %c70 = arith.constant 70 : index
    %849 = memref.load %arg6[%c70] : memref<98xf32, #tpu.memory_space<smem>>
    %850 = vector.extract_strided_slice %22 {offsets = [0, 1021], sizes = [1, 3], strides = [1, 1]} : vector<1x1024xf32> to vector<1x3xf32>
    %851 = vector.extract_strided_slice %22 {offsets = [0, 0], sizes = [1, 1021], strides = [1, 1]} : vector<1x1024xf32> to vector<1x1021xf32>
    %852 = tpu.concatenate %850, %851 in 1 : vector<1x3xf32>, vector<1x1021xf32> -> vector<1x1024xf32>
    %853 = arith.andi %123, %33 : vector<1x1024xi1>
    %cst_136 = arith.constant 0.000000e+00 : f32
    %854 = vector.broadcast %cst_136 : f32 to vector<1x1024xf32>
    %855 = arith.select %853, %852, %854 : vector<1x1024xi1>, vector<1x1024xf32>
    %856 = vector.broadcast %849 : f32 to vector<1x1024xf32>
    %857 = arith.mulf %856, %855 : vector<1x1024xf32>
    %858 = arith.addf %848, %857 : vector<1x1024xf32>
    %c71 = arith.constant 71 : index
    %859 = memref.load %arg6[%c71] : memref<98xf32, #tpu.memory_space<smem>>
    %860 = vector.extract_strided_slice %22 {offsets = [0, 1022], sizes = [1, 2], strides = [1, 1]} : vector<1x1024xf32> to vector<1x2xf32>
    %861 = vector.extract_strided_slice %22 {offsets = [0, 0], sizes = [1, 1022], strides = [1, 1]} : vector<1x1024xf32> to vector<1x1022xf32>
    %862 = tpu.concatenate %860, %861 in 1 : vector<1x2xf32>, vector<1x1022xf32> -> vector<1x1024xf32>
    %863 = arith.andi %123, %42 : vector<1x1024xi1>
    %cst_137 = arith.constant 0.000000e+00 : f32
    %864 = vector.broadcast %cst_137 : f32 to vector<1x1024xf32>
    %865 = arith.select %863, %862, %864 : vector<1x1024xi1>, vector<1x1024xf32>
    %866 = vector.broadcast %859 : f32 to vector<1x1024xf32>
    %867 = arith.mulf %866, %865 : vector<1x1024xf32>
    %868 = arith.addf %858, %867 : vector<1x1024xf32>
    %c72 = arith.constant 72 : index
    %869 = memref.load %arg6[%c72] : memref<98xf32, #tpu.memory_space<smem>>
    %870 = vector.extract_strided_slice %22 {offsets = [0, 1023], sizes = [1, 1], strides = [1, 1]} : vector<1x1024xf32> to vector<1x1xf32>
    %871 = vector.extract_strided_slice %22 {offsets = [0, 0], sizes = [1, 1023], strides = [1, 1]} : vector<1x1024xf32> to vector<1x1023xf32>
    %872 = tpu.concatenate %870, %871 in 1 : vector<1x1xf32>, vector<1x1023xf32> -> vector<1x1024xf32>
    %873 = arith.andi %123, %51 : vector<1x1024xi1>
    %cst_138 = arith.constant 0.000000e+00 : f32
    %874 = vector.broadcast %cst_138 : f32 to vector<1x1024xf32>
    %875 = arith.select %873, %872, %874 : vector<1x1024xi1>, vector<1x1024xf32>
    %876 = vector.broadcast %869 : f32 to vector<1x1024xf32>
    %877 = arith.mulf %876, %875 : vector<1x1024xf32>
    %878 = arith.addf %868, %877 : vector<1x1024xf32>
    %c73 = arith.constant 73 : index
    %879 = memref.load %arg6[%c73] : memref<98xf32, #tpu.memory_space<smem>>
    %880 = arith.andi %123, %60 : vector<1x1024xi1>
    %cst_139 = arith.constant 0.000000e+00 : f32
    %881 = vector.broadcast %cst_139 : f32 to vector<1x1024xf32>
    %882 = arith.select %880, %22, %881 : vector<1x1024xi1>, vector<1x1024xf32>
    %883 = vector.broadcast %879 : f32 to vector<1x1024xf32>
    %884 = arith.mulf %883, %882 : vector<1x1024xf32>
    %885 = arith.addf %878, %884 : vector<1x1024xf32>
    %c74 = arith.constant 74 : index
    %886 = memref.load %arg6[%c74] : memref<98xf32, #tpu.memory_space<smem>>
    %887 = vector.extract_strided_slice %22 {offsets = [0, 1], sizes = [1, 1023], strides = [1, 1]} : vector<1x1024xf32> to vector<1x1023xf32>
    %888 = vector.extract_strided_slice %22 {offsets = [0, 0], sizes = [1, 1], strides = [1, 1]} : vector<1x1024xf32> to vector<1x1xf32>
    %889 = tpu.concatenate %887, %888 in 1 : vector<1x1023xf32>, vector<1x1xf32> -> vector<1x1024xf32>
    %890 = arith.andi %123, %69 : vector<1x1024xi1>
    %cst_140 = arith.constant 0.000000e+00 : f32
    %891 = vector.broadcast %cst_140 : f32 to vector<1x1024xf32>
    %892 = arith.select %890, %889, %891 : vector<1x1024xi1>, vector<1x1024xf32>
    %893 = vector.broadcast %886 : f32 to vector<1x1024xf32>
    %894 = arith.mulf %893, %892 : vector<1x1024xf32>
    %895 = arith.addf %885, %894 : vector<1x1024xf32>
    %c75 = arith.constant 75 : index
    %896 = memref.load %arg6[%c75] : memref<98xf32, #tpu.memory_space<smem>>
    %897 = vector.extract_strided_slice %22 {offsets = [0, 2], sizes = [1, 1022], strides = [1, 1]} : vector<1x1024xf32> to vector<1x1022xf32>
    %898 = vector.extract_strided_slice %22 {offsets = [0, 0], sizes = [1, 2], strides = [1, 1]} : vector<1x1024xf32> to vector<1x2xf32>
    %899 = tpu.concatenate %897, %898 in 1 : vector<1x1022xf32>, vector<1x2xf32> -> vector<1x1024xf32>
    %900 = arith.andi %123, %78 : vector<1x1024xi1>
    %cst_141 = arith.constant 0.000000e+00 : f32
    %901 = vector.broadcast %cst_141 : f32 to vector<1x1024xf32>
    %902 = arith.select %900, %899, %901 : vector<1x1024xi1>, vector<1x1024xf32>
    %903 = vector.broadcast %896 : f32 to vector<1x1024xf32>
    %904 = arith.mulf %903, %902 : vector<1x1024xf32>
    %905 = arith.addf %895, %904 : vector<1x1024xf32>
    %c76 = arith.constant 76 : index
    %906 = memref.load %arg6[%c76] : memref<98xf32, #tpu.memory_space<smem>>
    %907 = vector.extract_strided_slice %22 {offsets = [0, 3], sizes = [1, 1021], strides = [1, 1]} : vector<1x1024xf32> to vector<1x1021xf32>
    %908 = vector.extract_strided_slice %22 {offsets = [0, 0], sizes = [1, 3], strides = [1, 1]} : vector<1x1024xf32> to vector<1x3xf32>
    %909 = tpu.concatenate %907, %908 in 1 : vector<1x1021xf32>, vector<1x3xf32> -> vector<1x1024xf32>
    %910 = arith.andi %123, %87 : vector<1x1024xi1>
    %cst_142 = arith.constant 0.000000e+00 : f32
    %911 = vector.broadcast %cst_142 : f32 to vector<1x1024xf32>
    %912 = arith.select %910, %909, %911 : vector<1x1024xi1>, vector<1x1024xf32>
    %913 = vector.broadcast %906 : f32 to vector<1x1024xf32>
    %914 = arith.mulf %913, %912 : vector<1x1024xf32>
    %915 = arith.addf %905, %914 : vector<1x1024xf32>
    %c77 = arith.constant 77 : index
    %916 = memref.load %arg6[%c77] : memref<98xf32, #tpu.memory_space<smem>>
    %917 = vector.extract_strided_slice %22 {offsets = [0, 29], sizes = [1, 995], strides = [1, 1]} : vector<1x1024xf32> to vector<1x995xf32>
    %918 = vector.extract_strided_slice %22 {offsets = [0, 0], sizes = [1, 29], strides = [1, 1]} : vector<1x1024xf32> to vector<1x29xf32>
    %919 = tpu.concatenate %917, %918 in 1 : vector<1x995xf32>, vector<1x29xf32> -> vector<1x1024xf32>
    %920 = arith.andi %132, %33 : vector<1x1024xi1>
    %cst_143 = arith.constant 0.000000e+00 : f32
    %921 = vector.broadcast %cst_143 : f32 to vector<1x1024xf32>
    %922 = arith.select %920, %919, %921 : vector<1x1024xi1>, vector<1x1024xf32>
    %923 = vector.broadcast %916 : f32 to vector<1x1024xf32>
    %924 = arith.mulf %923, %922 : vector<1x1024xf32>
    %925 = arith.addf %915, %924 : vector<1x1024xf32>
    %c78 = arith.constant 78 : index
    %926 = memref.load %arg6[%c78] : memref<98xf32, #tpu.memory_space<smem>>
    %927 = vector.extract_strided_slice %22 {offsets = [0, 30], sizes = [1, 994], strides = [1, 1]} : vector<1x1024xf32> to vector<1x994xf32>
    %928 = vector.extract_strided_slice %22 {offsets = [0, 0], sizes = [1, 30], strides = [1, 1]} : vector<1x1024xf32> to vector<1x30xf32>
    %929 = tpu.concatenate %927, %928 in 1 : vector<1x994xf32>, vector<1x30xf32> -> vector<1x1024xf32>
    %930 = arith.andi %132, %42 : vector<1x1024xi1>
    %cst_144 = arith.constant 0.000000e+00 : f32
    %931 = vector.broadcast %cst_144 : f32 to vector<1x1024xf32>
    %932 = arith.select %930, %929, %931 : vector<1x1024xi1>, vector<1x1024xf32>
    %933 = vector.broadcast %926 : f32 to vector<1x1024xf32>
    %934 = arith.mulf %933, %932 : vector<1x1024xf32>
    %935 = arith.addf %925, %934 : vector<1x1024xf32>
    %c79 = arith.constant 79 : index
    %936 = memref.load %arg6[%c79] : memref<98xf32, #tpu.memory_space<smem>>
    %937 = vector.extract_strided_slice %22 {offsets = [0, 31], sizes = [1, 993], strides = [1, 1]} : vector<1x1024xf32> to vector<1x993xf32>
    %938 = vector.extract_strided_slice %22 {offsets = [0, 0], sizes = [1, 31], strides = [1, 1]} : vector<1x1024xf32> to vector<1x31xf32>
    %939 = tpu.concatenate %937, %938 in 1 : vector<1x993xf32>, vector<1x31xf32> -> vector<1x1024xf32>
    %940 = arith.andi %132, %51 : vector<1x1024xi1>
    %cst_145 = arith.constant 0.000000e+00 : f32
    %941 = vector.broadcast %cst_145 : f32 to vector<1x1024xf32>
    %942 = arith.select %940, %939, %941 : vector<1x1024xi1>, vector<1x1024xf32>
    %943 = vector.broadcast %936 : f32 to vector<1x1024xf32>
    %944 = arith.mulf %943, %942 : vector<1x1024xf32>
    %945 = arith.addf %935, %944 : vector<1x1024xf32>
    %c80 = arith.constant 80 : index
    %946 = memref.load %arg6[%c80] : memref<98xf32, #tpu.memory_space<smem>>
    %947 = vector.extract_strided_slice %22 {offsets = [0, 32], sizes = [1, 992], strides = [1, 1]} : vector<1x1024xf32> to vector<1x992xf32>
    %948 = vector.extract_strided_slice %22 {offsets = [0, 0], sizes = [1, 32], strides = [1, 1]} : vector<1x1024xf32> to vector<1x32xf32>
    %949 = tpu.concatenate %947, %948 in 1 : vector<1x992xf32>, vector<1x32xf32> -> vector<1x1024xf32>
    %950 = arith.andi %132, %60 : vector<1x1024xi1>
    %cst_146 = arith.constant 0.000000e+00 : f32
    %951 = vector.broadcast %cst_146 : f32 to vector<1x1024xf32>
    %952 = arith.select %950, %949, %951 : vector<1x1024xi1>, vector<1x1024xf32>
    %953 = vector.broadcast %946 : f32 to vector<1x1024xf32>
    %954 = arith.mulf %953, %952 : vector<1x1024xf32>
    %955 = arith.addf %945, %954 : vector<1x1024xf32>
    %c81 = arith.constant 81 : index
    %956 = memref.load %arg6[%c81] : memref<98xf32, #tpu.memory_space<smem>>
    %957 = vector.extract_strided_slice %22 {offsets = [0, 33], sizes = [1, 991], strides = [1, 1]} : vector<1x1024xf32> to vector<1x991xf32>
    %958 = vector.extract_strided_slice %22 {offsets = [0, 0], sizes = [1, 33], strides = [1, 1]} : vector<1x1024xf32> to vector<1x33xf32>
    %959 = tpu.concatenate %957, %958 in 1 : vector<1x991xf32>, vector<1x33xf32> -> vector<1x1024xf32>
    %960 = arith.andi %132, %69 : vector<1x1024xi1>
    %cst_147 = arith.constant 0.000000e+00 : f32
    %961 = vector.broadcast %cst_147 : f32 to vector<1x1024xf32>
    %962 = arith.select %960, %959, %961 : vector<1x1024xi1>, vector<1x1024xf32>
    %963 = vector.broadcast %956 : f32 to vector<1x1024xf32>
    %964 = arith.mulf %963, %962 : vector<1x1024xf32>
    %965 = arith.addf %955, %964 : vector<1x1024xf32>
    %c82 = arith.constant 82 : index
    %966 = memref.load %arg6[%c82] : memref<98xf32, #tpu.memory_space<smem>>
    %967 = vector.extract_strided_slice %22 {offsets = [0, 34], sizes = [1, 990], strides = [1, 1]} : vector<1x1024xf32> to vector<1x990xf32>
    %968 = vector.extract_strided_slice %22 {offsets = [0, 0], sizes = [1, 34], strides = [1, 1]} : vector<1x1024xf32> to vector<1x34xf32>
    %969 = tpu.concatenate %967, %968 in 1 : vector<1x990xf32>, vector<1x34xf32> -> vector<1x1024xf32>
    %970 = arith.andi %132, %78 : vector<1x1024xi1>
    %cst_148 = arith.constant 0.000000e+00 : f32
    %971 = vector.broadcast %cst_148 : f32 to vector<1x1024xf32>
    %972 = arith.select %970, %969, %971 : vector<1x1024xi1>, vector<1x1024xf32>
    %973 = vector.broadcast %966 : f32 to vector<1x1024xf32>
    %974 = arith.mulf %973, %972 : vector<1x1024xf32>
    %975 = arith.addf %965, %974 : vector<1x1024xf32>
    %c83 = arith.constant 83 : index
    %976 = memref.load %arg6[%c83] : memref<98xf32, #tpu.memory_space<smem>>
    %977 = vector.extract_strided_slice %22 {offsets = [0, 35], sizes = [1, 989], strides = [1, 1]} : vector<1x1024xf32> to vector<1x989xf32>
    %978 = vector.extract_strided_slice %22 {offsets = [0, 0], sizes = [1, 35], strides = [1, 1]} : vector<1x1024xf32> to vector<1x35xf32>
    %979 = tpu.concatenate %977, %978 in 1 : vector<1x989xf32>, vector<1x35xf32> -> vector<1x1024xf32>
    %980 = arith.andi %132, %87 : vector<1x1024xi1>
    %cst_149 = arith.constant 0.000000e+00 : f32
    %981 = vector.broadcast %cst_149 : f32 to vector<1x1024xf32>
    %982 = arith.select %980, %979, %981 : vector<1x1024xi1>, vector<1x1024xf32>
    %983 = vector.broadcast %976 : f32 to vector<1x1024xf32>
    %984 = arith.mulf %983, %982 : vector<1x1024xf32>
    %985 = arith.addf %975, %984 : vector<1x1024xf32>
    %c84 = arith.constant 84 : index
    %986 = memref.load %arg6[%c84] : memref<98xf32, #tpu.memory_space<smem>>
    %987 = vector.extract_strided_slice %22 {offsets = [0, 61], sizes = [1, 963], strides = [1, 1]} : vector<1x1024xf32> to vector<1x963xf32>
    %988 = vector.extract_strided_slice %22 {offsets = [0, 0], sizes = [1, 61], strides = [1, 1]} : vector<1x1024xf32> to vector<1x61xf32>
    %989 = tpu.concatenate %987, %988 in 1 : vector<1x963xf32>, vector<1x61xf32> -> vector<1x1024xf32>
    %990 = arith.andi %141, %33 : vector<1x1024xi1>
    %cst_150 = arith.constant 0.000000e+00 : f32
    %991 = vector.broadcast %cst_150 : f32 to vector<1x1024xf32>
    %992 = arith.select %990, %989, %991 : vector<1x1024xi1>, vector<1x1024xf32>
    %993 = vector.broadcast %986 : f32 to vector<1x1024xf32>
    %994 = arith.mulf %993, %992 : vector<1x1024xf32>
    %995 = arith.addf %985, %994 : vector<1x1024xf32>
    %c85 = arith.constant 85 : index
    %996 = memref.load %arg6[%c85] : memref<98xf32, #tpu.memory_space<smem>>
    %997 = vector.extract_strided_slice %22 {offsets = [0, 62], sizes = [1, 962], strides = [1, 1]} : vector<1x1024xf32> to vector<1x962xf32>
    %998 = vector.extract_strided_slice %22 {offsets = [0, 0], sizes = [1, 62], strides = [1, 1]} : vector<1x1024xf32> to vector<1x62xf32>
    %999 = tpu.concatenate %997, %998 in 1 : vector<1x962xf32>, vector<1x62xf32> -> vector<1x1024xf32>
    %1000 = arith.andi %141, %42 : vector<1x1024xi1>
    %cst_151 = arith.constant 0.000000e+00 : f32
    %1001 = vector.broadcast %cst_151 : f32 to vector<1x1024xf32>
    %1002 = arith.select %1000, %999, %1001 : vector<1x1024xi1>, vector<1x1024xf32>
    %1003 = vector.broadcast %996 : f32 to vector<1x1024xf32>
    %1004 = arith.mulf %1003, %1002 : vector<1x1024xf32>
    %1005 = arith.addf %995, %1004 : vector<1x1024xf32>
    %c86 = arith.constant 86 : index
    %1006 = memref.load %arg6[%c86] : memref<98xf32, #tpu.memory_space<smem>>
    %1007 = vector.extract_strided_slice %22 {offsets = [0, 63], sizes = [1, 961], strides = [1, 1]} : vector<1x1024xf32> to vector<1x961xf32>
    %1008 = vector.extract_strided_slice %22 {offsets = [0, 0], sizes = [1, 63], strides = [1, 1]} : vector<1x1024xf32> to vector<1x63xf32>
    %1009 = tpu.concatenate %1007, %1008 in 1 : vector<1x961xf32>, vector<1x63xf32> -> vector<1x1024xf32>
    %1010 = arith.andi %141, %51 : vector<1x1024xi1>
    %cst_152 = arith.constant 0.000000e+00 : f32
    %1011 = vector.broadcast %cst_152 : f32 to vector<1x1024xf32>
    %1012 = arith.select %1010, %1009, %1011 : vector<1x1024xi1>, vector<1x1024xf32>
    %1013 = vector.broadcast %1006 : f32 to vector<1x1024xf32>
    %1014 = arith.mulf %1013, %1012 : vector<1x1024xf32>
    %1015 = arith.addf %1005, %1014 : vector<1x1024xf32>
    %c87 = arith.constant 87 : index
    %1016 = memref.load %arg6[%c87] : memref<98xf32, #tpu.memory_space<smem>>
    %1017 = vector.extract_strided_slice %22 {offsets = [0, 64], sizes = [1, 960], strides = [1, 1]} : vector<1x1024xf32> to vector<1x960xf32>
    %1018 = vector.extract_strided_slice %22 {offsets = [0, 0], sizes = [1, 64], strides = [1, 1]} : vector<1x1024xf32> to vector<1x64xf32>
    %1019 = tpu.concatenate %1017, %1018 in 1 : vector<1x960xf32>, vector<1x64xf32> -> vector<1x1024xf32>
    %1020 = arith.andi %141, %60 : vector<1x1024xi1>
    %cst_153 = arith.constant 0.000000e+00 : f32
    %1021 = vector.broadcast %cst_153 : f32 to vector<1x1024xf32>
    %1022 = arith.select %1020, %1019, %1021 : vector<1x1024xi1>, vector<1x1024xf32>
    %1023 = vector.broadcast %1016 : f32 to vector<1x1024xf32>
    %1024 = arith.mulf %1023, %1022 : vector<1x1024xf32>
    %1025 = arith.addf %1015, %1024 : vector<1x1024xf32>
    %c88 = arith.constant 88 : index
    %1026 = memref.load %arg6[%c88] : memref<98xf32, #tpu.memory_space<smem>>
    %1027 = vector.extract_strided_slice %22 {offsets = [0, 65], sizes = [1, 959], strides = [1, 1]} : vector<1x1024xf32> to vector<1x959xf32>
    %1028 = vector.extract_strided_slice %22 {offsets = [0, 0], sizes = [1, 65], strides = [1, 1]} : vector<1x1024xf32> to vector<1x65xf32>
    %1029 = tpu.concatenate %1027, %1028 in 1 : vector<1x959xf32>, vector<1x65xf32> -> vector<1x1024xf32>
    %1030 = arith.andi %141, %69 : vector<1x1024xi1>
    %cst_154 = arith.constant 0.000000e+00 : f32
    %1031 = vector.broadcast %cst_154 : f32 to vector<1x1024xf32>
    %1032 = arith.select %1030, %1029, %1031 : vector<1x1024xi1>, vector<1x1024xf32>
    %1033 = vector.broadcast %1026 : f32 to vector<1x1024xf32>
    %1034 = arith.mulf %1033, %1032 : vector<1x1024xf32>
    %1035 = arith.addf %1025, %1034 : vector<1x1024xf32>
    %c89 = arith.constant 89 : index
    %1036 = memref.load %arg6[%c89] : memref<98xf32, #tpu.memory_space<smem>>
    %1037 = vector.extract_strided_slice %22 {offsets = [0, 66], sizes = [1, 958], strides = [1, 1]} : vector<1x1024xf32> to vector<1x958xf32>
    %1038 = vector.extract_strided_slice %22 {offsets = [0, 0], sizes = [1, 66], strides = [1, 1]} : vector<1x1024xf32> to vector<1x66xf32>
    %1039 = tpu.concatenate %1037, %1038 in 1 : vector<1x958xf32>, vector<1x66xf32> -> vector<1x1024xf32>
    %1040 = arith.andi %141, %78 : vector<1x1024xi1>
    %cst_155 = arith.constant 0.000000e+00 : f32
    %1041 = vector.broadcast %cst_155 : f32 to vector<1x1024xf32>
    %1042 = arith.select %1040, %1039, %1041 : vector<1x1024xi1>, vector<1x1024xf32>
    %1043 = vector.broadcast %1036 : f32 to vector<1x1024xf32>
    %1044 = arith.mulf %1043, %1042 : vector<1x1024xf32>
    %1045 = arith.addf %1035, %1044 : vector<1x1024xf32>
    %c90 = arith.constant 90 : index
    %1046 = memref.load %arg6[%c90] : memref<98xf32, #tpu.memory_space<smem>>
    %1047 = vector.extract_strided_slice %22 {offsets = [0, 67], sizes = [1, 957], strides = [1, 1]} : vector<1x1024xf32> to vector<1x957xf32>
    %1048 = vector.extract_strided_slice %22 {offsets = [0, 0], sizes = [1, 67], strides = [1, 1]} : vector<1x1024xf32> to vector<1x67xf32>
    %1049 = tpu.concatenate %1047, %1048 in 1 : vector<1x957xf32>, vector<1x67xf32> -> vector<1x1024xf32>
    %1050 = arith.andi %141, %87 : vector<1x1024xi1>
    %cst_156 = arith.constant 0.000000e+00 : f32
    %1051 = vector.broadcast %cst_156 : f32 to vector<1x1024xf32>
    %1052 = arith.select %1050, %1049, %1051 : vector<1x1024xi1>, vector<1x1024xf32>
    %1053 = vector.broadcast %1046 : f32 to vector<1x1024xf32>
    %1054 = arith.mulf %1053, %1052 : vector<1x1024xf32>
    %1055 = arith.addf %1045, %1054 : vector<1x1024xf32>
    %c91 = arith.constant 91 : index
    %1056 = memref.load %arg6[%c91] : memref<98xf32, #tpu.memory_space<smem>>
    %1057 = vector.extract_strided_slice %22 {offsets = [0, 93], sizes = [1, 931], strides = [1, 1]} : vector<1x1024xf32> to vector<1x931xf32>
    %1058 = vector.extract_strided_slice %22 {offsets = [0, 0], sizes = [1, 93], strides = [1, 1]} : vector<1x1024xf32> to vector<1x93xf32>
    %1059 = tpu.concatenate %1057, %1058 in 1 : vector<1x931xf32>, vector<1x93xf32> -> vector<1x1024xf32>
    %1060 = arith.andi %150, %33 : vector<1x1024xi1>
    %cst_157 = arith.constant 0.000000e+00 : f32
    %1061 = vector.broadcast %cst_157 : f32 to vector<1x1024xf32>
    %1062 = arith.select %1060, %1059, %1061 : vector<1x1024xi1>, vector<1x1024xf32>
    %1063 = vector.broadcast %1056 : f32 to vector<1x1024xf32>
    %1064 = arith.mulf %1063, %1062 : vector<1x1024xf32>
    %1065 = arith.addf %1055, %1064 : vector<1x1024xf32>
    %c92 = arith.constant 92 : index
    %1066 = memref.load %arg6[%c92] : memref<98xf32, #tpu.memory_space<smem>>
    %1067 = vector.extract_strided_slice %22 {offsets = [0, 94], sizes = [1, 930], strides = [1, 1]} : vector<1x1024xf32> to vector<1x930xf32>
    %1068 = vector.extract_strided_slice %22 {offsets = [0, 0], sizes = [1, 94], strides = [1, 1]} : vector<1x1024xf32> to vector<1x94xf32>
    %1069 = tpu.concatenate %1067, %1068 in 1 : vector<1x930xf32>, vector<1x94xf32> -> vector<1x1024xf32>
    %1070 = arith.andi %150, %42 : vector<1x1024xi1>
    %cst_158 = arith.constant 0.000000e+00 : f32
    %1071 = vector.broadcast %cst_158 : f32 to vector<1x1024xf32>
    %1072 = arith.select %1070, %1069, %1071 : vector<1x1024xi1>, vector<1x1024xf32>
    %1073 = vector.broadcast %1066 : f32 to vector<1x1024xf32>
    %1074 = arith.mulf %1073, %1072 : vector<1x1024xf32>
    %1075 = arith.addf %1065, %1074 : vector<1x1024xf32>
    %c93 = arith.constant 93 : index
    %1076 = memref.load %arg6[%c93] : memref<98xf32, #tpu.memory_space<smem>>
    %1077 = vector.extract_strided_slice %22 {offsets = [0, 95], sizes = [1, 929], strides = [1, 1]} : vector<1x1024xf32> to vector<1x929xf32>
    %1078 = vector.extract_strided_slice %22 {offsets = [0, 0], sizes = [1, 95], strides = [1, 1]} : vector<1x1024xf32> to vector<1x95xf32>
    %1079 = tpu.concatenate %1077, %1078 in 1 : vector<1x929xf32>, vector<1x95xf32> -> vector<1x1024xf32>
    %1080 = arith.andi %150, %51 : vector<1x1024xi1>
    %cst_159 = arith.constant 0.000000e+00 : f32
    %1081 = vector.broadcast %cst_159 : f32 to vector<1x1024xf32>
    %1082 = arith.select %1080, %1079, %1081 : vector<1x1024xi1>, vector<1x1024xf32>
    %1083 = vector.broadcast %1076 : f32 to vector<1x1024xf32>
    %1084 = arith.mulf %1083, %1082 : vector<1x1024xf32>
    %1085 = arith.addf %1075, %1084 : vector<1x1024xf32>
    %c94 = arith.constant 94 : index
    %1086 = memref.load %arg6[%c94] : memref<98xf32, #tpu.memory_space<smem>>
    %1087 = vector.extract_strided_slice %22 {offsets = [0, 96], sizes = [1, 928], strides = [1, 1]} : vector<1x1024xf32> to vector<1x928xf32>
    %1088 = vector.extract_strided_slice %22 {offsets = [0, 0], sizes = [1, 96], strides = [1, 1]} : vector<1x1024xf32> to vector<1x96xf32>
    %1089 = tpu.concatenate %1087, %1088 in 1 : vector<1x928xf32>, vector<1x96xf32> -> vector<1x1024xf32>
    %1090 = arith.andi %150, %60 : vector<1x1024xi1>
    %cst_160 = arith.constant 0.000000e+00 : f32
    %1091 = vector.broadcast %cst_160 : f32 to vector<1x1024xf32>
    %1092 = arith.select %1090, %1089, %1091 : vector<1x1024xi1>, vector<1x1024xf32>
    %1093 = vector.broadcast %1086 : f32 to vector<1x1024xf32>
    %1094 = arith.mulf %1093, %1092 : vector<1x1024xf32>
    %1095 = arith.addf %1085, %1094 : vector<1x1024xf32>
    %c95 = arith.constant 95 : index
    %1096 = memref.load %arg6[%c95] : memref<98xf32, #tpu.memory_space<smem>>
    %1097 = vector.extract_strided_slice %22 {offsets = [0, 97], sizes = [1, 927], strides = [1, 1]} : vector<1x1024xf32> to vector<1x927xf32>
    %1098 = vector.extract_strided_slice %22 {offsets = [0, 0], sizes = [1, 97], strides = [1, 1]} : vector<1x1024xf32> to vector<1x97xf32>
    %1099 = tpu.concatenate %1097, %1098 in 1 : vector<1x927xf32>, vector<1x97xf32> -> vector<1x1024xf32>
    %1100 = arith.andi %150, %69 : vector<1x1024xi1>
    %cst_161 = arith.constant 0.000000e+00 : f32
    %1101 = vector.broadcast %cst_161 : f32 to vector<1x1024xf32>
    %1102 = arith.select %1100, %1099, %1101 : vector<1x1024xi1>, vector<1x1024xf32>
    %1103 = vector.broadcast %1096 : f32 to vector<1x1024xf32>
    %1104 = arith.mulf %1103, %1102 : vector<1x1024xf32>
    %1105 = arith.addf %1095, %1104 : vector<1x1024xf32>
    %c96 = arith.constant 96 : index
    %1106 = memref.load %arg6[%c96] : memref<98xf32, #tpu.memory_space<smem>>
    %1107 = vector.extract_strided_slice %22 {offsets = [0, 98], sizes = [1, 926], strides = [1, 1]} : vector<1x1024xf32> to vector<1x926xf32>
    %1108 = vector.extract_strided_slice %22 {offsets = [0, 0], sizes = [1, 98], strides = [1, 1]} : vector<1x1024xf32> to vector<1x98xf32>
    %1109 = tpu.concatenate %1107, %1108 in 1 : vector<1x926xf32>, vector<1x98xf32> -> vector<1x1024xf32>
    %1110 = arith.andi %150, %78 : vector<1x1024xi1>
    %cst_162 = arith.constant 0.000000e+00 : f32
    %1111 = vector.broadcast %cst_162 : f32 to vector<1x1024xf32>
    %1112 = arith.select %1110, %1109, %1111 : vector<1x1024xi1>, vector<1x1024xf32>
    %1113 = vector.broadcast %1106 : f32 to vector<1x1024xf32>
    %1114 = arith.mulf %1113, %1112 : vector<1x1024xf32>
    %1115 = arith.addf %1105, %1114 : vector<1x1024xf32>
    %c97 = arith.constant 97 : index
    %1116 = memref.load %arg6[%c97] : memref<98xf32, #tpu.memory_space<smem>>
    %1117 = vector.extract_strided_slice %22 {offsets = [0, 99], sizes = [1, 925], strides = [1, 1]} : vector<1x1024xf32> to vector<1x925xf32>
    %1118 = vector.extract_strided_slice %22 {offsets = [0, 0], sizes = [1, 99], strides = [1, 1]} : vector<1x1024xf32> to vector<1x99xf32>
    %1119 = tpu.concatenate %1117, %1118 in 1 : vector<1x925xf32>, vector<1x99xf32> -> vector<1x1024xf32>
    %1120 = arith.andi %150, %87 : vector<1x1024xi1>
    %cst_163 = arith.constant 0.000000e+00 : f32
    %1121 = vector.broadcast %cst_163 : f32 to vector<1x1024xf32>
    %1122 = arith.select %1120, %1119, %1121 : vector<1x1024xi1>, vector<1x1024xf32>
    %1123 = vector.broadcast %1116 : f32 to vector<1x1024xf32>
    %1124 = arith.mulf %1123, %1122 : vector<1x1024xf32>
    %1125 = arith.addf %1115, %1124 : vector<1x1024xf32>
    %1126 = arith.negf %1125 : vector<1x1024xf32>
    %1127 = math.exp %1126 : vector<1x1024xf32>
    %cst_164 = arith.constant 1.000000e+00 : f32
    %1128 = vector.broadcast %cst_164 : f32 to vector<1x1024xf32>
    %1129 = arith.addf %1128, %1127 : vector<1x1024xf32>
    %1130 = arith.divf %1128, %1129 : vector<1x1024xf32>
    %1131 = vector.shape_cast %1130 : vector<1x1024xf32> to vector<1x1x1024xf32>
    %1132 = vector.broadcast %1131 : vector<1x1x1024xf32> to vector<1x8x1024xf32>
    %1133 = arith.mulf %18, %1132 : vector<1x8x1024xf32>
    %c0_165 = arith.constant 0 : index
    %c0_166 = arith.constant 0 : index
    %c0_167 = arith.constant 0 : index
    %1134 = vector.load %arg7[%c0_165, %c0_166, %c0_167] : memref<1x8x1024xf32, #tpu.memory_space<vmem>>, vector<1x8x1024xf32>
    tpu.vector_store %arg7[%c0_165, %c0_166, %c0_167], %1133 {strides = array<i32>} : memref<1x8x1024xf32, #tpu.memory_space<vmem>>, vector<1x8x1024xf32>,
    return
  }
  func.func @transform_0(%arg0: i32) -> (i32, i32) {
    %c0_i32 = arith.constant 0 : i32
    %c0_i32_0 = arith.constant 0 : i32
    %c0_i32_1 = arith.constant 0 : i32
    return %c0_i32, %c0_i32_0 : i32, i32
  }
  func.func @transform_1(%arg0: i32) -> (i32, i32) {
    %c0_i32 = arith.constant 0 : i32
    %c0_i32_0 = arith.constant 0 : i32
    %c0_i32_1 = arith.constant 0 : i32
    return %c0_i32, %c0_i32_0 : i32, i32
  }
  func.func @transform_2(%arg0: i32) -> (i32, i32, i32) {
    %c0_i32 = arith.constant 0 : i32
    %c0_i32_0 = arith.constant 0 : i32
    %c0_i32_1 = arith.constant 0 : i32
    return %arg0, %c0_i32, %c0_i32_0 : i32, i32, i32
  }
  func.func @transform_3(%arg0: i32) -> (i32, i32) {
    %c0_i32 = arith.constant 0 : i32
    %c0_i32_0 = arith.constant 0 : i32
    %c0_i32_1 = arith.constant 0 : i32
    return %c0_i32, %c0_i32_0 : i32, i32
  }
  func.func @transform_4(%arg0: i32) -> (i32, i32) {
    %c0_i32 = arith.constant 0 : i32
    %c0_i32_0 = arith.constant 0 : i32
    %c0_i32_1 = arith.constant 0 : i32
    return %c0_i32, %c0_i32_0 : i32, i32
  }
  func.func @transform_5(%arg0: i32) -> i32 {
    %c0_i32 = arith.constant 0 : i32
    %c0_i32_0 = arith.constant 0 : i32
    return %c0_i32 : i32
  }
  func.func @transform_6(%arg0: i32) -> (i32, i32, i32) {
    %c0_i32 = arith.constant 0 : i32
    %c0_i32_0 = arith.constant 0 : i32
    %c0_i32_1 = arith.constant 0 : i32
    return %arg0, %c0_i32, %c0_i32_0 : i32, i32, i32
  }
}

</mosaic_0001>

<bundles_post_ra>
// kernel: cbam_forward.1
= control target key start
LH: loop header
LB: loop body
LE: loop exit
PB: predicated region body
PF: predicated region fallthrough
CT: control target
= control target key end

     0   :  { %s13760_s0 = inlined_call_operand.vmem [shape: s32[1,1024], index: 0, kind: input, shape index: {}]   ;;  %s13761_s1 = inlined_call_operand.vmem [shape: s32[1,1024], index: 1, kind: input, shape index: {}]   ;;  %s13762_s2 = inlined_call_operand.vmem [shape: f32[2,8,1024], index: 2, kind: input, shape index: {}]   ;;  %s13763_s3 = inlined_call_operand.vmem [shape: f32[8,8], index: 3, kind: input, shape index: {}]   ;;  %s13764_s4 = inlined_call_operand.vmem [shape: f32[8,1], index: 4, kind: input, shape index: {}]   ;;  %s13765_s5 = inlined_call_operand.vmem [shape: f32[98], index: 5, kind: input, shape index: {}]   ;;  %s13766_s6 = inlined_call_operand.vmem [shape: f32[2,8,1024], index: 6, kind: output, shape index: {}]  }
   0x1   :  { %14304 = sst [smem:[#allocation145_spill]] %s13760_s0 }
   0x2   :  { %14305 = sst [smem:[#allocation146_spill]] %s13761_s1 }
   0x3   :  { %14306 = sst [smem:[#allocation147_spill]] %s13762_s2 }
   0x4   :  { %14307 = sst [smem:[#allocation148_spill]] %s13763_s3 }
   0x5   :  { %11 = vsyncpa [#allocation3], 0  ;;  %s7828_s21 = smov 0  }
   0x6 LB: > { %s7562_s22 = sadd.s32 4294967295, %s7761_s21   ;;  %p7564_p0 = scmp.ge.s32.totalorder %s7761_s21, 1  ;;  %s7761_s21 = sphi %s7828_s21, %s17_s21  }
   0x7   : > { %p179_p1 = scmp.lt.s32.totalorder %s7761_s21, 3  ;;  %s204_s25 = sshll.u32 %s13765_s5, 4  ;;  %s205_s25 = int_to_ptr.vmem [resolvable:$true] %s204_s25 }
   0x8   : > { %p7684_p3 = scmp.eq.s32.totalorder %s7562_s22, 0  ;;  %s7736_s27 = scalar_lea.vmem %s205_s25, 16 }
   0x9   : > { %p7839_p2 = pnand %p7564_p0, %p179_p1  ;;  %p7737_p6 = scmp.ne.s32.totalorder %s205_s25, %s7736_s27 }
   0xa   : > { %p7744_p10 = scmp.lt.s32.totalorder %s205_s25, %s205_s25  ;;  %p7745_p11 = scmp.lt.s32.totalorder %s7736_s27, %s7736_s27 }
   0xb   : > { %p7680_p4 = pneg %p7839_p2 }
   0xc   : > { %p7746_p12 = por %p7745_p11, %p7744_p10 }
   0xd   : > { %p7681_p5 = pnand %p7684_p3, %p7680_p4 }
   0xf   : > { %p7738_p7 = pneg %p7681_p5 }
  0x11   : > { %p7739_p8 = pnand %p7738_p7, %p7737_p6 }
  0x13   : > { %p7740_p9 = pneg %p7739_p8 }
  0x15   : > { %p7747_p13 = pnand %p7746_p12, %p7740_p9 }
  0x17   : > { %7750 = shalt.err (!%p7747_p13)
}
  0x18   : > { %s7763_s28 = smov [#allocation2]   ;;  %225 = sbr.rel (%p7839_p2) target bundleno = 1648 (0x670), region = 44 }
  0x19   : > { %7683 = dma.vmem_to_smem (!%p7681_p5), %s205_s25, 16, %s7763_s28, [#allocation3]  }
  0x1f   : > { %7756 = dma.done.wait (%p7684_p3), [#allocation3], 16  }
  0x20   : > { %7758 = vsyncadd (%p7684_p3), [#allocation3], 4294967280 }
  0x21   : > { %231 = sfence }
  0x22   : > { %p256_p0 = scmp.lt.s32.totalorder %s7562_s22, 1  ;;  %s14309_s2 = sld [smem:[#allocation147_spill]]  ;;  %v287_v15 = vlaneseq  ;;  %vm307_vm0 = vcmask 64512   ;;  %v7764_v25 = vmov 0   ;;  %v285_v26 = vld [vmem:[%s13764_s4] sm:$0xff]  ;;  %vm518_vm1 = vcmask 809984  }
  0x23   : > { %s14311_s3 = sld [smem:[#allocation148_spill]]  ;;  %7724 = vset.pattern.permute.xlu1 %v7764_v25  ;;  %7725 = vset.pattern.permute.xlu0 %v7764_v25  ;;  %s7765_s13 = smov 99   ;;  %vm602_vm13 = vcmask 801792  }
  0x24   : > { %s15560_s22 = smov (!%p256_p0, %s7562_s22), 1  ;;  %v288_v16 = vand.u32 127, %v287_v15  ;;  %v7858_v17 = vshrl.u32 %v287_v15, 7  ;;  %s7766_s14 = smov 98  }
  0x25   : > { %s13870_s29 = sshll.u32 %s15560_s22, 6  ;;  %s13925_s15 = smov 97  }
  0x26   : > { %14310 = vst [vmem:[#allocation5_spill] sm:$0xff] %v7858_v17  ;;  %v291_v18 = vsub.s32 %v288_v16, %v7858_v17  ;;  %s13923_s16 = smov 96   ;;  %s13921_s17 = smov 95  }
  0x27   : > { %s13919_s18 = smov 94   ;;  %s14328_s0 = sld [smem:[#allocation145_spill]] }
  0x28   : > { %s260_s8 = scalar_lea.vmem %s14309_s2, %s13870_s29  ;;  %s14329_s1 = sld [smem:[#allocation146_spill]] }
  0x29   : > { %v266_v0 = vld [vmem:[%s260_s8] sm:$0xff]  ;;  %v267_v1 = vld [vmem:[%s260_s8 + $0x8] sm:$0xff]  ;;  %v268_v2 = vld [vmem:[%s260_s8 + $0x10] sm:$0xff]  ;;  %s13917_s25 = smov 93   ;;  %s13915_s26 = smov 67  }
  0x2a   : > { %v274_v3 = vadd.f32 %v267_v1, %v266_v0  ;;  %v269_v4 = vld [vmem:[%s260_s8 + $0x18] sm:$0xff]  ;;  %v270_v6 = vld [vmem:[%s260_s8 + $0x20] sm:$0xff]  ;;  %v271_v8 = vld [vmem:[%s260_s8 + $0x28] sm:$0xff]  ;;  %s13913_s27 = smov 66   ;;  %s13908_s28 = smov 65  }
  0x2b   : > { %v272_v10 = vld [vmem:[%s260_s8 + $0x30] sm:$0xff]  ;;  %v273_v12 = vld [vmem:[%s260_s8 + $0x38] sm:$0xff]  ;;  %v284_v21 = vld [vmem:[%s14311_s3] sm:$0xff]  ;;  %s13906_s30 = smov 64   ;;  %s13904_s7 = smov 63  }
  0x2c   : > { %v275_v5 = vadd.f32 %v274_v3, %v268_v2  ;;  %s13902_s8 = smov 62   ;;  %s13900_s9 = smov 61  }
  0x2d   : > { %s13898_s10 = smov 35   ;;  %s13896_s11 = smov 34  }
  0x2e   : > { %v276_v7 = vadd.f32 %v275_v5, %v269_v4  ;;  %s13891_s12 = smov 33   ;;  %s13871_s19 = smov 30  }
  0x2f   : > { %s13877_s20 = smov 29   ;;  %s13911_s23 = smov 3  }
  0x30   : > { %v277_v9 = vadd.f32 %v276_v7, %v270_v6  ;;  %s7597_s24 = sld [smem:[#allocation2 + $0x18]]  ;;  %s13936_s29 = smov 2  }
  0x31   : > { %s9748_s2 = sld [smem:[#allocation2 + $0x2a]]  ;;  %s9750_s3 = sld [smem:[#allocation2 + $0xf]] }
  0x32   : > { %v278_v11 = vadd.f32 %v277_v9, %v271_v8 }
  0x34   : > { %v279_v13 = vadd.f32 %v278_v11, %v272_v10 }
  0x36   : > { %v280_v14 = vadd.f32 %v279_v13, %v273_v12 }
  0x38   : > { %281 = vadd.xlane.f32.xlu0 %v280_v14 }
  0xc5   : > { %v282_v19 = vpop.xlane.xlu0 %281 }
  0xc6   : > { %v283_v20 = vmul.f32 0.0009765625, %v282_v19 }
  0xc8   : > { %v292_v22 = vrot.slane %v283_v20, %v291_v18 }
  0xca   : > { %v306_v23 = vmul.f32 %v292_v22, %v284_v21 }
  0xcc   : > { %v308_v24 = vsel %vm307_vm0, %v306_v23, 0.0 }
  0xcd   : > { %309 = vadd.xlane.f32.xlu0 %v308_v24 }
 0x15a   : > { %v310_v27 = vpop.xlane.xlu0 %309 }
 0x15b   : > { %v311_v28 = vadd.f32 %v310_v27, %v285_v26 }
 0x15d   : > { %v7573_v29 = vmul.f32 -1.442695, %v311_v28 }
 0x15f   : > { %7726 = vpow2.f32 %v7573_v29 }
 0x169   : > { %v7727_v30 = vpop.eup %7726 }
 0x16a   : > { %v315_v31 = vadd.f32 1.0, %v7727_v30 }
 0x16c   : > { %7728 = vrcp.f32 %v315_v31 }
 0x176   : > { %v7729_v32 = vpop.eup %7728 }
 0x177   : > { %320 = vperm.xlu1 %7724, %v7729_v32  }
 0x1f6   : > { %v321_v33 = vpop.permute.xlu1 %320 }
 0x1f7   : > { %v7867_v34 = vmul.f32 %v321_v33, %v266_v0  ;;  %v7869_v35 = vmul.f32 %v321_v33, %v267_v1  ;;  %v7871_v36 = vmul.f32 %v321_v33, %v268_v2  ;;  %v7873_v37 = vmul.f32 %v321_v33, %v269_v4 }
 0x1f8   : > { %v7875_v38 = vmul.f32 %v321_v33, %v270_v6  ;;  %v7877_v39 = vmul.f32 %v321_v33, %v273_v12  ;;  %v7879_v40 = vmul.f32 %v321_v33, %v272_v10  ;;  %v7884_v44 = vmul.f32 %v321_v33, %v271_v8 }
 0x1f9   : > { %14312 = vst [vmem:[#allocation6_spill] sm:$0xff] %v7867_v34  ;;  %14313 = vst [vmem:[#allocation7_spill] sm:$0xff] %v7869_v35  ;;  %v331_v41 = vrot.slane %v7867_v34, 4  ;;  %v337_v42 = vrot.slane %v7869_v35, 4  ;;  %v343_v43 = vrot.slane %v7871_v36, 4  ;;  %v349_v45 = vrot.slane %v7873_v37, 4 }
 0x1fa   : > { %14314 = vst [vmem:[#allocation8_spill] sm:$0xff] %v7871_v36  ;;  %14315 = vst [vmem:[#allocation9_spill] sm:$0xff] %v7873_v37  ;;  %v355_v46 = vrot.slane %v7875_v38, 4  ;;  %v373_v47 = vrot.slane %v7877_v39, 4  ;;  %v367_v48 = vrot.slane %v7879_v40, 4  ;;  %v361_v52 = vrot.slane %v7884_v44, 4 }
 0x1fb   : > { %14316 = vst [vmem:[#allocation10_spill] sm:$0xff] %v7875_v38  ;;  %14317 = vst [vmem:[#allocation11_spill] sm:$0xff] %v7877_v39  ;;  %v389_v49 = vmax.f32 %v7867_v34, %v331_v41  ;;  %v395_v50 = vmax.f32 %v7869_v35, %v337_v42  ;;  %v401_v51 = vmax.f32 %v7871_v36, %v343_v43 }
 0x1fc   : > { %14318 = vst [vmem:[#allocation12_spill] sm:$0xff] %v7879_v40  ;;  %14319 = vst [vmem:[#allocation13_spill] sm:$0xff] %v7884_v44  ;;  %v407_v53 = vmax.f32 %v7873_v37, %v349_v45  ;;  %v413_v54 = vmax.f32 %v7875_v38, %v355_v46  ;;  %v431_v55 = vmax.f32 %v7877_v39, %v373_v47 }
 0x1fd   : > { %v390_v56 = vrot.slane %v389_v49, 2  ;;  %v396_v57 = vrot.slane %v395_v50, 2  ;;  %v402_v58 = vrot.slane %v401_v51, 2  ;;  %v425_v63 = vmax.f32 %v7879_v40, %v367_v48 }
 0x1fe   : > { %v432_v59 = vrot.slane %v431_v55, 2  ;;  %v414_v62 = vrot.slane %v413_v54, 2  ;;  %v408_v1 = vrot.slane %v407_v53, 2  ;;  %v419_v2 = vmax.f32 %v7884_v44, %v361_v52 }
 0x1ff   : > { %v391_v60 = vmax.f32 %v389_v49, %v390_v56  ;;  %v403_v61 = vmax.f32 %v401_v51, %v402_v58  ;;  %v397_v0 = vmax.f32 %v395_v50, %v396_v57  ;;  %v426_v9 = vrot.slane %v425_v63, 2 }
 0x200   : > { %v433_v3 = vmax.f32 %v431_v55, %v432_v59  ;;  %v415_v8 = vmax.f32 %v413_v54, %v414_v62  ;;  %v409_v11 = vmax.f32 %v407_v53, %v408_v1  ;;  %v420_v12 = vrot.slane %v419_v2, 2 }
 0x201   : > { %v392_v4 = vrot.slane %v391_v60, 1  ;;  %v404_v7 = vrot.slane %v403_v61, 1  ;;  %v398_v10 = vrot.slane %v397_v0, 1  ;;  %v427_v16 = vmax.f32 %v425_v63, %v426_v9 }
 0x202   : > { %v434_v5 = vrot.slane %v433_v3, 1  ;;  %v416_v15 = vrot.slane %v415_v8, 1  ;;  %v410_v19 = vrot.slane %v409_v11, 1  ;;  %v421_v20 = vmax.f32 %v419_v2, %v420_v12 }
 0x203   : > { %v7911_v6 = vmax.f32 %v391_v60, %v392_v4  ;;  %v7919_v14 = vmax.f32 %v403_v61, %v404_v7  ;;  %v7921_v18 = vmax.f32 %v397_v0, %v398_v10  ;;  %v428_v22 = vrot.slane %v427_v16, 1 }
 0x204   : > { %v7913_v13 = vmax.f32 %v433_v3, %v434_v5  ;;  %v7927_v21 = vmax.f32 %v415_v8, %v416_v15  ;;  %v7929_v23 = vmax.f32 %v409_v11, %v410_v19  ;;  %v422_v24 = vrot.slane %v421_v20, 1 }
 0x205   : > { %14320 = vst [vmem:[#allocation14_spill] sm:$0xff] %v7911_v6  ;;  %4012 = vrot.lane.b32.xlu1 %v7911_v6, %s7765_s13  ;;  %14322 = vst [vmem:[#allocation16_spill] sm:$0xff] %v7919_v14  ;;  %v7935_v25 = vmax.f32 %v427_v16, %v428_v22  ;;  %v374_v27 = vadd.f32 %v373_v47, %v7877_v39  ;;  %v332_v28 = vadd.f32 %v331_v41, %v7867_v34 }
 0x206   : > { %14321 = vst [vmem:[#allocation15_spill] sm:$0xff] %v7913_v13  ;;  %4002 = vrot.lane.b32.xlu0 %v7913_v13, %s7765_s13  ;;  %14323 = vst [vmem:[#allocation17_spill] sm:$0xff] %v7921_v18  ;;  %v7937_v26 = vmax.f32 %v421_v20, %v422_v24  ;;  %v338_v29 = vadd.f32 %v337_v42, %v7869_v35  ;;  %v344_v33 = vadd.f32 %v343_v43, %v7871_v36 }
 0x207   : > { %14324 = vst [vmem:[#allocation18_spill] sm:$0xff] %v7927_v21  ;;  %14325 = vst [vmem:[#allocation19_spill] sm:$0xff] %v7929_v23  ;;  %v375_v30 = vrot.slane %v374_v27, 2  ;;  %v333_v31 = vrot.slane %v332_v28, 2  ;;  %v350_v50 = vadd.f32 %v349_v45, %v7873_v37  ;;  %v356_v43 = vadd.f32 %v355_v46, %v7875_v38 }
 0x208   : > { %14326 = vst [vmem:[#allocation20_spill] sm:$0xff] %v7935_v25  ;;  %14327 = vst [vmem:[#allocation21_spill] sm:$0xff] %v7937_v26  ;;  %v339_v32 = vrot.slane %v338_v29, 2  ;;  %v345_v49 = vrot.slane %v344_v33, 2  ;;  %v362_v45 = vadd.f32 %v361_v52, %v7884_v44  ;;  %v368_v52 = vadd.f32 %v367_v48, %v7879_v40 }
 0x209   : > { %4016 = vrot.lane.b32.xlu1 %v7919_v14, %s7765_s13  ;;  %v376_v41 = vadd.f32 %v375_v30, %v374_v27  ;;  %v334_v47 = vadd.f32 %v333_v31, %v332_v28  ;;  %v351_v56 = vrot.slane %v350_v50, 2  ;;  %v357_v59 = vrot.slane %v356_v43, 2 }
 0x20a   : > { %4014 = vrot.lane.b32.xlu0 %v7921_v18, %s7765_s13  ;;  %v340_v42 = vadd.f32 %v339_v32, %v338_v29  ;;  %v346_v55 = vadd.f32 %v345_v49, %v344_v33  ;;  %v363_v63 = vrot.slane %v362_v45, 2  ;;  %v369_v9 = vrot.slane %v368_v52, 2 }
 0x20b   : > { %v377_v51 = vrot.slane %v376_v41, 1  ;;  %v335_v53 = vrot.slane %v334_v47, 1  ;;  %v352_v61 = vadd.f32 %v351_v56, %v350_v50  ;;  %v358_v3 = vadd.f32 %v357_v59, %v356_v43  ;;  %v8096_v50 = vld [vmem:[%s14329_s1] sm:$0xff] }
 0x20c   : > { %v341_v54 = vrot.slane %v340_v42, 1  ;;  %v347_v60 = vrot.slane %v346_v55, 1  ;;  %v364_v5 = vadd.f32 %v363_v63, %v362_v45  ;;  %v370_v12 = vadd.f32 %v369_v9, %v368_v52 }
 0x20d   : > { %4020 = vrot.lane.b32.xlu1 %v7927_v21, %s7765_s13  ;;  %v378_v57 = vadd.f32 %v377_v51, %v376_v41  ;;  %v336_v58 = vadd.f32 %v335_v53, %v334_v47  ;;  %v353_v2 = vrot.slane %v352_v61, 1  ;;  %v359_v8 = vrot.slane %v358_v3, 1  ;;  %v8090_v47 = vld [vmem:[%s14328_s0] sm:$0xff] }
 0x20e   : > { %4018 = vrot.lane.b32.xlu0 %v7929_v23, %s7765_s13  ;;  %v342_v46 = vadd.f32 %v341_v54, %v340_v42  ;;  %v348_v1 = vadd.f32 %v347_v60, %v346_v55  ;;  %v365_v48 = vrot.slane %v364_v5, 1  ;;  %v371_v19 = vrot.slane %v370_v12, 1 }
 0x20f   : > { %v7984_v62 = vmul.f32 0.125, %v378_v57  ;;  %v7986_v0 = vmul.f32 0.125, %v336_v58  ;;  %v354_v7 = vadd.f32 %v353_v2, %v352_v61  ;;  %v360_v11 = vadd.f32 %v359_v8, %v358_v3 }
 0x210   : > { %v7995_v4 = vmul.f32 0.125, %v342_v46  ;;  %v8001_v10 = vmul.f32 0.125, %v348_v1  ;;  %v366_v16 = vadd.f32 %v365_v48, %v364_v5  ;;  %v372_v24 = vadd.f32 %v371_v19, %v370_v12 }
 0x211   : > { %4024 = vrot.lane.b32.xlu1 %v7935_v25, %s7765_s13  ;;  %v8007_v15 = vmul.f32 0.125, %v354_v7  ;;  %v8013_v20 = vmul.f32 0.125, %v360_v11  ;;  %v7771_v30 = vmov 1966171168   ;;  %v438_v51 = vadd.s32 4294967293, %v8090_v47 }
 0x212   : > { %4022 = vrot.lane.b32.xlu0 %v7937_v26, %s7765_s13  ;;  %v8015_v22 = vmul.f32 0.125, %v366_v16  ;;  %v8025_v27 = vmul.f32 0.125, %v372_v24  ;;  %v535_v31 = vunpack.c.l.s4 %v7771_v30  ;;  %v465_v54 = vadd.s32 4294967293, %v8096_v50 }
 0x213   : > { %vm439_vm2 = vcmp.ge.s32.totalorder %v438_v51, 0  ;;  %v480_v61 = vadd.s32 1, %v8096_v50  ;;  %vm440_vm3 = vcmp.lt.s32.totalorder %v438_v51, 32  ;;  %v14336_v51 = vmov 0 }
 0x214   : > { %v536_v41 = vunpack.c.0.s8 %v535_v31  ;;  %vm466_vm4 = vcmp.ge.s32.totalorder %v465_v54, 0  ;;  %vm467_vm5 = vcmp.lt.s32.totalorder %v465_v54, 32  ;;  %vm8128_vm8 = vmand %vm439_vm2, %vm440_vm3 }
 0x215   : > { %4094 = vrot.lane.b32.xlu1 %v7911_v6, %s7766_s14  ;;  %vm481_vm6 = vcmp.ge.s32.totalorder %v480_v61, 0  ;;  %vm482_vm7 = vcmp.lt.s32.totalorder %v480_v61, 32  ;;  %vm8137_vm9 = vmand %vm466_vm4, %vm467_vm5  ;;  %vm450_vm4 = vcmp.ge.s32.totalorder %v8090_v47, 0  ;;  %vm451_vm5 = vcmp.lt.s32.totalorder %v8090_v47, 32 }
 0x216   : > { %4091 = vrot.lane.b32.xlu0 %v7913_v13, %s7766_s14  ;;  %v8107_v58 = vsub.s32 %v536_v41, %v7858_v17  ;;  %vm8144_vm10 = vmand %vm481_vm6, %vm482_vm7  ;;  %vm477_vm6 = vcmp.ge.s32.totalorder %v8096_v50, 0  ;;  %vm478_vm7 = vcmp.lt.s32.totalorder %v8096_v50, 32 }
 0x217   : > { %v14337_v51 = vsel %vm8144_vm10, 4294967295, %v14336_v51  ;;  %vm528_vm11 = vmand %vm8137_vm9, %vm8128_vm8 }
 0x218   : > { %14338 = vst [vmem:[#allocation24_spill] sm:$0xff] %v14337_v51  ;;  %vm2825_vm12 = vmand %vm8144_vm10, %vm8128_vm8 }
 0x219   : > { %4098 = vrot.lane.b32.xlu1 %v7919_v14, %s7766_s14 }
 0x21a   : > { %4096 = vrot.lane.b32.xlu0 %v7921_v18, %s7766_s14 }
 0x21d   : > { %4102 = vrot.lane.b32.xlu1 %v7927_v21, %s7766_s14 }
 0x21e   : > { %4100 = vrot.lane.b32.xlu0 %v7929_v23, %s7766_s14 }
 0x221   : > { %4106 = vrot.lane.b32.xlu1 %v7935_v25, %s7766_s14 }
 0x222   : > { %4104 = vrot.lane.b32.xlu0 %v7937_v26, %s7766_s14 }
 0x225   : > { %4176 = vrot.lane.b32.xlu1 %v7911_v6, %s13925_s15 }
 0x226   : > { %4173 = vrot.lane.b32.xlu0 %v7913_v13, %s13925_s15 }
 0x229   : > { %4180 = vrot.lane.b32.xlu1 %v7919_v14, %s13925_s15 }
 0x22a   : > { %4178 = vrot.lane.b32.xlu0 %v7921_v18, %s13925_s15 }
 0x22d   : > { %494 = vrot.lane.b32.xlu1 %v7984_v62, %s7765_s13 }
 0x22e   : > { %504 = vrot.lane.b32.xlu0 %v7986_v0, %s7765_s13 }
 0x231   : > { %506 = vrot.lane.b32.xlu1 %v7995_v4, %s7765_s13 }
 0x232   : > { %585 = vrot.lane.b32.xlu0 %v7984_v62, %s7766_s14 }
 0x235   : > { %508 = vrot.lane.b32.xlu1 %v8001_v10, %s7765_s13 }
 0x236   : > { %590 = vrot.lane.b32.xlu0 %v7995_v4, %s7766_s14 }
 0x239   : > { %510 = vrot.lane.b32.xlu1 %v8007_v15, %s7765_s13 }
 0x23a   : > { %594 = vrot.lane.b32.xlu0 %v8007_v15, %s7766_s14 }
 0x23d   : > { %512 = vrot.lane.b32.xlu1 %v8013_v20, %s7765_s13 }
 0x23e   : > { %598 = vrot.lane.b32.xlu0 %v8015_v22, %s7766_s14 }
 0x241   : > { %514 = vrot.lane.b32.xlu1 %v8015_v22, %s7765_s13 }
 0x242   : > { %669 = vrot.lane.b32.xlu0 %v7984_v62, %s13925_s15 }
 0x245   : > { %516 = vrot.lane.b32.xlu1 %v8025_v27, %s7765_s13  ;;  %s13875_s13 = smov 32  }
 0x246   : > { %674 = vrot.lane.b32.xlu0 %v7995_v4, %s13925_s15 }
 0x249   : > { %588 = vrot.lane.b32.xlu1 %v7986_v0, %s7766_s14 }
 0x24a   : > { %678 = vrot.lane.b32.xlu0 %v8007_v15, %s13925_s15 }
 0x24d   : > { %592 = vrot.lane.b32.xlu1 %v8001_v10, %s7766_s14 }
 0x24e   : > { %682 = vrot.lane.b32.xlu0 %v8015_v22, %s13925_s15 }
 0x251   : > { %596 = vrot.lane.b32.xlu1 %v8013_v20, %s7766_s14 }
 0x252   : > { %753 = vrot.lane.b32.xlu0 %v7984_v62, %s13923_s16 }
 0x255   : > { %600 = vrot.lane.b32.xlu1 %v8025_v27, %s7766_s14  ;;  %s13873_s14 = smov 31  }
 0x256   : > { %758 = vrot.lane.b32.xlu0 %v7995_v4, %s13923_s16 }
 0x259   : > { %672 = vrot.lane.b32.xlu1 %v7986_v0, %s13925_s15 }
 0x25a   : > { %762 = vrot.lane.b32.xlu0 %v8007_v15, %s13923_s16 }
 0x25d   : > { %676 = vrot.lane.b32.xlu1 %v8001_v10, %s13925_s15 }
 0x25e   : > { %766 = vrot.lane.b32.xlu0 %v8015_v22, %s13923_s16 }
 0x261   : > { %680 = vrot.lane.b32.xlu1 %v8013_v20, %s13925_s15 }
 0x262   : > { %837 = vrot.lane.b32.xlu0 %v7984_v62, %s13921_s17 }
 0x265   : > { %684 = vrot.lane.b32.xlu1 %v8025_v27, %s13925_s15  ;;  %s8922_s15 = sld [smem:[#allocation2 + $0x24]] }
 0x266   : > { %842 = vrot.lane.b32.xlu0 %v7995_v4, %s13921_s17 }
 0x269   : > { %756 = vrot.lane.b32.xlu1 %v7986_v0, %s13923_s16 }
 0x26a   : > { %846 = vrot.lane.b32.xlu0 %v8007_v15, %s13921_s17 }
 0x26d   : > { %760 = vrot.lane.b32.xlu1 %v8001_v10, %s13923_s16 }
 0x26e   : > { %850 = vrot.lane.b32.xlu0 %v8015_v22, %s13921_s17 }
 0x271   : > { %764 = vrot.lane.b32.xlu1 %v8013_v20, %s13923_s16 }
 0x272   : > { %921 = vrot.lane.b32.xlu0 %v7984_v62, %s13919_s18 }
 0x275   : > { %768 = vrot.lane.b32.xlu1 %v8025_v27, %s13923_s16  ;;  %s8920_s16 = sld [smem:[#allocation2 + $0x8]] }
 0x276   : > { %926 = vrot.lane.b32.xlu0 %v7995_v4, %s13919_s18 }
 0x277   : > { %v4013_v28 = vpop.permute.xlu1 %4012 }
 0x278   : > { %v4003_v29 = vpop.permute.xlu0 %4002 }
 0x279   : > { %840 = vrot.lane.b32.xlu1 %v7986_v0, %s13921_s17  ;;  %v4034_v55 = vsel %vm518_vm1, %v4003_v29, %v4013_v28 }
 0x27a   : > { %930 = vrot.lane.b32.xlu0 %v8007_v15, %s13919_s18 }
 0x27b   : > { %v4017_v32 = vpop.permute.xlu1 %4016 }
 0x27c   : > { %v4015_v33 = vpop.permute.xlu0 %4014 }
 0x27d   : > { %844 = vrot.lane.b32.xlu1 %v8001_v10, %s13921_s17  ;;  %v4026_v42 = vsel %vm518_vm1, %v4013_v28, %v4015_v33  ;;  %v4027_v53 = vsel %vm518_vm1, %v4015_v33, %v4017_v32  ;;  %v14330_v33 = vmov 0 }
 0x27e   : > { %934 = vrot.lane.b32.xlu0 %v8015_v22, %s13919_s18  ;;  %v4036_v45 = vcombine.low %v4034_v55, %v4026_v42  ;;  %v6278_v60 = vcombine.low %v4026_v42, %v4027_v53  ;;  %v14331_v33 = vsel %vm8128_vm8, 4294967295, %v14330_v33  ;;  %v14333_v42 = vmov 0 }
 0x27f   : > { %v4021_v49 = vpop.permute.xlu1 %4020  ;;  %14332 = vst [vmem:[#allocation22_spill] sm:$0xff] %v14331_v33  ;;  %v14334_v42 = vsel %vm8137_vm9, 4294967295, %v14333_v42 }
 0x280   : > { %v4019_v43 = vpop.permute.xlu0 %4018  ;;  %v4046_v9 = vrot.slane %v4036_v45, %v8107_v58  ;;  %v6288_v12 = vrot.slane %v6278_v60, %v8107_v58  ;;  %14335 = vst [vmem:[#allocation23_spill] sm:$0xff] %v14334_v42 }
 0x281   : > { %v4028_v56 = vsel %vm518_vm1, %v4017_v32, %v4019_v43  ;;  %v4029_v57 = vsel %vm518_vm1, %v4019_v43, %v4021_v49  ;;  %848 = vrot.lane.b32.xlu1 %v8013_v20, %s13921_s17 }
 0x282   : > { %v4037_v59 = vcombine.low %v4027_v53, %v4028_v56  ;;  %v6279_v46 = vcombine.low %v4028_v56, %v4029_v57  ;;  %1005 = vrot.lane.b32.xlu0 %v7984_v62, %s13917_s25 }
 0x283   : > { %v4025_v63 = vpop.permute.xlu1 %4024 }
 0x284   : > { %v4053_v52 = vrot.slane %v4037_v59, %v8107_v58  ;;  %v4023_v1 = vpop.permute.xlu0 %4022  ;;  %v4032_v2 = vsel %vm518_vm1, %v4025_v63, %v4003_v29  ;;  %v6295_v3 = vrot.slane %v6279_v46, %v8107_v58 }
 0x285   : > { %v4030_v5 = vsel %vm518_vm1, %v4021_v49, %v4023_v1  ;;  %v4031_v7 = vsel %vm518_vm1, %v4023_v1, %v4025_v63  ;;  %v6281_v8 = vcombine.low %v4032_v2, %v4034_v55  ;;  %852 = vrot.lane.b32.xlu1 %v8025_v27, %s13921_s17  ;;  %s13957_s17 = smov 127  }
 0x286   : > { %v4038_v48 = vcombine.low %v4029_v57, %v4030_v5  ;;  %v4039_v11 = vcombine.low %v4031_v7, %v4032_v2  ;;  %1010 = vrot.lane.b32.xlu0 %v7995_v4, %s13917_s25  ;;  %v6280_v16 = vcombine.low %v4030_v5, %v4031_v7  ;;  %v4068_v28 = vcombine.low %v4046_v9, %v4053_v52 }
 0x287   : > { %v6309_v19 = vrot.slane %v6281_v8, %v8107_v58  ;;  %v4095_v24 = vpop.permute.xlu1 %4094  ;;  %v6310_v32 = vcombine.low %v6288_v12, %v6295_v3 }
 0x288   : > { %v4060_v29 = vrot.slane %v4038_v48, %v8107_v58  ;;  %v4067_v30 = vrot.slane %v4039_v11, %v8107_v58  ;;  %v4092_v31 = vpop.permute.xlu0 %4091  ;;  %v6302_v41 = vrot.slane %v6280_v16, %v8107_v58  ;;  %v4076_v55 = vrot.slane %v4068_v28, %v8107_v58 }
 0x289   : > { %924 = vrot.lane.b32.xlu1 %v7986_v0, %s13919_s18  ;;  %v6318_v57 = vrot.slane %v6310_v32, %v8107_v58  ;;  %v4116_v3 = vsel %vm602_vm13, %v4092_v31, %v4095_v24  ;;  %v442_v11 = vadd.s32 4294967294, %v8090_v47 }
 0x28a   : > { %v4069_v49 = vcombine.low %v4060_v29, %v4067_v30  ;;  %1014 = vrot.lane.b32.xlu0 %v8007_v15, %s13917_s25  ;;  %v6311_v53 = vcombine.low %v6302_v41, %v6309_v19 }
 0x28b   : > { %v4099_v43 = vpop.permute.xlu1 %4098  ;;  %vm443_vm14 = vcmp.ge.s32.totalorder %v442_v11, 0  ;;  %vm444_vm15 = vcmp.lt.s32.totalorder %v442_v11, 32 }
 0x28c   : > { %v4083_v56 = vrot.slane %v4069_v49, %v8107_v58  ;;  %v4097_v54 = vpop.permute.xlu0 %4096  ;;  %v6325_v45 = vrot.slane %v6311_v53, %v8107_v58  ;;  %vm8210_vm0 = vmand %vm443_vm14, %vm444_vm15 }
 0x28d   : > { %928 = vrot.lane.b32.xlu1 %v8001_v10, %s13919_s18  ;;  %v4108_v60 = vsel %vm602_vm13, %v4095_v24, %v4097_v54  ;;  %v4109_v52 = vsel %vm602_vm13, %v4097_v54, %v4099_v43  ;;  %vm612_vm2 = vmand %vm8137_vm9, %vm8210_vm0 }
 0x28e   : > { %v4084_v59 = vcombine.low %v4076_v55, %v4083_v56  ;;  %1018 = vrot.lane.b32.xlu0 %v8015_v22, %s13917_s25  ;;  %v6326_v46 = vcombine.low %v6318_v57, %v6325_v45  ;;  %v4118_v8 = vcombine.low %v4116_v3, %v4108_v60  ;;  %v6333_v12 = vcombine.low %v4108_v60, %v4109_v52  ;;  %vm2881_vm3 = vmand %vm8144_vm10, %vm8210_vm0 }
 0x28f   : > { %v4103_v61 = vpop.permute.xlu1 %4102  ;;  %vm8722_vm14 = vmand %vm450_vm4, %vm451_vm5 }
 0x290   : > { %v8170_v63 = vsel %vm528_vm11, %v4084_v59, 0.0  ;;  %v4101_v1 = vpop.permute.xlu0 %4100  ;;  %v8178_v2 = vsel %vm2825_vm12, %v6326_v46, 0.0  ;;  %v4128_v49 = vrot.slane %v4118_v8, %v8107_v58  ;;  %vm8734_vm15 = vmand %vm477_vm6, %vm478_vm7 }
 0x291   : > { %14339 = vst [vmem:[#allocation25_spill] sm:$0xff] %v8170_v63  ;;  %14340 = vst [vmem:[#allocation26_spill] sm:$0xff] %v8178_v2  ;;  %v4110_v5 = vsel %vm602_vm13, %v4099_v43, %v4101_v1  ;;  %v4111_v7 = vsel %vm602_vm13, %v4101_v1, %v4103_v61  ;;  %932 = vrot.lane.b32.xlu1 %v8013_v20, %s13919_s18 }
 0x292   : > { %v4119_v9 = vcombine.low %v4109_v52, %v4110_v5  ;;  %v6334_v48 = vcombine.low %v4110_v5, %v4111_v7  ;;  %1089 = vrot.lane.b32.xlu0 %v7984_v62, %s13915_s26  ;;  %v14343_v52 = vmov 0  ;;  %vm13938_vm4 = vmand %vm8734_vm15, %vm8722_vm14 }
 0x293   : > { %v4107_v16 = vpop.permute.xlu1 %4106  ;;  %v14344_v52 = vsel %vm8210_vm0, 4294967295, %v14343_v52 }
 0x294   : > { %v4135_v19 = vrot.slane %v4119_v9, %v8107_v58  ;;  %v4105_v24 = vpop.permute.xlu0 %4104  ;;  %v4114_v28 = vsel %vm602_vm13, %v4107_v16, %v4092_v31  ;;  %v6350_v29 = vrot.slane %v6334_v48, %v8107_v58  ;;  %v6343_v31 = vrot.slane %v6333_v12, %v8107_v58  ;;  %14345 = vst [vmem:[#allocation29_spill] sm:$0xff] %v14344_v52 }
 0x295   : > { %v4112_v30 = vsel %vm602_vm13, %v4103_v61, %v4105_v24  ;;  %v4113_v32 = vsel %vm602_vm13, %v4105_v24, %v4107_v16  ;;  %v6336_v41 = vcombine.low %v4114_v28, %v4116_v3  ;;  %936 = vrot.lane.b32.xlu1 %v8025_v27, %s13919_s18  ;;  %s9014_s18 = sld [smem:[#allocation2 + $0x9]] }
 0x296   : > { %v4120_v53 = vcombine.low %v4111_v7, %v4112_v30  ;;  %v4121_v43 = vcombine.low %v4113_v32, %v4114_v28  ;;  %1094 = vrot.lane.b32.xlu0 %v7995_v4, %s13915_s26  ;;  %v6335_v55 = vcombine.low %v4112_v30, %v4113_v32  ;;  %v4150_v57 = vcombine.low %v4128_v49, %v4135_v19 }
 0x297   : > { %v6364_v56 = vrot.slane %v6336_v41, %v8107_v58  ;;  %v8200_v54 = vpop.permute.xlu1 %4176  ;;  %v6365_v60 = vcombine.low %v6343_v31, %v6350_v29 }
 0x298   : > { %14341 = vst [vmem:[#allocation27_spill] sm:$0xff] %v8200_v54  ;;  %v4142_v45 = vrot.slane %v4120_v53, %v8107_v58  ;;  %v4149_v59 = vrot.slane %v4121_v43, %v8107_v58  ;;  %v8204_v46 = vpop.permute.xlu0 %4173  ;;  %v6357_v61 = vrot.slane %v6335_v55, %v8107_v58  ;;  %v4158_v7 = vrot.slane %v4150_v57, %v8107_v58 }
 0x299   : > { %14342 = vst [vmem:[#allocation28_spill] sm:$0xff] %v8204_v46  ;;  %1008 = vrot.lane.b32.xlu1 %v7986_v0, %s13917_s25  ;;  %v6373_v48 = vrot.slane %v6365_v60, %v8107_v58 }
 0x29a   : > { %v4151_v1 = vcombine.low %v4142_v45, %v4149_v59  ;;  %1098 = vrot.lane.b32.xlu0 %v8007_v15, %s13915_s26  ;;  %v6366_v3 = vcombine.low %v6357_v61, %v6364_v56 }
 0x29b   : > { %v8216_v5 = vpop.permute.xlu1 %4180 }
 0x29c   : > { %14346 = vst [vmem:[#allocation30_spill] sm:$0xff] %v8216_v5  ;;  %v4165_v8 = vrot.slane %v4151_v1, %v8107_v58  ;;  %v8220_v9 = vpop.permute.xlu0 %4178  ;;  %v6380_v11 = vrot.slane %v6366_v3, %v8107_v58 }
 0x29d   : > { %14347 = vst [vmem:[#allocation31_spill] sm:$0xff] %v8220_v9  ;;  %1012 = vrot.lane.b32.xlu1 %v8001_v10, %s13917_s25 }
 0x29e   : > { %v4166_v12 = vcombine.low %v4158_v7, %v4165_v8  ;;  %1102 = vrot.lane.b32.xlu0 %v8015_v22, %s13915_s26  ;;  %v6381_v16 = vcombine.low %v6373_v48, %v6380_v11 }
 0x29f   : > { %v8236_v19 = vpop.permute.xlu1 %494 }
 0x2a0   : > { %v8243_v24 = vsel %vm612_vm2, %v4166_v12, 0.0  ;;  %v8245_v28 = vpop.permute.xlu0 %504  ;;  %v8252_v29 = vsel %vm2881_vm3, %v6381_v16, 0.0 }
 0x2a1   : > { %14348 = vst [vmem:[#allocation32_spill] sm:$0xff] %v8243_v24  ;;  %14349 = vst [vmem:[#allocation33_spill] sm:$0xff] %v8252_v29  ;;  %1016 = vrot.lane.b32.xlu1 %v8013_v20, %s13917_s25 }
 0x2a2   : > { %1173 = vrot.lane.b32.xlu0 %v7984_v62, %s13913_s27 }
 0x2a3   : > { %v8258_v30 = vpop.permute.xlu1 %506 }
 0x2a4   : > { %v8260_v32 = vpop.permute.xlu0 %585 }
 0x2a5   : > { %1020 = vrot.lane.b32.xlu1 %v8025_v27, %s13917_s25  ;;  %s8908_s25 = sld [smem:[#allocation2 + $0x23]] }
 0x2a6   : > { %1178 = vrot.lane.b32.xlu0 %v7995_v4, %s13913_s27 }
 0x2a7   : > { %v8266_v41 = vpop.permute.xlu1 %508 }
 0x2a8   : > { %v8268_v49 = vpop.permute.xlu0 %590 }
 0x2a9   : > { %1092 = vrot.lane.b32.xlu1 %v7986_v0, %s13915_s26 }
 0x2aa   : > { %1182 = vrot.lane.b32.xlu0 %v8007_v15, %s13913_s27 }
 0x2ab   : > { %v8274_v53 = vpop.permute.xlu1 %510 }
 0x2ac   : > { %v8276_v43 = vpop.permute.xlu0 %594 }
 0x2ad   : > { %1096 = vrot.lane.b32.xlu1 %v8001_v10, %s13915_s26 }
 0x2ae   : > { %1186 = vrot.lane.b32.xlu0 %v8015_v22, %s13913_s27 }
 0x2af   : > { %v8282_v31 = vpop.permute.xlu1 %512 }
 0x2b0   : > { %v8284_v55 = vpop.permute.xlu0 %598 }
 0x2b1   : > { %1100 = vrot.lane.b32.xlu1 %v8013_v20, %s13915_s26 }
 0x2b2   : > { %1257 = vrot.lane.b32.xlu0 %v7984_v62, %s13908_s28 }
 0x2b3   : > { %v8290_v56 = vpop.permute.xlu1 %514 }
 0x2b4   : > { %v8292_v57 = vpop.permute.xlu0 %669 }
 0x2b5   : > { %1104 = vrot.lane.b32.xlu1 %v8025_v27, %s13915_s26  ;;  %s8906_s26 = sld [smem:[#allocation2 + $0x7]] }
 0x2b6   : > { %1262 = vrot.lane.b32.xlu0 %v7995_v4, %s13908_s28 }
 0x2b7   : > { %v8298_v45 = vpop.permute.xlu1 %516 }
 0x2b8   : > { %v8300_v59 = vpop.permute.xlu0 %674 }
 0x2b9   : > { %1176 = vrot.lane.b32.xlu1 %v7986_v0, %s13913_s27 }
 0x2ba   : > { %1266 = vrot.lane.b32.xlu0 %v8007_v15, %s13908_s28 }
 0x2bb   : > { %v8306_v60 = vpop.permute.xlu1 %588 }
 0x2bc   : > { %v8308_v61 = vpop.permute.xlu0 %678 }
 0x2bd   : > { %1180 = vrot.lane.b32.xlu1 %v8001_v10, %s13913_s27 }
 0x2be   : > { %1270 = vrot.lane.b32.xlu0 %v8015_v22, %s13908_s28 }
 0x2bf   : > { %v8314_v1 = vpop.permute.xlu1 %592 }
 0x2c0   : > { %v8316_v3 = vpop.permute.xlu0 %682 }
 0x2c1   : > { %1184 = vrot.lane.b32.xlu1 %v8013_v20, %s13913_s27 }
 0x2c2   : > { %1341 = vrot.lane.b32.xlu0 %v7984_v62, %s13906_s30 }
 0x2c3   : > { %v8322_v7 = vpop.permute.xlu1 %596 }
 0x2c4   : > { %v8324_v8 = vpop.permute.xlu0 %753 }
 0x2c5   : > { %1188 = vrot.lane.b32.xlu1 %v8025_v27, %s13913_s27  ;;  %s8886_s27 = sld [smem:[#allocation2 + $0x22]] }
 0x2c6   : > { %1346 = vrot.lane.b32.xlu0 %v7995_v4, %s13906_s30 }
 0x2c7   : > { %v8330_v48 = vpop.permute.xlu1 %600 }
 0x2c8   : > { %v8332_v11 = vpop.permute.xlu0 %758 }
 0x2c9   : > { %1260 = vrot.lane.b32.xlu1 %v7986_v0, %s13908_s28 }
 0x2ca   : > { %1350 = vrot.lane.b32.xlu0 %v8007_v15, %s13906_s30 }
 0x2cb   : > { %v8338_v12 = vpop.permute.xlu1 %672 }
 0x2cc   : > { %v8340_v16 = vpop.permute.xlu0 %762 }
 0x2cd   : > { %1264 = vrot.lane.b32.xlu1 %v8001_v10, %s13908_s28 }
 0x2ce   : > { %1354 = vrot.lane.b32.xlu0 %v8015_v22, %s13906_s30 }
 0x2cf   : > { %v8346_v39 = vpop.permute.xlu1 %676 }
 0x2d0   : > { %v8348_v40 = vpop.permute.xlu0 %766 }
 0x2d1   : > { %1268 = vrot.lane.b32.xlu1 %v8013_v20, %s13908_s28 }
 0x2d2   : > { %1425 = vrot.lane.b32.xlu0 %v7984_v62, %s13904_s7 }
 0x2d3   : > { %v8354_v44 = vpop.permute.xlu1 %680 }
 0x2d4   : > { %v8356_v38 = vpop.permute.xlu0 %837 }
 0x2d5   : > { %1272 = vrot.lane.b32.xlu1 %v8025_v27, %s13908_s28  ;;  %s8868_s28 = sld [smem:[#allocation2 + $0x21]] }
 0x2d6   : > { %1430 = vrot.lane.b32.xlu0 %v7995_v4, %s13904_s7 }
 0x2d7   : > { %v8362_v37 = vpop.permute.xlu1 %684 }
 0x2d8   : > { %v8364_v36 = vpop.permute.xlu0 %842 }
 0x2d9   : > { %14350 = vst [vmem:[#allocation34_spill] sm:$0xff] %v8364_v36  ;;  %1344 = vrot.lane.b32.xlu1 %v7986_v0, %s13906_s30 }
 0x2da   : > { %1434 = vrot.lane.b32.xlu0 %v8007_v15, %s13904_s7 }
 0x2db   : > { %v8370_v35 = vpop.permute.xlu1 %756 }
 0x2dc   : > { %v8372_v34 = vpop.permute.xlu0 %846 }
 0x2dd   : > { %14351 = vst [vmem:[#allocation35_spill] sm:$0xff] %v8372_v34  ;;  %1348 = vrot.lane.b32.xlu1 %v8001_v10, %s13906_s30 }
 0x2de   : > { %1438 = vrot.lane.b32.xlu0 %v8015_v22, %s13904_s7 }
 0x2df   : > { %v8378_v17 = vpop.permute.xlu1 %760 }
 0x2e0   : > { %v8380_v29 = vpop.permute.xlu0 %850 }
 0x2e1   : > { %1352 = vrot.lane.b32.xlu1 %v8013_v20, %s13906_s30 }
 0x2e2   : > { %1509 = vrot.lane.b32.xlu0 %v7984_v62, %s13902_s8 }
 0x2e3   : > { %v8386_v2 = vpop.permute.xlu1 %764 }
 0x2e4   : > { %v8388_v5 = vpop.permute.xlu0 %921 }
 0x2e5   : > { %14352 = vst [vmem:[#allocation36_spill] sm:$0xff] %v8388_v5  ;;  %1356 = vrot.lane.b32.xlu1 %v8025_v27, %s13906_s30  ;;  %s8862_s30 = sld [smem:[#allocation2 + $0x5]] }
 0x2e6   : > { %1514 = vrot.lane.b32.xlu0 %v7995_v4, %s13902_s8 }
 0x2e7   : > { %v8394_v54 = vpop.permute.xlu1 %768 }
 0x2e8   : > { %v8396_v9 = vpop.permute.xlu0 %926 }
 0x2e9   : > { %14353 = vst [vmem:[#allocation37_spill] sm:$0xff] %v8396_v9  ;;  %1428 = vrot.lane.b32.xlu1 %v7986_v0, %s13904_s7 }
 0x2ea   : > { %1518 = vrot.lane.b32.xlu0 %v8007_v15, %s13902_s8 }
 0x2eb   : > { %v8402_v46 = vpop.permute.xlu1 %840 }
 0x2ec   : > { %14354 = vst [vmem:[#allocation38_spill] sm:$0xff] %v8402_v46  ;;  %v8404_v24 = vpop.permute.xlu0 %930 }
 0x2ed   : > { %14355 = vst [vmem:[#allocation39_spill] sm:$0xff] %v8404_v24  ;;  %1432 = vrot.lane.b32.xlu1 %v8001_v10, %s13904_s7 }
 0x2ee   : > { %1522 = vrot.lane.b32.xlu0 %v8015_v22, %s13902_s8 }
 0x2ef   : > { %v8410_v63 = vpop.permute.xlu1 %844 }
 0x2f0   : > { %v8412_v14 = vpop.permute.xlu0 %934 }
 0x2f1   : > { %14356 = vst [vmem:[#allocation40_spill] sm:$0xff] %v8412_v14  ;;  %1436 = vrot.lane.b32.xlu1 %v8013_v20, %s13904_s7 }
 0x2f2   : > { %1593 = vrot.lane.b32.xlu0 %v7984_v62, %s13900_s9 }
 0x2f3   : > { %v8418_v6 = vpop.permute.xlu1 %848 }
 0x2f4   : > { %14357 = vst [vmem:[#allocation41_spill] sm:$0xff] %v8418_v6  ;;  %v8420_v25 = vpop.permute.xlu0 %1005 }
 0x2f5   : > { %14358 = vst [vmem:[#allocation42_spill] sm:$0xff] %v8420_v25  ;;  %1440 = vrot.lane.b32.xlu1 %v8025_v27, %s13904_s7  ;;  %s8853_s7 = sld [smem:[#allocation2 + $0x20]] }
 0x2f6   : > { %1598 = vrot.lane.b32.xlu0 %v7995_v4, %s13900_s9 }
 0x2f7   : > { %v8426_v21 = vpop.permute.xlu1 %852 }
 0x2f8   : > { %v8428_v18 = vpop.permute.xlu0 %1010 }
 0x2f9   : > { %14359 = vst [vmem:[#allocation43_spill] sm:$0xff] %v8428_v18  ;;  %1512 = vrot.lane.b32.xlu1 %v7986_v0, %s13902_s8 }
 0x2fa   : > { %1602 = vrot.lane.b32.xlu0 %v8007_v15, %s13900_s9 }
 0x2fb   : > { %v8434_v13 = vpop.permute.xlu1 %924 }
 0x2fc   : > { %14360 = vst [vmem:[#allocation44_spill] sm:$0xff] %v8434_v13  ;;  %v8436_v26 = vpop.permute.xlu0 %1014 }
 0x2fd   : > { %14361 = vst [vmem:[#allocation45_spill] sm:$0xff] %v8436_v26  ;;  %1516 = vrot.lane.b32.xlu1 %v8001_v10, %s13902_s8 }
 0x2fe   : > { %1606 = vrot.lane.b32.xlu0 %v8015_v22, %s13900_s9 }
 0x2ff   : > { %v8442_v23 = vpop.permute.xlu1 %928 }
 0x300   : > { %14362 = vst [vmem:[#allocation46_spill] sm:$0xff] %v8442_v23  ;;  %v8444_v25 = vpop.permute.xlu0 %1018 }
 0x301   : > { %14363 = vst [vmem:[#allocation47_spill] sm:$0xff] %v8444_v25  ;;  %1520 = vrot.lane.b32.xlu1 %v8013_v20, %s13902_s8 }
 0x302   : > { %1677 = vrot.lane.b32.xlu0 %v7984_v62, %s13898_s10 }
 0x303   : > { %v8450_v18 = vpop.permute.xlu1 %932 }
 0x304   : > { %14364 = vst [vmem:[#allocation48_spill] sm:$0xff] %v8450_v18  ;;  %v8452_v26 = vpop.permute.xlu0 %1089 }
 0x305   : > { %14365 = vst [vmem:[#allocation49_spill] sm:$0xff] %v8452_v26  ;;  %1524 = vrot.lane.b32.xlu1 %v8025_v27, %s13902_s8  ;;  %s13927_s8 = smov 1  }
 0x306   : > { %1682 = vrot.lane.b32.xlu0 %v7995_v4, %s13898_s10 }
 0x307   : > { %v8458_v14 = vpop.permute.xlu1 %936 }
 0x308   : > { %14366 = vst [vmem:[#allocation50_spill] sm:$0xff] %v8458_v14  ;;  %v8460_v25 = vpop.permute.xlu0 %1094 }
 0x309   : > { %14367 = vst [vmem:[#allocation51_spill] sm:$0xff] %v8460_v25  ;;  %1596 = vrot.lane.b32.xlu1 %v7986_v0, %s13900_s9 }
 0x30a   : > { %1686 = vrot.lane.b32.xlu0 %v8007_v15, %s13898_s10 }
 0x30b   : > { %v8466_v24 = vpop.permute.xlu1 %1008 }
 0x30c   : > { %14368 = vst [vmem:[#allocation52_spill] sm:$0xff] %v8466_v24  ;;  %v8468_v18 = vpop.permute.xlu0 %1098 }
 0x30d   : > { %14369 = vst [vmem:[#allocation53_spill] sm:$0xff] %v8468_v18  ;;  %1600 = vrot.lane.b32.xlu1 %v8001_v10, %s13900_s9 }
 0x30e   : > { %1690 = vrot.lane.b32.xlu0 %v8015_v22, %s13898_s10 }
 0x30f   : > { %v8474_v26 = vpop.permute.xlu1 %1012 }
 0x310   : > { %14370 = vst [vmem:[#allocation54_spill] sm:$0xff] %v8474_v26  ;;  %v8476_v14 = vpop.permute.xlu0 %1102 }
 0x311   : > { %14371 = vst [vmem:[#allocation55_spill] sm:$0xff] %v8476_v14  ;;  %1604 = vrot.lane.b32.xlu1 %v8013_v20, %s13900_s9 }
 0x312   : > { %1761 = vrot.lane.b32.xlu0 %v7984_v62, %s13896_s11 }
 0x313   : > { %v8482_v25 = vpop.permute.xlu1 %1016 }
 0x314   : > { %14372 = vst [vmem:[#allocation56_spill] sm:$0xff] %v8482_v25  ;;  %v8484_v18 = vpop.permute.xlu0 %1173 }
 0x315   : > { %14373 = vst [vmem:[#allocation57_spill] sm:$0xff] %v8484_v18  ;;  %1608 = vrot.lane.b32.xlu1 %v8025_v27, %s13900_s9  ;;  %s8847_s9 = sld [smem:[#allocation2 + $0x4]] }
 0x316   : > { %1766 = vrot.lane.b32.xlu0 %v7995_v4, %s13896_s11 }
 0x317   : > { %v8490_v26 = vpop.permute.xlu1 %1020 }
 0x318   : > { %14374 = vst [vmem:[#allocation58_spill] sm:$0xff] %v8490_v26  ;;  %v8492_v14 = vpop.permute.xlu0 %1178 }
 0x319   : > { %14375 = vst [vmem:[#allocation59_spill] sm:$0xff] %v8492_v14  ;;  %1680 = vrot.lane.b32.xlu1 %v7986_v0, %s13898_s10 }
 0x31a   : > { %1770 = vrot.lane.b32.xlu0 %v8007_v15, %s13896_s11 }
 0x31b   : > { %v8498_v24 = vpop.permute.xlu1 %1092 }
 0x31c   : > { %14376 = vst [vmem:[#allocation60_spill] sm:$0xff] %v8498_v24  ;;  %v8500_v25 = vpop.permute.xlu0 %1182 }
 0x31d   : > { %14377 = vst [vmem:[#allocation61_spill] sm:$0xff] %v8500_v25  ;;  %1684 = vrot.lane.b32.xlu1 %v8001_v10, %s13898_s10 }
 0x31e   : > { %1774 = vrot.lane.b32.xlu0 %v8015_v22, %s13896_s11 }
 0x31f   : > { %v8506_v18 = vpop.permute.xlu1 %1096 }
 0x320   : > { %14378 = vst [vmem:[#allocation62_spill] sm:$0xff] %v8506_v18  ;;  %v8508_v26 = vpop.permute.xlu0 %1186 }
 0x321   : > { %14379 = vst [vmem:[#allocation63_spill] sm:$0xff] %v8508_v26  ;;  %1688 = vrot.lane.b32.xlu1 %v8013_v20, %s13898_s10 }
 0x322   : > { %1845 = vrot.lane.b32.xlu0 %v7984_v62, %s13891_s12 }
 0x323   : > { %v8514_v14 = vpop.permute.xlu1 %1100 }
 0x324   : > { %14380 = vst [vmem:[#allocation64_spill] sm:$0xff] %v8514_v14  ;;  %v8516_v25 = vpop.permute.xlu0 %1257 }
 0x325   : > { %14381 = vst [vmem:[#allocation65_spill] sm:$0xff] %v8516_v25  ;;  %1692 = vrot.lane.b32.xlu1 %v8025_v27, %s13898_s10  ;;  %s8840_s10 = sld [smem:[#allocation2 + $0x1f]] }
 0x326   : > { %1850 = vrot.lane.b32.xlu0 %v7995_v4, %s13891_s12 }
 0x327   : > { %v8522_v24 = vpop.permute.xlu1 %1104 }
 0x328   : > { %14382 = vst [vmem:[#allocation66_spill] sm:$0xff] %v8522_v24  ;;  %v8524_v26 = vpop.permute.xlu0 %1262 }
 0x329   : > { %14383 = vst [vmem:[#allocation67_spill] sm:$0xff] %v8524_v26  ;;  %1764 = vrot.lane.b32.xlu1 %v7986_v0, %s13896_s11 }
 0x32a   : > { %1854 = vrot.lane.b32.xlu0 %v8007_v15, %s13891_s12 }
 0x32b   : > { %v8530_v18 = vpop.permute.xlu1 %1176 }
 0x32c   : > { %14384 = vst [vmem:[#allocation68_spill] sm:$0xff] %v8530_v18  ;;  %v8532_v14 = vpop.permute.xlu0 %1266 }
 0x32d   : > { %14385 = vst [vmem:[#allocation69_spill] sm:$0xff] %v8532_v14  ;;  %1768 = vrot.lane.b32.xlu1 %v8001_v10, %s13896_s11 }
 0x32e   : > { %1858 = vrot.lane.b32.xlu0 %v8015_v22, %s13891_s12 }
 0x32f   : > { %v8538_v25 = vpop.permute.xlu1 %1180 }
 0x330   : > { %14386 = vst [vmem:[#allocation70_spill] sm:$0xff] %v8538_v25  ;;  %v8540_v24 = vpop.permute.xlu0 %1270 }
 0x331   : > { %14387 = vst [vmem:[#allocation71_spill] sm:$0xff] %v8540_v24  ;;  %1772 = vrot.lane.b32.xlu1 %v8013_v20, %s13896_s11 }
 0x332   : > { %1929 = vrot.lane.b32.xlu0 %v7984_v62, %s13875_s13 }
 0x333   : > { %v8546_v26 = vpop.permute.xlu1 %1184 }
 0x334   : > { %14388 = vst [vmem:[#allocation72_spill] sm:$0xff] %v8546_v26  ;;  %v8548_v14 = vpop.permute.xlu0 %1341 }
 0x335   : > { %14389 = vst [vmem:[#allocation73_spill] sm:$0xff] %v8548_v14  ;;  %1776 = vrot.lane.b32.xlu1 %v8025_v27, %s13896_s11  ;;  %s8838_s11 = sld [smem:[#allocation2 + $0x3]] }
 0x336   : > { %1934 = vrot.lane.b32.xlu0 %v7995_v4, %s13875_s13 }
 0x337   : > { %v8554_v18 = vpop.permute.xlu1 %1188 }
 0x338   : > { %14390 = vst [vmem:[#allocation74_spill] sm:$0xff] %v8554_v18  ;;  %v8556_v24 = vpop.permute.xlu0 %1346 }
 0x339   : > { %14391 = vst [vmem:[#allocation75_spill] sm:$0xff] %v8556_v24  ;;  %1848 = vrot.lane.b32.xlu1 %v7986_v0, %s13891_s12 }
 0x33a   : > { %1938 = vrot.lane.b32.xlu0 %v8007_v15, %s13875_s13 }
 0x33b   : > { %v8562_v25 = vpop.permute.xlu1 %1260 }
 0x33c   : > { %14392 = vst [vmem:[#allocation76_spill] sm:$0xff] %v8562_v25  ;;  %v8564_v26 = vpop.permute.xlu0 %1350 }
 0x33d   : > { %14393 = vst [vmem:[#allocation77_spill] sm:$0xff] %v8564_v26  ;;  %1852 = vrot.lane.b32.xlu1 %v8001_v10, %s13891_s12 }
 0x33e   : > { %1942 = vrot.lane.b32.xlu0 %v8015_v22, %s13875_s13 }
 0x33f   : > { %v8570_v14 = vpop.permute.xlu1 %1264 }
 0x340   : > { %14394 = vst [vmem:[#allocation78_spill] sm:$0xff] %v8570_v14  ;;  %v8572_v18 = vpop.permute.xlu0 %1354 }
 0x341   : > { %14395 = vst [vmem:[#allocation79_spill] sm:$0xff] %v8572_v18  ;;  %1856 = vrot.lane.b32.xlu1 %v8013_v20, %s13891_s12 }
 0x342   : > { %2013 = vrot.lane.b32.xlu0 %v7984_v62, %s13873_s14 }
 0x343   : > { %v8578_v24 = vpop.permute.xlu1 %1268 }
 0x344   : > { %14396 = vst [vmem:[#allocation80_spill] sm:$0xff] %v8578_v24  ;;  %v8580_v26 = vpop.permute.xlu0 %1425 }
 0x345   : > { %14397 = vst [vmem:[#allocation81_spill] sm:$0xff] %v8580_v26  ;;  %1860 = vrot.lane.b32.xlu1 %v8025_v27, %s13891_s12  ;;  %s8827_s12 = sld [smem:[#allocation2 + $0x1e]] }
 0x346   : > { %2018 = vrot.lane.b32.xlu0 %v7995_v4, %s13873_s14 }
 0x347   : > { %v8586_v25 = vpop.permute.xlu1 %1272 }
 0x348   : > { %14398 = vst [vmem:[#allocation82_spill] sm:$0xff] %v8586_v25  ;;  %v8588_v18 = vpop.permute.xlu0 %1430 }
 0x349   : > { %14399 = vst [vmem:[#allocation83_spill] sm:$0xff] %v8588_v18  ;;  %1932 = vrot.lane.b32.xlu1 %v7986_v0, %s13875_s13 }
 0x34a   : > { %2022 = vrot.lane.b32.xlu0 %v8007_v15, %s13873_s14 }
 0x34b   : > { %v8594_v14 = vpop.permute.xlu1 %1344 }
 0x34c   : > { %14400 = vst [vmem:[#allocation84_spill] sm:$0xff] %v8594_v14  ;;  %v8596_v24 = vpop.permute.xlu0 %1434  ;;  %v14605_v51 = vld [vmem:[#allocation81_spill] sm:$0xff] }
 0x34d   : > { %14401 = vst [vmem:[#allocation85_spill] sm:$0xff] %v8596_v24  ;;  %1936 = vrot.lane.b32.xlu1 %v8001_v10, %s13875_s13 }
 0x34e   : > { %2026 = vrot.lane.b32.xlu0 %v8015_v22, %s13873_s14 }
 0x34f   : > { %v8602_v26 = vpop.permute.xlu1 %1348 }
 0x350   : > { %14402 = vst [vmem:[#allocation86_spill] sm:$0xff] %v8602_v26  ;;  %v8604_v25 = vpop.permute.xlu0 %1438 }
 0x351   : > { %14403 = vst [vmem:[#allocation87_spill] sm:$0xff] %v8604_v25  ;;  %1940 = vrot.lane.b32.xlu1 %v8013_v20, %s13875_s13 }
 0x352   : > { %2097 = vrot.lane.b32.xlu0 %v7984_v62, %s13871_s19 }
 0x353   : > { %v8610_v18 = vpop.permute.xlu1 %1352 }
 0x354   : > { %14404 = vst [vmem:[#allocation88_spill] sm:$0xff] %v8610_v18  ;;  %v8612_v24 = vpop.permute.xlu0 %1509 }
 0x355   : > { %14405 = vst [vmem:[#allocation89_spill] sm:$0xff] %v8612_v24  ;;  %1944 = vrot.lane.b32.xlu1 %v8025_v27, %s13875_s13  ;;  %s8738_s13 = sld [smem:[#allocation2 + $0x1]] }
 0x356   : > { %2102 = vrot.lane.b32.xlu0 %v7995_v4, %s13871_s19 }
 0x357   : > { %v8618_v14 = vpop.permute.xlu1 %1356 }
 0x358   : > { %14406 = vst [vmem:[#allocation90_spill] sm:$0xff] %v8618_v14  ;;  %v8620_v25 = vpop.permute.xlu0 %1514 }
 0x359   : > { %14407 = vst [vmem:[#allocation91_spill] sm:$0xff] %v8620_v25  ;;  %2016 = vrot.lane.b32.xlu1 %v7986_v0, %s13873_s14 }
 0x35a   : > { %2106 = vrot.lane.b32.xlu0 %v8007_v15, %s13871_s19 }
 0x35b   : > { %v8626_v26 = vpop.permute.xlu1 %1428 }
 0x35c   : > { %14408 = vst [vmem:[#allocation92_spill] sm:$0xff] %v8626_v26  ;;  %v8628_v18 = vpop.permute.xlu0 %1518 }
 0x35d   : > { %14409 = vst [vmem:[#allocation93_spill] sm:$0xff] %v8628_v18  ;;  %2020 = vrot.lane.b32.xlu1 %v8001_v10, %s13873_s14 }
 0x35e   : > { %2110 = vrot.lane.b32.xlu0 %v8015_v22, %s13871_s19 }
 0x35f   : > { %v8634_v24 = vpop.permute.xlu1 %1432 }
 0x360   : > { %14410 = vst [vmem:[#allocation94_spill] sm:$0xff] %v8634_v24  ;;  %v8636_v14 = vpop.permute.xlu0 %1522 }
 0x361   : > { %14411 = vst [vmem:[#allocation95_spill] sm:$0xff] %v8636_v14  ;;  %2024 = vrot.lane.b32.xlu1 %v8013_v20, %s13873_s14 }
 0x362   : > { %2181 = vrot.lane.b32.xlu0 %v7984_v62, %s13877_s20 }
 0x363   : > { %v8642_v25 = vpop.permute.xlu1 %1436 }
 0x364   : > { %14412 = vst [vmem:[#allocation96_spill] sm:$0xff] %v8642_v25  ;;  %v8644_v18 = vpop.permute.xlu0 %1593 }
 0x365   : > { %14413 = vst [vmem:[#allocation97_spill] sm:$0xff] %v8644_v18  ;;  %2028 = vrot.lane.b32.xlu1 %v8025_v27, %s13873_s14  ;;  %s8730_s14 = sld [smem:[#allocation2 + $0x1c]] }
 0x366   : > { %2186 = vrot.lane.b32.xlu0 %v7995_v4, %s13877_s20 }
 0x367   : > { %v8650_v24 = vpop.permute.xlu1 %1440 }
 0x368   : > { %14414 = vst [vmem:[#allocation98_spill] sm:$0xff] %v8650_v24  ;;  %v8652_v14 = vpop.permute.xlu0 %1598 }
 0x369   : > { %14415 = vst [vmem:[#allocation99_spill] sm:$0xff] %v8652_v14  ;;  %2100 = vrot.lane.b32.xlu1 %v7986_v0, %s13871_s19 }
 0x36a   : > { %2190 = vrot.lane.b32.xlu0 %v8007_v15, %s13877_s20 }
 0x36b   : > { %v8658_v26 = vpop.permute.xlu1 %1512 }
 0x36c   : > { %14416 = vst [vmem:[#allocation100_spill] sm:$0xff] %v8658_v26  ;;  %v8660_v25 = vpop.permute.xlu0 %1602  ;;  %v2520_v26 = vcombine.low %v8013_v20, %v8015_v22 }
 0x36d   : > { %14417 = vst [vmem:[#allocation101_spill] sm:$0xff] %v8660_v25  ;;  %2104 = vrot.lane.b32.xlu1 %v8001_v10, %s13871_s19  ;;  %v2519_v25 = vcombine.low %v8001_v10, %v8007_v15 }
 0x36e   : > { %2194 = vrot.lane.b32.xlu0 %v8015_v22, %s13877_s20  ;;  %v2542_v13 = vrot.slane %v2520_v26, %v8107_v58 }
 0x36f   : > { %v8666_v18 = vpop.permute.xlu1 %1516  ;;  %v2535_v5 = vrot.slane %v2519_v25, %v8107_v58 }
 0x370   : > { %14418 = vst [vmem:[#allocation102_spill] sm:$0xff] %v8666_v18  ;;  %v8668_v24 = vpop.permute.xlu0 %1606  ;;  %v2521_v18 = vcombine.low %v8025_v27, %v7984_v62 }
 0x371   : > { %14419 = vst [vmem:[#allocation103_spill] sm:$0xff] %v8668_v24  ;;  %2108 = vrot.lane.b32.xlu1 %v8013_v20, %s13871_s19  ;;  %v2518_v24 = vcombine.low %v7986_v0, %v7995_v4 }
 0x372   : > { %2265 = vrot.lane.b32.xlu0 %v7984_v62, %s13911_s23  ;;  %v2549_v9 = vrot.slane %v2521_v18, %v8107_v58 }
 0x373   : > { %v8674_v14 = vpop.permute.xlu1 %1520  ;;  %v2528_v46 = vrot.slane %v2518_v24, %v8107_v58  ;;  %v2569_v24 = vstv %s7597_s24  ;;  %s8804_s24 = sld [smem:[#allocation2 + $0x2]] }
 0x374   : > { %14420 = vst [vmem:[#allocation104_spill] sm:$0xff] %v8674_v14  ;;  %v8684_v23 = vpop.permute.xlu0 %1677  ;;  %v2551_v34 = vcombine.low %v2542_v13, %v2549_v9 }
 0x375   : > { %14421 = vst [vmem:[#allocation105_spill] sm:$0xff] %v8684_v23  ;;  %2112 = vrot.lane.b32.xlu1 %v8025_v27, %s13871_s19  ;;  %s8728_s19 = sld [smem:[#allocation2]] }
 0x376   : > { %2270 = vrot.lane.b32.xlu0 %v7995_v4, %s13911_s23  ;;  %v2565_v25 = vrot.slane %v2551_v34, %v8107_v58 }
 0x377   : > { %v8690_v14 = vpop.permute.xlu1 %1524 }
 0x378   : > { %14422 = vst [vmem:[#allocation106_spill] sm:$0xff] %v8690_v14  ;;  %v8696_v6 = vpop.permute.xlu0 %1682  ;;  %v2550_v14 = vcombine.low %v2528_v46, %v2535_v5  ;;  %v14428_v46 = vmov 0 }
 0x379   : > { %14423 = vst [vmem:[#allocation107_spill] sm:$0xff] %v8696_v6  ;;  %2184 = vrot.lane.b32.xlu1 %v7986_v0, %s13877_s20  ;;  %v14429_v46 = vsel %vm8722_vm14, 4294967295, %v14428_v46  ;;  %v523_v6 = vsel %vm518_vm1, %v8282_v31, %v8290_v56 }
 0x37a   : > { %2274 = vrot.lane.b32.xlu0 %v8007_v15, %s13911_s23  ;;  %v2558_v13 = vrot.slane %v2550_v14, %v8107_v58  ;;  %14430 = vst [vmem:[#allocation112_spill] sm:$0xff] %v14429_v46  ;;  %v14432_v14 = vmov 0 }
 0x37b   : > { %v8702_v23 = vpop.permute.xlu1 %1596  ;;  %v14433_v14 = vsel %vm8734_vm15, 4294967295, %v14432_v14 }
 0x37c   : > { %14424 = vst [vmem:[#allocation108_spill] sm:$0xff] %v8702_v23  ;;  %v8704_v36 = vpop.permute.xlu0 %1686  ;;  %14434 = vst [vmem:[#allocation114_spill] sm:$0xff] %v14433_v14  ;;  %v2566_v50 = vcombine.low %v2558_v13, %v2565_v25  ;;  %v525_v14 = vsel %vm518_vm1, %v8298_v45, %v8236_v19 }
 0x37d   : > { %14425 = vst [vmem:[#allocation109_spill] sm:$0xff] %v8704_v36  ;;  %2188 = vrot.lane.b32.xlu1 %v8001_v10, %s13877_s20 }
 0x37e   : > { %2278 = vrot.lane.b32.xlu0 %v8015_v22, %s13911_s23  ;;  %v2568_v25 = vsel %vm13938_vm4, %v2566_v50, 0.0  ;;  %vm13955_vm4 = vcmask 760832  }
 0x37f   : > { %v8712_v18 = vpop.permute.xlu1 %1600  ;;  %v8771_v50 = vmul.f32 %v2569_v24, %v2568_v25  ;;  %v519_v24 = vsel %vm518_vm1, %v8245_v28, %v8258_v30  ;;  %v520_v25 = vsel %vm518_vm1, %v8258_v30, %v8266_v41 }
 0x380   : > { %14426 = vst [vmem:[#allocation110_spill] sm:$0xff] %v8712_v18  ;;  %v8716_v26 = vpop.permute.xlu0 %1690  ;;  %v2826_v46 = vcombine.low %v519_v24, %v520_v25 }
 0x381   : > { %14427 = vst [vmem:[#allocation111_spill] sm:$0xff] %v8716_v26  ;;  %2192 = vrot.lane.b32.xlu1 %v8013_v20, %s13877_s20  ;;  %14438 = vst [vmem:[#allocation118_spill] sm:$0xff] %v8771_v50 }
 0x382   : > { %2349 = vrot.lane.b32.xlu0 %v7984_v62, %s13936_s29 }
 0x383   : > { %v8732_v34 = vpop.permute.xlu1 %1604 }
 0x384   : > { %14431 = vst [vmem:[#allocation113_spill] sm:$0xff] %v8732_v34  ;;  %v8740_v5 = vpop.permute.xlu0 %1761 }
 0x385   : > { %14435 = vst [vmem:[#allocation115_spill] sm:$0xff] %v8740_v5  ;;  %2196 = vrot.lane.b32.xlu1 %v8025_v27, %s13877_s20  ;;  %s8757_s20 = sld [smem:[#allocation2 + $0x1d]]  ;;  %v524_v5 = vsel %vm518_vm1, %v8290_v56, %v8298_v45  ;;  %v527_v45 = vsel %vm518_vm1, %v8236_v19, %v8245_v28  ;;  %v522_v56 = vsel %vm518_vm1, %v8274_v53, %v8282_v31 }
 0x386   : > { %2354 = vrot.lane.b32.xlu0 %v7995_v4, %s13936_s29  ;;  %v533_v26 = vcombine.low %v524_v5, %v525_v14  ;;  %v608_v19 = vsel %vm602_vm13, %v8284_v55, %v8330_v48  ;;  %v609_v28 = vsel %vm602_vm13, %v8330_v48, %v8260_v32  ;;  %v2828_v50 = vcombine.low %v523_v6, %v524_v5 }
 0x387   : > { %v8750_v9 = vpop.permute.xlu1 %1608  ;;  %v2829_v36 = vcombine.low %v525_v14, %v527_v45  ;;  %v605_v31 = vsel %vm602_vm13, %v8314_v1, %v8276_v43  ;;  %v606_v48 = vsel %vm602_vm13, %v8276_v43, %v8322_v7  ;;  %v530_v5 = vcombine.low %v527_v45, %v519_v24 }
 0x388   : > { %14436 = vst [vmem:[#allocation116_spill] sm:$0xff] %v8750_v9  ;;  %v8759_v13 = vpop.permute.xlu0 %1766  ;;  %v617_v9 = vcombine.low %v608_v19, %v609_v28  ;;  %v603_v43 = vsel %vm602_vm13, %v8306_v60, %v8268_v49 }
 0x389   : > { %14437 = vst [vmem:[#allocation117_spill] sm:$0xff] %v8759_v13  ;;  %2268 = vrot.lane.b32.xlu1 %v7986_v0, %s13911_s23  ;;  %v521_v13 = vsel %vm518_vm1, %v8266_v41, %v8274_v53  ;;  %v532_v41 = vcombine.low %v522_v56, %v523_v6  ;;  %v8813_v53 = vsel %vm602_vm13, %v8268_v49, %v8314_v1  ;;  %vm13968_vm1 = vcmask 793600  }
 0x38a   : > { %2358 = vrot.lane.b32.xlu0 %v8007_v15, %s13936_s29  ;;  %v531_v30 = vcombine.low %v520_v25, %v521_v13  ;;  %v607_v6 = vsel %vm602_vm13, %v8322_v7, %v8284_v55  ;;  %v561_v1 = vrot.slane %v533_v26, %v8107_v58  ;;  %v611_v55 = vsel %vm602_vm13, %v8260_v32, %v8306_v60 }
 0x38b   : > { %v8781_v34 = vpop.permute.xlu1 %1680  ;;  %v2850_v7 = vrot.slane %v2828_v50, %v8107_v58  ;;  %v615_v26 = vcombine.low %v8813_v53, %v605_v31  ;;  %v616_v45 = vcombine.low %v606_v48, %v607_v6  ;;  %v554_v49 = vrot.slane %v532_v41, %v8107_v58 }
 0x38c   : > { %14439 = vst [vmem:[#allocation119_spill] sm:$0xff] %v8781_v34  ;;  %v8793_v23 = vpop.permute.xlu0 %1770  ;;  %v547_v32 = vrot.slane %v531_v30, %v8107_v58  ;;  %v2884_v60 = vcombine.low %v607_v6, %v608_v19  ;;  %v2885_v24 = vcombine.low %v609_v28, %v611_v55  ;;  %v614_v25 = vcombine.low %v611_v55, %v603_v43 }
 0x38d   : > { %14440 = vst [vmem:[#allocation120_spill] sm:$0xff] %v8793_v23  ;;  %2272 = vrot.lane.b32.xlu1 %v8001_v10, %s13911_s23  ;;  %v2827_v23 = vcombine.low %v521_v13, %v522_v56  ;;  %v2857_v13 = vrot.slane %v2829_v36, %v8107_v58  ;;  %v645_v56 = vrot.slane %v617_v9, %v8107_v58  ;;  %v8860_v34 = vadd.s32 4294967295, %v8090_v47 }
 0x38e   : > { %2362 = vrot.lane.b32.xlu0 %v8015_v22, %s13936_s29  ;;  %v540_v19 = vrot.slane %v530_v5, %v8107_v58  ;;  %v563_v28 = vcombine.low %v554_v49, %v561_v1  ;;  %v2883_v41 = vcombine.low %v605_v31, %v606_v48  ;;  %v631_v55 = vrot.slane %v615_v26, %v8107_v58 }
 0x38f   : > { %v8824_v14 = vpop.permute.xlu1 %1684  ;;  %v2843_v36 = vrot.slane %v2827_v23, %v8107_v58  ;;  %v2836_v23 = vrot.slane %v2826_v46, %v8107_v58  ;;  %v2859_v9 = vcombine.low %v2850_v7, %v2857_v13  ;;  %v2882_v48 = vcombine.low %v603_v43, %v8813_v53 }
 0x390   : > { %v8829_v18 = vpop.permute.xlu0 %1774  ;;  %v562_v31 = vcombine.low %v540_v19, %v547_v32  ;;  %v2906_v5 = vrot.slane %v2884_v60, %v8107_v58  ;;  %v2913_v1 = vrot.slane %v2885_v24, %v8107_v58  ;;  %v624_v13 = vrot.slane %v614_v25, %v8107_v58 }
 0x391   : > { %14441 = vst [vmem:[#allocation121_spill] sm:$0xff] %v8829_v18  ;;  %2276 = vrot.lane.b32.xlu1 %v8013_v20, %s13911_s23  ;;  %v638_v18 = vrot.slane %v616_v45, %v8107_v58  ;;  %v2858_v7 = vcombine.low %v2836_v23, %v2843_v36  ;;  %v577_v53 = vrot.slane %v563_v28, %v8107_v58  ;;  %vm13956_vm13 = vcmask 785408  }
 0x392   : > { %2433 = vrot.lane.b32.xlu0 %v7984_v62, %s13927_s8  ;;  %v2899_v43 = vrot.slane %v2883_v41, %v8107_v58  ;;  %v2873_v24 = vrot.slane %v2859_v9, %v8107_v58  ;;  %v646_v36 = vcombine.low %v624_v13, %v631_v55  ;;  %v2892_v19 = vrot.slane %v2882_v48, %v8107_v58  ;;  %v7734_v55 = vld [vmem:[%s14328_s0] sm:$0xff]  ;;  %s14508_s0 = smov 125  }
 0x393   : > { %v8855_v50 = vpop.permute.xlu1 %1688  ;;  %v647_v26 = vcombine.low %v638_v18, %v645_v56  ;;  %v8898_v18 = vadd.s32 1, %v8090_v47  ;;  %v570_v56 = vrot.slane %v562_v31, %v8107_v58  ;;  %v2915_v28 = vcombine.low %v2906_v5, %v2913_v1 }
 0x394   : > { %v8864_v30 = vpop.permute.xlu0 %1845  ;;  %v2866_v47 = vrot.slane %v2858_v7, %v8107_v58  ;;  %v8917_v31 = vadd.s32 2, %v7734_v55  ;;  %v2914_v13 = vcombine.low %v2892_v19, %v2899_v43  ;;  %v654_v48 = vrot.slane %v646_v36, %v8107_v58 }
 0x395   : > { %14442 = vst [vmem:[#allocation122_spill] sm:$0xff] %v8864_v30  ;;  %2280 = vrot.lane.b32.xlu1 %v8025_v27, %s13911_s23  ;;  %s8880_s23 = sld [smem:[#allocation2 + $0x6]]  ;;  %v661_v9 = vrot.slane %v647_v26, %v8107_v58  ;;  %v578_v1 = vcombine.low %v570_v56, %v577_v53  ;;  %v8927_v26 = vadd.s32 3, %v7734_v55  ;;  %v8935_v25 = vsel %vm13968_vm1, %v8300_v59, %v8346_v39 }
 0x396   : > { %2438 = vrot.lane.b32.xlu0 %v7995_v4, %s13927_s8  ;;  %v2874_v41 = vcombine.low %v2866_v47, %v2873_v24  ;;  %v8940_v53 = vsel %vm13968_vm1, %v8346_v39, %v8308_v61  ;;  %v2929_v43 = vrot.slane %v2915_v28, %v8107_v58  ;;  %v8948_v24 = vsel %vm13968_vm1, %v8338_v12, %v8300_v59 }
 0x397   : > { %v8882_v46 = vpop.permute.xlu1 %1692  ;;  %v8953_v36 = vsel %vm13968_vm1, %v8292_v57, %v8338_v12  ;;  %v662_v39 = vcombine.low %v654_v48, %v661_v9  ;;  %v692_v47 = vsel %vm13968_vm1, %v8316_v3, %v8362_v37  ;;  %v693_v28 = vsel %vm13968_vm1, %v8362_v37, %v8292_v57  ;;  %v8978_v37 = vld [vmem:[%s14329_s1] sm:$0xff]  ;;  %s9736_s1 = sld [smem:[#allocation2 + $0xe]] }
 0x398   : > { %v8888_v32 = vpop.permute.xlu0 %1850  ;;  %v580_v12 = vsel %vm528_vm11, %v578_v1, 0.0  ;;  %v2922_v9 = vrot.slane %v2914_v13, %v8107_v58  ;;  %v699_v48 = vcombine.low %v8935_v25, %v8940_v53  ;;  %v8981_v57 = vadd.s32 4294967294, %v8978_v37 }
 0x399   : > { %14443 = vst [vmem:[#allocation123_spill] sm:$0xff] %v8888_v32  ;;  %2352 = vrot.lane.b32.xlu1 %v7986_v0, %s13936_s29  ;;  %v2876_v1 = vsel %vm2825_vm12, %v2874_v41, 0.0  ;;  %v698_v13 = vcombine.low %v8953_v36, %v8948_v24  ;;  %v690_v55 = vsel %vm13968_vm1, %v8308_v61, %v8354_v44  ;;  %v691_v56 = vsel %vm13968_vm1, %v8354_v44, %v8316_v3 }
 0x39a   : > { %2442 = vrot.lane.b32.xlu0 %v8007_v15, %s13927_s8  ;;  %v2930_v7 = vcombine.low %v2922_v9, %v2929_v43  ;;  %v701_v60 = vcombine.low %v692_v47, %v693_v28  ;;  %v9001_v41 = vadd.s32 2, %v8978_v37  ;;  %v664_v61 = vsel %vm612_vm2, %v662_v39, 0.0 }
 0x39b   : > { %v8910_v23 = vpop.permute.xlu1 %1764  ;;  %v14447_v9 = vstv %s8728_s19  ;;  %v715_v32 = vrot.slane %v699_v48, %v8107_v58  ;;  %v700_v30 = vcombine.low %v690_v55, %v691_v56  ;;  %v708_v39 = vrot.slane %v698_v13, %v8107_v58  ;;  %s9136_s19 = sld [smem:[#allocation2 + $0x26]] }
 0x39c   : > { %v8924_v5 = vpop.permute.xlu0 %1854  ;;  %14445 = vst [vmem:[#allocation125_spill] sm:$0xff] %v9001_v41  ;;  %v582_v49 = vmul.f32 %v14447_v9, %v580_v12  ;;  %v14448_v41 = vstv %s8730_s14  ;;  %v2938_v6 = vcombine.low %v8948_v24, %v8935_v25  ;;  %v2939_v44 = vcombine.low %v8940_v53, %v690_v55  ;;  %s9134_s14 = sld [smem:[#allocation2 + $0xa]] }
 0x39d   : > { %14444 = vst [vmem:[#allocation124_spill] sm:$0xff] %v8924_v5  ;;  %2356 = vrot.lane.b32.xlu1 %v8001_v10, %s13936_s29  ;;  %v9024_v5 = vmul.f32 %v14448_v41, %v2876_v1  ;;  %v2940_v3 = vcombine.low %v691_v56, %v692_v47  ;;  %v14450_v12 = vstv %s8738_s13  ;;  %v2932_v48 = vsel %vm2881_vm3, %v2930_v7, 0.0  ;;  %s14452_s13 = smov 1  }
 0x39e   : > { %2446 = vrot.lane.b32.xlu0 %v8015_v22, %s13927_s8  ;;  %s9016_s8 = sld [smem:[#allocation2 + $0x25]]  ;;  %v666_v1 = vmul.f32 %v14450_v12, %v664_v61  ;;  %v729_v41 = vrot.slane %v701_v60, %v8107_v58  ;;  %v2941_v13 = vcombine.low %v693_v28, %v8953_v36  ;;  %vm13950_vm11 = vcmask 777216  }
 0x39f   : > { %v8956_v19 = vpop.permute.xlu1 %1768  ;;  %14449 = vst [vmem:[#allocation127_spill] sm:$0xff] %v9024_v5  ;;  %v9049_v53 = vsel %vm13956_vm13, %v8370_v35, %v8332_v11  ;;  %v779_v24 = vsel %vm13956_vm13, %v8324_v8, %v8370_v35  ;;  %v776_v7 = vsel %vm13956_vm13, %v8348_v40, %v8394_v54  ;;  %v777_v60 = vsel %vm13956_vm13, %v8394_v54, %v8324_v8 }
 0x3a0   : > { %v8965_v59 = vpop.permute.xlu0 %1858  ;;  %v730_v56 = vcombine.low %v708_v39, %v715_v32  ;;  %v722_v47 = vrot.slane %v700_v30, %v8107_v58  ;;  %vm447_vm12 = vcmp.ge.s32.totalorder %v8860_v34, 0  ;;  %vm448_vm2 = vcmp.lt.s32.totalorder %v8860_v34, 32 }
 0x3a1   : > { %2360 = vrot.lane.b32.xlu1 %v8013_v20, %s13936_s29  ;;  %v9068_v35 = vsel %vm13956_vm13, %v8332_v11, %v8378_v17  ;;  %v773_v54 = vsel %vm13956_vm13, %v8378_v17, %v8340_v16  ;;  %v2955_v8 = vrot.slane %v2939_v44, %v8107_v58  ;;  %v2962_v30 = vrot.slane %v2940_v3, %v8107_v58  ;;  %vm9162_vm5 = vmand %vm447_vm12, %vm448_vm2 }
 0x3a2   : > { %2573 = vrot.lane.b32.xlu0 %v7986_v0, %s13957_s17  ;;  %v774_v32 = vsel %vm13956_vm13, %v8340_v16, %v8386_v2  ;;  %v775_v11 = vsel %vm13956_vm13, %v8386_v2, %v8348_v40  ;;  %v731_v17 = vcombine.low %v722_v47, %v729_v41  ;;  %v2969_v28 = vrot.slane %v2941_v13, %v8107_v58  ;;  %vm13939_vm6 = vmand %vm8137_vm9, %vm9162_vm5 }
 0x3a3   : > { %v9004_v45 = vpop.permute.xlu1 %1772  ;;  %v782_v55 = vcombine.low %v779_v24, %v9049_v53  ;;  %v785_v61 = vcombine.low %v776_v7, %v777_v60  ;;  %v2948_v3 = vrot.slane %v2938_v6, %v8107_v58  ;;  %v783_v9 = vcombine.low %v9068_v35, %v773_v54  ;;  %vm13941_vm2 = vmand %vm8144_vm10, %vm9162_vm5 }
 0x3a4   : > { %v9018_v43 = vpop.permute.xlu0 %1929  ;;  %v9095_v40 = vadd.f32 %v666_v1, %v582_v49  ;;  %v14455_v2 = vstv %s8757_s20  ;;  %v784_v41 = vcombine.low %v774_v32, %v775_v11  ;;  %v2995_v13 = vcombine.low %v773_v54, %v774_v32  ;;  %s13945_s20 = smov 126  }
 0x3a5   : > { %14446 = vst [vmem:[#allocation126_spill] sm:$0xff] %v9018_v43  ;;  %2364 = vrot.lane.b32.xlu1 %v8025_v27, %s13936_s29  ;;  %v9099_v5 = vmul.f32 %v14455_v2, %v2932_v48  ;;  %v9104_v47 = vrot.slane %v730_v56, %v8107_v58  ;;  %v2970_v6 = vcombine.low %v2948_v3, %v2955_v8  ;;  %vm13949_vm3 = vcmask 769024   ;;  %s9206_s29 = sld [smem:[#allocation2 + $0xb]]  ;;  %v14558_v43 = vld [vmem:[#allocation67_spill] sm:$0xff] }
 0x3a6   : > { %2577 = vrot.lane.b32.xlu0 %v8001_v10, %s13957_s17  ;;  %v9109_v49 = vrot.slane %v731_v17, %v8107_v58  ;;  %v2971_v1 = vcombine.low %v2962_v30, %v2969_v28  ;;  %v792_v48 = vrot.slane %v782_v55, %v8107_v58  ;;  %v813_v54 = vrot.slane %v785_v61, %v8107_v58  ;;  %v14460_v28 = vld [vmem:[#allocation35_spill] sm:$0xff]  ;;  %v14461_v55 = vld [vmem:[#allocation41_spill] sm:$0xff] }
 0x3a7   : > { %v9044_v25 = vpop.permute.xlu1 %1776  ;;  %14456 = vst [vmem:[#allocation131_spill] sm:$0xff] %v9099_v5  ;;  %v799_v2 = vrot.slane %v783_v9, %v8107_v58  ;;  %v2994_v56 = vcombine.low %v9049_v53, %v9068_v35  ;;  %v806_v8 = vrot.slane %v784_v41, %v8107_v58  ;;  %v3011_v30 = vrot.slane %v2995_v13, %v8107_v58  ;;  %v14462_v9 = vld [vmem:[#allocation38_spill] sm:$0xff] }
 0x3a8   : > { %v9060_v36 = vpop.permute.xlu0 %1934  ;;  %v857_v53 = vsel %vm13950_vm11, %v8410_v63, %v14460_v28  ;;  %v858_v61 = vsel %vm13950_vm11, %v14460_v28, %v14461_v55  ;;  %v746_v34 = vcombine.low %v9104_v47, %v9109_v49  ;;  %vm454_vm7 = vcmp.ge.s32.totalorder %v8898_v18, 0 }
 0x3a9   : > { %14451 = vst [vmem:[#allocation128_spill] sm:$0xff] %v9060_v36  ;;  %2436 = vrot.lane.b32.xlu1 %v7986_v0, %s14452_s13  ;;  %v2997_v36 = vcombine.low %v777_v60, %v779_v24  ;;  %v860_v24 = vsel %vm13950_vm11, %v8380_v29, %v8426_v21  ;;  %v815_v3 = vcombine.low %v806_v8, %v813_v54  ;;  %vm455_vm12 = vcmp.lt.s32.totalorder %v8898_v18, 32 }
 0x3aa   : > { %2581 = vrot.lane.b32.xlu0 %v8013_v20, %s13957_s17  ;;  %v2985_v54 = vrot.slane %v2971_v1, %v8107_v58  ;;  %v3004_v39 = vrot.slane %v2994_v56, %v8107_v58  ;;  %v3051_v1 = vcombine.low %v857_v53, %v858_v61  ;;  %vm463_vm13 = vcmp.lt.s32.totalorder %v8927_v26, 32 }
 0x3ab   : > { %v9087_v44 = vpop.permute.xlu1 %1848  ;;  %v3025_v35 = vrot.slane %v2997_v36, %v8107_v58  ;;  %v863_v36 = vsel %vm13950_vm11, %v8356_v38, %v14462_v9 }
 0x3ac   : > { %14453 = vst [vmem:[#allocation129_spill] sm:$0xff] %v9087_v44  ;;  %v9093_v12 = vpop.permute.xlu0 %1938  ;;  %v2996_v44 = vcombine.low %v775_v11, %v776_v7  ;;  %v861_v7 = vsel %vm13950_vm11, %v8426_v21, %v8356_v38  ;;  %v14459_v11 = vld [vmem:[#allocation34_spill] sm:$0xff]  ;;  %v2978_v38 = vrot.slane %v2970_v6, %v8107_v58  ;;  %v3026_v6 = vcombine.low %v3004_v39, %v3011_v30 }
 0x3ad   : > { %14454 = vst [vmem:[#allocation130_spill] sm:$0xff] %v9093_v12  ;;  %2440 = vrot.lane.b32.xlu1 %v8001_v10, %s14452_s13  ;;  %v856_v17 = vsel %vm13950_vm11, %v14459_v11, %v8410_v63  ;;  %v859_v63 = vsel %vm13950_vm11, %v14461_v55, %v8380_v29  ;;  %v855_v41 = vsel %vm13950_vm11, %v14462_v9, %v14459_v11  ;;  %v14464_v29 = vmov 0 }
 0x3ae   : > { %2585 = vrot.lane.b32.xlu0 %v8025_v27, %s13957_s17  ;;  %v3018_v21 = vrot.slane %v2996_v44, %v8107_v58  ;;  %v869_v44 = vcombine.low %v860_v24, %v861_v7  ;;  %v14465_v29 = vsel %vm9162_vm5, 4294967295, %v14464_v29  ;;  %v867_v8 = vcombine.low %v856_v17, %v857_v53 }
 0x3af   : > { %v9113_v32 = vpop.permute.xlu1 %1852  ;;  %14466 = vst [vmem:[#allocation35_spill] sm:$0xff] %v14465_v29  ;;  %v3052_v28 = vcombine.low %v859_v63, %v860_v24  ;;  %v3053_v11 = vcombine.low %v861_v7, %v863_v36  ;;  %v814_v9 = vcombine.low %v792_v48, %v799_v2  ;;  %v868_v16 = vcombine.low %v858_v61, %v859_v63 }
 0x3b0   : > { %14457 = vst [vmem:[#allocation132_spill] sm:$0xff] %v9113_v32  ;;  %v9124_v60 = vpop.permute.xlu0 %1942  ;;  %v3027_v5 = vcombine.low %v3018_v21, %v3025_v35  ;;  %v866_v12 = vcombine.low %v863_v36, %v855_v41  ;;  %v829_v48 = vrot.slane %v815_v3, %v8107_v58  ;;  %v3050_v2 = vcombine.low %v855_v41, %v856_v17  ;;  %v14560_v32 = vld [vmem:[#allocation80_spill] sm:$0xff] }
 0x3b1   : > { %14458 = vst [vmem:[#allocation133_spill] sm:$0xff] %v9124_v60  ;;  %2444 = vrot.lane.b32.xlu1 %v8013_v20, %s14452_s13  ;;  %v897_v56 = vrot.slane %v869_v44, %v8107_v58  ;;  %v2986_v49 = vcombine.low %v2978_v38, %v2985_v54  ;;  %v883_v24 = vrot.slane %v867_v8, %v8107_v58  ;;  %v748_v61 = vsel %vm13939_vm6, %v746_v34, 0.0  ;;  %vm13947_vm6 = vmand %vm8137_vm9, %vm8722_vm14 }
 0x3b2   : > { %2657 = vrot.lane.b32.xlu0 %v7986_v0, %s13945_s20  ;;  %v3074_v7 = vrot.slane %v3052_v28, %v8107_v58  ;;  %v3081_v53 = vrot.slane %v3053_v11, %v8107_v58  ;;  %v822_v35 = vrot.slane %v814_v9, %v8107_v58  ;;  %v890_v39 = vrot.slane %v868_v16, %v8107_v58  ;;  %v14470_v28 = vld [vmem:[#allocation37_spill] sm:$0xff]  ;;  %v14471_v11 = vld [vmem:[#allocation44_spill] sm:$0xff] }
 0x3b3   : > { %v9156_v13 = vpop.permute.xlu1 %1856  ;;  %v3041_v63 = vrot.slane %v3027_v5, %v8107_v58  ;;  %v876_v3 = vrot.slane %v866_v12, %v8107_v58  ;;  %v3067_v16 = vrot.slane %v3051_v1, %v8107_v58  ;;  %v3034_v41 = vrot.slane %v3026_v6, %v8107_v58  ;;  %v14472_v9 = vld [vmem:[#allocation36_spill] sm:$0xff] }
 0x3b4   : > { %14463 = vst [vmem:[#allocation34_spill] sm:$0xff] %v9156_v13  ;;  %v9167_v55 = vpop.permute.xlu0 %2013  ;;  %v830_v36 = vcombine.low %v822_v35, %v829_v48  ;;  %v3060_v5 = vrot.slane %v3050_v2, %v8107_v58  ;;  %v899_v44 = vcombine.low %v890_v39, %v897_v56  ;;  %v3083_v8 = vcombine.low %v3074_v7, %v3081_v53  ;;  %v14475_v48 = vld [vmem:[#allocation46_spill] sm:$0xff]  ;;  %v14476_v56 = vld [vmem:[#allocation39_spill] sm:$0xff]  ;;  %v14478_v53 = vld [vmem:[#allocation40_spill] sm:$0xff] }
 0x3b5   : > { %14467 = vst [vmem:[#allocation41_spill] sm:$0xff] %v9167_v55  ;;  %2448 = vrot.lane.b32.xlu1 %v8025_v27, %s14452_s13  ;;  %v898_v54 = vcombine.low %v876_v3, %v883_v24  ;;  %v9221_v38 = vsel %vm13949_vm3, %v14471_v11, %v14470_v28  ;;  %v947_v34 = vsel %vm13949_vm3, %v14472_v9, %v14471_v11  ;;  %v14477_v7 = vld [vmem:[#allocation50_spill] sm:$0xff]  ;;  %v14479_v3 = vstv %s8804_s24  ;;  %s9292_s24 = sld [smem:[#allocation2 + $0x27]] }
 0x3b6   : > { %2661 = vrot.lane.b32.xlu0 %v8001_v10, %s13945_s20  ;;  %v9235_v2 = vsel %vm13949_vm3, %v14470_v28, %v14475_v48  ;;  %v9240_v24 = vsel %vm13949_vm3, %v14475_v48, %v14476_v56  ;;  %v944_v35 = vsel %vm13949_vm3, %v14478_v53, %v14477_v7  ;;  %v945_v39 = vsel %vm13949_vm3, %v14477_v7, %v14472_v9  ;;  %v14480_v7 = vld [vmem:[#allocation48_spill] sm:$0xff]  ;;  %v14557_v13 = vld [vmem:[#allocation78_spill] sm:$0xff] }
 0x3b7   : > { %v9183_v47 = vpop.permute.xlu1 %1860  ;;  %v750_v11 = vmul.f32 %v14479_v3, %v748_v61  ;;  %v2988_v28 = vsel %vm13941_vm2, %v2986_v49, 0.0  ;;  %v3042_v48 = vcombine.low %v3034_v41, %v3041_v63  ;;  %v3082_v17 = vcombine.low %v3060_v5, %v3067_v16  ;;  %vm13948_vm2 = vmand %vm8144_vm10, %vm8722_vm14 }
 0x3b8   : > { %v9188_v21 = vpop.permute.xlu0 %2018  ;;  %v9260_v30 = vrot.slane %v899_v44, %v8107_v58  ;;  %v950_v9 = vcombine.low %v947_v34, %v9221_v38  ;;  %v942_v61 = vsel %vm13949_vm3, %v14476_v56, %v14480_v7  ;;  %v943_v3 = vsel %vm13949_vm3, %v14480_v7, %v14478_v53 }
 0x3b9   : > { %14468 = vst [vmem:[#allocation38_spill] sm:$0xff] %v9188_v21  ;;  %2575 = vrot.lane.b32.xlu1 %v7995_v4, %s13957_s17  ;;  %v832_v49 = vsel %vm13947_vm6, %v830_v36, 0.0  ;;  %v9281_v63 = vrot.slane %v3083_v8, %v8107_v58  ;;  %v951_v16 = vcombine.low %v9235_v2, %v9240_v24  ;;  %v953_v41 = vcombine.low %v944_v35, %v945_v39  ;;  %vm9316_vm6 = vmand %vm454_vm7, %vm455_vm12 }
 0x3ba   : > { %2665 = vrot.lane.b32.xlu0 %v8013_v20, %s13945_s20  ;;  %v14483_v44 = vstv %s8827_s12  ;;  %v906_v53 = vrot.slane %v898_v54, %v8107_v58  ;;  %v3108_v7 = vcombine.low %v943_v3, %v944_v35  ;;  %v3109_v21 = vcombine.low %v945_v39, %v947_v34  ;;  %vm13962_vm7 = vmand %vm8137_vm9, %vm9316_vm6  ;;  %s9415_s12 = sld [smem:[#allocation2 + $0x28]] }
 0x3bb   : > { %v9216_v12 = vpop.permute.xlu1 %1932  ;;  %v9289_v56 = vmul.f32 %v14483_v44, %v2988_v28  ;;  %v751_v36 = vadd.f32 %v750_v11, %v9095_v40  ;;  %v3090_v8 = vrot.slane %v3082_v17, %v8107_v58  ;;  %v952_v55 = vcombine.low %v942_v61, %v943_v3  ;;  %v14490_v3 = vld [vmem:[#allocation58_spill] sm:$0xff]  ;;  %vm13961_vm12 = vmand %vm8144_vm10, %vm9316_vm6 }
 0x3bc   : > { %14469 = vst [vmem:[#allocation134_spill] sm:$0xff] %v9216_v12  ;;  %v9226_v1 = vpop.permute.xlu0 %2022  ;;  %v14485_v28 = vstv %s8838_s11  ;;  %v3044_v54 = vsel %vm13948_vm2, %v3042_v48, 0.0  ;;  %v914_v34 = vcombine.low %v906_v53, %v9260_v30  ;;  %v960_v40 = vrot.slane %v950_v9, %v8107_v58  ;;  %v14493_v53 = vld [vmem:[#allocation43_spill] sm:$0xff]  ;;  %s14502_s11 = smov 126  }
 0x3bd   : > { %14473 = vst [vmem:[#allocation37_spill] sm:$0xff] %v9226_v1  ;;  %2579 = vrot.lane.b32.xlu1 %v8007_v15, %s13957_s17  ;;  %14484 = vst [vmem:[#allocation46_spill] sm:$0xff] %v9289_v56  ;;  %v834_v44 = vmul.f32 %v14485_v28, %v832_v49  ;;  %v3098_v17 = vcombine.low %v3090_v8, %v9281_v63  ;;  %v967_v39 = vrot.slane %v951_v16, %v8107_v58  ;;  %vm13967_vm2 = vcmask 547840   ;;  %v14491_v49 = vld [vmem:[#allocation47_spill] sm:$0xff]  ;;  %v14492_v16 = vld [vmem:[#allocation42_spill] sm:$0xff] }
 0x3be   : > { %2669 = vrot.lane.b32.xlu0 %v8025_v27, %s13945_s20  ;;  %s13959_s20 = smov 125   ;;  %v3107_v11 = vcombine.low %v9240_v24, %v942_v61  ;;  %v981_v30 = vrot.slane %v953_v41, %v8107_v58  ;;  %vm458_vm3 = vcmp.ge.s32.totalorder %v8917_v31, 0  ;;  %vm459_vm11 = vcmp.lt.s32.totalorder %v8917_v31, 32 }
 0x3bf   : > { %v9269_v1 = vpop.permute.xlu1 %1936  ;;  %v3130_v18 = vrot.slane %v3108_v7, %v8107_v58  ;;  %v3137_v9 = vrot.slane %v3109_v21, %v8107_v58  ;;  %v1028_v63 = vsel %vm13955_vm4, %v14491_v49, %v14490_v3  ;;  %v1029_v24 = vsel %vm13955_vm4, %v14490_v3, %v14492_v16  ;;  %v14494_v7 = vld [vmem:[#allocation52_spill] sm:$0xff] }
 0x3c0   : > { %14481 = vst [vmem:[#allocation44_spill] sm:$0xff] %v9269_v1  ;;  %v9285_v5 = vpop.permute.xlu0 %2026  ;;  %v3106_v61 = vcombine.low %v9221_v38, %v9235_v2  ;;  %v974_v41 = vrot.slane %v952_v55, %v8107_v58  ;;  %v9344_v21 = vsel %vm13955_vm4, %v14494_v7, %v14493_v53  ;;  %v1031_v8 = vsel %vm13955_vm4, %v14492_v16, %v14494_v7  ;;  %v14495_v55 = vld [vmem:[#allocation54_spill] sm:$0xff]  ;;  %v14496_v2 = vld [vmem:[#allocation45_spill] sm:$0xff]  ;;  %v14497_v3 = vld [vmem:[#allocation56_spill] sm:$0xff] }
 0x3c1   : > { %14482 = vst [vmem:[#allocation36_spill] sm:$0xff] %v9285_v5  ;;  %2583 = vrot.lane.b32.xlu1 %v8015_v22, %s13957_s17  ;;  %v9358_v38 = vsel %vm13955_vm4, %v14493_v53, %v14495_v55  ;;  %v1025_v28 = vsel %vm13955_vm4, %v14495_v55, %v14496_v2  ;;  %v1026_v16 = vsel %vm13955_vm4, %v14496_v2, %v14497_v3  ;;  %v14500_v2 = vstv %s8840_s10  ;;  %s9413_s10 = sld [smem:[#allocation2 + $0xc]] }
 0x3c2   : > { %2741 = vrot.lane.b32.xlu0 %v7986_v0, %s13959_s20  ;;  %v982_v53 = vcombine.low %v960_v40, %v967_v39  ;;  %v3123_v12 = vrot.slane %v3107_v11, %v8107_v58  ;;  %v983_v56 = vcombine.low %v974_v41, %v981_v30  ;;  %v1037_v55 = vcombine.low %v1028_v63, %v1029_v24  ;;  %v14505_v41 = vld [vmem:[#allocation62_spill] sm:$0xff] }
 0x3c3   : > { %v9310_v35 = vpop.permute.xlu1 %1940  ;;  %v9378_v5 = vadd.f32 %v834_v44, %v751_v36  ;;  %v3116_v1 = vrot.slane %v3106_v61, %v8107_v58  ;;  %v1034_v40 = vcombine.low %v1031_v8, %v9344_v21  ;;  %v1035_v39 = vcombine.low %v9358_v38, %v1025_v28 }
 0x3c4   : > { %14486 = vst [vmem:[#allocation39_spill] sm:$0xff] %v9310_v35  ;;  %v9324_v48 = vpop.permute.xlu0 %2097  ;;  %v9382_v35 = vmul.f32 %v14500_v2, %v3044_v54  ;;  %v916_v36 = vsel %vm13962_vm7, %v914_v34, 0.0  ;;  %v3100_v44 = vsel %vm13961_vm12, %v3098_v17, 0.0  ;;  %v3165_v30 = vcombine.low %v1029_v24, %v1031_v8  ;;  %v14506_v8 = vld [vmem:[#allocation51_spill] sm:$0xff]  ;;  %vm9461_vm7 = vmand %vm458_vm3, %vm459_vm11 }
 0x3c5   : > { %14489 = vst [vmem:[#allocation50_spill] sm:$0xff] %v9324_v48  ;;  %2587 = vrot.lane.b32.xlu1 %v7984_v62, %s13957_s17  ;;  %v9410_v34 = vrot.slane %v983_v56, %v8107_v58  ;;  %v1065_v61 = vrot.slane %v1037_v55, %v8107_v58  ;;  %v3163_v24 = vcombine.low %v1025_v28, %v1026_v16  ;;  %s9437_s17 = sld [smem:[#allocation2 + $0xd]]  ;;  %v14518_v31 = vstv %s8847_s9  ;;  %s14520_s9 = smov 97   ;;  %vm13969_vm11 = vmand %vm8137_vm9, %vm9461_vm7 }
 0x3c6   : > { %2745 = vrot.lane.b32.xlu0 %v8001_v10, %s13959_s20  ;;  %v1027_v10 = vsel %vm13955_vm4, %v14497_v3, %v14491_v49  ;;  %14501 = vst [vmem:[#allocation58_spill] sm:$0xff] %v9382_v35  ;;  %v3139_v49 = vcombine.low %v3130_v18, %v3137_v9  ;;  %vm462_vm4 = vcmp.ge.s32.totalorder %v8927_v26, 0  ;;  %v3138_v9 = vcombine.low %v3116_v1, %v3123_v12  ;;  %v14507_v12 = vld [vmem:[#allocation53_spill] sm:$0xff] }
 0x3c7   : > { %v9369_v7 = vpop.permute.xlu1 %1944  ;;  %v1036_v11 = vcombine.low %v1026_v16, %v1027_v10  ;;  %v3164_v54 = vcombine.low %v1027_v10, %v1028_v63  ;;  %v9423_v10 = vsel %vm13967_vm2, %v14506_v8, %v14505_v41  ;;  %v9428_v1 = vsel %vm13967_vm2, %v14505_v41, %v14507_v12  ;;  %v14516_v41 = vld [vmem:[#allocation55_spill] sm:$0xff]  ;;  %vm9533_vm1 = vmand %vm462_vm4, %vm463_vm13 }
 0x3c8   : > { %14498 = vst [vmem:[#allocation40_spill] sm:$0xff] %v9369_v7  ;;  %v9376_v48 = vpop.permute.xlu0 %2102  ;;  %v3153_v63 = vrot.slane %v3139_v49, %v8107_v58  ;;  %v1044_v56 = vrot.slane %v1034_v40, %v8107_v58  ;;  %v3162_v28 = vcombine.low %v9344_v21, %v9358_v38  ;;  %v3193_v2 = vrot.slane %v3165_v30, %v8107_v58  ;;  %v14509_v49 = vld [vmem:[#allocation60_spill] sm:$0xff]  ;;  %v14510_v21 = vld [vmem:[#allocation49_spill] sm:$0xff]  ;;  %v14515_v30 = vld [vmem:[#allocation66_spill] sm:$0xff] }
 0x3c9   : > { %14499 = vst [vmem:[#allocation48_spill] sm:$0xff] %v9376_v48  ;;  %2659 = vrot.lane.b32.xlu1 %v7995_v4, %s14502_s11  ;;  %v1058_v16 = vrot.slane %v1036_v11, %v8107_v58  ;;  %v3186_v55 = vrot.slane %v3164_v54, %v8107_v58  ;;  %v9448_v40 = vsel %vm13967_vm2, %v14509_v49, %v14506_v8  ;;  %vm14530_vm4 = vmand %vm8144_vm10, %vm9461_vm7  ;;  %vm14534_vm13 = vcmask 539648  }
 0x3ca   : > { %2749 = vrot.lane.b32.xlu0 %v8013_v20, %s13959_s20  ;;  %v9407_v20 = vrot.slane %v982_v53, %v8107_v58  ;;  %v1051_v53 = vrot.slane %v1035_v39, %v8107_v58  ;;  %s9439_s20 = sld [smem:[#allocation2 + $0x29]]  ;;  %v9453_v38 = vsel %vm13967_vm2, %v14510_v21, %v14509_v49  ;;  %v1119_v54 = vcombine.low %v9423_v10, %v9428_v1 }
 0x3cb   : > { %v9404_v18 = vpop.permute.xlu1 %2016  ;;  %v1067_v11 = vcombine.low %v1058_v16, %v1065_v61  ;;  %v9470_v8 = vsel %vm13967_vm2, %v14516_v41, %v14515_v30  ;;  %v9475_v49 = vsel %vm13967_vm2, %v14515_v30, %v14510_v21  ;;  %v918_v35 = vmul.f32 %v14518_v31, %v916_v36  ;;  %v14519_v30 = vld [vmem:[#allocation64_spill] sm:$0xff] }
 0x3cc   : > { %14503 = vst [vmem:[#allocation47_spill] sm:$0xff] %v9404_v18  ;;  %v9417_v17 = vpop.permute.xlu0 %2106  ;;  %v3146_v48 = vrot.slane %v3138_v9, %v8107_v58  ;;  %v998_v61 = vcombine.low %v9407_v20, %v9410_v34  ;;  %v3179_v16 = vrot.slane %v3163_v24, %v8107_v58  ;;  %v1118_v21 = vcombine.low %v9453_v38, %v9448_v40  ;;  %v14521_v9 = vld [vmem:[#allocation19_spill] sm:$0xff] }
 0x3cd   : > { %14504 = vst [vmem:[#allocation42_spill] sm:$0xff] %v9417_v17  ;;  %2663 = vrot.lane.b32.xlu1 %v8007_v15, %s14502_s11  ;;  %v1066_v17 = vcombine.low %v1044_v56, %v1051_v53  ;;  %v1110_v36 = vsel %vm13967_vm2, %v14507_v12, %v14519_v30  ;;  %v9495_v20 = vsel %vm13967_vm2, %v14519_v30, %v14516_v41  ;;  %vm14048_vm2 = vcmask 531456  }
 0x3ce   : > { %2753 = vrot.lane.b32.xlu0 %v8025_v27, %s14508_s0  ;;  %v14512_v27 = vmov 0  ;;  %v3154_v34 = vcombine.low %v3146_v48, %v3153_v63  ;;  %v3172_v24 = vrot.slane %v3162_v28, %v8107_v58  ;;  %v3195_v56 = vcombine.low %v3186_v55, %v3193_v2  ;;  %v14533_v48 = vld [vmem:[#allocation63_spill] sm:$0xff] }
 0x3cf   : > { %v9455_v39 = vpop.permute.xlu1 %2020  ;;  %v14513_v27 = vsel %vm9461_vm7, 4294967295, %v14512_v27  ;;  %v1121_v12 = vcombine.low %v9470_v8, %v9475_v49  ;;  %v1081_v41 = vrot.slane %v1067_v11, %v8107_v58  ;;  %v1135_v31 = vrot.slane %v1119_v54, %v8107_v58 }
 0x3d0   : > { %14511 = vst [vmem:[#allocation43_spill] sm:$0xff] %v9455_v39  ;;  %14514 = vst [vmem:[#allocation52_spill] sm:$0xff] %v14513_v27  ;;  %v9477_v3 = vpop.permute.xlu0 %2110  ;;  %v9519_v55 = vadd.f32 %v918_v35, %v9378_v5  ;;  %v14524_v2 = vstv %s8853_s7  ;;  %v1120_v18 = vcombine.low %v1110_v36, %v9495_v20  ;;  %v1074_v11 = vrot.slane %v1066_v17, %v8107_v58  ;;  %v14532_v35 = vld [vmem:[#allocation74_spill] sm:$0xff]  ;;  %s14545_s7 = smov 96  }
 0x3d1   : > { %14517 = vst [vmem:[#allocation54_spill] sm:$0xff] %v9477_v3  ;;  %2667 = vrot.lane.b32.xlu1 %v8015_v22, %s14502_s11  ;;  %v9523_v30 = vmul.f32 %v14524_v2, %v3100_v44  ;;  %v3194_v3 = vcombine.low %v3172_v24, %v3179_v16  ;;  %v14526_v54 = vmov 0  ;;  %v1128_v5 = vrot.slane %v1118_v21, %v8107_v58  ;;  %v14529_v16 = vld [vmem:[#allocation21_spill] sm:$0xff] }
 0x3d2   : > { %4182 = vrot.lane.b32.xlu0 %v14521_v9, %s14520_s9  ;;  %v14527_v54 = vsel %vm9533_vm1, 4294967295, %v14526_v54  ;;  %v9549_v26 = vsel %vm13969_vm11, %v998_v61, 0.0  ;;  %v9556_v17 = vsel %vm14530_vm4, %v3154_v34, 0.0  ;;  %v9559_v21 = vrot.slane %v3195_v56, %v8107_v58  ;;  %vm14536_vm11 = vmmov %vm14534_vm13 }
 0x3d3   : > { %v9506_v53 = vpop.permute.xlu1 %2024  ;;  %14525 = vst [vmem:[#allocation62_spill] sm:$0xff] %v9523_v30  ;;  %14528 = vst [vmem:[#allocation51_spill] sm:$0xff] %v14527_v54  ;;  %v1149_v24 = vrot.slane %v1121_v12, %v8107_v58  ;;  %v1082_v44 = vcombine.low %v1074_v11, %v1081_v41  ;;  %v1150_v63 = vcombine.low %v1128_v5, %v1135_v31  ;;  %v14535_v30 = vld [vmem:[#allocation57_spill] sm:$0xff]  ;;  %v14538_v11 = vld [vmem:[#allocation70_spill] sm:$0xff] }
 0x3d4   : > { %14522 = vst [vmem:[#allocation45_spill] sm:$0xff] %v9506_v53  ;;  %v9516_v28 = vpop.permute.xlu0 %2181  ;;  %v9567_v61 = vsel %vm14534_vm13, %v14533_v48, %v14532_v35  ;;  %v9577_v56 = vrot.slane %v3194_v3, %v8107_v58  ;;  %vm13990_vm4 = vmand %vm8137_vm9, %vm9533_vm1  ;;  %v1142_v12 = vrot.slane %v1120_v18, %v8107_v58  ;;  %v3219_v41 = vcombine.low %v9428_v1, %v1110_v36  ;;  %v14539_v5 = vld [vmem:[#allocation59_spill] sm:$0xff]  ;;  %v14542_v53 = vld [vmem:[#allocation72_spill] sm:$0xff] }
 0x3d5   : > { %14523 = vst [vmem:[#allocation56_spill] sm:$0xff] %v9516_v28  ;;  %2671 = vrot.lane.b32.xlu1 %v7984_v62, %s14502_s11  ;;  %v9572_v28 = vsel %vm14536_vm11, %v14532_v35, %v14535_v30  ;;  %v3220_v31 = vcombine.low %v9495_v20, %v9470_v8  ;;  %v9592_v3 = vsel %vm14536_vm11, %v14539_v5, %v14538_v11  ;;  %v14540_v35 = vld [vmem:[#allocation61_spill] sm:$0xff]  ;;  %vm14541_vm13 = vmmov %vm14536_vm11  ;;  %v14547_v36 = vld [vmem:[#allocation68_spill] sm:$0xff] }
 0x3d6   : > { %4186 = vrot.lane.b32.xlu0 %v14529_v16, %s14520_s9  ;;  %vm14543_vm12 = vmmov %vm14536_vm11  ;;  %v1151_v8 = vcombine.low %v1142_v12, %v1149_v24  ;;  %v1158_v24 = vrot.slane %v1150_v63, %v8107_v58  ;;  %v9670_v60 = vsel %vm14048_vm2, %v14558_v43, %v14557_v13 }
 0x3d7   : > { %v9562_v2 = vpop.permute.xlu1 %2028  ;;  %v9602_v18 = vsel %vm14543_vm12, %v14540_v35, %v14542_v53  ;;  %vm14544_vm3 = vmmov %vm14536_vm11  ;;  %v9646_v63 = vrot.slane %v3220_v31, %v8107_v58  ;;  %vm14562_vm12 = vcmp.lt.s32.totalorder %v8981_v57, 32 }
 0x3d8   : > { %14531 = vst [vmem:[#allocation53_spill] sm:$0xff] %v9562_v2  ;;  %v9574_v34 = vpop.permute.xlu0 %2186  ;;  %v1195_v1 = vsel %vm14544_vm3, %v14542_v53, %v14533_v48  ;;  %vm14548_vm11 = vmmov %vm14544_vm3  ;;  %v9626_v53 = vsel %vm13990_vm4, %v1082_v44, 0.0  ;;  %v14553_v48 = vld [vmem:[#allocation71_spill] sm:$0xff] }
 0x3d9   : > { %14537 = vst [vmem:[#allocation60_spill] sm:$0xff] %v9574_v34  ;;  %2743 = vrot.lane.b32.xlu1 %v7995_v4, %s14508_s0  ;;  %v9597_v34 = vsel %vm14541_vm13, %v14538_v11, %v14540_v35  ;;  %v14546_v4 = vld [vmem:[#allocation15_spill] sm:$0xff]  ;;  %v9612_v20 = vsel %vm14548_vm11, %v14547_v36, %v14539_v5  ;;  %vm14549_vm13 = vmmov %vm14544_vm3  ;;  %v1205_v35 = vcombine.low %v9567_v61, %v9572_v28  ;;  %vm14563_vm3 = vcmp.ge.s32.totalorder %v8981_v57, 0 }
 0x3da   : > { %4255 = vrot.lane.b32.xlu0 %v14546_v4, %s14545_s7  ;;  %v1199_v11 = vsel %vm14549_vm13, %v14535_v30, %v14547_v36  ;;  %v3218_v30 = vcombine.low %v9448_v40, %v9423_v10  ;;  %v9636_v5 = vrot.slane %v3219_v41, %v8107_v58  ;;  %v3221_v36 = vcombine.low %v9475_v49, %v9453_v38  ;;  %v14552_v40 = vld [vmem:[#allocation82_spill] sm:$0xff]  ;;  %v14555_v49 = vld [vmem:[#allocation17_spill] sm:$0xff]  ;;  %vm9693_vm11 = vmand %vm14563_vm3, %vm14562_vm12 }
 0x3db   : > { %v9619_v39 = vpop.permute.xlu1 %2100  ;;  %v1203_v44 = vcombine.low %v9592_v3, %v9597_v34  ;;  %v1204_v42 = vcombine.low %v9602_v18, %v1195_v1  ;;  %v1202_v10 = vcombine.low %v1199_v11, %v9612_v20  ;;  %v9652_v41 = vsel %vm14048_vm2, %v14553_v48, %v14552_v40  ;;  %vm13988_vm13 = vmand %vm9693_vm11, %vm8128_vm8 }
 0x3dc   : > { %14550 = vst [vmem:[#allocation49_spill] sm:$0xff] %v9619_v39  ;;  %v9633_v12 = vpop.permute.xlu0 %2190  ;;  %v1233_v31 = vrot.slane %v1205_v35, %v8107_v58  ;;  %v3276_v39 = vcombine.low %v1195_v1, %v9567_v61  ;;  %v3277_v2 = vcombine.low %v9572_v28, %v1199_v11  ;;  %v9685_v28 = vsel %vm14048_vm2, %v14560_v32, %v14553_v48  ;;  %vm13987_vm12 = vmand %vm8144_vm10, %vm9533_vm1 }
 0x3dd   : > { %14551 = vst [vmem:[#allocation66_spill] sm:$0xff] %v9633_v12  ;;  %2747 = vrot.lane.b32.xlu1 %v8007_v15, %s14508_s0  ;;  %v14554_v12 = vld [vmem:[#allocation65_spill] sm:$0xff]  ;;  %v1165_v15 = vrot.slane %v1151_v8, %v8107_v58  ;;  %v14564_v1 = vmov 0  ;;  %v1219_v11 = vrot.slane %v1203_v44, %v8107_v58  ;;  %v1226_v35 = vrot.slane %v1204_v42, %v8107_v58  ;;  %vm14000_vm4 = vmand %vm9693_vm11, %vm9162_vm5 }
 0x3de   : > { %v9657_v38 = vsel %vm14048_vm2, %v14552_v40, %v14554_v12  ;;  %4260 = vrot.lane.b32.xlu0 %v14555_v49, %s14545_s7  ;;  %v14559_v40 = vld [vmem:[#allocation69_spill] sm:$0xff]  ;;  %v14565_v1 = vsel %vm9693_vm11, 4294967295, %v14564_v1  ;;  %v1212_v48 = vrot.slane %v1202_v10, %v8107_v58  ;;  %v3275_v57 = vcombine.low %v9597_v34, %v9602_v18 }
 0x3df   : > { %v9665_v27 = vpop.permute.xlu1 %2104  ;;  %v9675_v7 = vsel %vm14048_vm2, %v14557_v13, %v14559_v40  ;;  %v9680_v8 = vsel %vm14048_vm2, %v14559_v40, %v14560_v32  ;;  %14566 = vst [vmem:[#allocation19_spill] sm:$0xff] %v14565_v1  ;;  %v3249_v13 = vrot.slane %v3221_v36, %v8107_v58  ;;  %v1289_v32 = vcombine.low %v9652_v41, %v9657_v38  ;;  %v14567_v40 = vld [vmem:[#allocation76_spill] sm:$0xff] }
 0x3e0   : > { %14556 = vst [vmem:[#allocation55_spill] sm:$0xff] %v9665_v27  ;;  %v9687_v61 = vpop.permute.xlu0 %2194  ;;  %v9715_v42 = vsel %vm14048_vm2, %v14554_v12, %v14567_v40  ;;  %v1166_v36 = vcombine.low %v1158_v24, %v1165_v15  ;;  %v1287_v44 = vcombine.low %v9670_v60, %v9675_v7  ;;  %v1288_v34 = vcombine.low %v9680_v8, %v9685_v28  ;;  %v14628_v27 = vld [vmem:[#allocation100_spill] sm:$0xff] }
 0x3e1   : > { %14561 = vst [vmem:[#allocation64_spill] sm:$0xff] %v9687_v61  ;;  %2751 = vrot.lane.b32.xlu1 %v8015_v22, %s14508_s0  ;;  %v9710_v61 = vsel %vm14048_vm2, %v14567_v40, %v14558_v43  ;;  %v1235_v22 = vcombine.low %v1226_v35, %v1233_v31  ;;  %v3228_v43 = vrot.slane %v3218_v30, %v8107_v58  ;;  %vm14047_vm3 = vcmask 523264   ;;  %vm14052_vm2 = vmand %vm9693_vm11, %vm9316_vm6 }
 0x3e2   : > { %4264 = vrot.lane.b32.xlu0 %v14521_v9, %s14545_s7  ;;  %v3274_v24 = vcombine.low %v9612_v20, %v9592_v3  ;;  %v3298_v12 = vrot.slane %v3276_v39, %v8107_v58  ;;  %v3305_v10 = vrot.slane %v3277_v2, %v8107_v58  ;;  %v3251_v30 = vcombine.low %v9646_v63, %v3249_v13 }
 0x3e3   : > { %v9723_v18 = vpop.permute.xlu1 %2108  ;;  %v1234_v31 = vcombine.low %v1212_v48, %v1219_v11  ;;  %v1286_v35 = vcombine.low %v9715_v42, %v9710_v61  ;;  %v1317_v39 = vrot.slane %v1289_v32, %v8107_v58  ;;  %v14569_v2 = vstv %s8862_s30  ;;  %s14677_s30 = smov 93  }
 0x3e4   : > { %v9734_v15 = vpop.permute.xlu0 %2265  ;;  %v1002_v3 = vmul.f32 %v14569_v2, %v9549_v26  ;;  %v14570_v20 = vstv %s8868_s28  ;;  %v3250_v13 = vcombine.low %v3228_v43, %v9636_v5  ;;  %v3291_v11 = vrot.slane %v3275_v57, %v8107_v58  ;;  %s14578_s28 = smov 95  }
 0x3e5   : > { %14568 = vst [vmem:[#allocation21_spill] sm:$0xff] %v9734_v15  ;;  %2755 = vrot.lane.b32.xlu1 %v7984_v62, %s14508_s0  ;;  %v9758_v63 = vmul.f32 %v14570_v20, %v9556_v17  ;;  %v1168_v62 = vsel %vm13988_vm13, %v1166_v36, 0.0  ;;  %v1249_v26 = vrot.slane %v1235_v22, %v8107_v58  ;;  %v1303_v32 = vrot.slane %v1287_v44, %v8107_v58  ;;  %vm13989_vm13 = vmand %vm9693_vm11, %vm8210_vm0  ;;  %v14620_v15 = vld [vmem:[#allocation94_spill] sm:$0xff] }
 0x3e6   : > { %4268 = vrot.lane.b32.xlu0 %v14529_v16, %s14545_s7  ;;  %v1310_v17 = vrot.slane %v1288_v34, %v8107_v58  ;;  %v14572_v5 = vstv %s8880_s23  ;;  %v14573_v40 = vcombine.low %v9577_v56, %v9559_v21  ;;  %v3284_v22 = vrot.slane %v3274_v24, %v8107_v58  ;;  %v14576_v56 = vld [vmem:[#allocation18_spill] sm:$0xff]  ;;  %s10434_s23 = sld [smem:[#allocation2 + $0x12]] }
 0x3e7   : > { %14571 = vst [vmem:[#allocation74_spill] sm:$0xff] %v9758_v63  ;;  %v9772_v48 = vpop.permute.xlu1 %2112  ;;  %v1086_v57 = vmul.f32 %v14572_v5, %v9626_v53  ;;  %v3307_v43 = vcombine.low %v3298_v12, %v3305_v10  ;;  %v9789_v34 = vrot.slane %v3251_v30, %v8107_v58  ;;  %v1242_v2 = vrot.slane %v1234_v31, %v8107_v58 }
 0x3e8   : > { %v3212_v36 = vsel %vm13987_vm12, %v14573_v40, 0.0  ;;  %v9786_v44 = vpop.permute.xlu0 %2270  ;;  %v1296_v53 = vrot.slane %v1286_v35, %v8107_v58  ;;  %v1319_v21 = vcombine.low %v1310_v17, %v1317_v39  ;;  %v1003_v20 = vadd.f32 %v1002_v3, %v9519_v55 }
 0x3e9   : > { %14574 = vst [vmem:[#allocation63_spill] sm:$0xff] %v9786_v44  ;;  %14575 = vst [vmem:[#allocation57_spill] sm:$0xff] %v9789_v34  ;;  %4184 = vrot.lane.b32.xlu1 %v14576_v56, %s14520_s9  ;;  %v14577_v5 = vstv %s8906_s26  ;;  %v3306_v12 = vcombine.low %v3284_v22, %v3291_v11  ;;  %vm14011_vm12 = vcmask 515072   ;;  %v9801_v10 = vadd.s32 4294967295, %v8978_v37  ;;  %s9841_s26 = sld [smem:[#allocation2 + $0x10]]  ;;  %v14612_v34 = vld [vmem:[#allocation85_spill] sm:$0xff] }
 0x3ea   : > { %v1170_v24 = vmul.f32 %v14577_v5, %v1168_v62  ;;  %4337 = vrot.lane.b32.xlu0 %v14546_v4, %s14578_s28  ;;  %v9804_v30 = vrot.slane %v3250_v13, %v8107_v58  ;;  %v1250_v31 = vcombine.low %v1242_v2, %v1249_v26  ;;  %v1318_v35 = vcombine.low %v1296_v53, %v1303_v32  ;;  %v14588_v5 = vld [vmem:[#allocation86_spill] sm:$0xff]  ;;  %v14594_v32 = vld [vmem:[#allocation73_spill] sm:$0xff]  ;;  %v14596_v26 = vld [vmem:[#allocation79_spill] sm:$0xff] }
 0x3eb   : > { %v9806_v39 = vpop.permute.xlu1 %2184  ;;  %v9809_v55 = vadd.s32 3, %v8978_v37  ;;  %v1087_v3 = vadd.f32 %v1086_v57, %v1003_v20  ;;  %v14582_v11 = vstv %s8886_s27  ;;  %v9820_v17 = vrot.slane %v3307_v43, %v8107_v58  ;;  %v14586_v57 = vld [vmem:[#allocation20_spill] sm:$0xff]  ;;  %s14626_s27 = smov 94  }
 0x3ec   : > { %14579 = vst [vmem:[#allocation70_spill] sm:$0xff] %v9804_v30  ;;  %14580 = vst [vmem:[#allocation59_spill] sm:$0xff] %v9806_v39  ;;  %v9813_v62 = vmul.f32 %v14582_v11, %v3212_v36  ;;  %v9822_v13 = vpop.permute.xlu0 %2274  ;;  %v1333_v37 = vrot.slane %v1319_v21, %v8107_v58  ;;  %v9833_v2 = vrot.slane %v3306_v12, %v8107_v58  ;;  %v1252_v21 = vsel %vm13989_vm13, %v1250_v31, 0.0  ;;  %v14595_v12 = vld [vmem:[#allocation90_spill] sm:$0xff] }
 0x3ed   : > { %14581 = vst [vmem:[#allocation61_spill] sm:$0xff] %v9809_v55  ;;  %14584 = vst [vmem:[#allocation15_spill] sm:$0xff] %v9820_v17  ;;  %4188 = vrot.lane.b32.xlu1 %v14586_v57, %s14520_s9  ;;  %v1171_v22 = vadd.f32 %v1170_v24, %v1087_v3  ;;  %v3330_v43 = vcombine.low %v9710_v61, %v9670_v60  ;;  %v3331_v53 = vcombine.low %v9675_v7, %v9680_v8  ;;  %v14589_v24 = vld [vmem:[#allocation75_spill] sm:$0xff]  ;;  %v14590_v61 = vld [vmem:[#allocation77_spill] sm:$0xff]  ;;  %vm14043_vm13 = vcmask 506880   ;;  %s14842_s9 = smov 65  }
 0x3ee   : > { %14583 = vst [vmem:[#allocation72_spill] sm:$0xff] %v9813_v62  ;;  %14585 = vst [vmem:[#allocation68_spill] sm:$0xff] %v9822_v13  ;;  %4342 = vrot.lane.b32.xlu0 %v14555_v49, %s14578_s28  ;;  %v1326_v20 = vrot.slane %v1318_v35, %v8107_v58  ;;  %v1360_v60 = vsel %vm14047_vm3, %v14589_v24, %v14588_v5  ;;  %v9855_v7 = vsel %vm14047_vm3, %v14588_v5, %v14590_v61  ;;  %v14592_v3 = vld [vmem:[#allocation84_spill] sm:$0xff]  ;;  %v14616_v13 = vld [vmem:[#allocation83_spill] sm:$0xff] }
 0x3ef   : > { %14587 = vst [vmem:[#allocation82_spill] sm:$0xff] %v9833_v2  ;;  %v9857_v8 = vpop.permute.xlu1 %2188  ;;  %v3332_v31 = vcombine.low %v9685_v28, %v9652_v41  ;;  %v3333_v35 = vcombine.low %v9657_v38, %v9715_v42  ;;  %v1359_v11 = vsel %vm14047_vm3, %v14592_v3, %v14589_v24  ;;  %v9873_v36 = vsel %vm14047_vm3, %v14594_v32, %v14592_v3  ;;  %v14597_v28 = vld [vmem:[#allocation14_spill] sm:$0xff]  ;;  %v14611_v2 = vld [vmem:[#allocation96_spill] sm:$0xff] }
 0x3f0   : > { %14591 = vst [vmem:[#allocation71_spill] sm:$0xff] %v9857_v8  ;;  %v9868_v40 = vpop.permute.xlu0 %2278  ;;  %v1334_v5 = vcombine.low %v1326_v20, %v1333_v37  ;;  %v9878_v41 = vsel %vm14047_vm3, %v14596_v26, %v14595_v12  ;;  %v9883_v38 = vsel %vm14047_vm3, %v14595_v12, %v14594_v32  ;;  %v14598_v42 = vstv %s8920_s16  ;;  %v14601_v32 = vld [vmem:[#allocation88_spill] sm:$0xff]  ;;  %v14603_v12 = vld [vmem:[#allocation87_spill] sm:$0xff]  ;;  %s9935_s16 = sld [smem:[#allocation2 + $0x11]] }
 0x3f1   : > { %14593 = vst [vmem:[#allocation65_spill] sm:$0xff] %v9868_v40  ;;  %4258 = vrot.lane.b32.xlu1 %v14597_v28, %s14545_s7  ;;  %v1254_v37 = vmul.f32 %v14598_v42, %v1252_v21  ;;  %v9890_v20 = vrot.slane %v3330_v43, %v8107_v58  ;;  %v9893_v24 = vrot.slane %v3331_v53, %v8107_v58  ;;  %v14602_v53 = vld [vmem:[#allocation98_spill] sm:$0xff]  ;;  %v14623_v39 = vstv %s9014_s18  ;;  %s14737_s18 = smov 67  }
 0x3f2   : > { %v1371_v3 = vcombine.low %v1360_v60, %v9855_v7  ;;  %4346 = vrot.lane.b32.xlu0 %v14521_v9, %s14578_s28  ;;  %v9905_v21 = vsel %vm14047_vm3, %v14590_v61, %v14601_v32  ;;  %v9910_v43 = vsel %vm14047_vm3, %v14601_v32, %v14596_v26  ;;  %v9915_v42 = vsel %vm14011_vm12, %v14603_v12, %v14602_v53  ;;  %vm14058_vm3 = vmand %vm9693_vm11, %vm8722_vm14 }
 0x3f3   : > { %14599 = vst [vmem:[#allocation17_spill] sm:$0xff] %v9890_v20  ;;  %14600 = vst [vmem:[#allocation78_spill] sm:$0xff] %v9893_v24  ;;  %v9920_v62 = vsel %vm14011_vm12, %v14602_v53, %v14605_v51  ;;  %v9922_v63 = vpop.permute.xlu1 %2192  ;;  %v9925_v61 = vrot.slane %v3332_v31, %v8107_v58  ;;  %v9928_v55 = vrot.slane %v3333_v35, %v8107_v58  ;;  %v1336_v31 = vsel %vm14000_vm4, %v1334_v5, 0.0  ;;  %v14814_v52 = vld [vmem:[#allocation59_spill] sm:$0xff] }
 0x3f4   : > { %14604 = vst [vmem:[#allocation67_spill] sm:$0xff] %v9915_v42  ;;  %14606 = vst [vmem:[#allocation69_spill] sm:$0xff] %v9920_v62  ;;  %v1370_v26 = vcombine.low %v9873_v36, %v1359_v11  ;;  %v1373_v32 = vcombine.low %v9878_v41, %v9883_v38  ;;  %v9933_v17 = vpop.permute.xlu0 %2349  ;;  %v3386_v53 = vcombine.low %v1359_v11, %v1360_v60  ;;  %vm14029_vm4 = vcmask 498688  }
 0x3f5   : > { %14607 = vst [vmem:[#allocation80_spill] sm:$0xff] %v9922_v63  ;;  %14608 = vst [vmem:[#allocation76_spill] sm:$0xff] %v9925_v61  ;;  %v9945_v35 = vsel %vm14011_vm12, %v14612_v34, %v14611_v2  ;;  %v9950_v30 = vsel %vm14011_vm12, %v14611_v2, %v14603_v12  ;;  %v9955_v44 = vrot.slane %v1371_v3, %v8107_v58  ;;  %v14617_v2 = vld [vmem:[#allocation92_spill] sm:$0xff] }
 0x3f6   : > { %14609 = vst [vmem:[#allocation18_spill] sm:$0xff] %v9928_v55  ;;  %14610 = vst [vmem:[#allocation20_spill] sm:$0xff] %v9933_v17  ;;  %v14615_v17 = vld [vmem:[#allocation16_spill] sm:$0xff]  ;;  %v1372_v60 = vcombine.low %v9905_v21, %v9910_v43  ;;  %v1457_v11 = vcombine.low %v9915_v42, %v9920_v62  ;;  %4350 = vrot.lane.b32.xlu0 %v14529_v16, %s14578_s28  ;;  %v9967_v12 = vsel %vm14011_vm12, %v14617_v2, %v14616_v13 }
 0x3f7   : > { %14613 = vst [vmem:[#allocation86_spill] sm:$0xff] %v9945_v35  ;;  %14614 = vst [vmem:[#allocation75_spill] sm:$0xff] %v9950_v30  ;;  %4262 = vrot.lane.b32.xlu1 %v14615_v17, %s14545_s7  ;;  %v9972_v3 = vsel %vm14011_vm12, %v14605_v51, %v14617_v2  ;;  %v9977_v40 = vsel %vm14011_vm12, %v14616_v13, %v14620_v15  ;;  %v9982_v62 = vsel %vm14011_vm12, %v14620_v15, %v14612_v34  ;;  %v9984_v5 = vpop.permute.xlu1 %2196  ;;  %v14630_v13 = vld [vmem:[#allocation89_spill] sm:$0xff]  ;;  %vm14046_vm12 = vcmask 285696  }
 0x3f8   : > { %14618 = vst [vmem:[#allocation77_spill] sm:$0xff] %v9967_v12  ;;  %14619 = vst [vmem:[#allocation84_spill] sm:$0xff] %v9972_v3  ;;  %v1255_v42 = vadd.f32 %v1254_v37, %v1171_v22  ;;  %v1338_v63 = vmul.f32 %v14623_v39, %v1336_v31  ;;  %v1401_v8 = vrot.slane %v1373_v32, %v8107_v58  ;;  %v9991_v2 = vpop.permute.xlu0 %2354 }
 0x3f9   : > { %14621 = vst [vmem:[#allocation73_spill] sm:$0xff] %v9977_v40  ;;  %14622 = vst [vmem:[#allocation90_spill] sm:$0xff] %v9982_v62  ;;  %v1456_v51 = vcombine.low %v9945_v35, %v9950_v30  ;;  %v1380_v15 = vrot.slane %v1370_v26, %v8107_v58  ;;  %v9999_v34 = vrot.slane %v3386_v53, %v8107_v58  ;;  %v14627_v53 = vld [vmem:[#allocation91_spill] sm:$0xff]  ;;  %v14638_v35 = vld [vmem:[#allocation106_spill] sm:$0xff] }
 0x3fa   : > { %14624 = vst [vmem:[#allocation79_spill] sm:$0xff] %v9991_v2  ;;  %v1394_v39 = vrot.slane %v1372_v60, %v8107_v58  ;;  %v1454_v22 = vcombine.low %v9972_v3, %v9967_v12  ;;  %v1455_v37 = vcombine.low %v9977_v40, %v9982_v62  ;;  %v1485_v32 = vrot.slane %v1457_v11, %v8107_v58  ;;  %v14636_v62 = vld [vmem:[#allocation93_spill] sm:$0xff]  ;;  %v14639_v3 = vld [vmem:[#allocation95_spill] sm:$0xff]  ;;  %v14653_v30 = vld [vmem:[#allocation104_spill] sm:$0xff] }
 0x3fb   : > { %14625 = vst [vmem:[#allocation14_spill] sm:$0xff] %v9999_v34  ;;  %4266 = vrot.lane.b32.xlu1 %v14576_v56, %s14545_s7  ;;  %4419 = vrot.lane.b32.xlu0 %v14546_v4, %s14626_s27  ;;  %v1402_v26 = vcombine.low %v1380_v15, %v9955_v44  ;;  %v3387_v31 = vcombine.low %v9855_v7, %v9905_v21  ;;  %v10024_v11 = vpop.permute.xlu1 %2268  ;;  %v14634_v21 = vld [vmem:[#allocation102_spill] sm:$0xff]  ;;  %v14643_v7 = vld [vmem:[#allocation99_spill] sm:$0xff] }
 0x3fc   : > { %v10017_v60 = vsel %vm14043_vm13, %v14628_v27, %v14627_v53  ;;  %v10022_v55 = vsel %vm14043_vm13, %v14630_v13, %v14628_v27  ;;  %14632 = vst [vmem:[#allocation87_spill] sm:$0xff] %v10024_v11  ;;  %v10026_v61 = vadd.f32 %v1338_v63, %v1255_v42  ;;  %v1403_v24 = vcombine.low %v1394_v39, %v1401_v8  ;;  %v10029_v15 = vpop.permute.xlu0 %2358  ;;  %v14648_v40 = vld [vmem:[#allocation103_spill] sm:$0xff] }
 0x3fd   : > { %14629 = vst [vmem:[#allocation88_spill] sm:$0xff] %v10017_v60  ;;  %14631 = vst [vmem:[#allocation98_spill] sm:$0xff] %v10022_v55  ;;  %v1478_v44 = vrot.slane %v1456_v51, %v8107_v58  ;;  %v10035_v20 = vsel %vm14043_vm13, %v14627_v53, %v14634_v21  ;;  %v10040_v27 = vsel %vm14043_vm13, %v14634_v21, %v14636_v62  ;;  %v14642_v21 = vld [vmem:[#allocation110_spill] sm:$0xff]  ;;  %v14720_v34 = vld [vmem:[#allocation39_spill] sm:$0xff] }
 0x3fe   : > { %14633 = vst [vmem:[#allocation81_spill] sm:$0xff] %v10029_v15  ;;  %14635 = vst [vmem:[#allocation96_spill] sm:$0xff] %v10035_v20  ;;  %v10045_v63 = vsel %vm14043_vm13, %v14639_v3, %v14638_v35  ;;  %v10050_v8 = vsel %vm14043_vm13, %v14638_v35, %v14630_v13  ;;  %v1464_v42 = vrot.slane %v1454_v22, %v8107_v58  ;;  %v14645_v35 = vld [vmem:[#allocation101_spill] sm:$0xff]  ;;  %v14647_v22 = vld [vmem:[#allocation116_spill] sm:$0xff] }
 0x3ff   : > { %14637 = vst [vmem:[#allocation85_spill] sm:$0xff] %v10040_v27  ;;  %14640 = vst [vmem:[#allocation16_spill] sm:$0xff] %v10045_v63  ;;  %4270 = vrot.lane.b32.xlu1 %v14586_v57, %s14545_s7  ;;  %v1471_v51 = vrot.slane %v1455_v37, %v8107_v58  ;;  %v1487_v39 = vcombine.low %v1478_v44, %v1485_v32  ;;  %v1538_v53 = vcombine.low %v10022_v55, %v10017_v60  ;;  %v14650_v32 = vld [vmem:[#allocation97_spill] sm:$0xff]  ;;  %v10080_v60 = vpop.permute.xlu1 %2272  ;;  %s14867_s7 = smov 64  }
 0x400   : > { %14641 = vst [vmem:[#allocation83_spill] sm:$0xff] %v10050_v8  ;;  %4424 = vrot.lane.b32.xlu0 %v14555_v49, %s14626_s27  ;;  %v10063_v12 = vsel %vm14029_vm4, %v14643_v7, %v14642_v21  ;;  %v10068_v13 = vsel %vm14029_vm4, %v14642_v21, %v14645_v35  ;;  %v10073_v37 = vsel %vm14029_vm4, %v14648_v40, %v14647_v22  ;;  %14652 = vst [vmem:[#allocation89_spill] sm:$0xff] %v10080_v60  ;;  %v14656_v60 = vld [vmem:[#allocation108_spill] sm:$0xff] }
 0x401   : > { %14644 = vst [vmem:[#allocation92_spill] sm:$0xff] %v10063_v12  ;;  %14646 = vst [vmem:[#allocation94_spill] sm:$0xff] %v10068_v13  ;;  %v10078_v44 = vsel %vm14029_vm4, %v14647_v22, %v14650_v32  ;;  %v1539_v55 = vcombine.low %v10035_v20, %v10040_v27  ;;  %v10087_v21 = vsel %vm14043_vm13, %v14636_v62, %v14653_v30  ;;  %v10096_v22 = vpop.permute.xlu0 %2362  ;;  %v14659_v20 = vld [vmem:[#allocation113_spill] sm:$0xff] }
 0x402   : > { %14649 = vst [vmem:[#allocation91_spill] sm:$0xff] %v10073_v37  ;;  %14651 = vst [vmem:[#allocation100_spill] sm:$0xff] %v10078_v44  ;;  %v10092_v15 = vsel %vm14043_vm13, %v14653_v30, %v14639_v3  ;;  %v1541_v2 = vcombine.low %v10045_v63, %v10050_v8  ;;  %v10101_v11 = vsel %vm14029_vm4, %v14656_v60, %v14643_v7  ;;  %vm475_vm13 = vcmp.lt.s32.totalorder %v9801_v10, 32 }
 0x403   : > { %14654 = vst [vmem:[#allocation102_spill] sm:$0xff] %v10087_v21  ;;  %14655 = vst [vmem:[#allocation93_spill] sm:$0xff] %v10092_v15  ;;  %v10106_v62 = vsel %vm14029_vm4, %v14650_v32, %v14656_v60  ;;  %v10111_v30 = vsel %vm14029_vm4, %v14645_v35, %v14659_v20  ;;  %v10116_v3 = vsel %vm14029_vm4, %v14659_v20, %v14648_v40  ;;  %4340 = vrot.lane.b32.xlu1 %v14597_v28, %s14578_s28  ;;  %vm14050_vm4 = vcmask 277504   ;;  %v10139_v32 = vpop.permute.xlu1 %2276 }
 0x404   : > { %14657 = vst [vmem:[#allocation106_spill] sm:$0xff] %v10101_v11  ;;  %14658 = vst [vmem:[#allocation95_spill] sm:$0xff] %v10106_v62  ;;  %v10121_v7 = vrot.slane %v1402_v26, %v8107_v58  ;;  %v10124_v27 = vrot.slane %v3387_v31, %v8107_v58  ;;  %v1623_v60 = vcombine.low %v10063_v12, %v10068_v13  ;;  %4428 = vrot.lane.b32.xlu0 %v14521_v9, %s14626_s27 }
 0x405   : > { %14660 = vst [vmem:[#allocation110_spill] sm:$0xff] %v10111_v30  ;;  %14661 = vst [vmem:[#allocation99_spill] sm:$0xff] %v10116_v3  ;;  %v1625_v35 = vcombine.low %v10073_v37, %v10078_v44  ;;  %v10133_v40 = vrot.slane %v1403_v24, %v8107_v58  ;;  %v3388_v20 = vcombine.low %v9910_v43, %v9878_v41  ;;  %v14663_v44 = vld [vmem:[#allocation111_spill] sm:$0xff]  ;;  %v14665_v37 = vld [vmem:[#allocation105_spill] sm:$0xff]  ;;  %v10155_v43 = vpop.permute.xlu0 %2433 }
 0x406   : > { %14662 = vst [vmem:[#allocation101_spill] sm:$0xff] %v10124_v27  ;;  %v1486_v26 = vcombine.low %v1464_v42, %v1471_v51  ;;  %v1540_v31 = vcombine.low %v10087_v21, %v10092_v15  ;;  %v1622_v12 = vcombine.low %v10106_v62, %v10101_v11  ;;  %v1624_v13 = vcombine.low %v10111_v30, %v10116_v3  ;;  %v14718_v27 = vld [vmem:[#allocation130_spill] sm:$0xff] }
 0x407   : > { %v10148_v24 = vsel %vm14046_vm12, %v14663_v44, %v8882_v46  ;;  %v10153_v41 = vsel %vm14046_vm12, %v8882_v46, %v14665_v37  ;;  %14667 = vst [vmem:[#allocation97_spill] sm:$0xff] %v10155_v43  ;;  %v10158_v42 = vrot.slane %v1487_v39, %v8107_v58  ;;  %v1548_v51 = vrot.slane %v1538_v53, %v8107_v58  ;;  %v14668_v46 = vld [vmem:[#allocation109_spill] sm:$0xff] }
 0x408   : > { %14664 = vst [vmem:[#allocation116_spill] sm:$0xff] %v10148_v24  ;;  %14666 = vst [vmem:[#allocation103_spill] sm:$0xff] %v10153_v41  ;;  %v1555_v11 = vrot.slane %v1539_v55, %v8107_v58  ;;  %v1569_v30 = vrot.slane %v1541_v2, %v8107_v58  ;;  %4344 = vrot.lane.b32.xlu1 %v14615_v17, %s14578_s28  ;;  %v1639_v62 = vrot.slane %v1623_v60, %v8107_v58  ;;  %v14671_v2 = vld [vmem:[#allocation107_spill] sm:$0xff] }
 0x409   : > { %v1653_v3 = vrot.slane %v1625_v35, %v8107_v58  ;;  %v10170_v21 = vsel %vm14046_vm12, %v14668_v46, %v8855_v50  ;;  %v10175_v39 = vsel %vm14046_vm12, %v8855_v50, %v14663_v44  ;;  %4432 = vrot.lane.b32.xlu0 %v14529_v16, %s14626_s27  ;;  %v1562_v55 = vrot.slane %v1540_v31, %v8107_v58  ;;  %v10192_v50 = vpop.permute.xlu1 %2280  ;;  %v14674_v31 = vld [vmem:[#allocation119_spill] sm:$0xff] }
 0x40a   : > { %14669 = vst [vmem:[#allocation104_spill] sm:$0xff] %v10170_v21  ;;  %14670 = vst [vmem:[#allocation108_spill] sm:$0xff] %v10175_v39  ;;  %v10183_v53 = vsel %vm14046_vm12, %v14671_v2, %v8824_v14  ;;  %v10188_v60 = vsel %vm14046_vm12, %v8824_v14, %v14668_v46  ;;  %v1709_v35 = vcombine.low %v10148_v24, %v10153_v41  ;;  %v10206_v14 = vpop.permute.xlu0 %2438 }
 0x40b   : > { %14672 = vst [vmem:[#allocation113_spill] sm:$0xff] %v10183_v53  ;;  %14673 = vst [vmem:[#allocation111_spill] sm:$0xff] %v10188_v60  ;;  %v1632_v44 = vrot.slane %v1622_v12, %v8107_v58  ;;  %v1646_v8 = vrot.slane %v1624_v13, %v8107_v58  ;;  %v10199_v15 = vsel %vm14046_vm12, %v14674_v31, %v14671_v2 }
 0x40c   : > { %14675 = vst [vmem:[#allocation105_spill] sm:$0xff] %v10199_v15  ;;  %v10204_v63 = vsel %vm14046_vm12, %v14665_v37, %v14674_v31  ;;  %v1494_v41 = vrot.slane %v1486_v26, %v8107_v58  ;;  %v1571_v12 = vcombine.low %v1562_v55, %v1569_v30  ;;  %v1708_v13 = vcombine.low %v10170_v21, %v10175_v39  ;;  %v14715_v39 = vld [vmem:[#allocation128_spill] sm:$0xff] }
 0x40d   : > { %14676 = vst [vmem:[#allocation109_spill] sm:$0xff] %v10204_v63  ;;  %4348 = vrot.lane.b32.xlu1 %v14576_v56, %s14578_s28  ;;  %v1570_v2 = vcombine.low %v1548_v51, %v1555_v11  ;;  %v1654_v24 = vcombine.low %v1632_v44, %v1639_v62  ;;  %v1655_v43 = vcombine.low %v1646_v8, %v1653_v3  ;;  %v10227_v11 = vpop.permute.xlu1 %2352  ;;  %v14679_v3 = vld [vmem:[#allocation117_spill] sm:$0xff] }
 0x40e   : > { %v1707_v37 = vcombine.low %v10183_v53, %v10188_v60  ;;  %4501 = vrot.lane.b32.xlu0 %v14546_v4, %s14677_s30  ;;  %v3389_v26 = vcombine.low %v9883_v38, %v9873_v36  ;;  %v10222_v30 = vrot.slane %v3388_v20, %v8107_v58  ;;  %v1706_v55 = vcombine.low %v10204_v63, %v10199_v15  ;;  %v14681_v38 = vld [vmem:[#allocation120_spill] sm:$0xff]  ;;  %v10242_v51 = vpop.permute.xlu0 %2442  ;;  %v14698_v53 = vld [vmem:[#allocation123_spill] sm:$0xff]  ;;  %v14701_v60 = vld [vmem:[#allocation133_spill] sm:$0xff] }
 0x40f   : > { %v1737_v31 = vrot.slane %v1709_v35, %v8107_v58  ;;  %v1418_v8 = vcombine.low %v10121_v7, %v10133_v40  ;;  %v1502_v62 = vcombine.low %v1494_v41, %v10158_v42  ;;  %v10235_v36 = vsel %vm14050_vm4, %v14679_v3, %v8956_v19  ;;  %v14683_v41 = vld [vmem:[#allocation121_spill] sm:$0xff]  ;;  %v14685_v35 = vld [vmem:[#allocation115_spill] sm:$0xff]  ;;  %v14714_v63 = vld [vmem:[#allocation44_spill] sm:$0xff] }
 0x410   : > { %14678 = vst [vmem:[#allocation107_spill] sm:$0xff] %v10222_v30  ;;  %14680 = vst [vmem:[#allocation119_spill] sm:$0xff] %v10235_v36  ;;  %v10240_v20 = vsel %vm14050_vm4, %v8956_v19, %v14681_v38  ;;  %v10249_v7 = vrot.slane %v1571_v12, %v8107_v58  ;;  %v1730_v40 = vrot.slane %v1708_v13, %v8107_v58 }
 0x411   : > { %14682 = vst [vmem:[#allocation117_spill] sm:$0xff] %v10240_v20  ;;  %v10255_v42 = vsel %vm14050_vm4, %v14683_v41, %v9044_v25  ;;  %v10260_v19 = vsel %vm14050_vm4, %v9044_v25, %v14685_v35  ;;  %4352 = vrot.lane.b32.xlu1 %v14586_v57, %s14578_s28  ;;  %v10269_v44 = vrot.slane %v1570_v2, %v8107_v58  ;;  %s11081_s28 = sld [smem:[#allocation2 + $0x19]] }
 0x412   : > { %14684 = vst [vmem:[#allocation120_spill] sm:$0xff] %v10255_v42  ;;  %14686 = vst [vmem:[#allocation121_spill] sm:$0xff] %v10260_v19  ;;  %v10272_v12 = vrot.slane %v1654_v24, %v8107_v58  ;;  %v10275_v13 = vrot.slane %v1655_v43, %v8107_v58  ;;  %v10278_v25 = vrot.slane %v1707_v37, %v8107_v58  ;;  %4506 = vrot.lane.b32.xlu0 %v14555_v49, %s14677_s30  ;;  %v10292_v43 = vpop.permute.xlu1 %2356 }
 0x413   : > { %v10283_v46 = vrot.slane %v1706_v55, %v8107_v58  ;;  %v1739_v15 = vcombine.low %v1730_v40, %v1737_v31  ;;  %v10288_v2 = vsel %vm14050_vm4, %v8910_v23, %v14679_v3  ;;  %v1791_v24 = vcombine.low %v10235_v36, %v10240_v20  ;;  %v10313_v40 = vpop.permute.xlu0 %2446  ;;  %v14694_v36 = vld [vmem:[#allocation122_spill] sm:$0xff] }
 0x414   : > { %14687 = vst [vmem:[#allocation115_spill] sm:$0xff] %v10288_v2  ;;  %v10299_v37 = vsel %vm14050_vm4, %v14685_v35, %v8910_v23  ;;  %v10304_v55 = vsel %vm14050_vm4, %v14681_v38, %v9004_v45  ;;  %v10309_v31 = vsel %vm14050_vm4, %v9004_v45, %v14683_v41  ;;  %v1793_v3 = vcombine.low %v10255_v42, %v10260_v19  ;;  %v14707_v19 = vld [vmem:[#allocation124_spill] sm:$0xff] }
 0x415   : > { %14688 = vst [vmem:[#allocation135_spill] sm:$0xff] %v10299_v37  ;;  %14689 = vst [vmem:[#allocation136_spill] sm:$0xff] %v10304_v55  ;;  %v1420_v23 = vsel %vm14058_vm3, %v1418_v8, 0.0  ;;  %v10321_v35 = vrot.slane %v3389_v26, %v8107_v58  ;;  %v1504_v45 = vsel %vm14052_vm2, %v1502_v62, 0.0  ;;  %v1586_v38 = vcombine.low %v10269_v44, %v10249_v7  ;;  %4422 = vrot.lane.b32.xlu1 %v14597_v28, %s14626_s27 }
 0x416   : > { %14690 = vst [vmem:[#allocation137_spill] sm:$0xff] %v10309_v31  ;;  %v1670_v41 = vcombine.low %v10272_v12, %v10275_v13  ;;  %v1738_v8 = vcombine.low %v10283_v46, %v10278_v25  ;;  %vm14692_vm4 = vcmask 269312   ;;  %4510 = vrot.lane.b32.xlu0 %v14521_v9, %s14677_s30  ;;  %v10349_v7 = vrot.slane %v1739_v15, %v8107_v58  ;;  %v10358_v13 = vpop.permute.xlu1 %2360  ;;  %v14697_v25 = vld [vmem:[#allocation132_spill] sm:$0xff] }
 0x417   : > { %14691 = vst [vmem:[#allocation138_spill] sm:$0xff] %v10321_v35  ;;  %v10339_v26 = vsel %vm14692_vm4, %v8965_v59, %v9183_v47  ;;  %vm14695_vm2 = vmmov %vm14692_vm4  ;;  %v1790_v44 = vcombine.low %v10299_v37, %v10288_v2  ;;  %v10354_v46 = vrot.slane %v1791_v24, %v8107_v58  ;;  %v1792_v12 = vcombine.low %v10304_v55, %v10309_v31  ;;  %v14700_v15 = vld [vmem:[#allocation40_spill] sm:$0xff]  ;;  %v14704_v2 = vld [vmem:[#allocation126_spill] sm:$0xff]  ;;  %v10376_v55 = vpop.permute.xlu0 %2573 }
 0x418   : > { %14693 = vst [vmem:[#allocation139_spill] sm:$0xff] %v10339_v26  ;;  %v10344_v62 = vsel %vm14695_vm2, %v9183_v47, %v14694_v36  ;;  %v1821_v47 = vrot.slane %v1793_v3, %v8107_v58  ;;  %v10364_v20 = vsel %vm14695_vm2, %v14698_v53, %v14697_v25  ;;  %vm14702_vm4 = vcmask 261120   ;;  %vm14708_vm12 = vmmov %vm14695_vm2  ;;  %v14710_v37 = vld [vmem:[#allocation34_spill] sm:$0xff] }
 0x419   : > { %14696 = vst [vmem:[#allocation122_spill] sm:$0xff] %v10344_v62  ;;  %14699 = vst [vmem:[#allocation132_spill] sm:$0xff] %v10364_v20  ;;  %v10369_v21 = vsel %vm14702_vm4, %v14701_v60, %v14700_v15  ;;  %v10381_v3 = vsel %vm14708_vm12, %v14697_v25, %v14707_v19  ;;  %v10386_v31 = vsel %vm14695_vm2, %v14707_v19, %v14710_v37  ;;  %4426 = vrot.lane.b32.xlu1 %v14615_v17, %s14626_s27 }
 0x41a   : > { %14703 = vst [vmem:[#allocation123_spill] sm:$0xff] %v10369_v21  ;;  %vm14705_vm3 = vmmov %vm14702_vm4  ;;  %4514 = vrot.lane.b32.xlu0 %v14529_v16, %s14677_s30 }
 0x41b   : > { %v10374_v24 = vsel %vm14705_vm3, %v14700_v15, %v14704_v2  ;;  %14709 = vst [vmem:[#allocation133_spill] sm:$0xff] %v10381_v3  ;;  %14711 = vst [vmem:[#allocation126_spill] sm:$0xff] %v10386_v31  ;;  %v1877_v15 = vcombine.low %v10339_v26, %v10344_v62  ;;  %v10405_v19 = vsel %vm14705_vm3, %v14714_v63, %v14718_v27  ;;  %v14725_v26 = vld [vmem:[#allocation129_spill] sm:$0xff] }
 0x41c   : > { %14706 = vst [vmem:[#allocation40_spill] sm:$0xff] %v10374_v24  ;;  %vm14712_vm4 = vmmov %vm14695_vm2  ;;  %v1814_v62 = vrot.slane %v1792_v12, %v8107_v58  ;;  %v1961_v30 = vcombine.low %v10369_v21, %v10374_v24  ;;  %v10454_v21 = vpop.permute.xlu0 %2577 }
 0x41d   : > { %v10391_v42 = vsel %vm14712_vm4, %v14710_v37, %v8965_v59  ;;  %vm14716_vm12 = vmmov %vm14705_vm3  ;;  %14719 = vst [vmem:[#allocation44_spill] sm:$0xff] %v10405_v19  ;;  %4430 = vrot.lane.b32.xlu1 %v14576_v56, %s14626_s27 }
 0x41e   : > { %14713 = vst [vmem:[#allocation124_spill] sm:$0xff] %v10391_v42  ;;  %v10400_v25 = vsel %vm14716_vm12, %v14715_v39, %v14714_v63  ;;  %vm14721_vm2 = vmmov %vm14705_vm3  ;;  %vm14726_vm12 = vcmask 269312   ;;  %4583 = vrot.lane.b32.xlu0 %v14546_v4, %s14737_s18 }
 0x41f   : > { %14717 = vst [vmem:[#allocation34_spill] sm:$0xff] %v10400_v25  ;;  %v10410_v59 = vsel %vm14721_vm2, %v14718_v27, %v14720_v34  ;;  %vm14723_vm4 = vmmov %vm14721_vm2  ;;  %v10423_v63 = vsel %vm14726_vm12, %v14725_v26, %v14698_v53  ;;  %v1875_v53 = vcombine.low %v10364_v20, %v10381_v3  ;;  %v1800_v20 = vrot.slane %v1790_v44, %v8107_v58 }
 0x420   : > { %14722 = vst [vmem:[#allocation128_spill] sm:$0xff] %v10410_v59  ;;  %v10415_v37 = vsel %vm14723_vm4, %v14720_v34, %v14701_v60  ;;  %14727 = vst [vmem:[#allocation39_spill] sm:$0xff] %v10423_v63  ;;  %v10432_v34 = vpop.permute.xlu1 %2364  ;;  %v1905_v44 = vrot.slane %v1877_v15, %v8107_v58  ;;  %v1989_v15 = vrot.slane %v1961_v30, %v8107_v58 }
 0x421   : > { %14724 = vst [vmem:[#allocation130_spill] sm:$0xff] %v10415_v37  ;;  %vm14728_vm3 = vmmov %vm14726_vm12  ;;  %v1960_v3 = vcombine.low %v10410_v59, %v10415_v37  ;;  %v1891_v59 = vrot.slane %v1875_v53, %v8107_v58  ;;  %4434 = vrot.lane.b32.xlu1 %v14586_v57, %s14626_s27  ;;  %s14890_s27 = smov 63  }
 0x422   : > { %v10428_v27 = vsel %vm14728_vm3, %v14694_v36, %v14725_v26  ;;  %v1876_v36 = vcombine.low %v10386_v31, %v10391_v42  ;;  %v14731_v26 = vld [vmem:[#allocation134_spill] sm:$0xff]  ;;  %vm14732_vm4 = vmmov %vm14721_vm2  ;;  %v1823_v42 = vcombine.low %v1814_v62, %v1821_v47  ;;  %v1746_v31 = vrot.slane %v1738_v8, %v8107_v58  ;;  %4588 = vrot.lane.b32.xlu0 %v14555_v49, %s14737_s18 }
 0x423   : > { %14729 = vst [vmem:[#allocation129_spill] sm:$0xff] %v10428_v27  ;;  %v10447_v12 = vsel %vm14732_vm4, %v14731_v26, %v14715_v39  ;;  %vm14734_vm12 = vmmov %vm14721_vm2  ;;  %v1959_v39 = vcombine.low %v10400_v25, %v10405_v19  ;;  %v1874_v35 = vcombine.low %v10428_v27, %v10423_v63  ;;  %vm14738_vm4 = vcmp.ge.s32.totalorder %v9801_v10, 0  ;;  %v10499_v63 = vpop.permute.xlu0 %2581  ;;  %v14802_v27 = vld [vmem:[#allocation60_spill] sm:$0xff] }
 0x424   : > { %14733 = vst [vmem:[#allocation52_spill] sm:$0xff] %v10447_v12  ;;  %v10452_v24 = vsel %vm14734_vm12, %v14704_v2, %v14731_v26  ;;  %vm14085_vm2 = vmand %vm9693_vm11, %vm9533_vm1  ;;  %v14736_v2 = vstv %s9134_s14  ;;  %v14739_v62 = vmov 0  ;;  %v1822_v8 = vcombine.low %v1800_v20, %v10354_v46  ;;  %s10537_s14 = sld [smem:[#allocation2 + $0x14]] }
 0x425   : > { %14735 = vst [vmem:[#allocation134_spill] sm:$0xff] %v10452_v24  ;;  %v1422_v26 = vmul.f32 %v14736_v2, %v1420_v23  ;;  %vm10479_vm12 = vmand %vm14738_vm4, %vm475_vm13  ;;  %v1958_v47 = vcombine.low %v10452_v24, %v10447_v12  ;;  %v10492_v2 = vpop.permute.xlu1 %2436  ;;  %v14743_v10 = vstv %s9206_s29  ;;  %v1754_v19 = vcombine.low %v1746_v31, %v10349_v7  ;;  %s10526_s29 = sld [smem:[#allocation2 + $0x13]]  ;;  %4504 = vrot.lane.b32.xlu1 %v14597_v28, %s14677_s30  ;;  %v14801_v24 = vld [vmem:[#allocation71_spill] sm:$0xff] }
 0x426   : > { %v14740_v62 = vsel %vm10479_vm12, 4294967295, %v14739_v62  ;;  %vm14742_vm3 = vmand %vm9693_vm11, %vm9461_vm7  ;;  %v1506_v25 = vmul.f32 %v14743_v10, %v1504_v45  ;;  %v1898_v37 = vrot.slane %v1876_v36, %v8107_v58  ;;  %v1672_v20 = vsel %vm14085_vm2, %v1670_v41, 0.0  ;;  %4592 = vrot.lane.b32.xlu0 %v14521_v9, %s14737_s18  ;;  %v14765_v10 = vld [vmem:[#allocation47_spill] sm:$0xff] }
 0x427   : > { %14741 = vst [vmem:[#allocation140_spill] sm:$0xff] %v14740_v62  ;;  %v1588_v23 = vsel %vm14742_vm3, %v1586_v38, 0.0  ;;  %v1837_v30 = vrot.slane %v1823_v42, %v8107_v58  ;;  %v1975_v38 = vrot.slane %v1959_v39, %v8107_v58  ;;  %v1982_v45 = vrot.slane %v1960_v3, %v8107_v58  ;;  %vm14086_vm3 = vmand %vm10479_vm12, %vm8128_vm8 }
 0x428   : > { %v1423_v31 = vadd.f32 %v1422_v26, %v10026_v61  ;;  %v14744_v41 = vstv %s9413_s10  ;;  %v1884_v42 = vrot.slane %v1874_v35, %v8107_v58  ;;  %v1907_v46 = vcombine.low %v1898_v37, %v1905_v44  ;;  %s10696_s10 = sld [smem:[#allocation2 + $0x17]] }
 0x429   : > { %v1590_v7 = vmul.f32 %v14744_v41, %v1588_v23  ;;  %v1830_v3 = vrot.slane %v1822_v8, %v8107_v58  ;;  %v1968_v53 = vrot.slane %v1958_v47, %v8107_v58  ;;  %v1991_v36 = vcombine.low %v1982_v45, %v1989_v15  ;;  %v10523_v39 = vpop.permute.xlu1 %2440  ;;  %v10530_v41 = vpop.permute.xlu0 %2585  ;;  %v14746_v8 = vld [vmem:[#allocation53_spill] sm:$0xff]  ;;  %v14747_v47 = vld [vmem:[#allocation36_spill] sm:$0xff]  ;;  %v14753_v45 = vld [vmem:[#allocation43_spill] sm:$0xff]  ;;  %4508 = vrot.lane.b32.xlu1 %v14615_v17, %s14677_s30 }
 0x42a   : > { %v1507_v1 = vadd.f32 %v1506_v25, %v1423_v31  ;;  %v14745_v61 = vstv %s9437_s17  ;;  %v1906_v23 = vcombine.low %v1884_v42, %v1891_v59  ;;  %v1756_v35 = vsel %vm14086_vm3, %v1754_v19, 0.0  ;;  %v14750_v15 = vld [vmem:[#allocation41_spill] sm:$0xff]  ;;  %v14754_v31 = vld [vmem:[#allocation38_spill] sm:$0xff]  ;;  %4596 = vrot.lane.b32.xlu0 %v14529_v16, %s14737_s18  ;;  %s10676_s17 = sld [smem:[#allocation2 + $0x16]] }
 0x42b   : > { %v1674_v26 = vmul.f32 %v14745_v61, %v1672_v20  ;;  %v1838_v37 = vcombine.low %v1830_v3, %v1837_v30  ;;  %v1990_v44 = vcombine.low %v1968_v53, %v1975_v38  ;;  %vm14748_vm4 = vcmask 252928   ;;  %v14757_v38 = vld [vmem:[#allocation37_spill] sm:$0xff] }
 0x42c   : > { %v10542_v25 = vsel %vm14748_vm4, %v14747_v47, %v14746_v8  ;;  %vm14751_vm2 = vmmov %vm14748_vm4  ;;  %v1591_v20 = vadd.f32 %v1590_v7, %v1507_v1  ;;  %v1921_v19 = vrot.slane %v1907_v46, %v8107_v58  ;;  %v2005_v1 = vrot.slane %v1991_v36, %v8107_v58  ;;  %v14760_v7 = vld [vmem:[#allocation45_spill] sm:$0xff] }
 0x42d   : > { %14749 = vst [vmem:[#allocation53_spill] sm:$0xff] %v10542_v25  ;;  %v10547_v59 = vsel %vm14751_vm2, %v14746_v8, %v14750_v15  ;;  %vm14755_vm3 = vmmov %vm14751_vm2  ;;  %v10579_v53 = vpop.permute.xlu1 %2444  ;;  %v14764_v61 = vstv %s9736_s1  ;;  %4512 = vrot.lane.b32.xlu1 %v14576_v56, %s14677_s30  ;;  %s10656_s1 = sld [smem:[#allocation2 + $0x15]] }
 0x42e   : > { %14752 = vst [vmem:[#allocation36_spill] sm:$0xff] %v10547_v59  ;;  %v10555_v30 = vsel %vm14755_vm3, %v14754_v31, %v14753_v45  ;;  %vm14758_vm4 = vmmov %vm14751_vm2  ;;  %v10577_v3 = vsel %vm14755_vm3, %v14760_v7, %v14747_v47  ;;  %v1758_v8 = vmul.f32 %v14764_v61, %v1756_v35  ;;  %v2045_v47 = vcombine.low %v10542_v25, %v10547_v59 }
 0x42f   : > { %14756 = vst [vmem:[#allocation41_spill] sm:$0xff] %v10555_v30  ;;  %v10560_v42 = vsel %vm14758_vm4, %v14753_v45, %v14757_v38  ;;  %vm14094_vm2 = vmand %vm10479_vm12, %vm8210_vm0  ;;  %v1914_v45 = vrot.slane %v1906_v23, %v8107_v58  ;;  %v1675_v12 = vadd.f32 %v1674_v26, %v1591_v20  ;;  %v1998_v35 = vrot.slane %v1990_v44, %v8107_v58  ;;  %v14770_v44 = vld [vmem:[#allocation54_spill] sm:$0xff] }
 0x430   : > { %14759 = vst [vmem:[#allocation43_spill] sm:$0xff] %v10560_v42  ;;  %vm14761_vm13 = vmmov %vm14755_vm3  ;;  %v2043_v23 = vcombine.low %v10555_v30, %v10560_v42  ;;  %v2073_v42 = vrot.slane %v2045_v47, %v8107_v58  ;;  %v14776_v59 = vstv %s9750_s3  ;;  %s14787_s3 = smov 66  }
 0x431   : > { %v10572_v46 = vsel %vm14761_vm13, %v14757_v38, %v14760_v7  ;;  %14763 = vst [vmem:[#allocation37_spill] sm:$0xff] %v10577_v3  ;;  %vm14766_vm4 = vmmov %vm14755_vm3  ;;  %v10596_v7 = vpop.permute.xlu0 %2657  ;;  %v2006_v30 = vcombine.low %v1998_v35, %v2005_v1  ;;  %4665 = vrot.lane.b32.xlu0 %v14546_v4, %s14787_s3  ;;  %v14788_v1 = vld [vmem:[#allocation49_spill] sm:$0xff]  ;;  %4516 = vrot.lane.b32.xlu1 %v14586_v57, %s14677_s30  ;;  %s11279_s30 = sld [smem:[#allocation2 + $0x2b]] }
 0x432   : > { %14762 = vst [vmem:[#allocation38_spill] sm:$0xff] %v10572_v46  ;;  %v10587_v36 = vsel %vm14766_vm4, %v14765_v10, %v14754_v31  ;;  %vm14768_vm13 = vmmov %vm14755_vm3  ;;  %v2044_v26 = vcombine.low %v10572_v46, %v10577_v3  ;;  %vm14771_vm3 = vcmask 244736   ;;  %v14773_v31 = vld [vmem:[#allocation50_spill] sm:$0xff]  ;;  %v1759_v46 = vadd.f32 %v1758_v8, %v1675_v12  ;;  %v14782_v8 = vld [vmem:[#allocation55_spill] sm:$0xff] }
 0x433   : > { %14767 = vst [vmem:[#allocation45_spill] sm:$0xff] %v10587_v36  ;;  %v10592_v38 = vsel %vm14768_vm13, %v14750_v15, %v14765_v10  ;;  %v1840_v10 = vsel %vm14094_vm2, %v1838_v37, 0.0  ;;  %v1922_v15 = vcombine.low %v1914_v45, %v1921_v19  ;;  %v10613_v20 = vsel %vm14771_vm3, %v14770_v44, %v9772_v48  ;;  %vm14774_vm4 = vmmov %vm14771_vm3  ;;  %v10624_v19 = vpop.permute.xlu1 %2448 }
 0x434   : > { %14769 = vst [vmem:[#allocation47_spill] sm:$0xff] %v10592_v38  ;;  %14772 = vst [vmem:[#allocation54_spill] sm:$0xff] %v10613_v20  ;;  %v10618_v61 = vsel %vm14774_vm4, %v9772_v48, %v14773_v31  ;;  %v2042_v37 = vcombine.low %v10592_v38, %v10587_v36  ;;  %v1842_v3 = vmul.f32 %v14776_v59, %v1840_v10  ;;  %v14777_v36 = vld [vmem:[#allocation42_spill] sm:$0xff] }
 0x435   : > { %14775 = vst [vmem:[#allocation50_spill] sm:$0xff] %v10618_v61  ;;  %vm14096_vm3 = vmand %vm10479_vm12, %vm9162_vm5  ;;  %v10632_v48 = vpop.permute.xlu0 %2661  ;;  %v2059_v35 = vrot.slane %v2043_v23, %v8107_v58  ;;  %v2129_v12 = vcombine.low %v10613_v20, %v10618_v61  ;;  %v2066_v59 = vrot.slane %v2044_v26, %v8107_v58  ;;  %v14783_v23 = vld [vmem:[#allocation48_spill] sm:$0xff]  ;;  %4670 = vrot.lane.b32.xlu0 %v14555_v49, %s14787_s3 }
 0x436   : > { %vm14778_vm2 = vmmov %vm14774_vm4  ;;  %v2052_v26 = vrot.slane %v2042_v37, %v8107_v58  ;;  %v14794_v61 = vld [vmem:[#allocation64_spill] sm:$0xff]  ;;  %4586 = vrot.lane.b32.xlu1 %v14597_v28, %s14737_s18 }
 0x437   : > { %v10645_v38 = vsel %vm14778_vm2, %v14777_v36, %v9723_v18  ;;  %vm14780_vm13 = vmmov %vm14778_vm2  ;;  %v2075_v37 = vcombine.low %v2066_v59, %v2073_v42  ;;  %v2157_v59 = vrot.slane %v2129_v12, %v8107_v58 }
 0x438   : > { %14779 = vst [vmem:[#allocation42_spill] sm:$0xff] %v10645_v38  ;;  %v10650_v47 = vsel %vm14780_vm13, %v9723_v18, %v14770_v44  ;;  %vm14784_vm4 = vmmov %vm14778_vm2  ;;  %v10667_v18 = vsel %vm14778_vm2, %v14782_v8, %v14777_v36  ;;  %v1924_v44 = vsel %vm14096_vm3, %v1922_v15, 0.0 }
 0x439   : > { %14781 = vst [vmem:[#allocation141_spill] sm:$0xff] %v10650_v47  ;;  %v10662_v10 = vsel %vm14784_vm4, %v14783_v23, %v14782_v8  ;;  %14786 = vst [vmem:[#allocation48_spill] sm:$0xff] %v10667_v18  ;;  %v10689_v8 = vpop.permute.xlu1 %2575  ;;  %v10710_v25 = vpop.permute.xlu0 %2665  ;;  %4674 = vrot.lane.b32.xlu0 %v14521_v9, %s14787_s3 }
 0x43a   : > { %14785 = vst [vmem:[#allocation55_spill] sm:$0xff] %v10662_v10  ;;  %vm14789_vm13 = vmmov %vm14778_vm2  ;;  %v2127_v42 = vcombine.low %v10662_v10, %v10667_v18  ;;  %v14813_v10 = vstv %s9935_s16  ;;  %4590 = vrot.lane.b32.xlu1 %v14615_v17, %s14737_s18  ;;  %s11137_s16 = sld [smem:[#allocation2 + $0x1b]] }
 0x43b   : > { %v10682_v45 = vsel %vm14789_vm13, %v14788_v1, %v14783_v23  ;;  %vm14791_vm4 = vmmov %vm14778_vm2  ;;  %v2128_v23 = vcombine.low %v10645_v38, %v10650_v47  ;;  %vm14795_vm13 = vcmask 236544   ;;  %v14800_v38 = vstv %s9841_s26  ;;  %s11108_s26 = sld [smem:[#allocation2 + $0x1a]] }
 0x43c   : > { %14790 = vst [vmem:[#allocation49_spill] sm:$0xff] %v10682_v45  ;;  %v10687_v36 = vsel %vm14791_vm4, %v14773_v31, %v14788_v1  ;;  %vm14793_vm3 = vmand %vm10479_vm12, %vm8722_vm14  ;;  %v10703_v31 = vsel %vm14795_vm13, %v14794_v61, %v9984_v5  ;;  %v14797_v1 = vld [vmem:[#allocation56_spill] sm:$0xff]  ;;  %v1926_v47 = vmul.f32 %v14800_v38, %v1924_v44 }
 0x43d   : > { %14792 = vst [vmem:[#allocation142_spill] sm:$0xff] %v10687_v36  ;;  %v2008_v15 = vsel %vm14793_vm3, %v2006_v30, 0.0  ;;  %14796 = vst [vmem:[#allocation64_spill] sm:$0xff] %v10703_v31  ;;  %v2074_v30 = vcombine.low %v2052_v26, %v2059_v35  ;;  %v14808_v35 = vld [vmem:[#allocation80_spill] sm:$0xff]  ;;  %v2126_v38 = vcombine.low %v10687_v36, %v10682_v45  ;;  %v10745_v44 = vpop.permute.xlu1 %2579  ;;  %4678 = vrot.lane.b32.xlu0 %v14529_v16, %s14787_s3 }
 0x43e   : > { %vm14798_vm4 = vmmov %vm14795_vm13  ;;  %v2010_v18 = vmul.f32 %v14813_v10, %v2008_v15  ;;  %4594 = vrot.lane.b32.xlu1 %v14576_v56, %s14737_s18 }
 0x43f   : > { %v10708_v20 = vsel %vm14798_vm4, %v9984_v5, %v14797_v1  ;;  %vm14803_vm3 = vmmov %vm14798_vm4  ;;  %v14805_v5 = vld [vmem:[#allocation66_spill] sm:$0xff]  ;;  %v10773_v15 = vrot.slane %v2074_v30, %v8107_v58  ;;  %v14823_v30 = vld [vmem:[#allocation68_spill] sm:$0xff] }
 0x440   : > { %14799 = vst [vmem:[#allocation56_spill] sm:$0xff] %v10708_v20  ;;  %v10722_v6 = vsel %vm14803_vm3, %v14802_v27, %v14801_v24  ;;  %vm14806_vm13 = vmmov %vm14803_vm3 }
 0x441   : > { %14804 = vst [vmem:[#allocation71_spill] sm:$0xff] %v10722_v6  ;;  %v10727_v29 = vsel %vm14806_vm13, %v14801_v24, %v14805_v5  ;;  %vm14809_vm4 = vmmov %vm14803_vm3  ;;  %v2213_v24 = vcombine.low %v10703_v31, %v10708_v20  ;;  %v10763_v20 = vpop.permute.xlu0 %2669  ;;  %4747 = vrot.lane.b32.xlu0 %v14546_v4, %s14842_s9 }
 0x442   : > { %14807 = vst [vmem:[#allocation60_spill] sm:$0xff] %v10727_v29  ;;  %v10732_v26 = vsel %vm14809_vm4, %v14805_v5, %v14808_v35  ;;  %vm14811_vm2 = vmmov %vm14803_vm3  ;;  %v1843_v5 = vadd.f32 %v1842_v3, %v1759_v46  ;;  %v2211_v46 = vcombine.low %v10722_v6, %v10727_v29  ;;  %v10784_v29 = vpop.permute.xlu1 %2583  ;;  %4598 = vrot.lane.b32.xlu1 %v14586_v57, %s14737_s18  ;;  %s11619_s18 = sld [smem:[#allocation2 + $0x32]] }
 0x443   : > { %14810 = vst [vmem:[#allocation66_spill] sm:$0xff] %v10732_v26  ;;  %v10737_v12 = vsel %vm14811_vm2, %v14808_v35, %v14794_v61  ;;  %v10750_v61 = vrot.slane %v2075_v37, %v8107_v58  ;;  %v2150_v35 = vrot.slane %v2128_v23, %v8107_v58  ;;  %v10756_v33 = vsel %vm14811_vm2, %v14814_v52, %v14802_v27  ;;  %vm14816_vm13 = vmmov %vm14811_vm2  ;;  %v14821_v23 = vld [vmem:[#allocation21_spill] sm:$0xff] }
 0x444   : > { %14812 = vst [vmem:[#allocation80_spill] sm:$0xff] %v10737_v12  ;;  %14815 = vst [vmem:[#allocation59_spill] sm:$0xff] %v10756_v33  ;;  %v10761_v45 = vsel %vm14816_vm13, %v14797_v1, %v14814_v52  ;;  %v2212_v3 = vcombine.low %v10732_v26, %v10737_v12  ;;  %v1927_v10 = vadd.f32 %v1926_v47, %v1843_v5  ;;  %v14819_v5 = vld [vmem:[#allocation65_spill] sm:$0xff]  ;;  %vm14820_vm2 = vcmask 23552   ;;  %v14827_v26 = vld [vmem:[#allocation87_spill] sm:$0xff] }
 0x445   : > { %14817 = vst [vmem:[#allocation143_spill] sm:$0xff] %v10761_v45  ;;  %v10776_v52 = vrot.slane %v2127_v42, %v8107_v58  ;;  %v2159_v37 = vcombine.low %v2150_v35, %v2157_v59  ;;  %v2210_v1 = vcombine.low %v10761_v45, %v10756_v33  ;;  %v2241_v6 = vrot.slane %v2213_v24, %v8107_v58  ;;  %vm14822_vm13 = vmmov %vm14820_vm2  ;;  %v10800_v24 = vpop.permute.xlu0 %2741  ;;  %v14829_v12 = vld [vmem:[#allocation89_spill] sm:$0xff] }
 0x446   : > { %v10786_v47 = vadd.f32 %v2010_v18, %v1927_v10  ;;  %v10792_v59 = vrot.slane %v2126_v38, %v8107_v58  ;;  %v2288_v35 = vsel %vm14820_vm2, %v14819_v5, %v10192_v50  ;;  %v2289_v27 = vsel %vm14822_vm13, %v10192_v50, %v14821_v23  ;;  %vm14824_vm4 = vmmov %vm14820_vm2  ;;  %4752 = vrot.lane.b32.xlu0 %v14555_v49, %s14842_s9 }
 0x447   : > { %v2227_v18 = vrot.slane %v2211_v46, %v8107_v58  ;;  %v2234_v10 = vrot.slane %v2212_v3, %v8107_v58  ;;  %v2286_v42 = vsel %vm14824_vm4, %v14823_v30, %v10139_v32  ;;  %vm14825_vm3 = vmmov %vm14820_vm2  ;;  %v10815_v33 = vrot.slane %v2159_v37, %v8107_v58  ;;  %v14826_v46 = vld [vmem:[#allocation63_spill] sm:$0xff]  ;;  %4668 = vrot.lane.b32.xlu1 %v14597_v28, %s14787_s3 }
 0x448   : > { %14818 = vst [vmem:[#allocation144_spill] sm:$0xff] %v10786_v47  ;;  %v2287_v38 = vsel %vm14825_vm3, %v10139_v32, %v14819_v5  ;;  %v2158_v50 = vcombine.low %v10792_v59, %v10776_v52  ;;  %v2283_v3 = vsel %vm14820_vm2, %v14827_v26, %v14826_v46  ;;  %vm14828_vm4 = vmmov %vm14820_vm2  ;;  %v2220_v32 = vrot.slane %v2210_v1, %v8107_v58  ;;  %v10829_v59 = vpop.permute.xlu1 %2587  ;;  %v14834_v47 = vld [vmem:[#allocation81_spill] sm:$0xff] }
 0x449   : > { %v2291_v45 = vsel %vm14828_vm4, %v14821_v23, %v14827_v26  ;;  %v2243_v5 = vcombine.low %v2234_v10, %v2241_v6  ;;  %vm14830_vm3 = vmmov %vm14820_vm2  ;;  %v2297_v37 = vcombine.low %v2288_v35, %v2289_v27  ;;  %v2296_v36 = vcombine.low %v2286_v42, %v2287_v38  ;;  %v14832_v26 = vld [vmem:[#allocation79_spill] sm:$0xff]  ;;  %v10840_v1 = vpop.permute.xlu0 %2745  ;;  %v14837_v35 = vld [vmem:[#allocation20_spill] sm:$0xff] }
 0x44a   : > { %v2284_v52 = vsel %vm14830_vm3, %v14826_v46, %v14829_v12  ;;  %vm14831_vm13 = vmmov %vm14820_vm2  ;;  %vm14833_vm2 = vcmask 15360   ;;  %v2242_v10 = vcombine.low %v2220_v32, %v2227_v18  ;;  %v2294_v46 = vcombine.low %v2291_v45, %v2283_v3  ;;  %4756 = vrot.lane.b32.xlu0 %v14521_v9, %s14842_s9 }
 0x44b   : > { %v2285_v31 = vsel %vm14831_vm13, %v14829_v12, %v14823_v30  ;;  %v2368_v23 = vsel %vm14833_vm2, %v14832_v26, %v10292_v43  ;;  %vm14835_vm4 = vmmov %vm14833_vm2  ;;  %v2367_v30 = vsel %vm14833_vm2, %v10227_v11, %v14832_v26  ;;  %v2325_v38 = vrot.slane %v2297_v37, %v8107_v58  ;;  %4672 = vrot.lane.b32.xlu1 %v14615_v17, %s14787_s3 }
 0x44c   : > { %v2369_v6 = vsel %vm14835_vm4, %v10292_v43, %v14834_v47  ;;  %vm14836_vm3 = vmmov %vm14833_vm2  ;;  %v2295_v18 = vcombine.low %v2284_v52, %v2285_v31  ;;  %v2318_v32 = vrot.slane %v2296_v36, %v8107_v58 }
 0x44d   : > { %v2372_v27 = vsel %vm14836_vm3, %v10096_v22, %v10432_v34  ;;  %vm14838_vm13 = vmmov %vm14833_vm2  ;;  %v2379_v3 = vcombine.low %v2368_v23, %v2369_v6 }
 0x44e   : > { %v2373_v12 = vsel %vm14838_vm13, %v10432_v34, %v14837_v35  ;;  %vm14839_vm4 = vmmov %vm14833_vm2  ;;  %v10865_v34 = vrot.slane %v2243_v5, %v8107_v58  ;;  %4760 = vrot.lane.b32.xlu0 %v14529_v16, %s14842_s9 }
 0x44f   : > { %v2375_v43 = vsel %vm14839_vm4, %v14837_v35, %v10227_v11  ;;  %vm14840_vm10 = vmmov %vm14833_vm2  ;;  %v10868_v11 = vpop.permute.xlu1 %2659  ;;  %v10877_v35 = vpop.permute.xlu0 %2749  ;;  %4676 = vrot.lane.b32.xlu1 %v14576_v56, %s14787_s3 }
 0x450   : > { %v2370_v45 = vsel %vm14840_vm10, %v14834_v47, %v10358_v13  ;;  %vm14841_vm3 = vmmov %vm14833_vm2  ;;  %v2381_v47 = vcombine.low %v2372_v27, %v2373_v12  ;;  %vm14843_vm10 = vcmask 7168   ;;  %v2378_v5 = vcombine.low %v2375_v43, %v2367_v30 }
 0x451   : > { %v2371_v42 = vsel %vm14841_vm3, %v10358_v13, %v10096_v22  ;;  %v2456_v22 = vsel %vm14843_vm10, %v10313_v40, %v10624_v19  ;;  %v14844_v13 = vld [vmem:[#allocation97_spill] sm:$0xff]  ;;  %vm14845_vm2 = vmmov %vm14843_vm10  ;;  %v2327_v27 = vcombine.low %v2318_v32, %v2325_v38 }
 0x452   : > { %v2457_v26 = vsel %vm14845_vm2, %v10624_v19, %v14844_v13  ;;  %v2380_v31 = vcombine.low %v2370_v45, %v2371_v42  ;;  %vm14846_vm4 = vmmov %vm14845_vm2  ;;  %v2453_v19 = vsel %vm14845_vm2, %v10523_v39, %v10242_v51  ;;  %v2304_v45 = vrot.slane %v2294_v46, %v8107_v58  ;;  %4829 = vrot.lane.b32.xlu0 %v14546_v4, %s14867_s7 }
 0x453   : > { %v2451_v52 = vsel %vm14846_vm4, %v10492_v2, %v10206_v14  ;;  %vm14847_vm3 = vmmov %vm14845_vm2  ;;  %v2465_v12 = vcombine.low %v2456_v22, %v2457_v26  ;;  %v10916_v43 = vpop.permute.xlu0 %2753  ;;  %v2388_v42 = vrot.slane %v2378_v5, %v8107_v58  ;;  %v14851_v46 = vcombine.low %v10773_v15, %v10750_v61  ;;  %4680 = vrot.lane.b32.xlu1 %v14586_v57, %s14787_s3  ;;  %s15036_s3 = smov 31  }
 0x454   : > { %v2459_v36 = vsel %vm14847_vm3, %v14844_v13, %v10492_v2  ;;  %vm14848_vm10 = vmmov %vm14845_vm2  ;;  %v2311_v2 = vrot.slane %v2295_v18, %v8107_v58 }
 0x455   : > { %v2452_v37 = vsel %vm14848_vm10, %v10206_v14, %v10523_v39  ;;  %vm14849_vm13 = vmmov %vm14845_vm2  ;;  %v10903_v14 = vrot.slane %v2379_v3, %v8107_v58  ;;  %v2664_v39 = vpop.permute.xlu1 %2663  ;;  %v2462_v30 = vcombine.low %v2459_v36, %v2451_v52  ;;  %v2402_v3 = vrot.slane %v2380_v31, %v8107_v58 }
 0x456   : > { %v2454_v23 = vsel %vm14849_vm13, %v10242_v51, %v10579_v53  ;;  %vm14850_vm4 = vmmov %vm14845_vm2  ;;  %v10910_v51 = vrot.slane %v2158_v50, %v8107_v58  ;;  %v2463_v18 = vcombine.low %v2452_v37, %v2453_v19  ;;  %v2493_v13 = vrot.slane %v2465_v12, %v8107_v58  ;;  %4834 = vrot.lane.b32.xlu0 %v14555_v49, %s14867_s7 }
 0x457   : > { %v2455_v6 = vsel %vm14850_vm4, %v10579_v53, %v10313_v40  ;;  %vm14125_vm13 = vmand %vm10479_vm12, %vm9316_vm6  ;;  %v10913_v40 = vrot.slane %v2242_v10, %v8107_v58  ;;  %v2409_v53 = vrot.slane %v2381_v47, %v8107_v58  ;;  %v2326_v47 = vcombine.low %v2304_v45, %v2311_v2  ;;  %v10951_v52 = vpop.permute.xlu0 %4182  ;;  %4750 = vrot.lane.b32.xlu1 %v14597_v28, %s14842_s9 }
 0x458   : > { %v2464_v38 = vcombine.low %v2454_v23, %v2455_v6  ;;  %v2174_v50 = vcombine.low %v10910_v51, %v10815_v33  ;;  %v10937_v32 = vsel %vm14125_vm13, %v14851_v46, 0.0  ;;  %v10940_v33 = vrot.slane %v2327_v27, %v8107_v58 }
 0x459   : > { %v2258_v10 = vcombine.low %v10913_v40, %v10865_v34  ;;  %v2410_v22 = vcombine.low %v2388_v42, %v10903_v14  ;;  %v2668_v26 = vpop.permute.xlu1 %2667  ;;  %v2411_v5 = vcombine.low %v2402_v3, %v2409_v53  ;;  %v2472_v31 = vrot.slane %v2462_v30, %v8107_v58 }
 0x45a   : > { %vm14852_vm10 = vcmask 1039360   ;;  %v2479_v36 = vrot.slane %v2463_v18, %v8107_v58  ;;  %v2486_v37 = vrot.slane %v2464_v38, %v8107_v58  ;;  %v2334_v53 = vrot.slane %v2326_v47, %v8107_v58  ;;  %4838 = vrot.lane.b32.xlu0 %v14521_v9, %s14867_s7 }
 0x45b   : > { %v2596_v61 = vsel %vm14852_vm10, %v10530_v41, %v10829_v59  ;;  %vm14853_vm2 = vmmov %vm14852_vm10  ;;  %v10989_v51 = vpop.permute.xlu0 %4186  ;;  %4754 = vrot.lane.b32.xlu1 %v14615_v17, %s14842_s9 }
 0x45c   : > { %v2599_v15 = vsel %vm14853_vm2, %v10829_v59, %v10376_v55  ;;  %vm14854_vm4 = vmmov %vm14853_vm2  ;;  %v2593_v6 = vsel %vm14853_vm2, %v10745_v44, %v10499_v63 }
 0x45d   : > { %v2590_v19 = vsel %vm14854_vm4, %v10376_v55, %v10689_v8  ;;  %vm14855_vm13 = vmmov %vm14853_vm2  ;;  %v2605_v27 = vcombine.low %v2596_v61, %v2599_v15 }
 0x45e   : > { %v2591_v23 = vsel %vm14855_vm13, %v10689_v8, %v10454_v21  ;;  %vm14856_vm10 = vmmov %vm14853_vm2  ;;  %v2495_v8 = vcombine.low %v2486_v37, %v2493_v13  ;;  %vm14859_vm13 = vcmask 1031168   ;;  %4842 = vrot.lane.b32.xlu0 %v14529_v16, %s14867_s7 }
 0x45f   : > { %v2592_v59 = vsel %vm14856_vm10, %v10454_v21, %v10745_v44  ;;  %vm14857_vm3 = vmmov %vm14853_vm2  ;;  %v2676_v21 = vsel %vm14859_vm13, %v10632_v48, %v2664_v39  ;;  %v2672_v44 = vpop.permute.xlu1 %2671  ;;  %v2602_v38 = vcombine.low %v2590_v19, %v2591_v23  ;;  %v2633_v3 = vrot.slane %v2605_v27, %v8107_v58  ;;  %4758 = vrot.lane.b32.xlu1 %v14576_v56, %s14842_s9 }
 0x460   : > { %v2594_v2 = vsel %vm14857_vm3, %v10499_v63, %v10784_v29  ;;  %vm14858_vm4 = vmmov %vm14853_vm2  ;;  %vm14132_vm2 = vcmask 1022976   ;;  %v2603_v30 = vcombine.low %v2592_v59, %v2593_v6 }
 0x461   : > { %v2595_v55 = vsel %vm14858_vm4, %v10784_v29, %v10530_v41  ;;  %vm14860_vm10 = vmmov %vm14859_vm13  ;;  %v2612_v6 = vrot.slane %v2602_v38, %v8107_v58 }
 0x462   : > { %v2677_v14 = vsel %vm14860_vm10, %v2664_v39, %v10710_v25  ;;  %vm14861_vm11 = vmmov %vm14860_vm10  ;;  %v2604_v39 = vcombine.low %v2594_v2, %v2595_v55  ;;  %4911 = vrot.lane.b32.xlu0 %v14546_v4, %s14890_s27 }
 0x463   : > { %v2678_v63 = vsel %vm14861_vm11, %v10710_v25, %v2668_v26  ;;  %vm14862_vm3 = vmmov %vm14860_vm10  ;;  %v2425_v25 = vrot.slane %v2411_v5, %v8107_v58  ;;  %v2687_v46 = vcombine.low %v2676_v21, %v2677_v14  ;;  %v2744_v13 = vpop.permute.xlu1 %2743  ;;  %v14871_v21 = vstv %s10526_s29  ;;  %4762 = vrot.lane.b32.xlu1 %v14586_v57, %s14842_s9  ;;  %s15021_s29 = smov 34   ;;  %s12079_s9 = sld [smem:[#allocation2 + $0x34]] }
 0x464   : > { %v2679_v12 = vsel %vm14862_vm3, %v2668_v26, %v10763_v20  ;;  %vm14863_vm4 = vmmov %vm14862_vm3  ;;  %v2418_v26 = vrot.slane %v2410_v22, %v8107_v58  ;;  %v2626_v61 = vrot.slane %v2604_v39, %v8107_v58  ;;  %v14873_v39 = vld [vmem:[#allocation144_spill] sm:$0xff] }
 0x465   : > { %v2680_v29 = vsel %vm14863_vm4, %v10763_v20, %v2672_v44  ;;  %vm14864_vm9 = vmmov %vm14862_vm3  ;;  %v2494_v20 = vcombine.low %v2472_v31, %v2479_v36  ;;  %v2688_v47 = vcombine.low %v2678_v63, %v2679_v12  ;;  %v2619_v31 = vrot.slane %v2603_v30, %v8107_v58 }
 0x466   : > { %v2683_v41 = vsel %vm14864_vm9, %v2672_v44, %v10596_v7  ;;  %vm14233_vm11 = vmand %vm10479_vm12, %vm9461_vm7  ;;  %v2426_v37 = vcombine.low %v2418_v26, %v2425_v25  ;;  %v2635_v2 = vcombine.low %v2626_v61, %v2633_v3  ;;  %v2703_v55 = vrot.slane %v2687_v46, %v8107_v58  ;;  %4916 = vrot.lane.b32.xlu0 %v14555_v49, %s14890_s27 }
 0x467   : > { %v2689_v45 = vcombine.low %v2680_v29, %v2683_v41  ;;  %vm14865_vm9 = vmmov %vm14862_vm3  ;;  %v2176_v5 = vsel %vm14233_vm11, %v2174_v50, 0.0  ;;  %v2502_v19 = vrot.slane %v2494_v20, %v8107_v58  ;;  %v14870_v50 = vstv %s10434_s23  ;;  %v2748_v27 = vpop.permute.xlu1 %2747  ;;  %4832 = vrot.lane.b32.xlu1 %v14597_v28, %s14867_s7  ;;  %s14941_s23 = smov 62  }
 0x468   : > { %v2674_v42 = vsel %vm14865_vm9, %v10596_v7, %v10868_v11  ;;  %vm14866_vm13 = vmmov %vm14862_vm3  ;;  %v2342_v7 = vcombine.low %v2334_v53, %v10940_v33  ;;  %v2094_v23 = vmul.f32 %v14870_v50, %v10937_v32  ;;  %v2760_v32 = vsel %vm14132_vm2, %v10840_v1, %v2748_v27 }
 0x469   : > { %v2675_v18 = vsel %vm14866_vm13, %v10868_v11, %v10632_v48  ;;  %vm14139_vm10 = vmand %vm10479_vm12, %vm9533_vm1  ;;  %v2509_v48 = vrot.slane %v2495_v8, %v8107_v58  ;;  %v11015_v11 = vpop.permute.xlu0 %4255  ;;  %v2717_v36 = vrot.slane %v2689_v45, %v8107_v58  ;;  %v2710_v8 = vrot.slane %v2688_v47, %v8107_v58 }
 0x46a   : > { %v2686_v15 = vcombine.low %v2674_v42, %v2675_v18  ;;  %vm14130_vm3 = vmand %vm8734_vm15, %vm8128_vm8  ;;  %v2260_v59 = vsel %vm14139_vm10, %v2258_v10, 0.0  ;;  %v2761_v34 = vsel %vm14132_vm2, %v2748_v27, %v10877_v35  ;;  %v2178_v14 = vmul.f32 %v14871_v21, %v2176_v5  ;;  %v14876_v18 = vld [vmem:[#allocation125_spill] sm:$0xff]  ;;  %4920 = vrot.lane.b32.xlu0 %v14521_v9, %s14890_s27 }
 0x46b   : > { %v2344_v10 = vsel %vm14130_vm3, %v2342_v7, 0.0  ;;  %vm14138_vm4 = vmand %vm8734_vm15, %vm8210_vm0  ;;  %v2510_v63 = vcombine.low %v2502_v19, %v2509_v48  ;;  %v2634_v12 = vcombine.low %v2612_v6, %v2619_v31  ;;  %v2719_v41 = vcombine.low %v2710_v8, %v2717_v36  ;;  %v2752_v46 = vpop.permute.xlu1 %2751  ;;  %v14879_v19 = vld [vmem:[#allocation107_spill] sm:$0xff]  ;;  %4836 = vrot.lane.b32.xlu1 %v14615_v17, %s14867_s7 }
 0x46c   : > { %v2696_v29 = vrot.slane %v2686_v15, %v8107_v58  ;;  %v2758_v53 = vsel %vm14132_vm2, %v10800_v24, %v2744_v13  ;;  %v2759_v30 = vsel %vm14132_vm2, %v2744_v13, %v10840_v1  ;;  %v2095_v45 = vadd.f32 %v2094_v23, %v14873_v39  ;;  %vm14131_vm9 = vmand %vm8734_vm15, %vm9162_vm5  ;;  %v14880_v23 = vld [vmem:[#allocation67_spill] sm:$0xff]  ;;  %v14885_v39 = vld [vmem:[#allocation77_spill] sm:$0xff] }
 0x46d   : > { %v11052_v40 = vpop.permute.xlu0 %4260  ;;  %v14874_v25 = vstv %s10537_s14  ;;  %vm485_vm13 = vcmp.ge.s32.totalorder %v14876_v18, 0  ;;  %vm486_vm3 = vcmp.lt.s32.totalorder %v14876_v18, 32  ;;  %v2649_v1 = vrot.slane %v2635_v2, %v8107_v58  ;;  %s15023_s14 = smov 33  }
 0x46e   : > { %v2262_v20 = vmul.f32 %v14874_v25, %v2260_v59  ;;  %v2718_v38 = vcombine.low %v2696_v29, %v2703_v55  ;;  %v2771_v3 = vcombine.low %v2760_v32, %v2761_v34  ;;  %v2428_v47 = vsel %vm14138_vm4, %v2426_v37, 0.0  ;;  %v14878_v37 = vld [vmem:[#allocation138_spill] sm:$0xff]  ;;  %v14881_v59 = vld [vmem:[#allocation75_spill] sm:$0xff]  ;;  %4924 = vrot.lane.b32.xlu0 %v14529_v16, %s14890_s27 }
 0x46f   : > { %v2762_v13 = vsel %vm14132_vm2, %v10877_v35, %v2752_v46  ;;  %v2763_v7 = vsel %vm14132_vm2, %v2752_v46, %v10916_v43  ;;  %v2179_v48 = vadd.f32 %v2178_v14, %v2095_v45  ;;  %v14877_v5 = vstv %s10656_s1  ;;  %v2756_v14 = vpop.permute.xlu1 %2755  ;;  %v14889_v46 = vld [vmem:[#allocation93_spill] sm:$0xff]  ;;  %4840 = vrot.lane.b32.xlu1 %v14576_v56, %s14867_s7  ;;  %s15028_s1 = smov 32  }
 0x470   : > { %v2346_v31 = vmul.f32 %v14877_v5, %v2344_v10  ;;  %v2642_v61 = vrot.slane %v2634_v12, %v8107_v58  ;;  %v2733_v15 = vrot.slane %v2719_v41, %v8107_v58  ;;  %v2770_v36 = vcombine.low %v2758_v53, %v2759_v30  ;;  %v14884_v30 = vld [vmem:[#allocation73_spill] sm:$0xff] }
 0x471   : > { %v11095_v26 = vpop.permute.xlu0 %4264  ;;  %v2512_v35 = vsel %vm14131_vm9, %v2510_v63, 0.0  ;;  %v3419_v50 = vcombine.low %v14879_v19, %v14878_v37  ;;  %v3444_v6 = vcombine.low %v14881_v59, %v14880_v23  ;;  %v2263_v2 = vadd.f32 %v2262_v20, %v2179_v48  ;;  %vm14133_vm9 = vmand %vm8734_vm15, %vm9316_vm6  ;;  %v14933_v37 = vld [vmem:[#allocation109_spill] sm:$0xff]  ;;  %v14934_v19 = vld [vmem:[#allocation103_spill] sm:$0xff] }
 0x472   : > { %v14882_v55 = vstv %s10676_s17  ;;  %v2650_v27 = vcombine.low %v2642_v61, %v2649_v1  ;;  %v2726_v32 = vrot.slane %v2718_v38, %v8107_v58  ;;  %v2787_v34 = vrot.slane %v2771_v3, %v8107_v58  ;;  %v14887_v1 = vld [vmem:[#allocation69_spill] sm:$0xff]  ;;  %v14888_v3 = vld [vmem:[#allocation16_spill] sm:$0xff]  ;;  %4993 = vrot.lane.b32.xlu0 %v14546_v4, %s14941_s23  ;;  %s15084_s17 = smov 30  }
 0x473   : > { %v2430_v8 = vmul.f32 %v14882_v55, %v2428_v47  ;;  %v2772_v21 = vcombine.low %v2762_v13, %v2763_v7  ;;  %v2764_v10 = vsel %vm14132_vm2, %v10916_v43, %v2756_v14  ;;  %v2767_v63 = vsel %vm14132_vm2, %v2756_v14, %v10800_v24  ;;  %v14886_v24 = vld [vmem:[#allocation84_spill] sm:$0xff]  ;;  %vm14134_vm2 = vmand %vm8734_vm15, %vm9461_vm7  ;;  %v11152_v61 = vpop.permute.xlu1 %4184  ;;  %v14894_v55 = vld [vmem:[#allocation83_spill] sm:$0xff]  ;;  %4844 = vrot.lane.b32.xlu1 %v14586_v57, %s14867_s7  ;;  %s12081_s7 = sld [smem:[#allocation2 + $0x35]] }
 0x474   : > { %v2347_v29 = vadd.f32 %v2346_v31, %v2263_v2  ;;  %v14883_v41 = vstv %s10696_s10  ;;  %v3442_v45 = vcombine.low %v14885_v39, %v14884_v30  ;;  %v2734_v25 = vcombine.low %v2726_v32, %v2733_v15  ;;  %v14893_v2 = vld [vmem:[#allocation98_spill] sm:$0xff]  ;;  %v14897_v14 = vld [vmem:[#allocation85_spill] sm:$0xff]  ;;  %v14902_v30 = vld [vmem:[#allocation99_spill] sm:$0xff]  ;;  %s12048_s10 = sld [smem:[#allocation2 + $0x33]] }
 0x475   : > { %v11124_v12 = vpop.permute.xlu0 %4268  ;;  %v2514_v53 = vmul.f32 %v14883_v41, %v2512_v35  ;;  %v2780_v43 = vrot.slane %v2770_v36, %v8107_v58  ;;  %v2773_v20 = vcombine.low %v2764_v10, %v2767_v63  ;;  %v3445_v38 = vcombine.low %v14887_v1, %v14886_v24  ;;  %v14891_v36 = vld [vmem:[#allocation86_spill] sm:$0xff]  ;;  %v14905_v1 = vld [vmem:[#allocation96_spill] sm:$0xff] }
 0x476   : > { %v3500_v47 = vcombine.low %v14889_v46, %v14888_v3  ;;  %v2431_v13 = vadd.f32 %v2430_v8, %v2347_v29  ;;  %v2653_v7 = vstv %s11081_s28  ;;  %v2794_v5 = vrot.slane %v2772_v21, %v8107_v58  ;;  %v14892_v35 = vld [vmem:[#allocation90_spill] sm:$0xff]  ;;  %v14906_v3 = vld [vmem:[#allocation88_spill] sm:$0xff]  ;;  %4998 = vrot.lane.b32.xlu0 %v14555_v49, %s14941_s23  ;;  %s12086_s28 = sld [smem:[#allocation2 + $0x36]] }
 0x477   : > { %v2802_v48 = vcombine.low %v2780_v43, %v2787_v34  ;;  %v2801_v31 = vrot.slane %v2773_v20, %v8107_v58  ;;  %v2652_v15 = vsel %vm14133_vm9, %v2650_v27, 0.0  ;;  %v3443_v23 = vcombine.low %v14892_v35, %v14891_v36  ;;  %v14896_v21 = vld [vmem:[#allocation102_spill] sm:$0xff]  ;;  %vm11180_vm9 = vmand %vm485_vm13, %vm486_vm3  ;;  %v14903_v43 = vld [vmem:[#allocation95_spill] sm:$0xff]  ;;  %4914 = vrot.lane.b32.xlu1 %v14597_v28, %s14890_s27 }
 0x478   : > { %v3466_v59 = vrot.slane %v3444_v6, %v8107_v58  ;;  %v3501_v8 = vcombine.low %v14894_v55, %v14893_v2  ;;  %v2515_v34 = vadd.f32 %v2514_v53, %v2431_v13  ;;  %v3499_v10 = vcombine.low %v14897_v14, %v14896_v21  ;;  %v14901_v53 = vld [vmem:[#allocation91_spill] sm:$0xff]  ;;  %v14904_v20 = vld [vmem:[#allocation100_spill] sm:$0xff]  ;;  %v14907_v36 = vld [vmem:[#allocation110_spill] sm:$0xff] }
 0x479   : > { %v11164_v32 = vpop.permute.xlu0 %4337  ;;  %v2803_v63 = vcombine.low %v2794_v5, %v2801_v31  ;;  %v2737_v29 = vstv %s11108_s26  ;;  %v2736_v6 = vsel %vm14134_vm2, %v2734_v25, 0.0  ;;  %v14898_v27 = vmov 0  ;;  %v11196_v5 = vpop.permute.xlu1 %4188  ;;  %v14908_v35 = vld [vmem:[#allocation94_spill] sm:$0xff]  ;;  %vm14136_vm3 = vmand %vm8734_vm15, %vm9533_vm1  ;;  %v14911_v14 = vld [vmem:[#allocation92_spill] sm:$0xff]  ;;  %s12105_s26 = sld [smem:[#allocation2 + $0x37]] }
 0x47a   : > { %14895 = vst [vmem:[#allocation65_spill] sm:$0xff] %v11164_v32  ;;  %v14899_v27 = vsel %vm11180_vm9, 4294967295, %v14898_v27  ;;  %v3473_v41 = vrot.slane %v3445_v38, %v8107_v58  ;;  %v3556_v39 = vcombine.low %v14902_v30, %v14901_v53  ;;  %v3557_v24 = vcombine.low %v14904_v20, %v14903_v43  ;;  %vm14137_vm13 = vmand %vm11180_vm9, %vm8128_vm8  ;;  %5002 = vrot.lane.b32.xlu0 %v14521_v9, %s14941_s23  ;;  %v14989_v32 = vld [vmem:[#allocation52_spill] sm:$0xff] }
 0x47b   : > { %14900 = vst [vmem:[#allocation21_spill] sm:$0xff] %v14899_v27  ;;  %v2654_v25 = vmul.f32 %v2653_v7, %v2652_v15  ;;  %v3498_v46 = vcombine.low %v14906_v3, %v14905_v1  ;;  %v3522_v18 = vrot.slane %v3500_v47, %v8107_v58  ;;  %v2810_v13 = vrot.slane %v2802_v48, %v8107_v58  ;;  %v14910_v7 = vld [vmem:[#allocation118_spill] sm:$0xff]  ;;  %vm14135_vm2 = vmand %vm11180_vm9, %vm8210_vm0 }
 0x47c   : > { %v2817_v38 = vrot.slane %v2803_v63, %v8107_v58  ;;  %v3529_v31 = vrot.slane %v3501_v8, %v8107_v58  ;;  %v3555_v2 = vcombine.low %v14908_v35, %v14907_v36  ;;  %v2571_v15 = vadd.f32 %v14910_v7, %v2515_v34  ;;  %v14912_v63 = vld [vmem:[#allocation106_spill] sm:$0xff]  ;;  %v14918_v36 = vld [vmem:[#allocation15_spill] sm:$0xff]  ;;  %vm14165_vm4 = vmand %vm11180_vm9, %vm9461_vm7  ;;  %4918 = vrot.lane.b32.xlu1 %v14615_v17, %s14890_s27 }
 0x47d   : > { %v11201_v55 = vpop.permute.xlu0 %4342  ;;  %v2738_v21 = vmul.f32 %v2737_v29, %v2736_v6  ;;  %v3459_v47 = vrot.slane %v3443_v23, %v8107_v58  ;;  %v3515_v48 = vrot.slane %v3499_v10, %v8107_v58  ;;  %v2821_v34 = vstv %s11137_s16  ;;  %v11229_v20 = vpop.permute.xlu1 %4258  ;;  %vm14158_vm10 = vmand %vm11180_vm9, %vm9533_vm1  ;;  %s12107_s16 = sld [smem:[#allocation2 + $0x38]] }
 0x47e   : > { %14909 = vst [vmem:[#allocation68_spill] sm:$0xff] %v11201_v55  ;;  %v2818_v8 = vcombine.low %v2810_v13, %v2817_v38  ;;  %v3554_v29 = vcombine.low %v14912_v63, %v14911_v14  ;;  %v3578_v6 = vrot.slane %v3556_v39, %v8107_v58  ;;  %v3585_v53 = vrot.slane %v3557_v24, %v8107_v58  ;;  %v14914_v38 = vld [vmem:[#allocation70_spill] sm:$0xff]  ;;  %v14986_v55 = vld [vmem:[#allocation36_spill] sm:$0xff] }
 0x47f   : > { %v2655_v23 = vadd.f32 %v2654_v25, %v2571_v15  ;;  %v3452_v10 = vrot.slane %v3442_v45, %v8107_v58  ;;  %v3475_v30 = vcombine.low %v3466_v59, %v3473_v41  ;;  %v3508_v43 = vrot.slane %v3498_v46, %v8107_v58  ;;  %v14915_v45 = vld [vmem:[#allocation57_spill] sm:$0xff]  ;;  %v14917_v46 = vld [vmem:[#allocation82_spill] sm:$0xff]  ;;  %5006 = vrot.lane.b32.xlu0 %v14529_v16, %s14941_s23 }
 0x480   : > { %v2820_v1 = vsel %vm14136_vm3, %v2818_v8, 0.0  ;;  %v3531_v39 = vcombine.low %v3522_v18, %v3529_v31  ;;  %v3571_v24 = vrot.slane %v3555_v2, %v8107_v58  ;;  %v14916_v59 = vcombine.low %v14914_v38, %v14915_v45  ;;  %v14920_v31 = vld [vmem:[#allocation17_spill] sm:$0xff]  ;;  %v14921_v2 = vld [vmem:[#allocation78_spill] sm:$0xff]  ;;  %vm14141_vm3 = vmand %vm11180_vm9, %vm8722_vm14  ;;  %4922 = vrot.lane.b32.xlu1 %v14576_v56, %s14890_s27 }
 0x481   : > { %v11237_v3 = vpop.permute.xlu0 %4346  ;;  %v2739_v13 = vadd.f32 %v2738_v21, %v2655_v23  ;;  %v2822_v25 = vmul.f32 %v2821_v34, %v2820_v1  ;;  %v14919_v35 = vcombine.low %v14917_v46, %v14918_v36  ;;  %v14922_v7 = vcombine.low %v14920_v31, %v14921_v2  ;;  %v14923_v23 = vld [vmem:[#allocation76_spill] sm:$0xff]  ;;  %v14924_v1 = vld [vmem:[#allocation18_spill] sm:$0xff]  ;;  %v14927_v46 = vld [vmem:[#allocation101_spill] sm:$0xff] }
 0x482   : > { %14913 = vst [vmem:[#allocation63_spill] sm:$0xff] %v11237_v3  ;;  %v3268_v41 = vsel %vm14137_vm13, %v14916_v59, 0.0  ;;  %v3474_v21 = vcombine.low %v3452_v10, %v3459_v47  ;;  %v3530_v8 = vcombine.low %v3508_v43, %v3515_v48  ;;  %v3564_v34 = vrot.slane %v3554_v29, %v8107_v58  ;;  %v14926_v59 = vld [vmem:[#allocation14_spill] sm:$0xff]  ;;  %v14932_v31 = vld [vmem:[#allocation127_spill] sm:$0xff]  ;;  %vm14140_vm13 = vmand %vm11180_vm9, %vm9316_vm6 }
 0x483   : > { %v3324_v18 = vsel %vm14135_vm2, %v14919_v35, 0.0  ;;  %v3370_v15 = vrot.slane %v14922_v7, %v8107_v58  ;;  %v3587_v14 = vcombine.low %v3578_v6, %v3585_v53  ;;  %v2823_v63 = vadd.f32 %v2822_v25, %v2739_v13  ;;  %v11277_v6 = vpop.permute.xlu1 %4262  ;;  %v14929_v13 = vld [vmem:[#allocation116_spill] sm:$0xff]  ;;  %vm14180_vm2 = vmand %vm11180_vm9, %vm9162_vm5 }
 0x484   : > { %v14925_v38 = vcombine.low %v14923_v23, %v14924_v1  ;;  %v14928_v47 = vcombine.low %v14926_v59, %v14927_v46  ;;  %v3433_v48 = vrot.slane %v3419_v50, %v8107_v58  ;;  %v3489_v29 = vrot.slane %v3475_v30, %v8107_v58  ;;  %v14930_v25 = vld [vmem:[#allocation108_spill] sm:$0xff]  ;;  %v14936_v23 = vld [vmem:[#allocation137_spill] sm:$0xff]  ;;  %4926 = vrot.lane.b32.xlu1 %v14586_v57, %s14890_s27  ;;  %s15137_s27 = smov 29  }
 0x485   : > { %v3545_v53 = vrot.slane %v3531_v39, %v8107_v58  ;;  %v3586_v43 = vcombine.low %v3564_v34, %v3571_v24  ;;  %v3612_v36 = vcombine.low %v14930_v25, %v14929_v13  ;;  %v11284_v35 = vpop.permute.xlu0 %4350  ;;  %v2879_v2 = vadd.f32 %v14932_v31, %v2823_v63  ;;  %v14935_v30 = vld [vmem:[#allocation120_spill] sm:$0xff]  ;;  %v14938_v59 = vld [vmem:[#allocation121_spill] sm:$0xff]  ;;  %v14940_v63 = vld [vmem:[#allocation111_spill] sm:$0xff] }
 0x486   : > { %v3377_v45 = vrot.slane %v14925_v38, %v8107_v58  ;;  %v3426_v10 = vrot.slane %v14928_v47, %v8107_v58  ;;  %14931 = vst [vmem:[#allocation87_spill] sm:$0xff] %v11284_v35  ;;  %v3482_v7 = vrot.slane %v3474_v21, %v8107_v58  ;;  %v3613_v50 = vcombine.low %v14934_v19, %v14933_v37  ;;  %v14937_v38 = vld [vmem:[#allocation135_spill] sm:$0xff]  ;;  %v14939_v34 = vld [vmem:[#allocation104_spill] sm:$0xff]  ;;  %v14944_v19 = vld [vmem:[#allocation117_spill] sm:$0xff] }
 0x487   : > { %v3668_v1 = vcombine.low %v14936_v23, %v14935_v30  ;;  %v3669_v46 = vcombine.low %v14938_v59, %v14937_v38  ;;  %v3538_v39 = vrot.slane %v3530_v8, %v8107_v58  ;;  %v3601_v24 = vrot.slane %v3587_v14, %v8107_v58  ;;  %v14942_v21 = vld [vmem:[#allocation131_spill] sm:$0xff]  ;;  %v14943_v8 = vld [vmem:[#allocation136_spill] sm:$0xff]  ;;  %v11309_v30 = vpop.permute.xlu1 %4266  ;;  %v14947_v59 = vld [vmem:[#allocation113_spill] sm:$0xff] }
 0x488   : > { %v3611_v47 = vcombine.low %v14940_v63, %v14939_v34  ;;  %v2935_v13 = vadd.f32 %v14942_v21, %v2879_v2  ;;  %v3378_v25 = vcombine.low %v3370_v15, %v3377_v45  ;;  %v3434_v31 = vcombine.low %v3426_v10, %v3433_v48  ;;  %14945 = vst [vmem:[#allocation89_spill] sm:$0xff] %v11309_v30  ;;  %v14946_v23 = vld [vmem:[#allocation112_spill] sm:$0xff]  ;;  %v14948_v34 = vld [vmem:[#allocation105_spill] sm:$0xff] }
 0x489   : > { %v3490_v37 = vcombine.low %v3482_v7, %v3489_v29  ;;  %v3667_v14 = vcombine.low %v14944_v19, %v14943_v8  ;;  %v3546_v2 = vcombine.low %v3538_v39, %v3545_v53  ;;  %v3594_v38 = vrot.slane %v3586_v43, %v8107_v58  ;;  %v11319_v10 = vpop.permute.xlu0 %4419  ;;  %v14950_v29 = vld [vmem:[#allocation119_spill] sm:$0xff]  ;;  %v14953_v8 = vld [vmem:[#allocation46_spill] sm:$0xff]  ;;  %v14999_v35 = vld [vmem:[#allocation45_spill] sm:$0xff]  ;;  %4996 = vrot.lane.b32.xlu1 %v14597_v28, %s14941_s23 }
 0x48a   : > { %v3610_v15 = vcombine.low %v14948_v34, %v14947_v59  ;;  %v3634_v45 = vrot.slane %v3612_v36, %v8107_v58  ;;  %14949 = vst [vmem:[#allocation79_spill] sm:$0xff] %v11319_v10  ;;  %v3641_v48 = vrot.slane %v3613_v50, %v8107_v58  ;;  %v14951_v7 = vld [vmem:[#allocation115_spill] sm:$0xff]  ;;  %v3690_v43 = vrot.slane %v3668_v1, %v8107_v58 }
 0x48b   : > { %v3666_v53 = vcombine.low %v14951_v7, %v14950_v29  ;;  %v3697_v39 = vrot.slane %v3669_v46, %v8107_v58  ;;  %v14952_v36 = vstv %s8908_s25  ;;  %v3602_v21 = vcombine.low %v3594_v38, %v3601_v24  ;;  %v14963_v38 = vld [vmem:[#allocation124_spill] sm:$0xff]  ;;  %s11516_s25 = sld [smem:[#allocation2 + $0x2c]] }
 0x48c   : > { %v3270_v63 = vmul.f32 %v14952_v36, %v3268_v41  ;;  %v3627_v50 = vrot.slane %v3611_v47, %v8107_v58  ;;  %v2991_v1 = vadd.f32 %v14953_v8, %v2935_v13  ;;  %v14954_v19 = vstv %s8922_s15  ;;  %v11354_v47 = vpop.permute.xlu1 %4270  ;;  %s14992_s15 = smov 61  }
 0x48d   : > { %v3326_v46 = vmul.f32 %v14954_v19, %v3324_v18  ;;  %v3380_v41 = vsel %vm14180_vm2, %v3378_v25, 0.0  ;;  %v3683_v24 = vrot.slane %v3667_v14, %v8107_v58  ;;  %v3436_v18 = vsel %vm14141_vm3, %v3434_v31, 0.0  ;;  %v11368_v59 = vpop.permute.xlu0 %4424  ;;  %v14956_v14 = vld [vmem:[#allocation58_spill] sm:$0xff]  ;;  %5075 = vrot.lane.b32.xlu0 %v14546_v4, %s14992_s15  ;;  %5000 = vrot.lane.b32.xlu1 %v14615_v17, %s14941_s23 }
 0x48e   : > { %v3492_v13 = vsel %vm14140_vm13, %v3490_v37, 0.0  ;;  %v3620_v25 = vrot.slane %v3610_v15, %v8107_v58  ;;  %14955 = vst [vmem:[#allocation81_spill] sm:$0xff] %v11368_v59  ;;  %v3047_v34 = vadd.f32 %v14956_v14, %v2991_v1  ;;  %v3548_v29 = vsel %vm14165_vm4, %v3546_v2, 0.0  ;;  %v14957_v37 = vld [vmem:[#allocation61_spill] sm:$0xff]  ;;  %v14962_v14 = vld [vmem:[#allocation139_spill] sm:$0xff] }
 0x48f   : > { %v3643_v7 = vcombine.low %v3634_v45, %v3641_v48  ;;  %v3676_v31 = vrot.slane %v3666_v53, %v8107_v58  ;;  %v3699_v36 = vcombine.low %v3690_v43, %v3697_v39  ;;  %vm489_vm13 = vcmp.ge.s32.totalorder %v14957_v37, 0  ;;  %v14959_v48 = vld [vmem:[#allocation62_spill] sm:$0xff]  ;;  %v14961_v1 = vld [vmem:[#allocation133_spill] sm:$0xff] }
 0x490   : > { %vm490_vm3 = vcmp.lt.s32.totalorder %v14957_v37, 32  ;;  %v14958_v15 = vstv %s9016_s8  ;;  %v3604_v2 = vsel %vm14158_vm10, %v3602_v21, 0.0  ;;  %v3642_v45 = vcombine.low %v3620_v25, %v3627_v50  ;;  %v14960_v39 = vld [vmem:[#allocation126_spill] sm:$0xff]  ;;  %v11397_v62 = vpop.permute.xlu1 %4340  ;;  %s11538_s8 = sld [smem:[#allocation2 + $0x2d]] }
 0x491   : > { %v3382_v8 = vmul.f32 %v14958_v15, %v3380_v41  ;;  %v3103_v53 = vadd.f32 %v14959_v48, %v3047_v34  ;;  %v3698_v43 = vcombine.low %v3676_v31, %v3683_v24  ;;  %v3723_v19 = vcombine.low %v14961_v1, %v14960_v39  ;;  %v14964_v41 = vld [vmem:[#allocation129_spill] sm:$0xff]  ;;  %v14965_v15 = vld [vmem:[#allocation122_spill] sm:$0xff]  ;;  %14966 = vst [vmem:[#allocation20_spill] sm:$0xff] %v11397_v62  ;;  %v11409_v24 = vpop.permute.xlu0 %4428  ;;  %v14985_v62 = vld [vmem:[#allocation47_spill] sm:$0xff] }
 0x492   : > { %v3724_v22 = vcombine.low %v14963_v38, %v14962_v14  ;;  %v3725_v27 = vcombine.low %v14965_v15, %v14964_v41  ;;  %v14967_v59 = vstv %s9136_s19  ;;  %v14968_v50 = vstv %s9292_s24  ;;  %14970 = vst [vmem:[#allocation97_spill] sm:$0xff] %v11409_v24  ;;  %v14971_v34 = vld [vmem:[#allocation74_spill] sm:$0xff]  ;;  %v14978_v41 = vld [vmem:[#allocation40_spill] sm:$0xff]  ;;  %vm11484_vm10 = vmand %vm489_vm13, %vm490_vm3  ;;  %5080 = vrot.lane.b32.xlu0 %v14555_v49, %s14992_s15  ;;  %s11553_s19 = sld [smem:[#allocation2 + $0x2e]]  ;;  %5004 = vrot.lane.b32.xlu1 %v14576_v56, %s14941_s23  ;;  %s15018_s24 = smov 35  }
 0x493   : > { %v3438_v21 = vmul.f32 %v14967_v59, %v3436_v18  ;;  %v11403_v25 = vmul.f32 %v14968_v50, %v3492_v13  ;;  %v14969_v10 = vstv %s9415_s12  ;;  %v3159_v31 = vadd.f32 %v14971_v34, %v3103_v53  ;;  %v14973_v18 = vld [vmem:[#allocation132_spill] sm:$0xff]  ;;  %v14974_v59 = vld [vmem:[#allocation39_spill] sm:$0xff]  ;;  %v14976_v53 = vld [vmem:[#allocation130_spill] sm:$0xff]  ;;  %s11607_s12 = sld [smem:[#allocation2 + $0x31]] }
 0x494   : > { %v11407_v3 = vmul.f32 %v14969_v10, %v3548_v29  ;;  %v14972_v48 = vstv %s9439_s20  ;;  %v11417_v38 = vrot.slane %v3643_v7, %v8107_v58  ;;  %v11420_v1 = vrot.slane %v3699_v36, %v8107_v58  ;;  %v14975_v29 = vld [vmem:[#allocation123_spill] sm:$0xff]  ;;  %v14979_v7 = vld [vmem:[#allocation72_spill] sm:$0xff]  ;;  %vm14162_vm3 = vmand %vm11484_vm10, %vm8128_vm8  ;;  %s11577_s20 = sld [smem:[#allocation2 + $0x2f]] }
 0x495   : > { %v11414_v39 = vmul.f32 %v14972_v48, %v3604_v2  ;;  %v3722_v13 = vcombine.low %v14974_v59, %v14973_v18  ;;  %v11427_v10 = vrot.slane %v3642_v45, %v8107_v58  ;;  %v3780_v14 = vcombine.low %v14976_v53, %v14975_v29  ;;  %v14977_v2 = vld [vmem:[#allocation134_spill] sm:$0xff]  ;;  %v11442_v18 = vpop.permute.xlu1 %4344  ;;  %v14981_v59 = vld [vmem:[#allocation128_spill] sm:$0xff]  ;;  %vm14161_vm13 = vmand %vm11484_vm10, %vm8210_vm0 }
 0x496   : > { %v3781_v15 = vcombine.low %v14978_v41, %v14977_v2  ;;  %v3215_v36 = vadd.f32 %v14979_v7, %v3159_v31  ;;  %v11437_v50 = vrot.slane %v3698_v43, %v8107_v58  ;;  %v3739_v34 = vrot.slane %v3723_v19, %v8107_v58  ;;  %14980 = vst [vmem:[#allocation144_spill] sm:$0xff] %v11442_v18  ;;  %v14982_v29 = vld [vmem:[#allocation44_spill] sm:$0xff]  ;;  %v14983_v2 = vld [vmem:[#allocation53_spill] sm:$0xff]  ;;  %v11450_v7 = vpop.permute.xlu0 %4432  ;;  %v14988_v18 = vld [vmem:[#allocation34_spill] sm:$0xff] }
 0x497   : > { %v3746_v48 = vrot.slane %v3724_v22, %v8107_v58  ;;  %v3753_v45 = vrot.slane %v3725_v27, %v8107_v58  ;;  %v3779_v53 = vcombine.low %v14982_v29, %v14981_v59  ;;  %v14984_v41 = vld [vmem:[#allocation37_spill] sm:$0xff]  ;;  %v3837_v31 = vcombine.low %v14986_v55, %v14985_v62  ;;  %14987 = vst [vmem:[#allocation35_spill] sm:$0xff] %v11450_v7  ;;  %v14990_v55 = vld [vmem:[#allocation38_spill] sm:$0xff]  ;;  %vm14172_vm4 = vmand %vm11484_vm10, %vm9533_vm1 }
 0x498   : > { %v3836_v24 = vcombine.low %v14984_v41, %v14983_v2  ;;  %v3271_v43 = vadd.f32 %v3270_v63, %v3215_v36  ;;  %v3658_v19 = vcombine.low %v11427_v10, %v11417_v38  ;;  %v3714_v22 = vcombine.low %v11437_v50, %v11420_v1  ;;  %v14991_v63 = vld [vmem:[#allocation43_spill] sm:$0xff]  ;;  %v14994_v50 = vld [vmem:[#allocation141_spill] sm:$0xff]  ;;  %5084 = vrot.lane.b32.xlu0 %v14521_v9, %s14992_s15 }
 0x499   : > { %v3732_v27 = vrot.slane %v3722_v13, %v8107_v58  ;;  %v3778_v59 = vcombine.low %v14989_v32, %v14988_v18  ;;  %v3802_v29 = vrot.slane %v3780_v14, %v8107_v58  ;;  %v3809_v62 = vrot.slane %v3781_v15, %v8107_v58  ;;  %v14993_v13 = vld [vmem:[#allocation54_spill] sm:$0xff]  ;;  %v11471_v7 = vpop.permute.xlu1 %4348  ;;  %v14998_v15 = vld [vmem:[#allocation41_spill] sm:$0xff]  ;;  %5008 = vrot.lane.b32.xlu1 %v14586_v57, %s14941_s23  ;;  %s15182_s23 = smov 3  }
 0x49a   : > { %v3835_v36 = vcombine.low %v14991_v63, %v14990_v55  ;;  %v3327_v38 = vadd.f32 %v3326_v46, %v3271_v43  ;;  %v3755_v10 = vcombine.low %v3746_v48, %v3753_v45  ;;  %v3892_v2 = vcombine.low %v14994_v50, %v14993_v13  ;;  %v14995_v32 = vld [vmem:[#allocation142_spill] sm:$0xff]  ;;  %14997 = vst [vmem:[#allocation125_spill] sm:$0xff] %v11471_v7  ;;  %v11478_v46 = vpop.permute.xlu0 %4501  ;;  %v15005_v45 = vld [vmem:[#allocation48_spill] sm:$0xff]  ;;  %v15008_v13 = vld [vmem:[#allocation143_spill] sm:$0xff] }
 0x49b   : > { %v3754_v1 = vcombine.low %v3732_v27, %v3739_v34  ;;  %v14996_v18 = vld [vmem:[#allocation50_spill] sm:$0xff]  ;;  %v3795_v14 = vrot.slane %v3779_v53, %v8107_v58  ;;  %v3834_v30 = vcombine.low %v14999_v35, %v14998_v15  ;;  %v3858_v55 = vrot.slane %v3836_v24, %v8107_v58  ;;  %15000 = vst [vmem:[#allocation138_spill] sm:$0xff] %v11478_v46  ;;  %v15006_v43 = vld [vmem:[#allocation64_spill] sm:$0xff]  ;;  %v15010_v15 = vld [vmem:[#allocation55_spill] sm:$0xff] }
 0x49c   : > { %v3893_v41 = vcombine.low %v14996_v18, %v14995_v32  ;;  %v3865_v63 = vrot.slane %v3837_v31, %v8107_v58  ;;  %v15001_v34 = vmov 0  ;;  %v15004_v48 = vld [vmem:[#allocation42_spill] sm:$0xff]  ;;  %v15007_v27 = vld [vmem:[#allocation80_spill] sm:$0xff]  ;;  %v3383_v31 = vadd.f32 %v3382_v8, %v3327_v38  ;;  %v15011_v46 = vld [vmem:[#allocation49_spill] sm:$0xff]  ;;  %5088 = vrot.lane.b32.xlu0 %v14529_v16, %s14992_s15 }
 0x49d   : > { %v15002_v34 = vsel %vm11484_vm10, 4294967295, %v15001_v34  ;;  %v3891_v53 = vcombine.low %v15005_v45, %v15004_v48  ;;  %v3948_v35 = vcombine.low %v15007_v27, %v15006_v43  ;;  %v15009_v24 = vld [vmem:[#allocation56_spill] sm:$0xff]  ;;  %v3788_v32 = vrot.slane %v3778_v59, %v8107_v58  ;;  %v15012_v43 = vld [vmem:[#allocation66_spill] sm:$0xff]  ;;  %5078 = vrot.lane.b32.xlu1 %v14597_v28, %s14992_s15 }
 0x49e   : > { %15003 = vst [vmem:[#allocation107_spill] sm:$0xff] %v15002_v34  ;;  %v3949_v50 = vcombine.low %v15009_v24, %v15008_v13  ;;  %v3811_v37 = vcombine.low %v3802_v29, %v3809_v62  ;;  %v3851_v18 = vrot.slane %v3835_v36, %v8107_v58  ;;  %v3890_v7 = vcombine.low %v15011_v46, %v15010_v15  ;;  %v15013_v27 = vld [vmem:[#allocation60_spill] sm:$0xff]  ;;  %v11506_v24 = vpop.permute.xlu1 %4352  ;;  %v11514_v38 = vpop.permute.xlu0 %4506  ;;  %v15015_v46 = vld [vmem:[#allocation59_spill] sm:$0xff] }
 0x49f   : > { %v3914_v48 = vrot.slane %v3892_v2, %v8107_v58  ;;  %v3921_v45 = vrot.slane %v3893_v41, %v8107_v58  ;;  %v3947_v13 = vcombine.low %v15013_v27, %v15012_v43  ;;  %v3439_v8 = vadd.f32 %v3438_v21, %v3383_v31  ;;  %v15014_v41 = vld [vmem:[#allocation71_spill] sm:$0xff] }
 0x4a0   : > { %v3769_v59 = vrot.slane %v3755_v10, %v8107_v58  ;;  %v3810_v29 = vcombine.low %v3788_v32, %v3795_v14  ;;  %v3844_v62 = vrot.slane %v3834_v30, %v8107_v58  ;;  %v3867_v36 = vcombine.low %v3858_v55, %v3865_v63  ;;  %5157 = vrot.lane.b32.xlu0 %v14546_v4, %s15018_s24 }
 0x4a1   : > { %v3907_v2 = vrot.slane %v3891_v53, %v8107_v58  ;;  %v3946_v15 = vcombine.low %v15015_v46, %v15014_v41  ;;  %v3970_v43 = vrot.slane %v3948_v35, %v8107_v58  ;;  %v3977_v27 = vrot.slane %v3949_v50, %v8107_v58  ;;  %5082 = vrot.lane.b32.xlu1 %v14615_v17, %s14992_s15 }
 0x4a2   : > { %v3762_v30 = vrot.slane %v3754_v1, %v8107_v58  ;;  %v3825_v21 = vrot.slane %v3811_v37, %v8107_v58  ;;  %v3660_v10 = vsel %vm14162_vm3, %v3658_v19, 0.0  ;;  %v3495_v14 = vadd.f32 %v11403_v25, %v3439_v8  ;;  %v11543_v35 = vpop.permute.xlu1 %4422  ;;  %v11546_v32 = vpop.permute.xlu0 %4510  ;;  %vm14164_vm3 = vmand %vm11484_vm10, %vm8722_vm14 }
 0x4a3   : > { %v3866_v55 = vcombine.low %v3844_v62, %v3851_v18  ;;  %v3900_v63 = vrot.slane %v3890_v7, %v8107_v58  ;;  %v3923_v53 = vcombine.low %v3914_v48, %v3921_v45  ;;  %v3963_v1 = vrot.slane %v3947_v13, %v8107_v58 }
 0x4a4   : > { %v3770_v50 = vcombine.low %v3762_v30, %v3769_v59  ;;  %v3818_v31 = vrot.slane %v3810_v29, %v8107_v58  ;;  %v3716_v25 = vsel %vm14161_vm13, %v3714_v22, 0.0  ;;  %v3551_v7 = vadd.f32 %v11407_v3, %v3495_v14  ;;  %vm14163_vm13 = vmand %vm11484_vm10, %vm9162_vm5  ;;  %5162 = vrot.lane.b32.xlu0 %v14555_v49, %s15018_s24 }
 0x4a5   : > { %v3881_v19 = vrot.slane %v3867_v36, %v8107_v58  ;;  %v3922_v37 = vcombine.low %v3900_v63, %v3907_v2  ;;  %v3956_v18 = vrot.slane %v3946_v15, %v8107_v58  ;;  %v3979_v48 = vcombine.low %v3970_v43, %v3977_v27  ;;  %5086 = vrot.lane.b32.xlu1 %v14576_v56, %s14992_s15 }
 0x4a6   : > { %v3826_v22 = vcombine.low %v3818_v31, %v3825_v21  ;;  %v15016_v3 = vstv %s9748_s2  ;;  %v3607_v13 = vadd.f32 %v11414_v39, %v3551_v7  ;;  %v3874_v8 = vrot.slane %v3866_v55, %v8107_v58  ;;  %v11571_v62 = vpop.permute.xlu1 %4426  ;;  %v11579_v36 = vpop.permute.xlu0 %4514  ;;  %s11593_s2 = sld [smem:[#allocation2 + $0x30]] }
 0x4a7   : > { %v3662_v45 = vmul.f32 %v15016_v3, %v3660_v10  ;;  %v3937_v59 = vrot.slane %v3923_v53, %v8107_v58  ;;  %v3978_v29 = vcombine.low %v3956_v18, %v3963_v1  ;;  %v15017_v2 = vstv %s11279_s30  ;;  %s12124_s30 = sld [smem:[#allocation2 + $0x39]] }
 0x4a8   : > { %v3718_v41 = vmul.f32 %v15017_v2, %v3716_v25  ;;  %v3773_v39 = vstv %s11516_s25  ;;  %v3772_v46 = vsel %vm14163_vm13, %v3770_v50, 0.0  ;;  %v3882_v43 = vcombine.low %v3874_v8, %v3881_v19  ;;  %vm14178_vm13 = vmand %vm11484_vm10, %vm9316_vm6  ;;  %5166 = vrot.lane.b32.xlu0 %v14521_v9, %s15018_s24  ;;  %s12318_s25 = sld [smem:[#allocation2 + $0x3b]] }
 0x4a9   : > { %v3663_v15 = vadd.f32 %v3662_v45, %v3607_v13  ;;  %v3930_v27 = vrot.slane %v3922_v37, %v8107_v58  ;;  %v3993_v30 = vrot.slane %v3979_v48, %v8107_v58  ;;  %v3829_v21 = vstv %s11538_s8  ;;  %5090 = vrot.lane.b32.xlu1 %v14586_v57, %s14992_s15  ;;  %s12306_s15 = sld [smem:[#allocation2 + $0x3a]]  ;;  %s15235_s8 = smov 2  }
 0x4aa   : > { %v3828_v10 = vsel %vm14164_vm3, %v3826_v22, 0.0  ;;  %v3986_v63 = vrot.slane %v3978_v29, %v8107_v58  ;;  %v11610_v53 = vpop.permute.xlu1 %4430  ;;  %v3774_v1 = vmul.f32 %v3773_v39, %v3772_v46  ;;  %v11612_v50 = vpop.permute.xlu0 %4583  ;;  %v3885_v31 = vstv %s11553_s19  ;;  %vm14175_vm3 = vmand %vm11484_vm10, %vm9461_vm7  ;;  %s12621_s19 = sld [smem:[#allocation2 + $0x3c]] }
 0x4ab   : > { %v3719_v14 = vadd.f32 %v3718_v41, %v3663_v15  ;;  %v3938_v55 = vcombine.low %v3930_v27, %v3937_v59  ;;  %v3830_v7 = vmul.f32 %v3829_v21, %v3828_v10  ;;  %v3884_v19 = vsel %vm14178_vm13, %v3882_v43, 0.0 }
 0x4ac   : > { %v3994_v25 = vcombine.low %v3986_v63, %v3993_v30  ;;  %v3941_v48 = vstv %s11577_s20  ;;  %v3886_v13 = vmul.f32 %v3885_v31, %v3884_v19  ;;  %v3997_v8 = vstv %s11593_s2  ;;  %v15019_v30 = vld [vmem:[#allocation25_spill] sm:$0xff]  ;;  %5170 = vrot.lane.b32.xlu0 %v14529_v16, %s15018_s24  ;;  %s12637_s20 = sld [smem:[#allocation2 + $0x3d]]  ;;  %s12641_s2 = sld [smem:[#allocation2 + $0x3e]] }
 0x4ad   : > { %v3775_v37 = vadd.f32 %v3774_v1, %v3719_v14  ;;  %v3940_v22 = vsel %vm14175_vm3, %v3938_v55, 0.0  ;;  %v4087_v41 = vstv %s11607_s12  ;;  %v4169_v27 = vstv %s11619_s18  ;;  %v15020_v55 = vld [vmem:[#allocation32_spill] sm:$0xff]  ;;  %5160 = vrot.lane.b32.xlu1 %v14597_v28, %s15018_s24  ;;  %s15296_s12 = smov 127   ;;  %s12805_s18 = sld [smem:[#allocation2 + $0x40]] }
 0x4ae   : > { %v11634_v18 = vpop.permute.xlu1 %4434  ;;  %v11642_v45 = vpop.permute.xlu0 %4588  ;;  %v3996_v59 = vsel %vm14172_vm4, %v3994_v25, 0.0  ;;  %v3942_v29 = vmul.f32 %v3941_v48, %v3940_v22  ;;  %v4088_v21 = vmul.f32 %v4087_v41, %v15019_v30  ;;  %v4170_v63 = vmul.f32 %v4169_v27, %v15020_v55 }
 0x4af   : > { %v3831_v3 = vadd.f32 %v3830_v7, %v3775_v37  ;;  %v3998_v15 = vmul.f32 %v3997_v8, %v3996_v59  ;;  %vm15039_vm4 = vcmask 793600  }
 0x4b0   : > { %5239 = vrot.lane.b32.xlu0 %v14546_v4, %s15021_s29  ;;  %vm15042_vm3 = vmmov %vm15039_vm4 }
 0x4b1   : > { %v3887_v2 = vadd.f32 %v3886_v13, %v3831_v3  ;;  %5164 = vrot.lane.b32.xlu1 %v14615_v17, %s15018_s24  ;;  %vm15045_vm13 = vmmov %vm15042_vm3 }
 0x4b2   : > { %v11655_v39 = vpop.permute.xlu1 %4504  ;;  %v11657_v46 = vpop.permute.xlu0 %4592  ;;  %vm15047_vm2 = vmmov %vm15042_vm3 }
 0x4b3   : > { %v3943_v43 = vadd.f32 %v3942_v29, %v3887_v2 }
 0x4b4   : > { %5244 = vrot.lane.b32.xlu0 %v14555_v49, %s15021_s29 }
 0x4b5   : > { %v3999_v10 = vadd.f32 %v3998_v15, %v3943_v43  ;;  %5168 = vrot.lane.b32.xlu1 %v14576_v56, %s15018_s24 }
 0x4b6   : > { %v11665_v14 = vpop.permute.xlu1 %4508  ;;  %v11668_v1 = vpop.permute.xlu0 %4596 }
 0x4b7   : > { %v4089_v31 = vadd.f32 %v4088_v21, %v3999_v10 }
 0x4b8   : > { %5248 = vrot.lane.b32.xlu0 %v14521_v9, %s15021_s29 }
 0x4b9   : > { %v11674_v25 = vadd.f32 %v4170_v63, %v4089_v31  ;;  %5172 = vrot.lane.b32.xlu1 %v14586_v57, %s15018_s24  ;;  %s12735_s24 = sld [smem:[#allocation2 + $0x3f]] }
 0x4ba   : > { %v11676_v7 = vpop.permute.xlu1 %4512  ;;  %v11678_v19 = vpop.permute.xlu0 %4665 }
 0x4bc   : > { %5252 = vrot.lane.b32.xlu0 %v14529_v16, %s15021_s29 }
 0x4bd   : > { %5242 = vrot.lane.b32.xlu1 %v14597_v28, %s15021_s29 }
 0x4be   : > { %v11684_v37 = vpop.permute.xlu1 %4516  ;;  %v11686_v48 = vpop.permute.xlu0 %4670 }
 0x4c0   : > { %5321 = vrot.lane.b32.xlu0 %v14546_v4, %s15023_s14 }
 0x4c1   : > { %5246 = vrot.lane.b32.xlu1 %v14615_v17, %s15021_s29 }
 0x4c2   : > { %v11692_v22 = vpop.permute.xlu1 %4586  ;;  %v11694_v3 = vpop.permute.xlu0 %4674 }
 0x4c4   : > { %5326 = vrot.lane.b32.xlu0 %v14555_v49, %s15023_s14 }
 0x4c5   : > { %5250 = vrot.lane.b32.xlu1 %v14576_v56, %s15021_s29 }
 0x4c6   : > { %v11700_v13 = vpop.permute.xlu1 %4590  ;;  %v11702_v8 = vpop.permute.xlu0 %4678 }
 0x4c7   : > { %15022 = vst [vmem:[#allocation67_spill] sm:$0xff] %v11702_v8 }
 0x4c8   : > { %5330 = vrot.lane.b32.xlu0 %v14521_v9, %s15023_s14 }
 0x4c9   : > { %5254 = vrot.lane.b32.xlu1 %v14586_v57, %s15021_s29  ;;  %s12871_s29 = sld [smem:[#allocation2 + $0x41]] }
 0x4ca   : > { %v11708_v59 = vpop.permute.xlu1 %4594  ;;  %v11710_v29 = vpop.permute.xlu0 %4747 }
 0x4cb   : > { %15024 = vst [vmem:[#allocation75_spill] sm:$0xff] %v11710_v29  ;;  %v15054_v29 = vld [vmem:[#allocation30_spill] sm:$0xff] }
 0x4cc   : > { %5334 = vrot.lane.b32.xlu0 %v14529_v16, %s15023_s14 }
 0x4cd   : > { %5324 = vrot.lane.b32.xlu1 %v14597_v28, %s15023_s14 }
 0x4ce   : > { %v11716_v2 = vpop.permute.xlu1 %4598  ;;  %v11718_v41 = vpop.permute.xlu0 %4752 }
 0x4cf   : > { %15025 = vst [vmem:[#allocation73_spill] sm:$0xff] %v11718_v41 }
 0x4d0   : > { %5403 = vrot.lane.b32.xlu0 %v14546_v4, %s15028_s1 }
 0x4d1   : > { %5328 = vrot.lane.b32.xlu1 %v14615_v17, %s15023_s14 }
 0x4d2   : > { %v11724_v15 = vpop.permute.xlu1 %4668  ;;  %v11726_v43 = vpop.permute.xlu0 %4756 }
 0x4d3   : > { %15026 = vst [vmem:[#allocation77_spill] sm:$0xff] %v11726_v43  ;;  %v15050_v43 = vld [vmem:[#allocation31_spill] sm:$0xff] }
 0x4d4   : > { %5408 = vrot.lane.b32.xlu0 %v14555_v49, %s15028_s1 }
 0x4d5   : > { %5332 = vrot.lane.b32.xlu1 %v14576_v56, %s15023_s14 }
 0x4d6   : > { %v11732_v27 = vpop.permute.xlu1 %4672  ;;  %v11734_v30 = vpop.permute.xlu0 %4760 }
 0x4d7   : > { %15027 = vst [vmem:[#allocation84_spill] sm:$0xff] %v11734_v30 }
 0x4d8   : > { %5412 = vrot.lane.b32.xlu0 %v14521_v9, %s15028_s1 }
 0x4d9   : > { %5336 = vrot.lane.b32.xlu1 %v14586_v57, %s15023_s14  ;;  %s12999_s14 = sld [smem:[#allocation2 + $0x43]] }
 0x4da   : > { %v11740_v21 = vpop.permute.xlu1 %4676  ;;  %v11742_v10 = vpop.permute.xlu0 %4829 }
 0x4db   : > { %15029 = vst [vmem:[#allocation69_spill] sm:$0xff] %v11740_v21  ;;  %15030 = vst [vmem:[#allocation16_spill] sm:$0xff] %v11742_v10 }
 0x4dc   : > { %5416 = vrot.lane.b32.xlu0 %v14529_v16, %s15028_s1 }
 0x4dd   : > { %5406 = vrot.lane.b32.xlu1 %v14597_v28, %s15028_s1 }
 0x4de   : > { %v11748_v55 = vpop.permute.xlu1 %4680  ;;  %v11750_v63 = vpop.permute.xlu0 %4834 }
 0x4df   : > { %15031 = vst [vmem:[#allocation93_spill] sm:$0xff] %v11750_v63 }
 0x4e0   : > { %5485 = vrot.lane.b32.xlu0 %v14546_v4, %s15036_s3 }
 0x4e1   : > { %5410 = vrot.lane.b32.xlu1 %v14615_v17, %s15028_s1 }
 0x4e2   : > { %v11756_v31 = vpop.permute.xlu1 %4750  ;;  %v11758_v34 = vpop.permute.xlu0 %4838 }
 0x4e3   : > { %15032 = vst [vmem:[#allocation86_spill] sm:$0xff] %v11756_v31  ;;  %15033 = vst [vmem:[#allocation90_spill] sm:$0xff] %v11758_v34  ;;  %v11781_v34 = vsel %vm15039_vm4, %v10989_v51, %v11196_v5  ;;  %v15041_v31 = vld [vmem:[#allocation28_spill] sm:$0xff] }
 0x4e4   : > { %15040 = vst [vmem:[#allocation91_spill] sm:$0xff] %v11781_v34  ;;  %5490 = vrot.lane.b32.xlu0 %v14555_v49, %s15036_s3  ;;  %vm15052_vm4 = vmmov %vm15047_vm2 }
 0x4e5   : > { %5414 = vrot.lane.b32.xlu1 %v14576_v56, %s15028_s1 }
 0x4e6   : > { %v11764_v44 = vpop.permute.xlu1 %4754  ;;  %v11766_v33 = vpop.permute.xlu0 %4842 }
 0x4e7   : > { %15034 = vst [vmem:[#allocation98_spill] sm:$0xff] %v11764_v44  ;;  %15035 = vst [vmem:[#allocation83_spill] sm:$0xff] %v11766_v33  ;;  %v11786_v33 = vsel %vm15042_vm3, %v11196_v5, %v15041_v31  ;;  %v11800_v44 = vsel %vm15047_vm2, %v11152_v61, %v10989_v51  ;;  %v15051_v5 = vld [vmem:[#allocation27_spill] sm:$0xff] }
 0x4e8   : > { %15043 = vst [vmem:[#allocation99_spill] sm:$0xff] %v11786_v33  ;;  %15048 = vst [vmem:[#allocation96_spill] sm:$0xff] %v11800_v44  ;;  %v4203_v21 = vcombine.low %v11781_v34, %v11786_v33  ;;  %5494 = vrot.lane.b32.xlu0 %v14521_v9, %s15036_s3  ;;  %v11823_v51 = vsel %vm15047_vm2, %v15041_v31, %v15051_v5 }
 0x4e9   : > { %vm15055_vm3 = vmmov %vm15047_vm2  ;;  %15057 = vst [vmem:[#allocation118_spill] sm:$0xff] %v11823_v51  ;;  %5418 = vrot.lane.b32.xlu1 %v14586_v57, %s15028_s1  ;;  %s7643_s1 = sld [smem:[#allocation2 + $0x46]] }
 0x4ea   : > { %v11772_v10 = vpop.permute.xlu1 %4758  ;;  %v11774_v63 = vpop.permute.xlu0 %4911  ;;  %v11816_v30 = vsel %vm15055_vm3, %v15054_v29, %v10951_v52  ;;  %v4231_v31 = vrot.slane %v4203_v21, %v8107_v58 }
 0x4eb   : > { %15037 = vst [vmem:[#allocation102_spill] sm:$0xff] %v11772_v10  ;;  %15038 = vst [vmem:[#allocation85_spill] sm:$0xff] %v11774_v63  ;;  %v11795_v63 = vsel %vm15045_vm13, %v10951_v52, %v11152_v61  ;;  %v11807_v10 = vsel %vm15052_vm4, %v15051_v5, %v15050_v43  ;;  %vm15062_vm4 = vcmask 785408  }
 0x4ec   : > { %15046 = vst [vmem:[#allocation100_spill] sm:$0xff] %v11795_v63  ;;  %15053 = vst [vmem:[#allocation110_spill] sm:$0xff] %v11807_v10  ;;  %v4202_v61 = vcombine.low %v11795_v63, %v11800_v44  ;;  %v4200_v34 = vcombine.low %v11823_v51, %v11807_v10  ;;  %5498 = vrot.lane.b32.xlu0 %v14529_v16, %s15036_s3  ;;  %v15088_v44 = vld [vmem:[#allocation68_spill] sm:$0xff] }
 0x4ed   : > { %15056 = vst [vmem:[#allocation94_spill] sm:$0xff] %v11816_v30  ;;  %vm15059_vm13 = vmmov %vm15047_vm2  ;;  %5488 = vrot.lane.b32.xlu1 %v14597_v28, %s15036_s3 }
 0x4ee   : > { %v11790_v41 = vpop.permute.xlu1 %4762  ;;  %v11802_v54 = vpop.permute.xlu0 %4916  ;;  %v11834_v52 = vsel %vm15059_vm13, %v15050_v43, %v15054_v29  ;;  %v4224_v5 = vrot.slane %v4202_v61, %v8107_v58  ;;  %v11849_v29 = vsel %vm15062_vm4, %v11229_v20, %v11052_v40  ;;  %vm15064_vm3 = vmmov %vm15062_vm4  ;;  %v11859_v21 = vrot.slane %v4200_v34, %v8107_v58 }
 0x4ef   : > { %15044 = vst [vmem:[#allocation95_spill] sm:$0xff] %v11790_v41  ;;  %15049 = vst [vmem:[#allocation88_spill] sm:$0xff] %v11802_v54  ;;  %v4201_v41 = vcombine.low %v11834_v52, %v11816_v30  ;;  %v11854_v43 = vsel %vm15064_vm3, %v11015_v11, %v11229_v20 }
 0x4f0   : > { %15060 = vst [vmem:[#allocation106_spill] sm:$0xff] %v11834_v52  ;;  %15063 = vst [vmem:[#allocation57_spill] sm:$0xff] %v11849_v29  ;;  %v4233_v52 = vcombine.low %v4224_v5, %v4231_v31  ;;  %v15078_v31 = vld [vmem:[#allocation87_spill] sm:$0xff]  ;;  %v15081_v5 = vld [vmem:[#allocation65_spill] sm:$0xff]  ;;  %5567 = vrot.lane.b32.xlu0 %v14546_v4, %s15084_s17 }
 0x4f1   : > { %15065 = vst [vmem:[#allocation82_spill] sm:$0xff] %v11854_v43  ;;  %vm15067_vm2 = vmmov %vm15064_vm3  ;;  %v11874_v20 = vrot.slane %v4201_v41, %v8107_v58  ;;  %5492 = vrot.lane.b32.xlu1 %v14615_v17, %s15036_s3 }
 0x4f2   : > { %v11827_v33 = vpop.permute.xlu1 %4832  ;;  %v11836_v54 = vpop.permute.xlu0 %4920  ;;  %v11864_v63 = vsel %vm15067_vm2, %v11124_v12, %v11354_v47  ;;  %vm15069_vm13 = vmmov %vm15067_vm2 }
 0x4f3   : > { %15058 = vst [vmem:[#allocation92_spill] sm:$0xff] %v11827_v33  ;;  %15061 = vst [vmem:[#allocation70_spill] sm:$0xff] %v11836_v54  ;;  %v11869_v61 = vsel %vm15069_vm13, %v11354_v47, %v11015_v11  ;;  %v4282_v11 = vcombine.low %v11854_v43, %v11849_v29  ;;  %v15076_v47 = vld [vmem:[#allocation89_spill] sm:$0xff]  ;;  %vm15079_vm13 = vcmask 777216   ;;  %v15087_v43 = vld [vmem:[#allocation144_spill] sm:$0xff] }
 0x4f4   : > { %15068 = vst [vmem:[#allocation17_spill] sm:$0xff] %v11864_v63  ;;  %15070 = vst [vmem:[#allocation78_spill] sm:$0xff] %v11869_v61  ;;  %v11893_v41 = vsel %vm15067_vm2, %v11095_v26, %v15076_v47  ;;  %v15091_v54 = vld [vmem:[#allocation63_spill] sm:$0xff]  ;;  %5572 = vrot.lane.b32.xlu0 %v14555_v49, %s15084_s17 }
 0x4f5   : > { %vm15072_vm4 = vmmov %vm15067_vm2  ;;  %15077 = vst [vmem:[#allocation101_spill] sm:$0xff] %v11893_v41  ;;  %5496 = vrot.lane.b32.xlu1 %v14576_v56, %s15036_s3 }
 0x4f6   : > { %v11856_v30 = vpop.permute.xlu1 %4836  ;;  %v11871_v10 = vpop.permute.xlu0 %4924  ;;  %v11879_v34 = vsel %vm15072_vm4, %v11052_v40, %v11277_v6  ;;  %vm15074_vm3 = vmmov %vm15067_vm2  ;;  %v11898_v40 = vsel %vm15079_vm13, %v15078_v31, %v11506_v24 }
 0x4f7   : > { %15066 = vst [vmem:[#allocation15_spill] sm:$0xff] %v11856_v30  ;;  %15071 = vst [vmem:[#allocation76_spill] sm:$0xff] %v11871_v10  ;;  %v11884_v51 = vsel %vm15074_vm3, %v11277_v6, %v11095_v26  ;;  %v4285_v26 = vcombine.low %v11864_v63, %v11869_v61  ;;  %v15098_v61 = vld [vmem:[#allocation125_spill] sm:$0xff] }
 0x4f8   : > { %15073 = vst [vmem:[#allocation18_spill] sm:$0xff] %v11879_v34  ;;  %15075 = vst [vmem:[#allocation14_spill] sm:$0xff] %v11884_v51  ;;  %v4283_v30 = vcombine.low %v11879_v34, %v11884_v51  ;;  %v15104_v51 = vld [vmem:[#allocation35_spill] sm:$0xff]  ;;  %5576 = vrot.lane.b32.xlu0 %v14521_v9, %s15084_s17 }
 0x4f9   : > { %15080 = vst [vmem:[#allocation116_spill] sm:$0xff] %v11898_v40  ;;  %vm15082_vm4 = vmmov %vm15079_vm13  ;;  %5500 = vrot.lane.b32.xlu1 %v14586_v57, %s15036_s3  ;;  %s7644_s3 = sld [smem:[#allocation2 + $0x47]] }
 0x4fa   : > { %v11903_v6 = vsel %vm15082_vm4, %v11506_v24, %v15081_v5  ;;  %vm15085_vm3 = vmmov %vm15067_vm2  ;;  %v11924_v33 = vpop.permute.xlu1 %4840  ;;  %v11943_v8 = vpop.permute.xlu0 %4993 }
 0x4fb   : > { %15083 = vst [vmem:[#allocation108_spill] sm:$0xff] %v11903_v6  ;;  %v11910_v29 = vsel %vm15085_vm3, %v15076_v47, %v11124_v12  ;;  %vm15089_vm2 = vmmov %vm15082_vm4  ;;  %v15095_v12 = vld [vmem:[#allocation20_spill] sm:$0xff] }
 0x4fc   : > { %15086 = vst [vmem:[#allocation127_spill] sm:$0xff] %v11910_v29  ;;  %v11917_v10 = vsel %vm15089_vm2, %v15088_v44, %v15087_v43  ;;  %vm15092_vm13 = vmmov %vm15089_vm2  ;;  %5580 = vrot.lane.b32.xlu0 %v14529_v16, %s15084_s17 }
 0x4fd   : > { %15090 = vst [vmem:[#allocation109_spill] sm:$0xff] %v11917_v10  ;;  %v11922_v24 = vsel %vm15092_vm13, %v15087_v43, %v15091_v54  ;;  %15094 = vst [vmem:[#allocation120_spill] sm:$0xff] %v11924_v33  ;;  %v11941_v43 = vsel %vm15089_vm2, %v15098_v61, %v15078_v31  ;;  %v15106_v33 = vld [vmem:[#allocation79_spill] sm:$0xff]  ;;  %v4284_v31 = vcombine.low %v11893_v41, %v11910_v29  ;;  %5570 = vrot.lane.b32.xlu1 %v14597_v28, %s15084_s17 }
 0x4fe   : > { %15093 = vst [vmem:[#allocation103_spill] sm:$0xff] %v11922_v24  ;;  %vm15096_vm4 = vmmov %vm15089_vm2 }
 0x4ff   : > { %v11931_v47 = vsel %vm15096_vm4, %v15095_v12, %v15088_v44  ;;  %vm15099_vm3 = vmmov %vm15089_vm2  ;;  %15101 = vst [vmem:[#allocation121_spill] sm:$0xff] %v11943_v8  ;;  %v4367_v44 = vcombine.low %v11898_v40, %v11903_v6  ;;  %vm15105_vm4 = vcmask 769024   ;;  %v15112_v40 = vld [vmem:[#allocation97_spill] sm:$0xff] }
 0x500   : > { %15097 = vst [vmem:[#allocation137_spill] sm:$0xff] %v11931_v47  ;;  %v11936_v63 = vsel %vm15099_vm3, %v15091_v54, %v15098_v61  ;;  %vm15102_vm13 = vmmov %vm15089_vm2  ;;  %v11955_v54 = vsel %vm15105_vm4, %v15104_v51, %v11634_v18  ;;  %5649 = vrot.lane.b32.xlu0 %v14546_v4, %s15137_s27 }
 0x501   : > { %15100 = vst [vmem:[#allocation135_spill] sm:$0xff] %v11936_v63  ;;  %v11948_v34 = vsel %vm15102_vm13, %v15081_v5, %v15095_v12  ;;  %vm15107_vm3 = vmmov %vm15105_vm4  ;;  %v4365_v5 = vcombine.low %v11917_v10, %v11922_v24  ;;  %v15109_v12 = vld [vmem:[#allocation81_spill] sm:$0xff]  ;;  %v4366_v41 = vcombine.low %v11936_v63, %v11941_v43  ;;  %5574 = vrot.lane.b32.xlu1 %v14615_v17, %s15084_s17 }
 0x502   : > { %15103 = vst [vmem:[#allocation104_spill] sm:$0xff] %v11948_v34  ;;  %v11960_v61 = vsel %vm15107_vm3, %v11634_v18, %v15106_v33  ;;  %vm15110_vm2 = vmmov %vm15107_vm3  ;;  %v4313_v18 = vrot.slane %v4285_v26, %v8107_v58  ;;  %v4364_v29 = vcombine.low %v11948_v34, %v11931_v47  ;;  %v12014_v47 = vrot.slane %v4233_v52, %v8107_v58 }
 0x503   : > { %15108 = vst [vmem:[#allocation111_spill] sm:$0xff] %v11960_v61  ;;  %v11971_v6 = vsel %vm15110_vm2, %v15109_v12, %v11571_v62  ;;  %vm15113_vm13 = vmmov %vm15110_vm2  ;;  %v12000_v26 = vsel %vm15110_vm2, %v11543_v35, %v15109_v12  ;;  %v4449_v63 = vcombine.low %v11955_v54, %v11960_v61  ;;  %v4395_v34 = vrot.slane %v4367_v44, %v8107_v58 }
 0x504   : > { %15111 = vst [vmem:[#allocation131_spill] sm:$0xff] %v11971_v6  ;;  %v11976_v8 = vsel %vm15113_vm13, %v11571_v62, %v15112_v40  ;;  %vm15115_vm4 = vmmov %vm15110_vm2  ;;  %v11993_v62 = vpop.permute.xlu1 %4844  ;;  %v4381_v61 = vrot.slane %v4365_v5, %v8107_v58  ;;  %v4388_v52 = vrot.slane %v4366_v41, %v8107_v58  ;;  %v4374_v41 = vrot.slane %v4364_v29, %v8107_v58 }
 0x505   : > { %15114 = vst [vmem:[#allocation136_spill] sm:$0xff] %v11976_v8  ;;  %v11986_v10 = vsel %vm15115_vm4, %v15112_v40, %v11610_v53  ;;  %vm15117_vm3 = vmmov %vm15110_vm2  ;;  %v4447_v12 = vcombine.low %v11971_v6, %v11976_v8  ;;  %vm15122_vm4 = vcmask 760832   ;;  %v4292_v6 = vrot.slane %v4282_v11, %v8107_v58  ;;  %5654 = vrot.lane.b32.xlu0 %v14555_v49, %s15137_s27 }
 0x506   : > { %15116 = vst [vmem:[#allocation117_spill] sm:$0xff] %v11986_v10  ;;  %v11991_v24 = vsel %vm15117_vm3, %v11610_v53, %v15104_v51  ;;  %15119 = vst [vmem:[#allocation113_spill] sm:$0xff] %v12000_v26  ;;  %v12009_v53 = vpop.permute.xlu0 %4998  ;;  %v4232_v51 = vcombine.low %v11859_v21, %v11874_v20  ;;  %v12034_v44 = vsel %vm15122_vm4, %v11579_v36, %v11684_v37  ;;  %5578 = vrot.lane.b32.xlu1 %v14576_v56, %s15084_s17 }
 0x507   : > { %15118 = vst [vmem:[#allocation112_spill] sm:$0xff] %v11991_v24  ;;  %vm15120_vm13 = vmmov %vm15110_vm2  ;;  %v4448_v21 = vcombine.low %v11986_v10, %v11991_v24  ;;  %v4477_v10 = vrot.slane %v4449_v63, %v8107_v58  ;;  %v4463_v24 = vrot.slane %v4447_v12, %v8107_v58  ;;  %v4396_v12 = vcombine.low %v4374_v41, %v4381_v61 }
 0x508   : > { %v12005_v40 = vsel %vm15120_vm13, %v15106_v33, %v11543_v35  ;;  %v4299_v33 = vrot.slane %v4283_v30, %v8107_v58  ;;  %v4306_v35 = vrot.slane %v4284_v31, %v8107_v58  ;;  %15123 = vst [vmem:[#allocation119_spill] sm:$0xff] %v12034_v44  ;;  %v15124_v30 = vld [vmem:[#allocation138_spill] sm:$0xff]  ;;  %vm15125_vm3 = vmmov %vm15122_vm4  ;;  %v12041_v5 = vpop.permute.xlu1 %4914 }
 0x509   : > { %15121 = vst [vmem:[#allocation105_spill] sm:$0xff] %v12005_v40  ;;  %v4446_v20 = vcombine.low %v12005_v40, %v12000_v26  ;;  %v12039_v31 = vsel %vm15125_vm3, %v11684_v37, %v15124_v30  ;;  %v4397_v40 = vcombine.low %v4388_v52, %v4395_v34  ;;  %vm15127_vm2 = vmmov %vm15125_vm3  ;;  %v4470_v63 = vrot.slane %v4448_v21, %v8107_v58 }
 0x50a   : > { %15126 = vst [vmem:[#allocation115_spill] sm:$0xff] %v12039_v31  ;;  %v4315_v8 = vcombine.low %v4306_v35, %v4313_v18  ;;  %v12046_v26 = vpop.permute.xlu0 %5002  ;;  %v12054_v37 = vsel %vm15127_vm2, %v11546_v32, %v11676_v7  ;;  %vm15128_vm13 = vmmov %vm15127_vm2  ;;  %v4531_v18 = vcombine.low %v12034_v44, %v12039_v31  ;;  %5658 = vrot.lane.b32.xlu0 %v14521_v9, %s15137_s27 }
 0x50b   : > { %v12059_v11 = vsel %vm15128_vm13, %v11676_v7, %v11579_v36  ;;  %vm15130_vm4 = vmmov %vm15127_vm2  ;;  %v4240_v36 = vrot.slane %v4232_v51, %v8107_v58  ;;  %v4314_v7 = vcombine.low %v4292_v6, %v4299_v33  ;;  %v4456_v35 = vrot.slane %v4446_v20, %v8107_v58  ;;  %5582 = vrot.lane.b32.xlu1 %v14586_v57, %s15084_s17  ;;  %s13217_s17 = sld [smem:[#allocation2 + $0x48]] }
 0x50c   : > { %15129 = vst [vmem:[#allocation46_spill] sm:$0xff] %v12059_v11  ;;  %v12067_v29 = vsel %vm15130_vm4, %v11514_v38, %v11665_v14  ;;  %vm15132_vm3 = vmmov %vm15127_vm2  ;;  %v12084_v21 = vpop.permute.xlu1 %4918  ;;  %v4530_v61 = vcombine.low %v12054_v37, %v12059_v11  ;;  %v4559_v20 = vrot.slane %v4531_v18, %v8107_v58  ;;  %v4251_v18 = vstv %s12048_s10  ;;  %s13221_s10 = sld [smem:[#allocation2 + $0x49]] }
 0x50d   : > { %15131 = vst [vmem:[#allocation58_spill] sm:$0xff] %v12067_v29  ;;  %v12072_v34 = vsel %vm15132_vm3, %v11665_v14, %v11546_v32  ;;  %v4479_v32 = vcombine.low %v4470_v63, %v4477_v10  ;;  %v12091_v14 = vsel %vm15127_vm2, %v11655_v39, %v11514_v38  ;;  %vm15135_vm13 = vmmov %vm15127_vm2  ;;  %v4248_v33 = vcombine.low %v4240_v36, %v12014_v47  ;;  %v15138_v36 = vld [vmem:[#allocation23_spill] sm:$0xff] }
 0x50e   : > { %15133 = vst [vmem:[#allocation61_spill] sm:$0xff] %v12072_v34  ;;  %15134 = vst [vmem:[#allocation62_spill] sm:$0xff] %v12091_v14  ;;  %v12096_v6 = vsel %vm15135_vm13, %v15124_v30, %v11655_v39  ;;  %v12100_v51 = vpop.permute.xlu0 %5006  ;;  %v4529_v10 = vcombine.low %v12067_v29, %v12072_v34  ;;  %v4329_v38 = vrot.slane %v4315_v8, %v8107_v58  ;;  %vm15139_vm4 = vnez %v15138_v36  ;;  %v15202_v29 = vld [vmem:[#allocation93_spill] sm:$0xff] }
 0x50f   : > { %15136 = vst [vmem:[#allocation126_spill] sm:$0xff] %v12096_v6  ;;  %v4411_v39 = vrot.slane %v4397_v40, %v8107_v58  ;;  %v4478_v52 = vcombine.low %v4456_v35, %v4463_v24  ;;  %v4528_v47 = vcombine.low %v12096_v6, %v12091_v14  ;;  %v4322_v41 = vrot.slane %v4314_v7, %v8107_v58  ;;  %vm15140_vm3 = vmand %vm15139_vm4, %vm9162_vm5 }
 0x510   : > { %v12118_v30 = vpop.permute.xlu1 %4922  ;;  %v4404_v63 = vrot.slane %v4396_v12, %v8107_v58  ;;  %v4493_v8 = vrot.slane %v4479_v32, %v8107_v58  ;;  %v4552_v24 = vrot.slane %v4530_v61, %v8107_v58  ;;  %v4250_v35 = vsel %vm15140_vm3, %v4248_v33, 0.0  ;;  %vm15145_vm3 = vmand %vm15139_vm4, %vm8722_vm14  ;;  %5662 = vrot.lane.b32.xlu0 %v14529_v16, %s15137_s27  ;;  %5652 = vrot.lane.b32.xlu1 %v14597_v28, %s15137_s27 }
 0x511   : > { %v4545_v7 = vrot.slane %v4529_v10, %v8107_v58  ;;  %v4330_v12 = vcombine.low %v4322_v41, %v4329_v38  ;;  %v4486_v61 = vrot.slane %v4478_v52, %v8107_v58  ;;  %v4333_v6 = vstv %s12079_s9  ;;  %s13280_s9 = sld [smem:[#allocation2 + $0x4d]] }
 0x512   : > { %v12126_v40 = vpop.permute.xlu0 %5075  ;;  %v4412_v32 = vcombine.low %v4404_v63, %v4411_v39  ;;  %v4561_v31 = vcombine.low %v4552_v24, %v4559_v20  ;;  %v4415_v11 = vstv %s12081_s7  ;;  %v4538_v44 = vrot.slane %v4528_v47, %v8107_v58  ;;  %s13290_s7 = sld [smem:[#allocation2 + $0x4e]] }
 0x513   : > { %v4497_v10 = vstv %s12086_s28  ;;  %v4494_v14 = vcombine.low %v4486_v61, %v4493_v8  ;;  %vm15141_vm2 = vcmask 547840   ;;  %v4252_v20 = vmul.f32 %v4251_v18, %v4250_v35  ;;  %s13294_s28 = sld [smem:[#allocation2 + $0x4f]] }
 0x514   : > { %v12143_v33 = vpop.permute.xlu1 %4926  ;;  %v12149_v38 = vsel %vm15141_vm2, %v11668_v1, %v11716_v2  ;;  %vm15143_vm13 = vmmov %vm15141_vm2  ;;  %v4560_v41 = vcombine.low %v4538_v44, %v4545_v7  ;;  %v4332_v8 = vsel %vm15145_vm3, %v4330_v12, 0.0  ;;  %v4575_v44 = vrot.slane %v4561_v31, %v8107_v58  ;;  %5731 = vrot.lane.b32.xlu0 %v14546_v4, %s15182_s23  ;;  %5656 = vrot.lane.b32.xlu1 %v14615_v17, %s15137_s27 }
 0x515   : > { %15142 = vst [vmem:[#allocation133_spill] sm:$0xff] %v12149_v38  ;;  %v12154_v39 = vsel %vm15143_vm13, %v11716_v2, %v11612_v50  ;;  %vm15146_vm2 = vmand %vm15139_vm4, %vm9316_vm6  ;;  %v12176_v24 = vsel %vm15143_vm13, %v11642_v45, %v11700_v13  ;;  %v4334_v61 = vmul.f32 %v4333_v6, %v4332_v8 }
 0x516   : > { %15144 = vst [vmem:[#allocation139_spill] sm:$0xff] %v12154_v39  ;;  %v12156_v52 = vpop.permute.xlu0 %5080  ;;  %v4414_v2 = vsel %vm15146_vm2, %v4412_v32, 0.0  ;;  %15147 = vst [vmem:[#allocation124_spill] sm:$0xff] %v12176_v24  ;;  %v4613_v7 = vcombine.low %v12149_v38, %v12154_v39  ;;  %v4568_v63 = vrot.slane %v4560_v41, %v8107_v58 }
 0x517   : > { %vm15148_vm11 = vmmov %vm15143_vm13  ;;  %v4416_v47 = vmul.f32 %v4415_v11, %v4414_v2 }
 0x518   : > { %v12183_v18 = vsel %vm15148_vm11, %v11700_v13, %v11657_v46  ;;  %vm15150_vm3 = vmmov %vm15148_vm11  ;;  %v12197_v12 = vpop.permute.xlu1 %4996  ;;  %v4576_v11 = vcombine.low %v4568_v63, %v4575_v44  ;;  %5736 = vrot.lane.b32.xlu0 %v14555_v49, %s15182_s23  ;;  %5660 = vrot.lane.b32.xlu1 %v14576_v56, %s15137_s27 }
 0x519   : > { %15149 = vst [vmem:[#allocation129_spill] sm:$0xff] %v12183_v18  ;;  %v12188_v35 = vsel %vm15150_vm3, %v11657_v46, %v11708_v59  ;;  %vm15152_vm2 = vmmov %vm15150_vm3 }
 0x51a   : > { %15151 = vst [vmem:[#allocation122_spill] sm:$0xff] %v12188_v35  ;;  %v12193_v31 = vsel %vm15152_vm2, %v11708_v59, %v11668_v1  ;;  %vm15154_vm11 = vmand %vm15139_vm4, %vm9461_vm7  ;;  %v12215_v32 = vpop.permute.xlu0 %5084  ;;  %v15175_v59 = vld [vmem:[#allocation75_spill] sm:$0xff] }
 0x51b   : > { %15153 = vst [vmem:[#allocation74_spill] sm:$0xff] %v12193_v31  ;;  %v4496_v13 = vsel %vm15154_vm11, %v4494_v14, 0.0  ;;  %vm15155_vm13 = vmmov %vm15152_vm2  ;;  %v4253_v14 = vadd.f32 %v4252_v20, %v11674_v25  ;;  %v4612_v39 = vcombine.low %v12188_v35, %v12193_v31  ;;  %v4641_v20 = vrot.slane %v4613_v7, %v8107_v58  ;;  %v15171_v7 = vld [vmem:[#allocation95_spill] sm:$0xff] }
 0x51c   : > { %v12207_v46 = vsel %vm15155_vm13, %v11692_v22, %v11642_v45  ;;  %vm15157_vm3 = vmmov %vm15152_vm2  ;;  %v4611_v45 = vcombine.low %v12176_v24, %v12183_v18  ;;  %vm15159_vm2 = vcmask 539648   ;;  %v4498_v25 = vmul.f32 %v4497_v10, %v4496_v13  ;;  %v12240_v41 = vpop.permute.xlu1 %5000  ;;  %v15167_v10 = vld [vmem:[#allocation67_spill] sm:$0xff]  ;;  %v15172_v13 = vld [vmem:[#allocation84_spill] sm:$0xff]  ;;  %5740 = vrot.lane.b32.xlu0 %v14521_v9, %s15182_s23  ;;  %5664 = vrot.lane.b32.xlu1 %v14586_v57, %s15137_s27  ;;  %s13310_s27 = sld [smem:[#allocation2 + $0x52]] }
 0x51d   : > { %15156 = vst [vmem:[#allocation132_spill] sm:$0xff] %v12207_v46  ;;  %v12212_v1 = vsel %vm15157_vm3, %v11612_v50, %v11692_v22  ;;  %v12228_v50 = vsel %vm15159_vm2, %v11686_v48, %v11732_v27  ;;  %vm15161_vm11 = vmmov %vm15159_vm2  ;;  %v12255_v63 = vsel %vm15159_vm2, %v15167_v10, %v11748_v55  ;;  %v4634_v35 = vrot.slane %v4612_v39, %v8107_v58  ;;  %v15183_v39 = vld [vmem:[#allocation102_spill] sm:$0xff] }
 0x51e   : > { %15158 = vst [vmem:[#allocation39_spill] sm:$0xff] %v12212_v1  ;;  %15160 = vst [vmem:[#allocation123_spill] sm:$0xff] %v12228_v50  ;;  %v12233_v22 = vsel %vm15161_vm11, %v11732_v27, %v11694_v3  ;;  %v4610_v6 = vcombine.low %v12212_v1, %v12207_v46  ;;  %v12262_v44 = vpop.permute.xlu0 %5088  ;;  %v15178_v46 = vld [vmem:[#allocation69_spill] sm:$0xff]  ;;  %v15190_v24 = vld [vmem:[#allocation98_spill] sm:$0xff] }
 0x51f   : > { %15162 = vst [vmem:[#allocation130_spill] sm:$0xff] %v12233_v22  ;;  %vm15163_vm13 = vmmov %vm15159_vm2  ;;  %v15191_v1 = vld [vmem:[#allocation73_spill] sm:$0xff] }
 0x520   : > { %v12245_v8 = vsel %vm15163_vm13, %v11724_v15, %v11686_v48  ;;  %vm15165_vm3 = vmmov %vm15159_vm2  ;;  %15168 = vst [vmem:[#allocation72_spill] sm:$0xff] %v12255_v63  ;;  %v4693_v48 = vcombine.low %v12228_v50, %v12233_v22  ;;  %vm15173_vm13 = vcmask 531456   ;;  %v12283_v50 = vsel %vm15159_vm2, %v11694_v3, %v15178_v46  ;;  %5744 = vrot.lane.b32.xlu0 %v14529_v16, %s15182_s23 }
 0x521   : > { %15164 = vst [vmem:[#allocation134_spill] sm:$0xff] %v12245_v8  ;;  %v12250_v27 = vsel %vm15165_vm3, %v11678_v19, %v11724_v15  ;;  %vm15169_vm11 = vmmov %vm15159_vm2  ;;  %v12269_v15 = vsel %vm15173_vm13, %v15172_v13, %v15171_v7  ;;  %5734 = vrot.lane.b32.xlu1 %v14597_v28, %s15182_s23 }
 0x522   : > { %15166 = vst [vmem:[#allocation40_spill] sm:$0xff] %v12250_v27  ;;  %v12260_v2 = vsel %vm15169_vm11, %v11748_v55, %v11678_v19  ;;  %15174 = vst [vmem:[#allocation44_spill] sm:$0xff] %v12269_v15  ;;  %v4335_v19 = vadd.f32 %v4334_v61, %v4253_v14  ;;  %v4627_v55 = vrot.slane %v4611_v45, %v8107_v58  ;;  %v15184_v45 = vld [vmem:[#allocation77_spill] sm:$0xff] }
 0x523   : > { %15170 = vst [vmem:[#allocation128_spill] sm:$0xff] %v12260_v2  ;;  %vm15176_vm3 = vmmov %vm15173_vm13  ;;  %v4692_v61 = vcombine.low %v12250_v27, %v12245_v8  ;;  %v4695_v14 = vcombine.low %v12255_v63, %v12260_v2  ;;  %v4620_v2 = vrot.slane %v4610_v6, %v8107_v58  ;;  %v4643_v27 = vcombine.low %v4634_v35, %v4641_v20  ;;  %v15196_v6 = vld [vmem:[#allocation86_spill] sm:$0xff] }
 0x524   : > { %v12274_v18 = vsel %vm15176_vm3, %v15171_v7, %v15175_v59  ;;  %15179 = vst [vmem:[#allocation37_spill] sm:$0xff] %v12283_v50  ;;  %vm15180_vm11 = vmmov %vm15159_vm2  ;;  %v12304_v3 = vsel %vm15176_vm3, %v15183_v39, %v15172_v13  ;;  %v12320_v13 = vpop.permute.xlu0 %5157  ;;  %5813 = vrot.lane.b32.xlu0 %v14546_v4, %s15235_s8 }
 0x525   : > { %15177 = vst [vmem:[#allocation53_spill] sm:$0xff] %v12274_v18  ;;  %v12288_v22 = vsel %vm15180_vm11, %v15178_v46, %v15167_v10  ;;  %vm15185_vm13 = vmmov %vm15176_vm3  ;;  %v12308_v46 = vpop.permute.xlu1 %5004  ;;  %v4777_v63 = vcombine.low %v12269_v15, %v12274_v18  ;;  %5738 = vrot.lane.b32.xlu1 %v14615_v17, %s15182_s23 }
 0x526   : > { %15181 = vst [vmem:[#allocation47_spill] sm:$0xff] %v12288_v22  ;;  %v12299_v7 = vsel %vm15185_vm13, %v15184_v45, %v15183_v39  ;;  %15187 = vst [vmem:[#allocation34_spill] sm:$0xff] %v12304_v3  ;;  %v4709_v39 = vrot.slane %v4693_v48, %v8107_v58  ;;  %v4694_v36 = vcombine.low %v12283_v50, %v12288_v22 }
 0x527   : > { %15186 = vst [vmem:[#allocation36_spill] sm:$0xff] %v12299_v7  ;;  %vm15189_vm2 = vmand %vm15139_vm4, %vm9533_vm1  ;;  %v12345_v48 = vsel %vm15176_vm3, %v15175_v59, %v15196_v6  ;;  %v4776_v18 = vcombine.low %v12299_v7, %v12304_v3  ;;  %v4642_v22 = vcombine.low %v4620_v2, %v4627_v55  ;;  %v4702_v50 = vrot.slane %v4692_v61, %v8107_v58 }
 0x528   : > { %v4578_v8 = vsel %vm15189_vm2, %v4576_v11, 0.0  ;;  %vm15192_vm4 = vmmov %vm15176_vm3  ;;  %15199 = vst [vmem:[#allocation54_spill] sm:$0xff] %v12345_v48  ;;  %v4805_v59 = vrot.slane %v4777_v63, %v8107_v58  ;;  %vm15203_vm2 = vcmask 523264   ;;  %v12368_v2 = vpop.permute.xlu0 %5162  ;;  %v4716_v63 = vrot.slane %v4694_v36, %v8107_v58  ;;  %5818 = vrot.lane.b32.xlu0 %v14555_v49, %s15235_s8 }
 0x529   : > { %v12328_v11 = vsel %vm15192_vm4, %v15191_v1, %v15190_v24  ;;  %vm15194_vm11 = vmmov %vm15176_vm3  ;;  %v5009_v31 = vpop.permute.xlu1 %5008  ;;  %v4724_v55 = vcombine.low %v4702_v50, %v4709_v39  ;;  %v12392_v36 = vrot.slane %v4642_v22, %v8107_v58  ;;  %5742 = vrot.lane.b32.xlu1 %v14576_v56, %s15182_s23 }
 0x52a   : > { %15193 = vst [vmem:[#allocation52_spill] sm:$0xff] %v12328_v11  ;;  %v12333_v35 = vsel %vm15194_vm11, %v15190_v24, %v15184_v45  ;;  %vm15197_vm13 = vmmov %vm15176_vm3  ;;  %v4417_v24 = vadd.f32 %v4416_v47, %v4335_v19  ;;  %v15200_v45 = vstv %s12105_s26  ;;  %v15205_v47 = vld [vmem:[#allocation90_spill] sm:$0xff]  ;;  %v12371_v19 = vrot.slane %v4643_v27, %v8107_v58  ;;  %v15211_v27 = vld [vmem:[#allocation16_spill] sm:$0xff]  ;;  %s13300_s26 = sld [smem:[#allocation2 + $0x50]] }
 0x52b   : > { %15195 = vst [vmem:[#allocation38_spill] sm:$0xff] %v12333_v35  ;;  %v12340_v20 = vsel %vm15197_vm13, %v15196_v6, %v15191_v1  ;;  %v4580_v15 = vmul.f32 %v15200_v45, %v4578_v8  ;;  %v4723_v1 = vrot.slane %v4695_v14, %v8107_v58  ;;  %v4775_v38 = vcombine.low %v12328_v11, %v12333_v35  ;;  %v15201_v6 = vld [vmem:[#allocation15_spill] sm:$0xff]  ;;  %vm15206_vm4 = vmmov %vm15203_vm2  ;;  %v15208_v45 = vld [vmem:[#allocation92_spill] sm:$0xff] }
 0x52c   : > { %15198 = vst [vmem:[#allocation43_spill] sm:$0xff] %v12340_v20  ;;  %v12361_v7 = vsel %vm15203_vm2, %v15202_v29, %v15201_v6  ;;  %v12366_v8 = vsel %vm15206_vm4, %v15201_v6, %v15205_v47  ;;  %v4774_v61 = vcombine.low %v12345_v48, %v12340_v20  ;;  %v4798_v14 = vrot.slane %v4776_v18, %v8107_v58  ;;  %vm15209_vm11 = vmmov %vm15203_vm2  ;;  %v12403_v3 = vpop.permute.xlu0 %5166  ;;  %v15226_v20 = vld [vmem:[#allocation85_spill] sm:$0xff] }
 0x52d   : > { %15204 = vst [vmem:[#allocation141_spill] sm:$0xff] %v12361_v7  ;;  %15207 = vst [vmem:[#allocation142_spill] sm:$0xff] %v12366_v8  ;;  %v12382_v6 = vsel %vm15209_vm11, %v15208_v45, %v15202_v29  ;;  %v4499_v39 = vadd.f32 %v4498_v25, %v4417_v24  ;;  %v4725_v35 = vcombine.low %v4716_v63, %v4723_v1  ;;  %v12397_v11 = vpop.permute.xlu1 %5078  ;;  %vm15218_vm4 = vcmask 515072   ;;  %5822 = vrot.lane.b32.xlu0 %v14521_v9, %s15235_s8 }
 0x52e   : > { %15210 = vst [vmem:[#allocation50_spill] sm:$0xff] %v12382_v6  ;;  %vm15212_vm13 = vmmov %vm15203_vm2  ;;  %v4857_v18 = vcombine.low %v12361_v7, %v12366_v8  ;;  %v12400_v29 = vrot.slane %v4775_v38, %v8107_v58  ;;  %v4807_v48 = vcombine.low %v4798_v14, %v4805_v59  ;;  %v12410_v25 = vrot.slane %v4724_v55, %v8107_v58  ;;  %v15214_v38 = vld [vmem:[#allocation83_spill] sm:$0xff]  ;;  %v15217_v55 = vld [vmem:[#allocation88_spill] sm:$0xff] }
 0x52f   : > { %v12387_v50 = vsel %vm15212_vm13, %v15211_v27, %v15208_v45  ;;  %v12405_v34 = vadd.f32 %v4580_v15, %v4499_v39  ;;  %v12413_v24 = vrot.slane %v4774_v61, %v8107_v58  ;;  %vm15215_vm3 = vmmov %vm15203_vm2  ;;  %v12427_v59 = vsel %vm15203_vm2, %v11993_v62, %v15211_v27  ;;  %v15220_v61 = vld [vmem:[#allocation70_spill] sm:$0xff]  ;;  %v15229_v7 = vld [vmem:[#allocation120_spill] sm:$0xff]  ;;  %5746 = vrot.lane.b32.xlu1 %v14586_v57, %s15182_s23  ;;  %s13316_s23 = sld [smem:[#allocation2 + $0x54]] }
 0x530   : > { %15213 = vst [vmem:[#allocation41_spill] sm:$0xff] %v12387_v50  ;;  %v4856_v1 = vcombine.low %v12387_v50, %v12382_v6  ;;  %v12422_v15 = vsel %vm15215_vm3, %v15214_v38, %v11993_v62  ;;  %15216 = vst [vmem:[#allocation45_spill] sm:$0xff] %v12427_v59  ;;  %v12432_v63 = vsel %vm15218_vm4, %v15217_v55, %v12084_v21  ;;  %v15223_v62 = vld [vmem:[#allocation76_spill] sm:$0xff]  ;;  %v12472_v8 = vpop.permute.xlu0 %5170 }
 0x531   : > { %15219 = vst [vmem:[#allocation42_spill] sm:$0xff] %v12432_v63  ;;  %vm15221_vm11 = vmmov %vm15218_vm4  ;;  %v12442_v39 = vrot.slane %v4725_v35, %v8107_v58  ;;  %v12445_v45 = vrot.slane %v4857_v18, %v8107_v58  ;;  %v4806_v6 = vcombine.low %v12413_v24, %v12400_v29  ;;  %v12460_v35 = vrot.slane %v4807_v48, %v8107_v58 }
 0x532   : > { %v12437_v14 = vsel %vm15221_vm11, %v12084_v21, %v15220_v61  ;;  %vm15224_vm13 = vmmov %vm15218_vm4  ;;  %v5083_v21 = vpop.permute.xlu1 %5082  ;;  %v12465_v18 = vsel %vm15203_vm2, %v15205_v47, %v15229_v7  ;;  %v4859_v29 = vcombine.low %v12422_v15, %v12427_v59  ;;  %5826 = vrot.lane.b32.xlu0 %v14529_v16, %s15235_s8 }
 0x533   : > { %15222 = vst [vmem:[#allocation48_spill] sm:$0xff] %v12437_v14  ;;  %v12450_v27 = vsel %vm15224_vm13, %v15223_v62, %v12143_v33  ;;  %vm15227_vm3 = vmmov %vm15218_vm4  ;;  %v4939_v47 = vcombine.low %v12432_v63, %v12437_v14  ;;  %5816 = vrot.lane.b32.xlu1 %v14597_v28, %s15235_s8 }
 0x534   : > { %15225 = vst [vmem:[#allocation64_spill] sm:$0xff] %v12450_v27  ;;  %v12455_v22 = vsel %vm15227_vm3, %v12143_v33, %v15226_v20  ;;  %vm15230_vm4 = vmmov %vm15203_vm2  ;;  %v12475_v33 = vrot.slane %v4856_v1, %v8107_v58  ;;  %v12496_v24 = vsel %vm15227_vm3, %v15220_v61, %v12118_v30  ;;  %v15238_v61 = vld [vmem:[#allocation121_spill] sm:$0xff]  ;;  %v12539_v14 = vpop.permute.xlu0 %5239 }
 0x535   : > { %15228 = vst [vmem:[#allocation80_spill] sm:$0xff] %v12455_v22  ;;  %v12470_v50 = vsel %vm15230_vm4, %v15229_v7, %v15214_v38  ;;  %vm15231_vm11 = vmmov %vm15227_vm3  ;;  %v4941_v38 = vcombine.low %v12450_v27, %v12455_v22  ;;  %vm15236_vm4 = vcmask 506880   ;;  %v4887_v22 = vrot.slane %v4859_v29, %v8107_v58 }
 0x536   : > { %v12482_v48 = vsel %vm15231_vm11, %v12041_v5, %v15217_v55  ;;  %vm15233_vm13 = vmmov %vm15227_vm3  ;;  %v12513_v55 = vsel %vm15236_vm4, %v12100_v51, %v5009_v31  ;;  %5895 = vrot.lane.b32.xlu0 %v14546_v4, %s14452_s13 }
 0x537   : > { %15232 = vst [vmem:[#allocation143_spill] sm:$0xff] %v12482_v48  ;;  %v12491_v7 = vsel %vm15233_vm13, %v15226_v20, %v12041_v5  ;;  %vm15234_vm2 = vmmov %vm15227_vm3  ;;  %v4888_v5 = vcombine.low %v12475_v33, %v12445_v45  ;;  %v4858_v20 = vcombine.low %v12465_v18, %v12470_v50  ;;  %5820 = vrot.lane.b32.xlu1 %v14615_v17, %s15235_s8 }
 0x538   : > { %v12501_v1 = vsel %vm15234_vm2, %v12118_v30, %v15223_v62  ;;  %15237 = vst [vmem:[#allocation56_spill] sm:$0xff] %v12513_v55  ;;  %vm15239_vm11 = vmmov %vm15236_vm4  ;;  %v5087_v62 = vpop.permute.xlu1 %5086  ;;  %v4938_v27 = vcombine.low %v12491_v7, %v12482_v48 }
 0x539   : > { %v12517_v30 = vsel %vm15239_vm11, %v5009_v31, %v15238_v61  ;;  %vm15241_vm13 = vmmov %vm15236_vm4  ;;  %v4940_v59 = vcombine.low %v12496_v24, %v12501_v1 }
 0x53a   : > { %15240 = vst [vmem:[#allocation55_spill] sm:$0xff] %v12517_v30  ;;  %v12522_v63 = vsel %vm15241_vm13, %v12009_v53, %v12240_v41  ;;  %vm15243_vm3 = vmmov %vm15236_vm4  ;;  %v5023_v29 = vcombine.low %v12513_v55, %v12517_v30  ;;  %5900 = vrot.lane.b32.xlu0 %v14555_v49, %s14452_s13 }
 0x53b   : > { %15242 = vst [vmem:[#allocation49_spill] sm:$0xff] %v12522_v63  ;;  %v12527_v45 = vsel %vm15243_vm3, %v12240_v41, %v12046_v26  ;;  %vm15245_vm2 = vmmov %vm15243_vm3  ;;  %v4955_v41 = vrot.slane %v4939_v47, %v8107_v58  ;;  %vm15253_vm3 = vcmask 498688   ;;  %5824 = vrot.lane.b32.xlu1 %v14576_v56, %s15235_s8 }
 0x53c   : > { %15244 = vst [vmem:[#allocation66_spill] sm:$0xff] %v12527_v45  ;;  %v12532_v33 = vsel %vm15245_vm2, %v12046_v26, %v12308_v46  ;;  %vm15247_vm4 = vmmov %vm15245_vm2  ;;  %v4969_v26 = vrot.slane %v4941_v38, %v8107_v58  ;;  %v5021_v47 = vcombine.low %v12522_v63, %v12527_v45 }
 0x53d   : > { %15246 = vst [vmem:[#allocation60_spill] sm:$0xff] %v12532_v33  ;;  %v12537_v31 = vsel %vm15247_vm4, %v12308_v46, %v12100_v51  ;;  %vm15249_vm11 = vmmov %vm15245_vm2 }
 0x53e   : > { %15248 = vst [vmem:[#allocation71_spill] sm:$0xff] %v12537_v31  ;;  %v12553_v51 = vsel %vm15249_vm11, %v12197_v12, %v12009_v53  ;;  %vm15251_vm13 = vmmov %vm15245_vm2  ;;  %v5022_v38 = vcombine.low %v12532_v33, %v12537_v31  ;;  %v12570_v53 = vsel %vm15253_vm3, %v12156_v52, %v5083_v21  ;;  %v12592_v33 = vpop.permute.xlu0 %5244  ;;  %v4948_v31 = vrot.slane %v4938_v27, %v8107_v58 }
 0x53f   : > { %15250 = vst [vmem:[#allocation59_spill] sm:$0xff] %v12553_v51  ;;  %v12558_v46 = vsel %vm15251_vm13, %v15238_v61, %v12197_v12  ;;  %15254 = vst [vmem:[#allocation32_spill] sm:$0xff] %v12570_v53  ;;  %v5091_v61 = vpop.permute.xlu1 %5090  ;;  %5904 = vrot.lane.b32.xlu0 %v14521_v9, %s14452_s13  ;;  %5828 = vrot.lane.b32.xlu1 %v14586_v57, %s15235_s8  ;;  %s13463_s8 = sld [smem:[#allocation2 + $0x4b]] }
 0x540   : > { %15252 = vst [vmem:[#allocation25_spill] sm:$0xff] %v12558_v46  ;;  %vm15255_vm2 = vmmov %vm15253_vm3 }
 0x541   : > { %v12574_v12 = vsel %vm15255_vm2, %v5083_v21, %v12215_v32  ;;  %vm15256_vm4 = vmmov %vm15255_vm2  ;;  %v4880_v21 = vrot.slane %v4858_v20, %v8107_v58  ;;  %v12607_v48 = vsel %vm15255_vm2, %v12397_v11, %v12156_v52  ;;  %v4814_v52 = vrot.slane %v4806_v6, %v8107_v58 }
 0x542   : > { %v12578_v30 = vsel %vm15256_vm4, %v12215_v32, %v5087_v62  ;;  %vm15257_vm11 = vmmov %vm15255_vm2  ;;  %v4962_v32 = vrot.slane %v4940_v59, %v8107_v58  ;;  %15262 = vst [vmem:[#allocation27_spill] sm:$0xff] %v12607_v48  ;;  %v4740_v6 = vcombine.low %v12410_v25, %v12442_v39 }
 0x543   : > { %v12582_v55 = vsel %vm15257_vm11, %v5087_v62, %v12262_v44  ;;  %vm15258_vm13 = vmmov %vm15255_vm2  ;;  %v4889_v27 = vcombine.low %v4880_v21, %v4887_v22  ;;  %v15264_v22 = vcombine.low %v12392_v36, %v12371_v19  ;;  %v4822_v19 = vcombine.low %v4814_v52, %v12460_v35  ;;  %5908 = vrot.lane.b32.xlu0 %v14529_v16, %s14452_s13 }
 0x544   : > { %v12586_v63 = vsel %vm15258_vm13, %v12262_v44, %v5091_v61  ;;  %vm15260_vm3 = vmmov %vm15255_vm2  ;;  %v5020_v44 = vcombine.low %v12558_v46, %v12553_v51  ;;  %v4971_v20 = vcombine.low %v4962_v32, %v4969_v26  ;;  %v5103_v51 = vcombine.low %v12570_v53, %v12574_v12  ;;  %v12625_v46 = vpop.permute.xlu0 %5248  ;;  %v15265_v26 = vld [vmem:[#allocation19_spill] sm:$0xff]  ;;  %5898 = vrot.lane.b32.xlu1 %v14597_v28, %s14452_s13 }
 0x545   : > { %15259 = vst [vmem:[#allocation28_spill] sm:$0xff] %v12586_v63  ;;  %v12590_v45 = vsel %vm15260_vm3, %v5091_v61, %v12126_v40  ;;  %v5051_v61 = vrot.slane %v5023_v29, %v8107_v58  ;;  %vm15263_vm4 = vmmov %vm15255_vm2  ;;  %v5104_v29 = vcombine.low %v12578_v30, %v12582_v55  ;;  %vm15266_vm11 = vnez %v15265_v26 }
 0x546   : > { %15261 = vst [vmem:[#allocation31_spill] sm:$0xff] %v12590_v45  ;;  %v5105_v62 = vcombine.low %v12586_v63, %v12590_v45  ;;  %v12612_v59 = vsel %vm15263_vm4, %v12126_v40, %v12397_v11  ;;  %v5161_v45 = vpop.permute.xlu1 %5160  ;;  %v4970_v63 = vcombine.low %v4948_v31, %v4955_v41  ;;  %v5037_v40 = vrot.slane %v5021_v47, %v8107_v58  ;;  %vm15268_vm13 = vmand %vm15266_vm11, %vm8128_vm8 }
 0x547   : > { %v5044_v11 = vrot.slane %v5022_v38, %v8107_v58  ;;  %v4660_v32 = vsel %vm15268_vm13, %v15264_v22, 0.0  ;;  %v5102_v31 = vcombine.low %v12612_v59, %v12607_v48  ;;  %v4896_v36 = vrot.slane %v4888_v5, %v8107_v58  ;;  %6032 = vrot.lane.b32.xlu0 %v14597_v28, %s15296_s12 }
 0x548   : > { %v5133_v41 = vrot.slane %v5105_v62, %v8107_v58  ;;  %v5030_v47 = vrot.slane %v5020_v44, %v8107_v58  ;;  %v4903_v25 = vrot.slane %v4889_v27, %v8107_v58  ;;  %v4985_v39 = vrot.slane %v4971_v20, %v8107_v58  ;;  %5902 = vrot.lane.b32.xlu1 %v14615_v17, %s14452_s13 }
 0x549   : > { %v5053_v38 = vcombine.low %v5044_v11, %v5051_v61  ;;  %v5119_v62 = vrot.slane %v5103_v51, %v8107_v58  ;;  %v5126_v22 = vrot.slane %v5104_v29, %v8107_v58  ;;  %v4978_v35 = vrot.slane %v4970_v63, %v8107_v58  ;;  %v12664_v61 = vpop.permute.xlu0 %5252 }
 0x54a   : > { %v5165_v48 = vpop.permute.xlu1 %5164  ;;  %v5052_v52 = vcombine.low %v5030_v47, %v5037_v40  ;;  %vm15269_vm3 = vcmask 285696   ;;  %v5112_v27 = vrot.slane %v5102_v31, %v8107_v58  ;;  %v15276_v29 = vstv %s12107_s16  ;;  %s13303_s16 = sld [smem:[#allocation2 + $0x51]] }
 0x54b   : > { %v12658_v5 = vsel %vm15269_vm3, %v12368_v2, %v5165_v48  ;;  %vm15271_vm2 = vmmov %vm15269_vm3  ;;  %v5135_v20 = vcombine.low %v5126_v22, %v5133_v41  ;;  %v4662_v40 = vmul.f32 %v15276_v29, %v4660_v32  ;;  %v4904_v32 = vcombine.low %v4896_v36, %v4903_v25  ;;  %6036 = vrot.lane.b32.xlu0 %v14615_v17, %s15296_s12 }
 0x54c   : > { %15270 = vst [vmem:[#allocation30_spill] sm:$0xff] %v12658_v5  ;;  %v12662_v44 = vsel %vm15271_vm2, %v5165_v48, %v12403_v3  ;;  %vm15273_vm4 = vmmov %vm15271_vm2  ;;  %v4986_v41 = vcombine.low %v4978_v35, %v4985_v39  ;;  %v5134_v47 = vcombine.low %v5112_v27, %v5119_v62  ;;  %v4989_v53 = vstv %s12621_s19  ;;  %5906 = vrot.lane.b32.xlu1 %v14576_v56, %s14452_s13  ;;  %s13477_s19 = sld [smem:[#allocation2 + $0x4c]] }
 0x54d   : > { %15272 = vst [vmem:[#allocation89_spill] sm:$0xff] %v12662_v44  ;;  %v12669_v51 = vsel %vm15273_vm4, %v5161_v45, %v12368_v2  ;;  %vm15275_vm13 = vmmov %vm15271_vm2  ;;  %v5067_v2 = vrot.slane %v5053_v38, %v8107_v58  ;;  %v5185_v31 = vcombine.low %v12658_v5, %v12662_v44  ;;  %v5060_v38 = vrot.slane %v5052_v52, %v8107_v58  ;;  %v12700_v44 = vpop.permute.xlu0 %5321 }
 0x54e   : > { %15274 = vst [vmem:[#allocation87_spill] sm:$0xff] %v12669_v51  ;;  %v5182_v63 = vsel %vm15275_vm13, %v12320_v13, %v5161_v45  ;;  %vm15278_vm3 = vmand %vm15266_vm11, %vm8210_vm0  ;;  %v5153_v36 = vstv %s12641_s2  ;;  %v5149_v25 = vrot.slane %v5135_v20, %v8107_v58  ;;  %v15282_v39 = vstv %s12124_s30  ;;  %s13312_s30 = sld [smem:[#allocation2 + $0x53]]  ;;  %s13606_s2 = sld [smem:[#allocation2 + $0x57]] }
 0x54f   : > { %v4742_v11 = vsel %vm15278_vm3, %v4740_v6, 0.0  ;;  %vm15279_vm2 = vmand %vm15266_vm11, %vm9162_vm5  ;;  %v5169_v6 = vpop.permute.xlu1 %5168  ;;  %v5184_v22 = vcombine.low %v5182_v63, %v12669_v51  ;;  %v5068_v35 = vcombine.low %v5060_v38, %v5067_v2  ;;  %v5201_v52 = vrot.slane %v5185_v31, %v8107_v58  ;;  %6040 = vrot.lane.b32.xlu0 %v14576_v56, %s15296_s12 }
 0x550   : > { %v4824_v45 = vsel %vm15279_vm2, %v4822_v19, 0.0  ;;  %v12696_v29 = vsel %vm15273_vm4, %v12403_v3, %v5169_v6  ;;  %vm15281_vm13 = vmmov %vm15273_vm4  ;;  %v5071_v19 = vstv %s12637_s20  ;;  %v4744_v62 = vmul.f32 %v15282_v39, %v4742_v11  ;;  %5910 = vrot.lane.b32.xlu1 %v14586_v57, %s14452_s13  ;;  %s12937_s13 = sld [smem:[#allocation2 + $0x42]]  ;;  %s13594_s20 = sld [smem:[#allocation2 + $0x56]] }
 0x551   : > { %15280 = vst [vmem:[#allocation65_spill] sm:$0xff] %v12696_v29  ;;  %v5178_v5 = vsel %vm15281_vm13, %v5169_v6, %v12472_v8  ;;  %v4663_v3 = vadd.f32 %v4662_v40, %v12405_v34  ;;  %v15283_v27 = vstv %s12306_s15  ;;  %vm15284_vm3 = vmand %vm15266_vm11, %vm8722_vm14  ;;  %v5142_v51 = vrot.slane %v5134_v47, %v8107_v58  ;;  %s13318_s15 = sld [smem:[#allocation2 + $0x55]] }
 0x552   : > { %v4826_v6 = vmul.f32 %v15283_v27, %v4824_v45  ;;  %v4906_v20 = vsel %vm15284_vm3, %v4904_v32, 0.0  ;;  %v5186_v11 = vcombine.low %v12696_v29, %v5178_v5  ;;  %vm15285_vm2 = vmand %vm15266_vm11, %vm9316_vm6  ;;  %v5194_v40 = vrot.slane %v5184_v22, %v8107_v58  ;;  %v12733_v32 = vpop.permute.xlu0 %5326 }
 0x553   : > { %v5173_v2 = vpop.permute.xlu1 %5172  ;;  %v4988_v34 = vsel %vm15285_vm2, %v4986_v41, 0.0  ;;  %vm15286_vm13 = vmmov %vm15273_vm4  ;;  %v5150_v47 = vcombine.low %v5142_v51, %v5149_v25  ;;  %v15287_v41 = vstv %s12318_s25  ;;  %v4745_v51 = vadd.f32 %v4744_v62, %v4663_v3  ;;  %6044 = vrot.lane.b32.xlu0 %v14586_v57, %s15296_s12  ;;  %s13450_s25 = sld [smem:[#allocation2 + $0x4a]] }
 0x554   : > { %v5179_v31 = vsel %vm15273_vm4, %v12472_v8, %v5173_v2  ;;  %v5180_v45 = vsel %vm15286_vm13, %v5173_v2, %v12320_v13  ;;  %v4908_v29 = vmul.f32 %v15287_v41, %v4906_v20  ;;  %vm15288_vm3 = vmand %vm15266_vm11, %vm9461_vm7  ;;  %v5216_v13 = vcombine.low %v5194_v40, %v5201_v52  ;;  %6034 = vrot.lane.b32.xlu1 %v14555_v49, %s15296_s12 }
 0x555   : > { %v5187_v38 = vcombine.low %v5179_v31, %v5180_v45  ;;  %v7050_v39 = vcombine.low %v5178_v5, %v5179_v31  ;;  %v7051_v27 = vcombine.low %v5180_v45, %v5182_v63  ;;  %v5070_v8 = vsel %vm15288_vm3, %v5068_v35, 0.0  ;;  %vm15293_vm13 = vmand %vm15266_vm11, %vm9533_vm1 }
 0x556   : > { %v5208_v22 = vrot.slane %v5186_v11, %v8107_v58  ;;  %v4990_v2 = vmul.f32 %v4989_v53, %v4988_v34  ;;  %vm15291_vm2 = vcmask 277504   ;;  %v12760_v40 = vpop.permute.xlu0 %5330  ;;  %v4827_v62 = vadd.f32 %v4826_v6, %v4745_v51 }
 0x557   : > { %v5215_v5 = vrot.slane %v5187_v38, %v8107_v58  ;;  %v12751_v63 = vrot.slane %v7050_v39, %v8107_v58  ;;  %v12754_v25 = vrot.slane %v7051_v27, %v8107_v58  ;;  %v5243_v20 = vpop.permute.xlu1 %5242  ;;  %vm15292_vm4 = vmmov %vm15291_vm2  ;;  %v5152_v3 = vsel %vm15293_vm13, %v5150_v47, 0.0  ;;  %6114 = vrot.lane.b32.xlu0 %v14597_v28, %s14502_s11 }
 0x558   : > { %v5256_v35 = vsel %vm15291_vm2, %v5243_v20, %v12592_v33  ;;  %v5264_v52 = vsel %vm15292_vm4, %v12539_v14, %v5243_v20  ;;  %v5072_v31 = vmul.f32 %v5071_v19, %v5070_v8  ;;  %v4909_v6 = vadd.f32 %v4908_v29, %v4827_v62  ;;  %vm15294_vm11 = vmmov %vm15291_vm2  ;;  %6038 = vrot.lane.b32.xlu1 %v14521_v9, %s15296_s12 }
 0x559   : > { %15289 = vst [vmem:[#allocation144_spill] sm:$0xff] %v12751_v63  ;;  %15290 = vst [vmem:[#allocation68_spill] sm:$0xff] %v12754_v25  ;;  %v5217_v11 = vcombine.low %v5208_v22, %v5215_v5  ;;  %v5266_v34 = vcombine.low %v5264_v52, %v5256_v35  ;;  %v5224_v26 = vrot.slane %v5216_v13, %v8107_v58  ;;  %v5235_v19 = vstv %s12735_s24  ;;  %s13617_s24 = sld [smem:[#allocation2 + $0x58]] }
 0x55a   : > { %v5154_v47 = vmul.f32 %v5153_v36, %v5152_v3  ;;  %vm15295_vm3 = vmmov %vm15291_vm2  ;;  %v12779_v41 = vpop.permute.xlu0 %5334  ;;  %v4991_v51 = vadd.f32 %v4990_v2, %v4909_v6 }
 0x55b   : > { %v5231_v45 = vrot.slane %v5217_v11, %v8107_v58  ;;  %v5247_v38 = vpop.permute.xlu1 %5246  ;;  %vm15298_vm2 = vmand %vm10479_vm12, %vm8128_vm8  ;;  %v5276_v13 = vrot.slane %v5266_v34, %v8107_v58  ;;  %6118 = vrot.lane.b32.xlu0 %v14615_v17, %s14502_s11 }
 0x55c   : > { %v5257_v39 = vsel %vm15294_vm11, %v12592_v33, %v5247_v38  ;;  %v5258_v27 = vsel %vm15295_vm3, %v5247_v38, %v12625_v46  ;;  %v5073_v29 = vadd.f32 %v5072_v31, %v4991_v51  ;;  %vm15299_vm4 = vmmov %vm15295_vm3  ;;  %6042 = vrot.lane.b32.xlu1 %v14529_v16, %s15296_s12 }
 0x55d   : > { %v5232_v8 = vcombine.low %v5224_v26, %v5231_v45  ;;  %v5267_v22 = vcombine.low %v5257_v39, %v5258_v27  ;;  %v7103_v5 = vcombine.low %v5256_v35, %v5257_v39  ;;  %vm15300_vm13 = vmmov %vm15295_vm3 }
 0x55e   : > { %v12797_v11 = vpop.permute.xlu0 %5403  ;;  %v5155_v31 = vadd.f32 %v5154_v47, %v5073_v29  ;;  %vm15301_vm11 = vmmov %vm15295_vm3 }
 0x55f   : > { %v5234_v33 = vsel %vm15298_vm2, %v5232_v8, 0.0  ;;  %v5283_v20 = vrot.slane %v5267_v22, %v8107_v58  ;;  %v5251_v2 = vpop.permute.xlu1 %5250  ;;  %v7113_v38 = vrot.slane %v7103_v5, %v8107_v58  ;;  %vm15302_vm2 = vcmask 269312   ;;  %6122 = vrot.lane.b32.xlu0 %v14576_v56, %s14502_s11 }
 0x560   : > { %v5236_v62 = vmul.f32 %v5235_v19, %v5234_v33  ;;  %v5259_v35 = vsel %vm15299_vm4, %v12625_v46, %v5251_v2  ;;  %v5260_v3 = vsel %vm15300_vm13, %v5251_v2, %v12664_v61  ;;  %vm15303_vm4 = vmmov %vm15302_vm2  ;;  %6046 = vrot.lane.b32.xlu1 %v14546_v4, %s15296_s12  ;;  %s13634_s12 = sld [smem:[#allocation2 + $0x59]] }
 0x561   : > { %v5298_v6 = vcombine.low %v5276_v13, %v5283_v20  ;;  %v5268_v26 = vcombine.low %v5259_v35, %v5260_v3  ;;  %v7104_v45 = vcombine.low %v5258_v27, %v5259_v35  ;;  %vm15306_vm13 = vmmov %vm15302_vm2 }
 0x562   : > { %v5237_v34 = vadd.f32 %v5236_v62, %v5155_v31  ;;  %v12811_v51 = vpop.permute.xlu0 %5408 }
 0x563   : > { %v7120_v46 = vrot.slane %v7104_v45, %v8107_v58  ;;  %v5255_v39 = vpop.permute.xlu1 %5254  ;;  %v5290_v5 = vrot.slane %v5268_v26, %v8107_v58  ;;  %v5306_v31 = vrot.slane %v5298_v6, %v8107_v58  ;;  %6126 = vrot.lane.b32.xlu0 %v14586_v57, %s14502_s11 }
 0x564   : > { %v5261_v47 = vsel %vm15301_vm11, %v12664_v61, %v5255_v39  ;;  %v5262_v27 = vsel %vm15295_vm3, %v5255_v39, %v12539_v14  ;;  %v5317_v39 = vstv %s12805_s18  ;;  %vm15307_vm11 = vmmov %vm15302_vm2  ;;  %6116 = vrot.lane.b32.xlu1 %v14555_v49, %s14502_s11  ;;  %s13648_s18 = sld [smem:[#allocation2 + $0x5a]] }
 0x565   : > { %v7135_v19 = vcombine.low %v7113_v38, %v7120_v46  ;;  %v5269_v8 = vcombine.low %v5261_v47, %v5262_v27  ;;  %v7105_v22 = vcombine.low %v5260_v3, %v5261_v47  ;;  %v7106_v29 = vcombine.low %v5262_v27, %v5264_v52  ;;  %vm15308_vm3 = vmand %vm10479_vm12, %vm8210_vm0 }
 0x566   : > { %v12825_v2 = vpop.permute.xlu0 %5412 }
 0x567   : > { %v5297_v33 = vrot.slane %v5269_v8, %v8107_v58  ;;  %v7127_v61 = vrot.slane %v7105_v22, %v8107_v58  ;;  %v7134_v14 = vrot.slane %v7106_v29, %v8107_v58  ;;  %v5325_v13 = vpop.permute.xlu1 %5324  ;;  %v12833_v26 = vrot.slane %v7135_v19, %v8107_v58  ;;  %6196 = vrot.lane.b32.xlu0 %v14597_v28, %s14508_s0 }
 0x568   : > { %v5338_v20 = vsel %vm15302_vm2, %v5325_v13, %v12733_v32  ;;  %v5346_v52 = vsel %vm15303_vm4, %v12700_v44, %v5325_v13  ;;  %vm15309_vm4 = vmmov %vm15302_vm2  ;;  %6120 = vrot.lane.b32.xlu1 %v14521_v9, %s14502_s11 }
 0x569   : > { %v5299_v62 = vcombine.low %v5290_v5, %v5297_v33  ;;  %v7136_v35 = vcombine.low %v7127_v61, %v7134_v14  ;;  %v5348_v3 = vcombine.low %v5346_v52, %v5338_v20  ;;  %15304 = vst [vmem:[#allocation63_spill] sm:$0xff] %v12833_v26 }
 0x56a   : > { %v12844_v8 = vpop.permute.xlu0 %5416 }
 0x56b   : > { %v5313_v45 = vrot.slane %v5299_v62, %v8107_v58  ;;  %v12837_v38 = vrot.slane %v7136_v35, %v8107_v58  ;;  %v5329_v46 = vpop.permute.xlu1 %5328  ;;  %v5358_v5 = vrot.slane %v5348_v3, %v8107_v58  ;;  %6200 = vrot.lane.b32.xlu0 %v14615_v17, %s14508_s0 }
 0x56c   : > { %v5339_v47 = vsel %vm15306_vm13, %v12733_v32, %v5329_v46  ;;  %v5340_v27 = vsel %vm15307_vm11, %v5329_v46, %v12760_v40  ;;  %vm15310_vm13 = vmmov %vm15302_vm2  ;;  %6124 = vrot.lane.b32.xlu1 %v14529_v16, %s14502_s11 }
 0x56d   : > { %15305 = vst [vmem:[#allocation20_spill] sm:$0xff] %v12837_v38  ;;  %v5314_v22 = vcombine.low %v5306_v31, %v5313_v45  ;;  %v5349_v19 = vcombine.low %v5339_v47, %v5340_v27  ;;  %v7158_v29 = vcombine.low %v5338_v20, %v5339_v47  ;;  %vm15311_vm11 = vmmov %vm15302_vm2 }
 0x56e   : > { %v12863_v62 = vpop.permute.xlu0 %5485 }
 0x56f   : > { %v5316_v32 = vsel %vm15308_vm3, %v5314_v22, 0.0  ;;  %v5365_v33 = vrot.slane %v5349_v19, %v8107_v58  ;;  %v5333_v61 = vpop.permute.xlu1 %5332  ;;  %v7168_v46 = vrot.slane %v7158_v29, %v8107_v58  ;;  %vm15312_vm3 = vcmask 261120   ;;  %6204 = vrot.lane.b32.xlu0 %v14576_v56, %s14508_s0 }
 0x570   : > { %v5318_v14 = vmul.f32 %v5317_v39, %v5316_v32  ;;  %v5341_v13 = vsel %vm15302_vm2, %v12760_v40, %v5333_v61  ;;  %v5342_v20 = vsel %vm15309_vm4, %v5333_v61, %v12779_v41  ;;  %vm15313_vm2 = vmmov %vm15312_vm3  ;;  %6128 = vrot.lane.b32.xlu1 %v14546_v4, %s14502_s11  ;;  %s13057_s11 = sld [smem:[#allocation2 + $0x44]] }
 0x571   : > { %v5380_v35 = vcombine.low %v5358_v5, %v5365_v33  ;;  %v5350_v31 = vcombine.low %v5341_v13, %v5342_v20  ;;  %v7159_v45 = vcombine.low %v5340_v27, %v5341_v13  ;;  %vm15316_vm4 = vmmov %vm15313_vm2 }
 0x572   : > { %v5319_v3 = vadd.f32 %v5318_v14, %v5237_v34  ;;  %v12877_v22 = vpop.permute.xlu0 %5490 }
 0x573   : > { %v7175_v39 = vrot.slane %v7159_v45, %v8107_v58  ;;  %v5337_v40 = vpop.permute.xlu1 %5336  ;;  %v5372_v34 = vrot.slane %v5350_v31, %v8107_v58  ;;  %v5388_v31 = vrot.slane %v5380_v35, %v8107_v58  ;;  %6208 = vrot.lane.b32.xlu0 %v14586_v57, %s14508_s0 }
 0x574   : > { %v5343_v47 = vsel %vm15310_vm13, %v12779_v41, %v5337_v40  ;;  %v5344_v27 = vsel %vm15311_vm11, %v5337_v40, %v12700_v44  ;;  %vm15317_vm13 = vmmov %vm15313_vm2  ;;  %6198 = vrot.lane.b32.xlu1 %v14555_v49, %s14508_s0 }
 0x575   : > { %v7190_v19 = vcombine.low %v7168_v46, %v7175_v39  ;;  %v5351_v32 = vcombine.low %v5343_v47, %v5344_v27  ;;  %v7160_v5 = vcombine.low %v5342_v20, %v5343_v47  ;;  %v7161_v33 = vcombine.low %v5344_v27, %v5346_v52  ;;  %vm15318_vm11 = vmand %vm10479_vm12, %vm9162_vm5 }
 0x576   : > { %v12891_v13 = vpop.permute.xlu0 %5494 }
 0x577   : > { %v5379_v29 = vrot.slane %v5351_v32, %v8107_v58  ;;  %v7182_v41 = vrot.slane %v7160_v5, %v8107_v58  ;;  %v7189_v44 = vrot.slane %v7161_v33, %v8107_v58  ;;  %v5407_v61 = vpop.permute.xlu1 %5406  ;;  %v12899_v39 = vrot.slane %v7190_v19, %v8107_v58 }
 0x578   : > { %v5420_v14 = vsel %vm15312_vm3, %v5407_v61, %v12811_v51  ;;  %v5428_v52 = vsel %vm15313_vm2, %v12797_v11, %v5407_v61  ;;  %v5399_v32 = vstv %s12871_s29  ;;  %vm15319_vm3 = vmmov %vm15313_vm2  ;;  %6202 = vrot.lane.b32.xlu1 %v14521_v9, %s14508_s0  ;;  %s7664_s29 = sld [smem:[#allocation2 + $0x5b]] }
 0x579   : > { %v5381_v20 = vcombine.low %v5372_v34, %v5379_v29  ;;  %v7191_v45 = vcombine.low %v7182_v41, %v7189_v44  ;;  %v5430_v46 = vcombine.low %v5428_v52, %v5420_v14  ;;  %15314 = vst [vmem:[#allocation125_spill] sm:$0xff] %v12899_v39 }
 0x57a   : > { %v12910_v34 = vpop.permute.xlu0 %5498 }
 0x57b   : > { %v5395_v40 = vrot.slane %v5381_v20, %v8107_v58  ;;  %v12903_v47 = vrot.slane %v7191_v45, %v8107_v58  ;;  %v5411_v27 = vpop.permute.xlu1 %5410  ;;  %v5440_v44 = vrot.slane %v5430_v46, %v8107_v58 }
 0x57c   : > { %v5421_v5 = vsel %vm15316_vm4, %v12811_v51, %v5411_v27  ;;  %v5422_v33 = vsel %vm15317_vm13, %v5411_v27, %v12825_v2  ;;  %vm15320_vm4 = vmmov %vm15313_vm2  ;;  %6206 = vrot.lane.b32.xlu1 %v14529_v16, %s14508_s0 }
 0x57d   : > { %15315 = vst [vmem:[#allocation35_spill] sm:$0xff] %v12903_v47  ;;  %v5396_v29 = vcombine.low %v5388_v31, %v5395_v40  ;;  %v5431_v19 = vcombine.low %v5421_v5, %v5422_v33  ;;  %v7213_v41 = vcombine.low %v5420_v14, %v5421_v5  ;;  %vm15321_vm13 = vmmov %vm15313_vm2 }
 0x57e   : > { %v12929_v40 = vpop.permute.xlu0 %5567 }
 0x57f   : > { %v5398_v51 = vsel %vm15318_vm11, %v5396_v29, 0.0  ;;  %v5447_v61 = vrot.slane %v5431_v19, %v8107_v58  ;;  %v5415_v20 = vpop.permute.xlu1 %5414  ;;  %vm15322_vm11 = vcmask 252928  }
 0x580   : > { %v5400_v45 = vmul.f32 %v5399_v32, %v5398_v51  ;;  %v5423_v14 = vsel %vm15319_vm3, %v12825_v2, %v5415_v20  ;;  %v5424_v31 = vsel %vm15313_vm2, %v5415_v20, %v12844_v8  ;;  %v7223_v32 = vrot.slane %v7213_v41, %v8107_v58  ;;  %vm15323_vm3 = vmmov %vm15322_vm11  ;;  %6210 = vrot.lane.b32.xlu1 %v14546_v4, %s14508_s0  ;;  %s13111_s0 = sld [smem:[#allocation2 + $0x45]]  ;;  %v15529_v21 = vld [vmem:[#allocation125_spill] sm:$0xff] }
 0x581   : > { %v5462_v27 = vcombine.low %v5440_v44, %v5447_v61  ;;  %v5432_v5 = vcombine.low %v5423_v14, %v5424_v31  ;;  %v7214_v35 = vcombine.low %v5422_v33, %v5423_v14  ;;  %vm15326_vm2 = vmmov %vm15323_vm3 }
 0x582   : > { %v5401_v46 = vadd.f32 %v5400_v45, %v5319_v3  ;;  %v12943_v51 = vpop.permute.xlu0 %5572 }
 0x583   : > { %v7230_v29 = vrot.slane %v7214_v35, %v8107_v58  ;;  %v5419_v2 = vpop.permute.xlu1 %5418  ;;  %v5454_v3 = vrot.slane %v5432_v5, %v8107_v58  ;;  %v5470_v5 = vrot.slane %v5462_v27, %v8107_v58 }
 0x584   : > { %v5425_v19 = vsel %vm15320_vm4, %v12844_v8, %v5419_v2  ;;  %v5426_v33 = vsel %vm15321_vm13, %v5419_v2, %v12797_v11  ;;  %vm15327_vm4 = vmmov %vm15326_vm2 }
 0x585   : > { %v7245_v44 = vcombine.low %v7223_v32, %v7230_v29  ;;  %v5433_v61 = vcombine.low %v5425_v19, %v5426_v33  ;;  %v7215_v20 = vcombine.low %v5424_v31, %v5425_v19  ;;  %v7216_v14 = vcombine.low %v5426_v33, %v5428_v52  ;;  %vm15328_vm13 = vmand %vm10479_vm12, %vm8722_vm14 }
 0x586   : > { %v12957_v31 = vpop.permute.xlu0 %5576 }
 0x587   : > { %v5461_v35 = vrot.slane %v5433_v61, %v8107_v58  ;;  %v7237_v8 = vrot.slane %v7215_v20, %v8107_v58  ;;  %v7244_v11 = vrot.slane %v7216_v14, %v8107_v58  ;;  %v5489_v41 = vpop.permute.xlu1 %5488  ;;  %v12965_v19 = vrot.slane %v7245_v44, %v8107_v58 }
 0x588   : > { %v5502_v45 = vsel %vm15322_vm11, %v5489_v41, %v12877_v22  ;;  %v5510_v52 = vsel %vm15323_vm3, %v12863_v62, %v5489_v41  ;;  %v5481_v14 = vstv %s12937_s13  ;;  %vm15329_vm11 = vmmov %vm15326_vm2  ;;  %s7665_s13 = sld [smem:[#allocation2 + $0x5c]] }
 0x589   : > { %v5463_v32 = vcombine.low %v5454_v3, %v5461_v35  ;;  %v7246_v29 = vcombine.low %v7237_v8, %v7244_v11  ;;  %v5512_v2 = vcombine.low %v5510_v52, %v5502_v45  ;;  %15324 = vst [vmem:[#allocation79_spill] sm:$0xff] %v12965_v19  ;;  %vm15330_vm3 = vmmov %vm15326_vm2 }
 0x58a   : > { %v12976_v8 = vpop.permute.xlu0 %5580 }
 0x58b   : > { %v5477_v33 = vrot.slane %v5463_v32, %v8107_v58  ;;  %v12969_v61 = vrot.slane %v7246_v29, %v8107_v58  ;;  %v5493_v20 = vpop.permute.xlu1 %5492  ;;  %v5522_v32 = vrot.slane %v5512_v2, %v8107_v58 }
 0x58c   : > { %v5503_v3 = vsel %vm15326_vm2, %v12877_v22, %v5493_v20  ;;  %v5504_v35 = vsel %vm15327_vm4, %v5493_v20, %v12891_v13  ;;  %vm15331_vm4 = vmmov %vm15326_vm2 }
 0x58d   : > { %15325 = vst [vmem:[#allocation81_spill] sm:$0xff] %v12969_v61  ;;  %v5478_v11 = vcombine.low %v5470_v5, %v5477_v33  ;;  %v5513_v44 = vcombine.low %v5503_v3, %v5504_v35  ;;  %v7268_v41 = vcombine.low %v5502_v45, %v5503_v3 }
 0x58e   : > { %v12993_v3 = vpop.permute.xlu0 %5649 }
 0x58f   : > { %v5480_v22 = vsel %vm15328_vm13, %v5478_v11, 0.0  ;;  %v5529_v29 = vrot.slane %v5513_v44, %v8107_v58  ;;  %v5497_v20 = vpop.permute.xlu1 %5496  ;;  %v7278_v2 = vrot.slane %v7268_v41, %v8107_v58  ;;  %vm15332_vm13 = vcmask 244736  }
 0x590   : > { %v5482_v5 = vmul.f32 %v5481_v14, %v5480_v22  ;;  %v5505_v33 = vsel %vm15329_vm11, %v12891_v13, %v5497_v20  ;;  %v5506_v45 = vsel %vm15330_vm3, %v5497_v20, %v12910_v34  ;;  %vm15333_vm11 = vmmov %vm15332_vm13  ;;  %v15533_v48 = vld [vmem:[#allocation79_spill] sm:$0xff] }
 0x591   : > { %v5544_v27 = vcombine.low %v5522_v32, %v5529_v29  ;;  %v5514_v6 = vcombine.low %v5505_v33, %v5506_v45  ;;  %v7269_v53 = vcombine.low %v5504_v35, %v5505_v33  ;;  %vm15336_vm3 = vmmov %vm15333_vm11 }
 0x592   : > { %v5483_v11 = vadd.f32 %v5482_v5, %v5401_v46  ;;  %v13005_v32 = vpop.permute.xlu0 %5654 }
 0x593   : > { %v7285_v44 = vrot.slane %v7269_v53, %v8107_v58  ;;  %v5501_v14 = vpop.permute.xlu1 %5500  ;;  %v5536_v53 = vrot.slane %v5514_v6, %v8107_v58  ;;  %v5552_v6 = vrot.slane %v5544_v27, %v8107_v58 }
 0x594   : > { %v5507_v13 = vsel %vm15326_vm2, %v12910_v34, %v5501_v14  ;;  %v5508_v22 = vsel %vm15331_vm4, %v5501_v14, %v12863_v62  ;;  %vm15337_vm2 = vmmov %vm15336_vm3 }
 0x595   : > { %v7300_v35 = vcombine.low %v7278_v2, %v7285_v44  ;;  %v5515_v29 = vcombine.low %v5507_v13, %v5508_v22  ;;  %v7270_v20 = vcombine.low %v5506_v45, %v5507_v13  ;;  %v7271_v33 = vcombine.low %v5508_v22, %v5510_v52  ;;  %vm15338_vm4 = vmand %vm10479_vm12, %vm9316_vm6 }
 0x596   : > { %v13017_v52 = vpop.permute.xlu0 %5658 }
 0x597   : > { %v5543_v46 = vrot.slane %v5515_v29, %v8107_v58  ;;  %v7292_v41 = vrot.slane %v7270_v20, %v8107_v58  ;;  %v7299_v34 = vrot.slane %v7271_v33, %v8107_v58  ;;  %v5571_v5 = vpop.permute.xlu1 %5570  ;;  %v13023_v13 = vrot.slane %v7300_v35, %v8107_v58 }
 0x598   : > { %v5584_v62 = vsel %vm15332_vm13, %v5571_v5, %v12943_v51  ;;  %v5592_v45 = vsel %vm15333_vm11, %v12929_v40, %v5571_v5  ;;  %v5563_v33 = vstv %s12999_s14  ;;  %vm15339_vm13 = vmmov %vm15337_vm2  ;;  %s7666_s14 = sld [smem:[#allocation2 + $0x5d]] }
 0x599   : > { %v5545_v2 = vcombine.low %v5536_v53, %v5543_v46  ;;  %v7301_v44 = vcombine.low %v7292_v41, %v7299_v34  ;;  %v5594_v14 = vcombine.low %v5592_v45, %v5584_v62  ;;  %15334 = vst [vmem:[#allocation97_spill] sm:$0xff] %v13023_v13  ;;  %vm15340_vm11 = vmmov %vm15337_vm2 }
 0x59a   : > { %v13034_v41 = vpop.permute.xlu0 %5662 }
 0x59b   : > { %v5559_v22 = vrot.slane %v5545_v2, %v8107_v58  ;;  %v13027_v29 = vrot.slane %v7301_v44, %v8107_v58  ;;  %v5575_v20 = vpop.permute.xlu1 %5574  ;;  %v5604_v2 = vrot.slane %v5594_v14, %v8107_v58 }
 0x59c   : > { %v5585_v53 = vsel %vm15336_vm3, %v12943_v51, %v5575_v20  ;;  %v5586_v46 = vsel %vm15337_vm2, %v5575_v20, %v12957_v31  ;;  %vm15341_vm3 = vmmov %vm15337_vm2 }
 0x59d   : > { %15335 = vst [vmem:[#allocation138_spill] sm:$0xff] %v13027_v29  ;;  %v5560_v34 = vcombine.low %v5552_v6, %v5559_v22  ;;  %v5595_v35 = vcombine.low %v5585_v53, %v5586_v46  ;;  %v7323_v5 = vcombine.low %v5584_v62, %v5585_v53 }
 0x59e   : > { %v13051_v53 = vpop.permute.xlu0 %5731 }
 0x59f   : > { %v5562_v51 = vsel %vm15338_vm4, %v5560_v34, 0.0  ;;  %v5611_v44 = vrot.slane %v5595_v35, %v8107_v58  ;;  %v5579_v20 = vpop.permute.xlu1 %5578  ;;  %v7333_v14 = vrot.slane %v7323_v5, %v8107_v58  ;;  %vm15342_vm4 = vcmask 236544  }
 0x5a0   : > { %v5564_v6 = vmul.f32 %v5563_v33, %v5562_v51  ;;  %v5587_v22 = vsel %vm15339_vm13, %v12957_v31, %v5579_v20  ;;  %v5588_v62 = vsel %vm15340_vm11, %v5579_v20, %v12976_v8  ;;  %vm15343_vm13 = vmmov %vm15342_vm4 }
 0x5a1   : > { %v5626_v27 = vcombine.low %v5604_v2, %v5611_v44  ;;  %v5596_v29 = vcombine.low %v5587_v22, %v5588_v62  ;;  %v7324_v13 = vcombine.low %v5586_v46, %v5587_v22  ;;  %vm15346_vm11 = vmmov %vm15342_vm4 }
 0x5a2   : > { %v5565_v34 = vadd.f32 %v5564_v6, %v5483_v11  ;;  %v13063_v2 = vpop.permute.xlu0 %5736 }
 0x5a3   : > { %v7340_v35 = vrot.slane %v7324_v13, %v8107_v58  ;;  %v5583_v33 = vpop.permute.xlu1 %5582  ;;  %v5618_v11 = vrot.slane %v5596_v29, %v8107_v58  ;;  %v5634_v29 = vrot.slane %v5626_v27, %v8107_v58 }
 0x5a4   : > { %v5589_v31 = vsel %vm15341_vm3, %v12976_v8, %v5583_v33  ;;  %v5590_v51 = vsel %vm15337_vm2, %v5583_v33, %v12929_v40  ;;  %vm15347_vm3 = vmmov %vm15342_vm4  ;;  %v15538_v42 = vld [vmem:[#allocation138_spill] sm:$0xff] }
 0x5a5   : > { %v7355_v46 = vcombine.low %v7333_v14, %v7340_v35  ;;  %v5597_v44 = vcombine.low %v5589_v31, %v5590_v51  ;;  %v7325_v20 = vcombine.low %v5588_v62, %v5589_v31  ;;  %v7326_v22 = vcombine.low %v5590_v51, %v5592_v45  ;;  %vm15348_vm2 = vmand %vm10479_vm12, %vm9461_vm7 }
 0x5a6   : > { %v13073_v14 = vpop.permute.xlu0 %5740 }
 0x5a7   : > { %v5625_v13 = vrot.slane %v5597_v44, %v8107_v58  ;;  %v7347_v5 = vrot.slane %v7325_v20, %v8107_v58  ;;  %v7354_v6 = vrot.slane %v7326_v22, %v8107_v58  ;;  %v5653_v61 = vpop.permute.xlu1 %5652  ;;  %v13077_v33 = vrot.slane %v7355_v46, %v8107_v58 }
 0x5a8   : > { %v5666_v8 = vsel %vm15342_vm4, %v5653_v61, %v13005_v32  ;;  %v5674_v40 = vsel %vm15343_vm13, %v12993_v3, %v5653_v61  ;;  %v5645_v20 = vstv %s13057_s11  ;;  %vm15349_vm4 = vmmov %vm15347_vm3  ;;  %s7667_s11 = sld [smem:[#allocation2 + $0x5e]] }
 0x5a9   : > { %v5627_v62 = vcombine.low %v5618_v11, %v5625_v13  ;;  %v7356_v45 = vcombine.low %v7347_v5, %v7354_v6  ;;  %v5676_v35 = vcombine.low %v5674_v40, %v5666_v8  ;;  %15344 = vst [vmem:[#allocation23_spill] sm:$0xff] %v13077_v33  ;;  %vm15350_vm13 = vmmov %vm15347_vm3 }
 0x5aa   : > { %v13088_v11 = vpop.permute.xlu0 %5744 }
 0x5ab   : > { %v5641_v31 = vrot.slane %v5627_v62, %v8107_v58  ;;  %v13081_v51 = vrot.slane %v7356_v45, %v8107_v58  ;;  %v5657_v44 = vpop.permute.xlu1 %5656  ;;  %v5686_v62 = vrot.slane %v5676_v35, %v8107_v58 }
 0x5ac   : > { %v5667_v61 = vsel %vm15346_vm11, %v13005_v32, %v5657_v44  ;;  %v5668_v22 = vsel %vm15347_vm3, %v5657_v44, %v13017_v52  ;;  %vm15351_vm11 = vmmov %vm15347_vm3 }
 0x5ad   : > { %15345 = vst [vmem:[#allocation67_spill] sm:$0xff] %v13081_v51  ;;  %v5642_v13 = vcombine.low %v5634_v29, %v5641_v31  ;;  %v5677_v46 = vcombine.low %v5667_v61, %v5668_v22  ;;  %v7378_v5 = vcombine.low %v5666_v8, %v5667_v61 }
 0x5ae   : > { %v13103_v27 = vpop.permute.xlu0 %5813 }
 0x5af   : > { %v5644_v6 = vsel %vm15348_vm2, %v5642_v13, 0.0  ;;  %v5693_v32 = vrot.slane %v5677_v46, %v8107_v58  ;;  %v5661_v45 = vpop.permute.xlu1 %5660  ;;  %v7388_v13 = vrot.slane %v7378_v5, %v8107_v58  ;;  %vm15352_vm2 = vcmask 23552  }
 0x5b0   : > { %v5646_v44 = vmul.f32 %v5645_v20, %v5644_v6  ;;  %v5669_v29 = vsel %vm15349_vm4, %v13017_v52, %v5661_v45  ;;  %v5670_v31 = vsel %vm15350_vm13, %v5661_v45, %v13034_v41  ;;  %vm15353_vm4 = vmmov %vm15352_vm2 }
 0x5b1   : > { %v5708_v8 = vcombine.low %v5686_v62, %v5693_v32  ;;  %v5678_v61 = vcombine.low %v5669_v29, %v5670_v31  ;;  %v7379_v51 = vcombine.low %v5668_v22, %v5669_v29  ;;  %vm15356_vm13 = vmmov %vm15352_vm2 }
 0x5b2   : > { %v5647_v33 = vadd.f32 %v5646_v44, %v5565_v34  ;;  %v5819_v46 = vpop.permute.xlu0 %5818 }
 0x5b3   : > { %v7395_v35 = vrot.slane %v7379_v51, %v8107_v58  ;;  %v5665_v19 = vpop.permute.xlu1 %5664  ;;  %v5700_v34 = vrot.slane %v5678_v61, %v8107_v58  ;;  %v5716_v61 = vrot.slane %v5708_v8, %v8107_v58 }
 0x5b4   : > { %v5671_v20 = vsel %vm15351_vm11, %v13034_v41, %v5665_v19  ;;  %v5672_v52 = vsel %vm15347_vm3, %v5665_v19, %v12993_v3  ;;  %vm15357_vm11 = vmmov %vm15352_vm2 }
 0x5b5   : > { %v7410_v6 = vcombine.low %v7388_v13, %v7395_v35  ;;  %v5679_v45 = vcombine.low %v5671_v20, %v5672_v52  ;;  %v7380_v62 = vcombine.low %v5670_v31, %v5671_v20  ;;  %v7381_v32 = vcombine.low %v5672_v52, %v5674_v40  ;;  %vm15358_vm3 = vmand %vm10479_vm12, %vm9533_vm1 }
 0x5b6   : > { %v5823_v44 = vpop.permute.xlu0 %5822  ;;  %vm15360_vm12 = vmmov %vm15352_vm2 }
 0x5b7   : > { %v5707_v22 = vrot.slane %v5679_v45, %v8107_v58  ;;  %v7402_v51 = vrot.slane %v7380_v62, %v8107_v58  ;;  %v7409_v5 = vrot.slane %v7381_v32, %v8107_v58  ;;  %v5735_v41 = vpop.permute.xlu1 %5734  ;;  %v13123_v13 = vrot.slane %v7410_v6, %v8107_v58 }
 0x5b8   : > { %v5748_v19 = vsel %vm15352_vm2, %v5735_v41, %v13063_v2  ;;  %v5756_v3 = vsel %vm15353_vm4, %v13051_v53, %v5735_v41  ;;  %vm15359_vm4 = vmmov %vm15352_vm2 }
 0x5b9   : > { %v5709_v29 = vcombine.low %v5700_v34, %v5707_v22  ;;  %v7411_v31 = vcombine.low %v7402_v51, %v7409_v5  ;;  %v5758_v40 = vcombine.low %v5756_v3, %v5748_v19  ;;  %15354 = vst [vmem:[#allocation95_spill] sm:$0xff] %v13123_v13  ;;  %v5727_v34 = vstv %s13111_s0  ;;  %s7668_s0 = sld [smem:[#allocation2 + $0x5f]] }
 0x5ba   : > { %v5827_v32 = vpop.permute.xlu0 %5826 }
 0x5bb   : > { %v5723_v35 = vrot.slane %v5709_v29, %v8107_v58  ;;  %v13127_v20 = vrot.slane %v7411_v31, %v8107_v58  ;;  %v5739_v52 = vpop.permute.xlu1 %5738  ;;  %v5768_v5 = vrot.slane %v5758_v40, %v8107_v58 }
 0x5bc   : > { %v5749_v45 = vsel %vm15356_vm13, %v13063_v2, %v5739_v52  ;;  %v5750_v62 = vsel %vm15357_vm11, %v5739_v52, %v13073_v14  ;;  %vm15361_vm13 = vmmov %vm15352_vm2  ;;  %vm15362_vm11 = vcmask 15360  }
 0x5bd   : > { %15355 = vst [vmem:[#allocation84_spill] sm:$0xff] %v13127_v20  ;;  %v5724_v22 = vcombine.low %v5716_v61, %v5723_v35  ;;  %v5759_v6 = vcombine.low %v5749_v45, %v5750_v62 }
 0x5be   : > { %v13147_v31 = vpop.permute.xlu0 %5895 }
 0x5bf   : > { %v5726_v51 = vsel %vm15358_vm3, %v5724_v22, 0.0  ;;  %v5775_v2 = vrot.slane %v5759_v6, %v8107_v58  ;;  %v5743_v41 = vpop.permute.xlu1 %5742  ;;  %vm15363_vm3 = vmmov %vm15362_vm11 }
 0x5c0   : > { %v5728_v19 = vmul.f32 %v5727_v34, %v5726_v51  ;;  %v5751_v3 = vsel %vm15352_vm2, %v13073_v14, %v5743_v41  ;;  %v5752_v29 = vsel %vm15359_vm4, %v5743_v41, %v13088_v11  ;;  %vm15364_vm2 = vmmov %vm15363_vm3 }
 0x5c1   : > { %v5790_v61 = vcombine.low %v5768_v5, %v5775_v2  ;;  %v5760_v36 = vcombine.low %v5751_v3, %v5752_v29  ;;  %vm15365_vm4 = vmmov %vm15364_vm2 }
 0x5c2   : > { %v5729_v35 = vadd.f32 %v5728_v19, %v5647_v33  ;;  %v5901_v62 = vpop.permute.xlu0 %5900 }
 0x5c3   : > { %v5747_v52 = vpop.permute.xlu1 %5746  ;;  %v5782_v14 = vrot.slane %v5760_v36, %v8107_v58 }
 0x5c4   : > { %v5753_v45 = vsel %vm15360_vm12, %v13088_v11, %v5747_v52  ;;  %v5754_v40 = vsel %vm15361_vm13, %v5747_v52, %v13051_v53  ;;  %v5798_v11 = vrot.slane %v5790_v61, %v8107_v58  ;;  %v5809_v52 = vstv %s7643_s1  ;;  %vm15367_vm12 = vmand %vm8734_vm15, %vm8128_vm8  ;;  %s7669_s1 = sld [smem:[#allocation2 + $0x60]] }
 0x5c5   : > { %v5761_v34 = vcombine.low %v5753_v45, %v5754_v40  ;;  %vm15368_vm13 = vmmov %vm15364_vm2 }
 0x5c6   : > { %v5905_v5 = vpop.permute.xlu0 %5904 }
 0x5c7   : > { %v5789_v22 = vrot.slane %v5761_v34, %v8107_v58  ;;  %v5817_v6 = vpop.permute.xlu1 %5816 }
 0x5c8   : > { %v5830_v51 = vsel %vm15362_vm11, %v5817_v6, %v5819_v46  ;;  %v5838_v33 = vsel %vm15363_vm3, %v13103_v27, %v5817_v6  ;;  %vm15369_vm11 = vmmov %vm15364_vm2 }
 0x5c9   : > { %v5791_v2 = vcombine.low %v5782_v14, %v5789_v22  ;;  %v5840_v41 = vcombine.low %v5838_v33, %v5830_v51  ;;  %vm15370_vm3 = vmmov %vm15364_vm2 }
 0x5ca   : > { %v5909_v36 = vpop.permute.xlu0 %5908 }
 0x5cb   : > { %v5805_v53 = vrot.slane %v5791_v2, %v8107_v58  ;;  %v5821_v19 = vpop.permute.xlu1 %5820 }
 0x5cc   : > { %v5831_v3 = vsel %vm15364_vm2, %v5819_v46, %v5821_v19  ;;  %v5832_v29 = vsel %vm15365_vm4, %v5821_v19, %v5823_v44  ;;  %vm15371_vm4 = vcmask 7168  }
 0x5cd   : > { %v5806_v45 = vcombine.low %v5798_v11, %v5805_v53  ;;  %v5841_v14 = vcombine.low %v5831_v3, %v5832_v29  ;;  %v5850_v3 = vrot.slane %v5840_v41, %v8107_v58  ;;  %v5979_v41 = vcombine.low %v14576_v56, %v14529_v16 }
 0x5ce   : > { %v13169_v33 = vpop.permute.xlu0 %6032 }
 0x5cf   : > { %v5808_v34 = vsel %vm15367_vm12, %v5806_v45, 0.0  ;;  %v5825_v22 = vpop.permute.xlu1 %5824  ;;  %v5857_v2 = vrot.slane %v5841_v14, %v8107_v58  ;;  %vm15372_vm12 = vmmov %vm15371_vm4  ;;  %v6001_v56 = vrot.slane %v5979_v41, %v8107_v58 }
 0x5d0   : > { %v5810_v6 = vmul.f32 %v5809_v52, %v5808_v34  ;;  %v5833_v61 = vsel %vm15368_vm13, %v5823_v44, %v5825_v22  ;;  %v5834_v51 = vsel %vm15369_vm11, %v5825_v22, %v5827_v32  ;;  %vm15373_vm13 = vmmov %vm15371_vm4 }
 0x5d1   : > { %v5842_v19 = vcombine.low %v5833_v61, %v5834_v51  ;;  %v5872_v29 = vcombine.low %v5850_v3, %v5857_v2  ;;  %vm15374_vm11 = vmmov %vm15371_vm4 }
 0x5d2   : > { %v5811_v46 = vadd.f32 %v5810_v6, %v5729_v35  ;;  %v13175_v45 = vpop.permute.xlu0 %6036 }
 0x5d3   : > { %v5829_v11 = vpop.permute.xlu1 %5828  ;;  %v5864_v52 = vrot.slane %v5842_v19, %v8107_v58  ;;  %v5880_v6 = vrot.slane %v5872_v29, %v8107_v58 }
 0x5d4   : > { %v5835_v53 = vsel %vm15370_vm3, %v5827_v32, %v5829_v11  ;;  %v5836_v8 = vsel %vm15364_vm2, %v5829_v11, %v13103_v27  ;;  %v5977_v32 = vcombine.low %v14597_v28, %v14555_v49  ;;  %v5978_v27 = vcombine.low %v14615_v17, %v14521_v9  ;;  %vm15375_vm3 = vmand %vm8734_vm15, %vm8210_vm0 }
 0x5d5   : > { %v5843_v44 = vcombine.low %v5835_v53, %v5836_v8  ;;  %v5980_v8 = vcombine.low %v14586_v57, %v14546_v4  ;;  %v5891_v11 = vstv %s7644_s3  ;;  %vm15376_vm2 = vmmov %vm15371_vm4  ;;  %s7670_s3 = sld [smem:[#allocation2 + $0x61]] }
 0x5d6   : > { %v13180_v22 = vpop.permute.xlu0 %6040  ;;  %v5987_v28 = vrot.slane %v5977_v32, %v8107_v58  ;;  %v5994_v9 = vrot.slane %v5978_v27, %v8107_v58 }
 0x5d7   : > { %v5871_v35 = vrot.slane %v5843_v44, %v8107_v58  ;;  %v5899_v34 = vpop.permute.xlu1 %5898  ;;  %v6008_v17 = vrot.slane %v5980_v8, %v8107_v58 }
 0x5d8   : > { %v5912_v16 = vsel %vm15373_vm13, %v5899_v34, %v5901_v62  ;;  %v5920_v4 = vsel %vm15374_vm11, %v13147_v31, %v5899_v34  ;;  %v6009_v34 = vcombine.low %v5987_v28, %v5994_v9  ;;  %vm15379_vm13 = vmmov %vm15376_vm2  ;;  %v15383_v9 = vld [vmem:[#allocation99_spill] sm:$0xff] }
 0x5d9   : > { %v5873_v14 = vcombine.low %v5864_v52, %v5871_v35  ;;  %v5922_v35 = vcombine.low %v5920_v4, %v5912_v16  ;;  %vm15401_vm11 = vmand %vm8734_vm15, %vm8722_vm14 }
 0x5da   : > { %v13206_v3 = vpop.permute.xlu0 %6044 }
 0x5db   : > { %v5887_v61 = vrot.slane %v5873_v14, %v8107_v58  ;;  %v5903_v51 = vpop.permute.xlu1 %5902  ;;  %v6010_v14 = vcombine.low %v6001_v56, %v6008_v17 }
 0x5dc   : > { %v5913_v2 = vsel %vm15371_vm4, %v5901_v62, %v5903_v51  ;;  %v5914_v19 = vsel %vm15372_vm12, %v5903_v51, %v5905_v5  ;;  %vm15377_vm4 = vmmov %vm15376_vm2  ;;  %v5932_v51 = vrot.slane %v5922_v35, %v8107_v58 }
 0x5dd   : > { %v5888_v49 = vcombine.low %v5880_v6, %v5887_v61  ;;  %v5923_v53 = vcombine.low %v5913_v2, %v5914_v19  ;;  %vm15378_vm12 = vmmov %vm15376_vm2  ;;  %v15380_v19 = vld [vmem:[#allocation91_spill] sm:$0xff]  ;;  %v6024_v28 = vrot.slane %v6010_v14, %v8107_v58 }
 0x5de   : > { %v13215_v2 = vpop.permute.xlu0 %6114 }
 0x5df   : > { %v5890_v57 = vsel %vm15375_vm3, %v5888_v49, 0.0  ;;  %v5907_v44 = vpop.permute.xlu1 %5906  ;;  %v5939_v27 = vrot.slane %v5923_v53, %v8107_v58  ;;  %v15385_v53 = vld [vmem:[#allocation127_spill] sm:$0xff]  ;;  %vm15402_vm3 = vmand %vm8734_vm15, %vm9162_vm5 }
 0x5e0   : > { %v5892_v29 = vmul.f32 %v5891_v11, %v5890_v57  ;;  %v5915_v62 = vsel %vm15376_vm2, %v5905_v5, %v5907_v44  ;;  %v5916_v52 = vsel %vm15377_vm4, %v5907_v44, %v5909_v36  ;;  %v15381_v11 = vld [vmem:[#allocation96_spill] sm:$0xff]  ;;  %v15384_v57 = vld [vmem:[#allocation17_spill] sm:$0xff] }
 0x5e1   : > { %v5924_v41 = vcombine.low %v5915_v62, %v5916_v52  ;;  %v6390_v49 = vcombine.low %v15381_v11, %v15380_v19  ;;  %v6445_v44 = vcombine.low %v15385_v53, %v15384_v57  ;;  %v15387_v62 = vld [vmem:[#allocation78_spill] sm:$0xff]  ;;  %v15392_v19 = vld [vmem:[#allocation101_spill] sm:$0xff] }
 0x5e2   : > { %v5893_v32 = vadd.f32 %v5892_v29, %v5811_v46  ;;  %v6017_v46 = vrot.slane %v6009_v34, %v8107_v58  ;;  %v15386_v29 = vld [vmem:[#allocation82_spill] sm:$0xff] }
 0x5e3   : > { %v5911_v8 = vpop.permute.xlu1 %5910  ;;  %v5946_v4 = vrot.slane %v5924_v41, %v8107_v58  ;;  %v6446_v52 = vcombine.low %v15387_v62, %v15386_v29  ;;  %v15388_v34 = vld [vmem:[#allocation106_spill] sm:$0xff]  ;;  %v6412_v41 = vrot.slane %v6390_v49, %v8107_v58  ;;  %v15395_v29 = vld [vmem:[#allocation57_spill] sm:$0xff] }
 0x5e4   : > { %v5917_v6 = vsel %vm15378_vm12, %v5909_v36, %v5911_v8  ;;  %v5918_v61 = vsel %vm15379_vm13, %v5911_v8, %v13147_v31  ;;  %v15382_v36 = vld [vmem:[#allocation118_spill] sm:$0xff]  ;;  %v5954_v31 = vcombine.low %v5932_v51, %v5939_v27  ;;  %v6025_v51 = vcombine.low %v6017_v46, %v6024_v28  ;;  %v15397_v46 = vld [vmem:[#allocation104_spill] sm:$0xff] }
 0x5e5   : > { %v5925_v5 = vcombine.low %v5917_v6, %v5918_v61  ;;  %v6391_v16 = vcombine.low %v15383_v9, %v15382_v36  ;;  %v15389_v8 = vld [vmem:[#allocation110_spill] sm:$0xff]  ;;  %v15390_v6 = vld [vmem:[#allocation100_spill] sm:$0xff] }
 0x5e6   : > { %v6388_v14 = vcombine.low %v15389_v8, %v15388_v34  ;;  %v15391_v61 = vld [vmem:[#allocation94_spill] sm:$0xff]  ;;  %v5962_v9 = vrot.slane %v5954_v31, %v8107_v58  ;;  %v15396_v34 = vld [vmem:[#allocation116_spill] sm:$0xff]  ;;  %v6467_v8 = vrot.slane %v6445_v44, %v8107_v58  ;;  %v5973_v31 = vstv %s13217_s17  ;;  %s15550_s17 = sshll.u32 %s15560_s22, 6 }
 0x5e7   : > { %v5953_v56 = vrot.slane %v5925_v5, %v8107_v58  ;;  %v13229_v17 = vpop.permute.xlu1 %6034  ;;  %v6389_v27 = vcombine.low %v15391_v61, %v15390_v6  ;;  %v6419_v5 = vrot.slane %v6391_v16, %v8107_v58  ;;  %v15393_v11 = vld [vmem:[#allocation14_spill] sm:$0xff]  ;;  %v6500_v49 = vcombine.low %v11941_v43, %v15396_v34  ;;  %v15398_v28 = vld [vmem:[#allocation108_spill] sm:$0xff] }
 0x5e8   : > { %v6444_v36 = vcombine.low %v15393_v11, %v15392_v19  ;;  %v15394_v53 = vld [vmem:[#allocation18_spill] sm:$0xff]  ;;  %v6501_v16 = vcombine.low %v15398_v28, %v15397_v46  ;;  %v6474_v6 = vrot.slane %v6446_v52, %v8107_v58  ;;  %v15399_v19 = vld [vmem:[#allocation135_spill] sm:$0xff]  ;;  %v6027_v43 = vsel %vm15401_vm11, %v6025_v51, 0.0 }
 0x5e9   : > { %v5955_v35 = vcombine.low %v5946_v4, %v5953_v56  ;;  %v13245_v56 = vpop.permute.xlu0 %6118  ;;  %v6443_v62 = vcombine.low %v15395_v29, %v15394_v53  ;;  %v15400_v11 = vld [vmem:[#allocation103_spill] sm:$0xff]  ;;  %v6028_v53 = vstv %s13221_s10  ;;  %v6398_v29 = vrot.slane %v6388_v14, %v8107_v58 }
 0x5ea   : > { %v6499_v20 = vcombine.low %v15400_v11, %v15399_v19  ;;  %v6421_v34 = vcombine.low %v6412_v41, %v6419_v5  ;;  %v6460_v44 = vrot.slane %v6444_v36, %v8107_v58  ;;  %v6522_v28 = vrot.slane %v6500_v49, %v8107_v58  ;;  %v15405_v5 = vld [vmem:[#allocation112_spill] sm:$0xff]  ;;  %v15406_v11 = vld [vmem:[#allocation105_spill] sm:$0xff] }
 0x5eb   : > { %v5969_v4 = vrot.slane %v5955_v35, %v8107_v58  ;;  %v13247_v57 = vpop.permute.xlu1 %6038  ;;  %v6405_v35 = vrot.slane %v6389_v27, %v8107_v58  ;;  %v6529_v51 = vrot.slane %v6501_v16, %v8107_v58  ;;  %v6453_v14 = vrot.slane %v6443_v62, %v8107_v58 }
 0x5ec   : > { %v6476_v41 = vcombine.low %v6467_v8, %v6474_v6  ;;  %v6555_v36 = vcombine.low %v15405_v5, %v11955_v54  ;;  %v6029_v49 = vmul.f32 %v6028_v53, %v6027_v43  ;;  %v6435_v54 = vrot.slane %v6421_v34, %v8107_v58 }
 0x5ed   : > { %v5970_v61 = vcombine.low %v5962_v9, %v5969_v4  ;;  %v15403_v9 = vld [vmem:[#allocation109_spill] sm:$0xff]  ;;  %v13287_v47 = vpop.permute.xlu0 %6122  ;;  %v6420_v39 = vcombine.low %v6398_v29, %v6405_v35  ;;  %v6475_v16 = vcombine.low %v6453_v14, %v6460_v44  ;;  %v6531_v5 = vcombine.low %v6522_v28, %v6529_v51 }
 0x5ee   : > { %v15404_v4 = vld [vmem:[#allocation137_spill] sm:$0xff]  ;;  %v6577_v53 = vrot.slane %v6555_v36, %v8107_v58  ;;  %v6329_v14 = vstv %s13280_s9  ;;  %vm15420_vm11 = vcmask 1039360  }
 0x5ef   : > { %v5972_v52 = vsel %vm15402_vm3, %v5970_v61, 0.0  ;;  %v13274_v27 = vpop.permute.xlu1 %6042  ;;  %v6498_v46 = vcombine.low %v15404_v4, %v15403_v9  ;;  %v15407_v61 = vld [vmem:[#allocation111_spill] sm:$0xff]  ;;  %v6515_v9 = vrot.slane %v6499_v20, %v8107_v58  ;;  %v6490_v20 = vrot.slane %v6476_v41, %v8107_v58  ;;  %v15411_v35 = vld [vmem:[#allocation113_spill] sm:$0xff]  ;;  %vm15421_vm3 = vmmov %vm15420_vm11 }
 0x5f0   : > { %v5974_v19 = vmul.f32 %v5973_v31, %v5972_v52  ;;  %v6556_v13 = vcombine.low %v15407_v61, %v15406_v11  ;;  %v15408_v31 = vld [vmem:[#allocation117_spill] sm:$0xff]  ;;  %v15409_v52 = vld [vmem:[#allocation136_spill] sm:$0xff]  ;;  %v6428_v34 = vrot.slane %v6420_v39, %v8107_v58  ;;  %v6545_v39 = vrot.slane %v6531_v5, %v8107_v58  ;;  %vm15428_vm10 = vmmov %vm15421_vm3 }
 0x5f1   : > { %v6554_v62 = vcombine.low %v15409_v52, %v15408_v31  ;;  %v6508_v6 = vrot.slane %v6498_v46, %v8107_v58  ;;  %v6483_v46 = vrot.slane %v6475_v16, %v8107_v58  ;;  %v6127_v51 = vpop.permute.xlu0 %6126  ;;  %v15412_v31 = vld [vmem:[#allocation26_spill] sm:$0xff] }
 0x5f2   : > { %v5975_v4 = vadd.f32 %v5974_v19, %v5893_v32  ;;  %v15410_v32 = vld [vmem:[#allocation131_spill] sm:$0xff]  ;;  %v6584_v29 = vrot.slane %v6556_v13, %v8107_v58  ;;  %v6436_v19 = vcombine.low %v6428_v34, %v6435_v54  ;;  %v13326_v52 = vmul.f32 %v6329_v14, %v15412_v31  ;;  %v15413_v54 = vld [vmem:[#allocation24_spill] sm:$0xff]  ;;  %v15418_v34 = vld [vmem:[#allocation33_spill] sm:$0xff] }
 0x5f3   : > { %v6047_v8 = vpop.permute.xlu1 %6046  ;;  %v6553_v43 = vcombine.low %v15411_v35, %v15410_v32  ;;  %v6530_v44 = vcombine.low %v6508_v6, %v6515_v9  ;;  %v6570_v28 = vrot.slane %v6554_v62, %v8107_v58  ;;  %v6491_v41 = vcombine.low %v6483_v46, %v6490_v20  ;;  %v15438_v46 = vld [vmem:[#allocation115_spill] sm:$0xff] }
 0x5f4   : > { %v13298_v11 = vadd.f32 %v6029_v49, %v5975_v4  ;;  %v6586_v61 = vcombine.low %v6577_v53, %v6584_v29  ;;  %v6384_v49 = vstv %s13290_s7  ;;  %v6439_v62 = vstv %s13294_s28  ;;  %s265_s7 = scalar_lea.vmem %s13766_s6, %s15550_s17 }
 0x5f5   : > { %v6563_v36 = vrot.slane %v6553_v43, %v8107_v58  ;;  %v6538_v9 = vrot.slane %v6530_v44, %v8107_v58  ;;  %vm15414_vm2 = vnez %v15413_v54  ;;  %v6494_v20 = vstv %s13300_s26  ;;  %v15417_v43 = vld [vmem:[#allocation61_spill] sm:$0xff]  ;;  %v13343_v29 = vpop.permute.xlu0 %6196 }
 0x5f6   : > { %vm15415_vm4 = vmand %vm15414_vm2, %vm9162_vm5  ;;  %v6600_v35 = vrot.slane %v6586_v61, %v8107_v58  ;;  %v6609_v53 = vcombine.low %v15417_v43, %v12054_v37  ;;  %v13346_v44 = vmul.f32 %v6384_v49, %v15418_v34  ;;  %v6054_v61 = vsel %vm15420_vm11, %v13206_v3, %v6047_v8 }
 0x5f7   : > { %v6117_v13 = vpop.permute.xlu1 %6116  ;;  %v6585_v4 = vcombine.low %v6563_v36, %v6570_v28  ;;  %v6438_v6 = vsel %vm15415_vm4, %v6436_v19, 0.0  ;;  %v6546_v5 = vcombine.low %v6538_v9, %v6545_v39  ;;  %vm15416_vm12 = vmand %vm15414_vm2, %vm8722_vm14  ;;  %v6057_v49 = vsel %vm15421_vm3, %v6047_v8, %v13169_v33  ;;  %v15435_v36 = vld [vmem:[#allocation119_spill] sm:$0xff]  ;;  %v15436_v19 = vld [vmem:[#allocation46_spill] sm:$0xff] }
 0x5f8   : > { %v6493_v32 = vsel %vm15416_vm12, %v6491_v41, 0.0  ;;  %v13351_v39 = vmul.f32 %v6439_v62, %v6438_v6  ;;  %vm15419_vm13 = vmand %vm15414_vm2, %vm9316_vm6  ;;  %v15423_v6 = vld [vmem:[#allocation62_spill] sm:$0xff] }
 0x5f9   : > { %v6593_v14 = vrot.slane %v6585_v4, %v8107_v58  ;;  %v13356_v31 = vmul.f32 %v6494_v20, %v6493_v32  ;;  %v13363_v37 = vsel %vm15419_vm13, %v6546_v5, 0.0  ;;  %v15422_v4 = vld [vmem:[#allocation58_spill] sm:$0xff]  ;;  %v13372_v20 = vrot.slane %v6609_v53, %v8107_v58  ;;  %vm15424_vm4 = vmmov %vm15421_vm3 }
 0x5fa   : > { %v6608_v43 = vcombine.low %v15423_v6, %v15422_v4  ;;  %v6048_v32 = vsel %vm15424_vm4, %v13169_v33, %v13229_v17  ;;  %vm15425_vm12 = vmmov %vm15421_vm3  ;;  %v6049_v33 = vsel %vm15428_vm10, %v13229_v17, %v13175_v45  ;;  %v6062_v53 = vcombine.low %v6054_v61, %v6057_v49  ;;  %v15437_v28 = vld [vmem:[#allocation126_spill] sm:$0xff] }
 0x5fb   : > { %v6121_v16 = vpop.permute.xlu1 %6120  ;;  %v6601_v62 = vcombine.low %v6593_v14, %v6600_v35  ;;  %v6050_v5 = vsel %vm15425_vm12, %v13175_v45, %v13247_v57  ;;  %vm15426_vm13 = vmmov %vm15421_vm3  ;;  %v6053_v35 = vsel %vm15421_vm3, %v13274_v27, %v13206_v3  ;;  %v6201_v14 = vpop.permute.xlu0 %6200  ;;  %vm15429_vm4 = vcmask 1031168  }
 0x5fc   : > { %v6051_v34 = vsel %vm15426_vm13, %v13247_v57, %v13180_v22  ;;  %vm15427_vm11 = vmmov %vm15421_vm3  ;;  %v6132_v4 = vsel %vm15429_vm4, %v13245_v56, %v6121_v16  ;;  %v13403_v45 = vrot.slane %v6608_v43, %v8107_v58  ;;  %v6611_v38 = vcombine.low %v15438_v46, %v15437_v28  ;;  %v15443_v28 = vld [vmem:[#allocation74_spill] sm:$0xff]  ;;  %v15457_v46 = vld [vmem:[#allocation128_spill] sm:$0xff] }
 0x5fd   : > { %v6052_v8 = vsel %vm15427_vm11, %v13180_v22, %v13274_v27  ;;  %vm15430_vm12 = vmmov %vm15429_vm4  ;;  %v6060_v17 = vcombine.low %v6050_v5, %v6051_v34 }
 0x5fe   : > { %v6133_v57 = vsel %vm15430_vm12, %v6121_v16, %v13287_v47  ;;  %vm15431_vm13 = vmmov %vm15429_vm4  ;;  %v6061_v61 = vcombine.low %v6052_v8, %v6053_v35  ;;  %v6610_v16 = vcombine.low %v15436_v19, %v15435_v36  ;;  %vm15450_vm12 = vcmask 1022976  }
 0x5ff   : > { %v6125_v41 = vpop.permute.xlu1 %6124  ;;  %vm15432_vm11 = vmmov %vm15429_vm4  ;;  %v6142_v43 = vcombine.low %v6132_v4, %v6133_v57  ;;  %v6076_v34 = vrot.slane %v6060_v17, %v8107_v58  ;;  %v6205_v35 = vpop.permute.xlu0 %6204  ;;  %v15446_v4 = vld [vmem:[#allocation124_spill] sm:$0xff] }
 0x600   : > { %v6134_v22 = vsel %vm15431_vm13, %v13287_v47, %v6125_v41  ;;  %v6135_v9 = vsel %vm15432_vm11, %v6125_v41, %v6127_v51  ;;  %vm15433_vm14 = vmmov %vm15429_vm4  ;;  %v6059_v41 = vcombine.low %v6048_v32, %v6049_v33  ;;  %v15447_v57 = vld [vmem:[#allocation132_spill] sm:$0xff] }
 0x601   : > { %vm15434_vm3 = vmmov %vm15429_vm4  ;;  %v6143_v26 = vcombine.low %v6134_v22, %v6135_v9  ;;  %v6083_v9 = vrot.slane %v6061_v61, %v8107_v58  ;;  %v6663_v22 = vcombine.low %v15447_v57, %v15446_v4  ;;  %v6158_v17 = vrot.slane %v6142_v43, %v8107_v58  ;;  %v15453_v4 = vld [vmem:[#allocation130_spill] sm:$0xff]  ;;  %v15455_v43 = vld [vmem:[#allocation47_spill] sm:$0xff] }
 0x602   : > { %vm15439_vm10 = vmmov %vm15434_vm3 }
 0x603   : > { %v6129_v6 = vpop.permute.xlu1 %6128  ;;  %v6130_v47 = vsel %vm15439_vm10, %v13215_v2, %v6117_v13  ;;  %vm15441_vm4 = vmand %vm15414_vm2, %vm9461_vm7  ;;  %v6165_v61 = vrot.slane %v6143_v26, %v8107_v58  ;;  %v15456_v26 = vld [vmem:[#allocation40_spill] sm:$0xff]  ;;  %v6673_v63 = vrot.slane %v6663_v22, %v8107_v58 }
 0x604   : > { %v6136_v3 = vsel %vm15433_vm14, %v6127_v51, %v6129_v6  ;;  %v6139_v27 = vsel %vm15434_vm3, %v6129_v6, %v13215_v2  ;;  %vm15440_vm14 = vmmov %vm15434_vm3  ;;  %v6090_v6 = vrot.slane %v6062_v53, %v8107_v58  ;;  %v13419_v19 = vsel %vm15441_vm4, %v6601_v62, 0.0  ;;  %v15442_v2 = vld [vmem:[#allocation133_spill] sm:$0xff] }
 0x605   : > { %v6144_v49 = vcombine.low %v6136_v3, %v6139_v27  ;;  %v6131_v51 = vsel %vm15440_vm14, %v6117_v13, %v13245_v56  ;;  %v6665_v36 = vcombine.low %v15443_v28, %v15442_v2  ;;  %v15444_v56 = vld [vmem:[#allocation39_spill] sm:$0xff]  ;;  %v6632_v62 = vrot.slane %v6610_v16, %v8107_v58  ;;  %v15448_v3 = vld [vmem:[#allocation122_spill] sm:$0xff]  ;;  %v15449_v27 = vld [vmem:[#allocation129_spill] sm:$0xff] }
 0x606   : > { %v15445_v13 = vld [vmem:[#allocation139_spill] sm:$0xff]  ;;  %v6141_v8 = vcombine.low %v6130_v47, %v6131_v51  ;;  %v6639_v53 = vrot.slane %v6611_v38, %v8107_v58  ;;  %v6664_v2 = vcombine.low %v15449_v27, %v15448_v3  ;;  %v6069_v28 = vrot.slane %v6059_v41, %v8107_v58  ;;  %vm15451_vm13 = vmmov %vm15450_vm12 }
 0x607   : > { %v6199_v5 = vpop.permute.xlu1 %6198  ;;  %v6666_v32 = vcombine.low %v15445_v13, %v15444_v56  ;;  %v6172_v33 = vrot.slane %v6144_v49, %v8107_v58  ;;  %v6092_v56 = vcombine.low %v6083_v9, %v6090_v6  ;;  %v6687_v49 = vrot.slane %v6665_v36, %v8107_v58  ;;  %v15452_v13 = vld [vmem:[#allocation37_spill] sm:$0xff]  ;;  %v15454_v9 = vld [vmem:[#allocation72_spill] sm:$0xff]  ;;  %vm15458_vm11 = vmmov %vm15450_vm12 }
 0x608   : > { %v6719_v57 = vcombine.low %v15453_v4, %v15452_v13  ;;  %v6091_v3 = vcombine.low %v6069_v28, %v6076_v34  ;;  %v6151_v41 = vrot.slane %v6141_v8, %v8107_v58  ;;  %v6720_v27 = vcombine.low %v15455_v43, %v15454_v9  ;;  %vm15459_vm3 = vmmov %vm15458_vm11  ;;  %v6209_v28 = vpop.permute.xlu0 %6208  ;;  %v15460_v4 = vld [vmem:[#allocation123_spill] sm:$0xff]  ;;  %v15461_v9 = vld [vmem:[#allocation134_spill] sm:$0xff] }
 0x609   : > { %v6694_v16 = vrot.slane %v6666_v32, %v8107_v58  ;;  %v6174_v6 = vcombine.low %v6165_v61, %v6172_v33  ;;  %v6721_v25 = vcombine.low %v15457_v46, %v15456_v26  ;;  %v6212_v36 = vsel %vm15458_vm11, %v13343_v29, %v6199_v5  ;;  %vm15462_vm10 = vmmov %vm15459_vm3 }
 0x60a   : > { %v6213_v32 = vsel %vm15459_vm3, %v6199_v5, %v6201_v14  ;;  %v6106_v13 = vrot.slane %v6092_v56, %v8107_v58  ;;  %v6173_v34 = vcombine.low %v6151_v41, %v6158_v17  ;;  %v6680_v61 = vrot.slane %v6664_v2, %v8107_v58  ;;  %vm15463_vm14 = vmmov %vm15459_vm3 }
 0x60b   : > { %v6203_v47 = vpop.permute.xlu1 %6202  ;;  %v6718_v43 = vcombine.low %v15461_v9, %v15460_v4  ;;  %v6188_v5 = vrot.slane %v6174_v6, %v8107_v58  ;;  %v6735_v56 = vrot.slane %v6719_v57, %v8107_v58  ;;  %v6742_v2 = vrot.slane %v6720_v27, %v8107_v58  ;;  %vm15464_vm4 = vmmov %vm15459_vm3 }
 0x60c   : > { %v6214_v38 = vsel %vm15450_vm12, %v6201_v14, %v6203_v47  ;;  %v6215_v51 = vsel %vm15451_vm13, %v6203_v47, %v6205_v35  ;;  %v6641_v47 = vcombine.low %v6632_v62, %v6639_v53  ;;  %v6099_v14 = vrot.slane %v6091_v3, %v8107_v58  ;;  %vm15465_vm12 = vmmov %vm15459_vm3 }
 0x60d   : > { %v6224_v8 = vcombine.low %v6214_v38, %v6215_v51  ;;  %v6223_v62 = vcombine.low %v6212_v36, %v6213_v32  ;;  %v6696_v53 = vcombine.low %v6687_v49, %v6694_v16  ;;  %v6749_v17 = vrot.slane %v6721_v25, %v8107_v58  ;;  %vm15466_vm13 = vmand %vm8734_vm15, %vm9316_vm6 }
 0x60e   : > { %v6107_v38 = vcombine.low %v6099_v14, %v6106_v13  ;;  %v6695_v41 = vcombine.low %v6673_v63, %v6680_v61  ;;  %v6655_v57 = vrot.slane %v6641_v47, %v8107_v58  ;;  %v6110_v13 = vstv %s13450_s25  ;;  %vm15473_vm11 = vmand %vm8734_vm15, %vm9461_vm7 }
 0x60f   : > { %v6207_v33 = vpop.permute.xlu1 %6206  ;;  %v6240_v22 = vrot.slane %v6224_v8, %v8107_v58  ;;  %v6233_v6 = vrot.slane %v6223_v62, %v8107_v58  ;;  %v6710_v36 = vrot.slane %v6696_v53, %v8107_v58  ;;  %v6751_v32 = vcombine.low %v6742_v2, %v6749_v17  ;;  %v15472_v62 = vld [vmem:[#allocation53_spill] sm:$0xff]  ;;  %vm15480_vm3 = vmand %vm15414_vm2, %vm9533_vm1 }
 0x610   : > { %v6216_v46 = vsel %vm15462_vm10, %v6205_v35, %v6207_v33  ;;  %v6217_v26 = vsel %vm15463_vm14, %v6207_v33, %v6209_v28  ;;  %v6181_v35 = vrot.slane %v6173_v34, %v8107_v58  ;;  %v6728_v33 = vrot.slane %v6718_v43, %v8107_v58  ;;  %vm15484_vm10 = vmand %vm11180_vm9, %vm8128_vm8 }
 0x611   : > { %v6225_v51 = vcombine.low %v6216_v46, %v6217_v26  ;;  %v6255_v47 = vcombine.low %v6233_v6, %v6240_v22  ;;  %v15467_v8 = vstv %s13303_s16  ;;  %v15468_v4 = vcombine.low %v13403_v45, %v13372_v20  ;;  %v15469_v46 = vld [vmem:[#allocation44_spill] sm:$0xff]  ;;  %v15470_v26 = vld [vmem:[#allocation34_spill] sm:$0xff]  ;;  %vm15487_vm2 = vmand %vm8734_vm15, %vm9533_vm1 }
 0x612   : > { %v6189_v25 = vcombine.low %v6181_v35, %v6188_v5  ;;  %v6750_v63 = vcombine.low %v6728_v33, %v6735_v56  ;;  %v13491_v61 = vmul.f32 %v15467_v8, %v13363_v37  ;;  %v6703_v43 = vrot.slane %v6695_v41, %v8107_v58  ;;  %v15471_v5 = vld [vmem:[#allocation54_spill] sm:$0xff]  ;;  %v15475_v33 = vld [vmem:[#allocation52_spill] sm:$0xff]  ;;  %v15482_v8 = vld [vmem:[#allocation45_spill] sm:$0xff] }
 0x613   : > { %v6211_v3 = vpop.permute.xlu1 %6210  ;;  %v6247_v34 = vrot.slane %v6225_v51, %v8107_v58  ;;  %v6648_v9 = vrot.slane %v15468_v4, %v8107_v58  ;;  %v6775_v14 = vcombine.low %v15470_v26, %v15469_v46  ;;  %v6776_v53 = vcombine.low %v15472_v62, %v15471_v5  ;;  %v15478_v6 = vld [vmem:[#allocation38_spill] sm:$0xff]  ;;  %v15485_v46 = vld [vmem:[#allocation141_spill] sm:$0xff]  ;;  %v15489_v5 = vld [vmem:[#allocation80_spill] sm:$0xff] }
 0x614   : > { %v6218_v49 = vsel %vm15464_vm4, %v6209_v28, %v6211_v3  ;;  %v6221_v16 = vsel %vm15465_vm12, %v6211_v3, %v13343_v29  ;;  %v6109_v29 = vsel %vm15466_vm13, %v6107_v38, 0.0  ;;  %v6192_v56 = vstv %s13463_s8  ;;  %v15486_v26 = vld [vmem:[#allocation50_spill] sm:$0xff]  ;;  %vm15510_vm15 = vmand %vm11180_vm9, %vm8210_vm0 }
 0x615   : > { %v6226_v27 = vcombine.low %v6218_v49, %v6221_v16  ;;  %v6191_v37 = vsel %vm15473_vm11, %v6189_v25, 0.0  ;;  %v15474_v20 = vstv %s13310_s27  ;;  %v6656_v17 = vcombine.low %v6648_v9, %v6655_v57  ;;  %v15476_v49 = vld [vmem:[#allocation43_spill] sm:$0xff]  ;;  %v15477_v25 = vld [vmem:[#allocation36_spill] sm:$0xff]  ;;  %vm15512_vm14 = vmand %vm11180_vm9, %vm9162_vm5 }
 0x616   : > { %v13511_v45 = vmul.f32 %v15474_v20, %v13419_v19  ;;  %v6711_v38 = vcombine.low %v6703_v43, %v6710_v36  ;;  %v6111_v35 = vmul.f32 %v6110_v13, %v6109_v29  ;;  %v13514_v22 = vrot.slane %v6750_v63, %v8107_v58  ;;  %v15479_v63 = vld [vmem:[#allocation142_spill] sm:$0xff]  ;;  %vm15519_vm13 = vmand %vm11180_vm9, %vm9316_vm6  ;;  %v15526_v43 = vld [vmem:[#allocation20_spill] sm:$0xff] }
 0x617   : > { %v6254_v28 = vrot.slane %v6226_v27, %v8107_v58  ;;  %v13517_v51 = vrot.slane %v6751_v32, %v8107_v58  ;;  %v6263_v3 = vrot.slane %v6255_v47, %v8107_v58  ;;  %v6773_v16 = vcombine.low %v15476_v49, %v15475_v33  ;;  %v15492_v33 = vld [vmem:[#allocation143_spill] sm:$0xff]  ;;  %vm15520_vm11 = vmand %vm11180_vm9, %vm9461_vm7 }
 0x618   : > { %v6774_v19 = vcombine.low %v15478_v6, %v15477_v25  ;;  %v6797_v57 = vrot.slane %v6775_v14, %v8107_v58  ;;  %v6193_v27 = vmul.f32 %v6192_v56, %v6191_v37  ;;  %v6804_v36 = vrot.slane %v6776_v53, %v8107_v58  ;;  %v15493_v25 = vld [vmem:[#allocation56_spill] sm:$0xff] }
 0x619   : > { %v6256_v2 = vcombine.low %v6247_v34, %v6254_v28  ;;  %v6829_v13 = vcombine.low %v15479_v63, %v12465_v18  ;;  %v6274_v32 = vstv %s13477_s19  ;;  %v13535_v47 = vsel %vm15480_vm3, %v6656_v17, 0.0  ;;  %v15481_v28 = vld [vmem:[#allocation41_spill] sm:$0xff]  ;;  %vm15521_vm3 = vmand %vm11180_vm9, %vm9533_vm1 }
 0x61a   : > { %v6830_v34 = vcombine.low %v12470_v50, %v12422_v15  ;;  %v6831_v4 = vcombine.low %v15482_v8, %v15481_v28  ;;  %v6112_v9 = vadd.f32 %v6111_v35, %v13298_v11  ;;  %v13547_v18 = vsel %vm15484_vm10, %v6711_v38, 0.0  ;;  %v15488_v15 = vld [vmem:[#allocation64_spill] sm:$0xff] }
 0x61b   : > { %v6270_v41 = vrot.slane %v6256_v2, %v8107_v58  ;;  %v6766_v54 = vcombine.low %v13514_v22, %v13517_v51  ;;  %v6828_v14 = vcombine.low %v15486_v26, %v15485_v46  ;;  %v6885_v11 = vcombine.low %v12501_v1, %v15488_v15  ;;  %v15490_v35 = vld [vmem:[#allocation48_spill] sm:$0xff] }
 0x61c   : > { %v6886_v62 = vcombine.low %v15489_v5, %v12491_v7  ;;  %v6194_v53 = vadd.f32 %v6193_v27, %v6112_v9  ;;  %v6783_v37 = vrot.slane %v6773_v16, %v8107_v58  ;;  %v6790_v2 = vrot.slane %v6774_v19, %v8107_v58  ;;  %v15491_v7 = vld [vmem:[#allocation42_spill] sm:$0xff]  ;;  %v15494_v16 = vld [vmem:[#allocation71_spill] sm:$0xff]  ;;  %v15495_v19 = vld [vmem:[#allocation25_spill] sm:$0xff] }
 0x61d   : > { %v6271_v29 = vcombine.low %v6263_v3, %v6270_v41  ;;  %v6806_v20 = vcombine.low %v6797_v57, %v6804_v36  ;;  %v6845_v17 = vrot.slane %v6829_v13, %v8107_v58  ;;  %v6852_v40 = vrot.slane %v6830_v34, %v8107_v58  ;;  %v15496_v57 = vld [vmem:[#allocation55_spill] sm:$0xff]  ;;  %v15497_v13 = vld [vmem:[#allocation60_spill] sm:$0xff] }
 0x61e   : > { %v6859_v38 = vrot.slane %v6831_v4, %v8107_v58  ;;  %v6884_v3 = vcombine.low %v15490_v35, %v12496_v24  ;;  %v6838_v41 = vrot.slane %v6828_v14, %v8107_v58  ;;  %v6883_v49 = vcombine.low %v15492_v33, %v15491_v7  ;;  %v15499_v8 = vld [vmem:[#allocation28_spill] sm:$0xff]  ;;  %v15500_v9 = vld [vmem:[#allocation31_spill] sm:$0xff]  ;;  %v15505_v35 = vld [vmem:[#allocation65_spill] sm:$0xff] }
 0x61f   : > { %v6273_v50 = vsel %vm15487_vm2, %v6271_v29, 0.0  ;;  %v6940_v6 = vcombine.low %v15494_v16, %v15493_v25  ;;  %v6941_v27 = vcombine.low %v15496_v57, %v15495_v19  ;;  %v6907_v36 = vrot.slane %v6885_v11, %v8107_v58  ;;  %v15501_v11 = vld [vmem:[#allocation49_spill] sm:$0xff]  ;;  %v15502_v5 = vld [vmem:[#allocation59_spill] sm:$0xff]  ;;  %v15507_v25 = vld [vmem:[#allocation30_spill] sm:$0xff] }
 0x620   : > { %v6275_v56 = vmul.f32 %v6274_v32, %v6273_v50  ;;  %v6914_v63 = vrot.slane %v6886_v62, %v8107_v58  ;;  %v15498_v32 = vld [vmem:[#allocation66_spill] sm:$0xff]  ;;  %v6805_v34 = vcombine.low %v6783_v37, %v6790_v2  ;;  %v6820_v28 = vrot.slane %v6806_v20, %v8107_v58  ;;  %v15504_v20 = vld [vmem:[#allocation27_spill] sm:$0xff] }
 0x621   : > { %v6939_v29 = vcombine.low %v15498_v32, %v15497_v13  ;;  %v6995_v4 = vcombine.low %v12582_v55, %v15499_v8  ;;  %v6996_v46 = vcombine.low %v15500_v9, %v12612_v59  ;;  %v6860_v26 = vcombine.low %v6838_v41, %v6845_v17  ;;  %v15508_v16 = vld [vmem:[#allocation87_spill] sm:$0xff] }
 0x622   : > { %v6276_v1 = vadd.f32 %v6275_v56, %v6194_v53  ;;  %v6861_v14 = vcombine.low %v6852_v40, %v6859_v38  ;;  %v6900_v50 = vrot.slane %v6884_v3, %v8107_v58  ;;  %v6938_v62 = vcombine.low %v15502_v5, %v15501_v11  ;;  %v15506_v3 = vld [vmem:[#allocation89_spill] sm:$0xff] }
 0x623   : > { %v6969_v53 = vrot.slane %v6941_v27, %v8107_v58  ;;  %v6994_v56 = vcombine.low %v12574_v12, %v12578_v30  ;;  %v6893_v55 = vrot.slane %v6883_v49, %v8107_v58  ;;  %v6916_v59 = vcombine.low %v6907_v36, %v6914_v63 }
 0x624   : > { %v6331_v24 = vadd.f32 %v13326_v52, %v6276_v1  ;;  %v6962_v52 = vrot.slane %v6940_v6, %v8107_v58  ;;  %v6955_v37 = vrot.slane %v6939_v29, %v8107_v58  ;;  %v7017_v40 = vrot.slane %v6995_v4, %v8107_v58 }
 0x625   : > { %v7024_v38 = vrot.slane %v6996_v46, %v8107_v58  ;;  %v7049_v1 = vcombine.low %v15506_v3, %v15505_v35  ;;  %v6813_v30 = vrot.slane %v6805_v34, %v8107_v58  ;;  %v6875_v12 = vrot.slane %v6861_v14, %v8107_v58 }
 0x626   : > { %v6386_v15 = vadd.f32 %v13346_v44, %v6331_v24  ;;  %v15503_v44 = vld [vmem:[#allocation32_spill] sm:$0xff]  ;;  %v6915_v41 = vcombine.low %v6893_v55, %v6900_v50  ;;  %v6948_v7 = vrot.slane %v6938_v62, %v8107_v58  ;;  %v6971_v33 = vcombine.low %v6962_v52, %v6969_v53 }
 0x627   : > { %v6993_v17 = vcombine.low %v15504_v20, %v15503_v44  ;;  %v7010_v49 = vrot.slane %v6994_v56, %v8107_v58  ;;  %v7048_v6 = vcombine.low %v15508_v16, %v15507_v25  ;;  %v6821_v19 = vcombine.low %v6813_v30, %v6820_v28  ;;  %v15516_v55 = vld [vmem:[#allocation144_spill] sm:$0xff] }
 0x628   : > { %v6441_v2 = vadd.f32 %v13351_v39, %v6386_v15  ;;  %v6868_v57 = vrot.slane %v6860_v26, %v8107_v58  ;;  %v6930_v27 = vrot.slane %v6916_v59, %v8107_v58  ;;  %v7026_v13 = vcombine.low %v7017_v40, %v7024_v38  ;;  %v15517_v59 = vld [vmem:[#allocation68_spill] sm:$0xff] }
 0x629   : > { %v7003_v63 = vrot.slane %v6993_v17, %v8107_v58  ;;  %v7065_v32 = vrot.slane %v7049_v1, %v8107_v58  ;;  %v15509_v29 = vstv %s13312_s30  ;;  %v6923_v8 = vrot.slane %v6915_v41, %v8107_v58 }
 0x62a   : > { %v6496_v39 = vadd.f32 %v13356_v31, %v6441_v2  ;;  %v6970_v31 = vcombine.low %v6948_v7, %v6955_v37  ;;  %v6660_v24 = vmul.f32 %v15509_v29, %v13535_v47  ;;  %v6876_v34 = vcombine.low %v6868_v57, %v6875_v12 }
 0x62b   : > { %v6985_v47 = vrot.slane %v6971_v33, %v8107_v58  ;;  %v7025_v4 = vcombine.low %v7003_v63, %v7010_v49  ;;  %v7058_v22 = vrot.slane %v7048_v6, %v8107_v58  ;;  %v15511_v51 = vstv %s13316_s23  ;;  %v15522_v6 = vld [vmem:[#allocation107_spill] sm:$0xff] }
 0x62c   : > { %v6551_v36 = vadd.f32 %v13491_v61, %v6496_v39  ;;  %v6768_v61 = vsel %vm15510_vm15, %v6766_v54, 0.0  ;;  %v6715_v9 = vmul.f32 %v15511_v51, %v13547_v18  ;;  %v6824_v46 = vstv %s13594_s20 }
 0x62d   : > { %v6931_v26 = vcombine.low %v6923_v8, %v6930_v27  ;;  %v6978_v14 = vrot.slane %v6970_v31, %v8107_v58  ;;  %v7040_v50 = vrot.slane %v7026_v13, %v8107_v58  ;;  %v7080_v15 = vcombine.low %v7058_v22, %v7065_v32  ;;  %v15525_v31 = vld [vmem:[#allocation63_spill] sm:$0xff]  ;;  %v15534_v22 = vld [vmem:[#allocation81_spill] sm:$0xff] }
 0x62e   : > { %v6606_v28 = vadd.f32 %v13511_v45, %v6551_v36  ;;  %v6823_v45 = vsel %vm15512_vm14, %v6821_v19, 0.0  ;;  %v15513_v11 = vstv %s13318_s15  ;;  %v6879_v18 = vstv %s13606_s2 }
 0x62f   : > { %v6770_v5 = vmul.f32 %v15513_v11, %v6768_v61  ;;  %vm15514_vm4 = vnez %v14946_v23  ;;  %v6986_v53 = vcombine.low %v6978_v14, %v6985_v47  ;;  %v7033_v56 = vrot.slane %v7025_v4, %v8107_v58  ;;  %v15530_v61 = vld [vmem:[#allocation35_spill] sm:$0xff] }
 0x630   : > { %v6661_v54 = vadd.f32 %v6660_v24, %v6606_v28  ;;  %vm15515_vm12 = vmand %vm11180_vm9, %vm15514_vm4  ;;  %v15518_v37 = vcombine.low %v15516_v55, %v15517_v59  ;;  %v6825_v44 = vmul.f32 %v6824_v46, %v6823_v45  ;;  %v6934_v17 = vstv %s13617_s24  ;;  %v15545_v59 = vld [vmem:[#allocation95_spill] sm:$0xff] }
 0x631   : > { %v6878_v52 = vsel %vm15515_vm12, %v6876_v34, 0.0  ;;  %v6933_v40 = vsel %vm15519_vm13, %v6931_v26, 0.0  ;;  %v7041_v38 = vcombine.low %v7033_v56, %v7040_v50  ;;  %v7088_v35 = vrot.slane %v7080_v15, %v8107_v58  ;;  %v15537_v26 = vld [vmem:[#allocation97_spill] sm:$0xff] }
 0x632   : > { %v6716_v62 = vadd.f32 %v6715_v9, %v6661_v54  ;;  %v7095_v2 = vrot.slane %v15518_v37, %v8107_v58  ;;  %v6880_v3 = vmul.f32 %v6879_v18, %v6878_v52  ;;  %v6989_v30 = vstv %s13634_s12  ;;  %v15541_v18 = vld [vmem:[#allocation23_spill] sm:$0xff]  ;;  %v15546_v37 = vld [vmem:[#allocation84_spill] sm:$0xff] }
 0x633   : > { %v6988_v12 = vsel %vm15520_vm11, %v6986_v53, 0.0  ;;  %v6935_v39 = vmul.f32 %v6934_v17, %v6933_v40  ;;  %v7044_v33 = vstv %s13648_s18  ;;  %v7043_v58 = vsel %vm15521_vm3, %v7041_v38, 0.0 }
 0x634   : > { %v6771_v20 = vadd.f32 %v6770_v5, %v6716_v62  ;;  %v7096_v41 = vcombine.low %v7088_v35, %v7095_v2  ;;  %v6990_v49 = vmul.f32 %v6989_v30, %v6988_v12  ;;  %v7099_v16 = vstv %s7664_s29  ;;  %v15542_v62 = vld [vmem:[#allocation67_spill] sm:$0xff] }
 0x635   : > { %vm15523_vm10 = vnez %v15522_v6  ;;  %v7045_v57 = vmul.f32 %v7044_v33, %v7043_v58  ;;  %v7154_v36 = vstv %s7665_s13  ;;  %v15527_v63 = vcombine.low %v15525_v31, %v15526_v43  ;;  %v15551_v43 = vld [vmem:[#allocation6_spill] sm:$0xff] }
 0x636   : > { %v6826_v1 = vadd.f32 %v6825_v44, %v6771_v20  ;;  %vm15524_vm2 = vmand %vm15523_vm10, %vm8128_vm8  ;;  %v7209_v24 = vstv %s7666_s14  ;;  %v15531_v34 = vcombine.low %v15529_v21, %v15530_v61  ;;  %v7264_v4 = vstv %s7667_s11  ;;  %v15554_v21 = vld [vmem:[#allocation9_spill] sm:$0xff] }
 0x637   : > { %v7098_v19 = vsel %vm15524_vm2, %v7096_v41, 0.0  ;;  %vm15528_vm9 = vmand %vm15523_vm10, %vm8210_vm0  ;;  %v15535_v51 = vcombine.low %v15533_v48, %v15534_v22  ;;  %v7319_v54 = vstv %s7668_s0  ;;  %v15539_v14 = vcombine.low %v15537_v26, %v15538_v42  ;;  %v15558_v22 = vld [vmem:[#allocation11_spill] sm:$0xff] }
 0x638   : > { %v6881_v7 = vadd.f32 %v6880_v3, %v6826_v1  ;;  %v7153_v13 = vsel %vm15528_vm9, %v15527_v63, 0.0  ;;  %v7100_v32 = vmul.f32 %v7099_v16, %v7098_v19  ;;  %vm15532_vm8 = vmand %vm15523_vm10, %vm9162_vm5  ;;  %v7374_v5 = vstv %s7669_s1  ;;  %v15549_v1 = vld [vmem:[#allocation5_spill] sm:$0xff] }
 0x639   : > { %v7208_v28 = vsel %vm15532_vm8, %v15531_v34, 0.0  ;;  %v7155_v8 = vmul.f32 %v7154_v36, %v7153_v13  ;;  %vm15536_vm0 = vmand %vm15523_vm10, %vm15514_vm4  ;;  %v15543_v23 = vcombine.low %v15541_v18, %v15542_v62  ;;  %v7429_v55 = vstv %s7670_s3  ;;  %v15552_v13 = vld [vmem:[#allocation7_spill] sm:$0xff]  ;;  %v15555_v34 = vld [vmem:[#allocation10_spill] sm:$0xff] }
 0x63a   : > { %v6936_v25 = vadd.f32 %v6935_v39, %v6881_v7  ;;  %v7263_v9 = vsel %vm15536_vm0, %v15535_v51, 0.0  ;;  %v7210_v46 = vmul.f32 %v7209_v24, %v7208_v28  ;;  %vm15540_vm5 = vmand %vm15523_vm10, %vm9316_vm6  ;;  %v15547_v0 = vcombine.low %v15545_v59, %v15546_v37 }
 0x63b   : > { %v7318_v50 = vsel %vm15540_vm5, %v15539_v14, 0.0  ;;  %v7265_v15 = vmul.f32 %v7264_v4, %v7263_v9  ;;  %vm15544_vm15 = vmand %vm15523_vm10, %vm9461_vm7  ;;  %v7441_v30 = vsub.s32 0, %v15549_v1  ;;  %v7445_v12 = vsub.s32 1, %v15549_v1  ;;  %v15557_v4 = vld [vmem:[#allocation12_spill] sm:$0xff] }
 0x63c   : > { %v6991_v27 = vadd.f32 %v6990_v49, %v6936_v25  ;;  %v7373_v52 = vsel %vm15544_vm15, %v15543_v23, 0.0  ;;  %v7320_v53 = vmul.f32 %v7319_v54, %v7318_v50  ;;  %vm15548_vm6 = vmand %vm15523_vm10, %vm9533_vm1  ;;  %v7449_v41 = vsub.s32 2, %v15549_v1 }
 0x63d   : > { %v7428_v2 = vsel %vm15548_vm6, %v15547_v0, 0.0  ;;  %v7375_v44 = vmul.f32 %v7374_v5, %v7373_v52  ;;  %v7453_v10 = vsub.s32 3, %v15549_v1  ;;  %v7457_v39 = vsub.s32 4, %v15549_v1 }
 0x63e   : > { %v7046_v29 = vadd.f32 %v7045_v57, %v6991_v27  ;;  %v7430_v17 = vmul.f32 %v7429_v55, %v7428_v2  ;;  %v7461_v7 = vsub.s32 5, %v15549_v1  ;;  %v7465_v33 = vsub.s32 6, %v15549_v1 }
 0x63f   : > { %v7469_v58 = vsub.s32 7, %v15549_v1 }
 0x640   : > { %v7101_v47 = vadd.f32 %v7100_v32, %v7046_v29  ;;  %v15553_v29 = vld [vmem:[#allocation8_spill] sm:$0xff] }
 0x642   : > { %v7156_v45 = vadd.f32 %v7155_v8, %v7101_v47  ;;  %v15556_v8 = vld [vmem:[#allocation13_spill] sm:$0xff] }
 0x644   : > { %v7211_v11 = vadd.f32 %v7210_v46, %v7156_v45 }
 0x646   : > { %v7266_v56 = vadd.f32 %v7265_v15, %v7211_v11 }
 0x648   : > { %v7321_v20 = vadd.f32 %v7320_v53, %v7266_v56 }
 0x64a   : > { %v7376_v40 = vadd.f32 %v7375_v44, %v7321_v20 }
 0x64c   : > { %v7431_v38 = vadd.f32 %v7430_v17, %v7376_v40 }
 0x64e   : > { %v7671_v60 = vmul.f32 -1.442695, %v7431_v38 }
 0x650   : > { %7730 = vpow2.f32 %v7671_v60 }
 0x65a   : > { %v7731_v35 = vpop.eup %7730 }
 0x65b   : > { %v7435_v3 = vadd.f32 1.0, %v7731_v35 }
 0x65d   : > { %7732 = vrcp.f32 %v7435_v3 }
 0x667   : > { %v7733_v49 = vpop.eup %7732 }
 0x668   : > { %v7442_v25 = vrot.slane %v7733_v49, %v7441_v30  ;;  %v7446_v16 = vrot.slane %v7733_v49, %v7445_v12  ;;  %v7450_v6 = vrot.slane %v7733_v49, %v7449_v41  ;;  %v7454_v19 = vrot.slane %v7733_v49, %v7453_v10 }
 0x669   : > { %v7458_v57 = vrot.slane %v7733_v49, %v7457_v39  ;;  %v7462_v27 = vrot.slane %v7733_v49, %v7461_v7  ;;  %v7466_v36 = vrot.slane %v7733_v49, %v7465_v33  ;;  %v7470_v31 = vrot.slane %v7733_v49, %v7469_v58 }
 0x66a   : > { %v7479_v63 = vmul.f32 %v7442_v25, %v15551_v43  ;;  %v7480_v32 = vmul.f32 %v7446_v16, %v15552_v13  ;;  %v7481_v24 = vmul.f32 %v7450_v6, %v15553_v29  ;;  %v7482_v61 = vmul.f32 %v7454_v19, %v15554_v21 }
 0x66b   : > { %v7483_v28 = vmul.f32 %v7458_v57, %v15555_v34  ;;  %v7484_v47 = vmul.f32 %v7462_v27, %v15556_v8  ;;  %v7485_v48 = vmul.f32 %v7466_v36, %v15557_v4  ;;  %v7486_v51 = vmul.f32 %v7470_v31, %v15558_v22 }
 0x66c   : > { %7487 = vst [vmem:[%s265_s7] sm:$0xff] %v7479_v63  ;;  %7488 = vst [vmem:[%s265_s7 + $0x8] sm:$0xff] %v7480_v32 }
 0x66d   : > { %7489 = vst [vmem:[%s265_s7 + $0x10] sm:$0xff] %v7481_v24  ;;  %7490 = vst [vmem:[%s265_s7 + $0x18] sm:$0xff] %v7482_v61 }
 0x66e   : > { %7491 = vst [vmem:[%s265_s7 + $0x20] sm:$0xff] %v7483_v28  ;;  %7492 = vst [vmem:[%s265_s7 + $0x28] sm:$0xff] %v7484_v47 }
 0x66f   : > { %7493 = vst [vmem:[%s265_s7 + $0x30] sm:$0xff] %v7485_v48  ;;  %7494 = vst [vmem:[%s265_s7 + $0x38] sm:$0xff] %v7486_v51 }
 0x670 PF: > { %s17_s21 = sadd.s32 1, %s7761_s21  }
 0x671   : > { %p14_p1 = scmp.ge.s32.totalorder %s17_s21, 4  }
 0x673   :  { %16 = sbr.rel (!%p14_p1) target bundleno = 6 (0x6), region = 79 }
 0x67a   :  { %7516 = vsyncpa [#allocation3], 1 }
 0x67b   :  { %7518 = vsyncpa [#allocation3 + $0x1], 1 }

</bundles_post_ra>
